<compile_context>
chip_gen: v7x
topology: tpu7x:2x2x1
jax: 0.10.0
libtpu: 0.0.40
codegen_flags: <defaults>
</compile_context>

<pallas_src>
import numpy as np

import jax
import jax.numpy as jnp
from jax import lax
from jax.experimental import pallas as pl
from jax.experimental.pallas import tpu as pltpu


_S1 = 336        # per-image row stride of the padded 18x18 layer-1 layout (>=324, mult of 16)
_C2 = 248        # per-image conv2 slab rows (pool reads rows up to 247)
_A1_CHUNK = 48   # layer-1 row chunk (divides _S1, mult of 16 for aligned bf16 stores)
_C2_CHUNK = 64   # conv2 row chunk

# Load-bearing layout invariants (see review "correctness_concerns"):
assert _S1 >= 324 and _S1 % 16 == 0 and _S1 % _A1_CHUNK == 0
assert _C2 % 8 == 0
assert _C2 >= 36 * 6 + 2 * 6 + 19 + 1          # pool2 reads stay inside the conv slab
assert (_C2 - 1) + 18 * 4 + 4 <= _S1 - 1       # conv2 taps stay inside one image's a1


# ---------------------------------------------------------------------------
# The fused per-image Pallas kernel
# ---------------------------------------------------------------------------
def _cnn_fused_kernel(p1_ref, w1_ref, w2_ref, b2_ref, wc_ref, rf_ref, bl_ref,
                      o_ref, a1_ref, c2_ref):
    # ---- layer 1: block-diagonal conv1 matmul (all four 2x2-pool offsets as
    #      16-lane groups), 4-way lane-group max + ReLU in registers, bf16 store.
    for r0 in range(0, _S1, _A1_CHUNK):
        z = jnp.dot(p1_ref[r0:r0 + _A1_CHUNK, :], w1_ref[...],
                    preferred_element_type=jnp.float32)                    # (48, 64)
        m = jnp.maximum(jnp.maximum(z[:, 0:16], z[:, 16:32]),
                        jnp.maximum(z[:, 32:48], z[:, 48:64]))
        a1_ref[r0:r0 + _A1_CHUNK, :] = jnp.maximum(m, 0.0).astype(jnp.bfloat16)

    # ---- layer 2: stride-1 5x5 conv = 25 row-shifted matmuls; register
    #      accumulation per row chunk, single store per chunk.
    for r0 in range(0, _C2, _C2_CHUNK):
        rs = min(_C2_CHUNK, _C2 - r0)
        acc = None
        for t in range(25):
            kh, kw = t // 5, t % 5
            d = 18 * kh + kw
            part = jnp.dot(a1_ref[r0 + d:r0 + d + rs, :],
                           w2_ref[t * 16:(t + 1) * 16, :],
                           preferred_element_type=jnp.float32)             # (rs, 32)
            acc = part if acc is None else acc + part
        c2_ref[r0:r0 + rs, :] = acc

    # ---- 2x2 max-pool + bias + ReLU, gathered with STRIDED row slices into a
    #      compact (49, 32) value (no selection matmul, no pooled slab).
    rows = []
    for i in range(7):
        base = 36 * i
        pm = jnp.maximum(
            jnp.maximum(c2_ref[pl.ds(base, 7, stride=2), :],
                        c2_ref[pl.ds(base + 1, 7, stride=2), :]),
            jnp.maximum(c2_ref[pl.ds(base + 18, 7, stride=2), :],
                        c2_ref[pl.ds(base + 19, 7, stride=2), :]))
        rows.append(pm)                                                    # (7, 32)
    pooled = jnp.maximum(jnp.concatenate(rows, axis=0) + b2_ref[...], 0.0)  # (49, 32)

    # ---- classifier: one lane-dense (49,32)@(32,490) matmul; pick the
    #      block-diagonal entries with an iota mask and fold 490 -> 10 classes.
    y = jnp.dot(pooled.astype(jnp.bfloat16), wc_ref[...],
                preferred_element_type=jnp.float32)                        # (49, 490)
    p_id = lax.broadcasted_iota(jnp.int32, (49, 490), 0) * 10
    q_id = lax.broadcasted_iota(jnp.int32, (49, 490), 1)
    y = jnp.where((q_id >= p_id) & (q_id < p_id + 10), y, 0.0)
    s = jnp.sum(y, axis=0, keepdims=True)                                  # (1, 490)
    out = jnp.dot(s, rf_ref[...], preferred_element_type=jnp.float32) + bl_ref[...]
    o_ref[...] = jnp.broadcast_to(out, (8, 10))


# ---------------------------------------------------------------------------
# Plain-JAX glue: layer-1 patch blocks in the padded 18x18 row layout.
# TODO(synk): fuse this stride-2 dilated patch gather into the kernel itself
# (no clean BlockSpec/slice expression for it); it is a cheap XLA fusion whose
# output is the pipelined per-image p1 DMA.
# ---------------------------------------------------------------------------
def _layer1_patches(x_nchw):
    B = x_nchw.shape[0]
    xp = jnp.pad(x_nchw[:, 0, :, :], ((0, 0), (2, 2), (2, 2)))             # (B,32,32)
    taps = [xp[:, kh:kh + 28, kw:kw + 28] for kh in range(5) for kw in range(5)]
    col = jnp.stack(taps, axis=-1)                                          # (B,28,28,25)
    col = jnp.concatenate([col, jnp.ones_like(col[..., :1])], axis=-1)      # + bias col
    groups = []
    for dh in range(2):
        for dw in range(2):
            g = col[:, dh::2, dw::2, :]                                     # (B,14,14,26)
            g = jnp.pad(g, ((0, 0), (2, 2), (2, 2), (0, 0)))                # (B,18,18,26)
            groups.append(g.reshape(B, 324, 26))
    p1 = jnp.concatenate(groups, axis=-1)                                   # (B,324,104)
    p1 = jnp.pad(p1, ((0, 0), (0, _S1 - 324), (0, 0)))                      # (B,336,104)
    return p1.reshape(B * _S1, 104).astype(jnp.bfloat16)


# ---------------------------------------------------------------------------
# One-time parameter preparation (outside the jitted hot path)
# ---------------------------------------------------------------------------
def prepare_params(params):
    w1, b1, w2, b2, wl, bl = params

    # conv1 -> block-diagonal (104,64): block g = (25 taps + bias row, 16 ch).
    w1m = jnp.transpose(w1, (2, 3, 1, 0)).reshape(25, 16)
    w1m = jnp.concatenate([w1m, b1.reshape(1, 16)], axis=0)                 # (26,16)
    w1bd = jnp.zeros((104, 64), jnp.float32)
    for g in range(4):
        w1bd = w1bd.at[g * 26:(g + 1) * 26, g * 16:(g + 1) * 16].set(w1m)
    w1bd = w1bd.astype(jnp.bfloat16)

    # conv2: (32,16,5,5) -> (400,32), rows ordered (kh, kw, cin).
    w2m = jnp.transpose(w2, (2, 3, 1, 0)).reshape(400, 32).astype(jnp.bfloat16)
    b2m = b2.reshape(1, 32).astype(jnp.float32)

    # classifier: fold PyTorch's (C,H,W) flatten -> Wc[c, p*10+n] = wl[n, c*49+p]
    wc = (wl.reshape(10, 32, 49).transpose(1, 2, 0)
            .reshape(32, 490).astype(jnp.bfloat16))
    # fold matrix R[q, n] = 1 iff q % 10 == n  (490 -> 10 class columns)
    rf = jnp.asarray(np.equal.outer(np.arange(490) % 10,
                                    np.arange(10)).astype(np.float32))
    blm = bl.reshape(1, 10).astype(jnp.float32)
    return (w1bd, w2m, b2m, wc, rf, blm)


# ---------------------------------------------------------------------------
# Forward pass: one pallas_call with a per-image "parallel" batch grid
# ---------------------------------------------------------------------------
def cnn_forward(x_nchw, kparams):
    w1bd, w2m, b2m, wc, rf, blm = kparams
    B = x_nchw.shape[0]
    p1 = _layer1_patches(x_nchw)                                            # (B*336, 104) bf16

    flops = B * (2 * _S1 * 104 * 64 + 2 * 25 * _C2 * 16 * 32
                 + 2 * 49 * 32 * 490 + 2 * 490 * 10)
    bytes_accessed = (p1.size * 2 + (w1bd.size + w2m.size + wc.size) * 2
                      + (b2m.size + rf.size + blm.size) * 4 + B * 8 * 10 * 4)

    out = pl.pallas_call(
        _cnn_fused_kernel,
        out_shape=jax.ShapeDtypeStruct((B * 8, 10), jnp.float32),
        grid=(B,),
        in_specs=[
            pl.BlockSpec((_S1, 104), lambda b: (b, 0)),     # per-image patch block
            pl.BlockSpec((104, 64), lambda b: (0, 0)),      # w1 block-diagonal
            pl.BlockSpec((400, 32), lambda b: (0, 0)),      # w2
            pl.BlockSpec((1, 32), lambda b: (0, 0)),        # b2
            pl.BlockSpec((32, 490), lambda b: (0, 0)),      # classifier weight
            pl.BlockSpec((490, 10), lambda b: (0, 0)),      # fold matrix
            pl.BlockSpec((1, 10), lambda b: (0, 0)),        # classifier bias
        ],
        out_specs=pl.BlockSpec((8, 10), lambda b: (b, 0)),
        scratch_shapes=[
            pltpu.VMEM((_S1, 16), jnp.bfloat16),            # pooled layer-1 activation
            pltpu.VMEM((_C2, 32), jnp.float32),             # layer-2 conv slab
        ],
        compiler_params=pltpu.CompilerParams(
            dimension_semantics=("parallel",)),
        cost_estimate=pl.CostEstimate(flops=int(flops), transcendentals=0,
                                      bytes_accessed=int(bytes_accessed)),
    )(p1, w1bd, w2m, b2m, wc, rf, blm)
    return out[0::8, :]                                                     # (B, 10)


# ---------------------------------------------------------------------------
# Deterministic parameter init (PyTorch-style uniform(-1/sqrt(fan_in), +))
# ---------------------------------------------------------------------------
def init_params(key):
    ks = jax.random.split(key, 6)

    def u(k, shape, fan_in):
        bound = 1.0 / jnp.sqrt(fan_in)
        return jax.random.uniform(k, shape, jnp.float32, -bound, bound)

    w1 = u(ks[0], (16, 1, 5, 5), 1 * 25)
    b1 = u(ks[1], (16,), 1 * 25)
    w2 = u(ks[2], (32, 16, 5, 5), 16 * 25)
    b2 = u(ks[3], (32,), 16 * 25)
    wl = u(ks[4], (10, 32 * 7 * 7), 32 * 7 * 7)
    bl = u(ks[5], (10,), 32 * 7 * 7)
    return (w1, b1, w2, b2, wl, bl)


# Pure-JAX reference of the PyTorch forward (sanity check only).
def ref_forward(x, params):
    w1, b1, w2, b2, wl, bl = params

    def block(y, w, b):
        y = lax.conv_general_dilated(
            y, w, (1, 1), ((2, 2), (2, 2)),
            dimension_numbers=('NCHW', 'OIHW', 'NCHW'),
            precision=lax.Precision.HIGHEST)
        y = jnp.maximum(y + b[None, :, None, None], 0.0)
        return lax.reduce_window(y, -jnp.inf, lax.max,
                                 (1, 1, 2, 2), (1, 1, 2, 2), 'VALID')

    y = block(x, w1, b1)
    y = block(y, w2, b2)
    y = y.reshape(x.shape[0], -1)
    return y @ wl.T + bl


if __name__ == "__main__":
    key = jax.random.PRNGKey(0)
    kx, kp = jax.random.split(key)
    # Module hard-codes 32*7*7 -> input must be (B, 1, 28, 28); use batch=2.
    x = jax.random.normal(kx, (2, 1, 28, 28), jnp.float32)
    params = init_params(kp)

    kparams = prepare_params(params)              # once, outside the jitted hot path
    fwd = jax.jit(cnn_forward)
    out = jax.block_until_ready(fwd(x, kparams))

    assert out.shape == (2, 10)
    ref = ref_forward(x, params)
    assert jnp.allclose(out, ref, rtol=2e-2, atol=2e-2), (out, ref)
    print("KERNEL_OK")
</pallas_src>

<mosaic_0001>
module attributes {stable_mosaic.version = 11 : i64} {
  func.func @_cnn_fused_kernel(%arg0: i32, %arg1: memref<336x104xbf16, #tpu.memory_space<vmem>>, %arg2: memref<104x64xbf16, #tpu.memory_space<vmem>>, %arg3: memref<400x32xbf16, #tpu.memory_space<vmem>>, %arg4: memref<1x32xf32, #tpu.memory_space<vmem>>, %arg5: memref<32x490xbf16, #tpu.memory_space<vmem>>, %arg6: memref<490x10xf32, #tpu.memory_space<vmem>>, %arg7: memref<1x10xf32, #tpu.memory_space<vmem>>, %arg8: memref<8x10xf32, #tpu.memory_space<vmem>>, %arg9: memref<336x16xbf16, #tpu.memory_space<vmem>>, %arg10: memref<248x32xf32, #tpu.memory_space<vmem>>) attributes {dimension_semantics = [#tpu.dimension_semantics<parallel>], iteration_bounds = array<i64: 2>, scalar_prefetch = 0 : i64, scratch_operands = 2 : i64, tpu.core_type = #tpu.core_type<tc>, window_params = [{transform_indices = @transform_0, window_bounds = array<i64: 336, 104>}, {pipeline_mode = #tpu.pipeline_mode<synchronous>, transform_indices = @transform_1, window_bounds = array<i64: 104, 64>}, {pipeline_mode = #tpu.pipeline_mode<synchronous>, transform_indices = @transform_2, window_bounds = array<i64: 400, 32>}, {pipeline_mode = #tpu.pipeline_mode<synchronous>, transform_indices = @transform_3, window_bounds = array<i64: 1, 32>}, {pipeline_mode = #tpu.pipeline_mode<synchronous>, transform_indices = @transform_4, window_bounds = array<i64: 32, 490>}, {pipeline_mode = #tpu.pipeline_mode<synchronous>, transform_indices = @transform_5, window_bounds = array<i64: 490, 10>}, {pipeline_mode = #tpu.pipeline_mode<synchronous>, transform_indices = @transform_6, window_bounds = array<i64: 1, 10>}, {transform_indices = @transform_7, window_bounds = array<i64: 8, 10>}]} {
    %c0 = arith.constant 0 : index
    %c0_0 = arith.constant 0 : index
    %0 = vector.load %arg1[%c0, %c0_0] : memref<336x104xbf16, #tpu.memory_space<vmem>>, vector<48x104xbf16>
    %c0_1 = arith.constant 0 : index
    %c0_2 = arith.constant 0 : index
    %1 = vector.load %arg2[%c0_1, %c0_2] : memref<104x64xbf16, #tpu.memory_space<vmem>>, vector<104x64xbf16>
    %cst = arith.constant dense<0.000000e+00> : vector<48x64xf32>
    %2 = tpu.matmul %0, %1, %cst {dimension_numbers = #tpu.dot_dimension_numbers<[1], [0], [0], [1], [0, 0, 1, 1], [], []>} : vector<48x104xbf16>, vector<104x64xbf16>, vector<48x64xf32> -> vector<48x64xf32>
    %3 = vector.extract_strided_slice %2 {offsets = [0, 0], sizes = [48, 16], strides = [1, 1]} : vector<48x64xf32> to vector<48x16xf32>
    %4 = vector.extract_strided_slice %2 {offsets = [0, 16], sizes = [48, 16], strides = [1, 1]} : vector<48x64xf32> to vector<48x16xf32>
    %5 = arith.maximumf %3, %4 : vector<48x16xf32>
    %6 = vector.extract_strided_slice %2 {offsets = [0, 32], sizes = [48, 16], strides = [1, 1]} : vector<48x64xf32> to vector<48x16xf32>
    %7 = vector.extract_strided_slice %2 {offsets = [0, 48], sizes = [48, 16], strides = [1, 1]} : vector<48x64xf32> to vector<48x16xf32>
    %8 = arith.maximumf %6, %7 : vector<48x16xf32>
    %9 = arith.maximumf %5, %8 : vector<48x16xf32>
    %cst_3 = arith.constant 0.000000e+00 : f32
    %10 = vector.broadcast %cst_3 : f32 to vector<48x16xf32>
    %11 = arith.maximumf %9, %10 : vector<48x16xf32>
    %12 = arith.truncf %11 : vector<48x16xf32> to vector<48x16xbf16>
    %c0_4 = arith.constant 0 : index
    %c0_5 = arith.constant 0 : index
    %13 = vector.load %arg9[%c0_4, %c0_5] : memref<336x16xbf16, #tpu.memory_space<vmem>>, vector<48x16xbf16>
    tpu.vector_store %arg9[%c0_4, %c0_5], %12 {strides = array<i32>} : memref<336x16xbf16, #tpu.memory_space<vmem>>, vector<48x16xbf16>,
    %c48 = arith.constant 48 : index
    %c0_6 = arith.constant 0 : index
    %14 = vector.load %arg1[%c48, %c0_6] : memref<336x104xbf16, #tpu.memory_space<vmem>>, vector<48x104xbf16>
    %c0_7 = arith.constant 0 : index
    %c0_8 = arith.constant 0 : index
    %15 = vector.load %arg2[%c0_7, %c0_8] : memref<104x64xbf16, #tpu.memory_space<vmem>>, vector<104x64xbf16>
    %cst_9 = arith.constant dense<0.000000e+00> : vector<48x64xf32>
    %16 = tpu.matmul %14, %15, %cst_9 {dimension_numbers = #tpu.dot_dimension_numbers<[1], [0], [0], [1], [0, 0, 1, 1], [], []>} : vector<48x104xbf16>, vector<104x64xbf16>, vector<48x64xf32> -> vector<48x64xf32>
    %17 = vector.extract_strided_slice %16 {offsets = [0, 0], sizes = [48, 16], strides = [1, 1]} : vector<48x64xf32> to vector<48x16xf32>
    %18 = vector.extract_strided_slice %16 {offsets = [0, 16], sizes = [48, 16], strides = [1, 1]} : vector<48x64xf32> to vector<48x16xf32>
    %19 = arith.maximumf %17, %18 : vector<48x16xf32>
    %20 = vector.extract_strided_slice %16 {offsets = [0, 32], sizes = [48, 16], strides = [1, 1]} : vector<48x64xf32> to vector<48x16xf32>
    %21 = vector.extract_strided_slice %16 {offsets = [0, 48], sizes = [48, 16], strides = [1, 1]} : vector<48x64xf32> to vector<48x16xf32>
    %22 = arith.maximumf %20, %21 : vector<48x16xf32>
    %23 = arith.maximumf %19, %22 : vector<48x16xf32>
    %cst_10 = arith.constant 0.000000e+00 : f32
    %24 = vector.broadcast %cst_10 : f32 to vector<48x16xf32>
    %25 = arith.maximumf %23, %24 : vector<48x16xf32>
    %26 = arith.truncf %25 : vector<48x16xf32> to vector<48x16xbf16>
    %c48_11 = arith.constant 48 : index
    %c0_12 = arith.constant 0 : index
    %27 = vector.load %arg9[%c48_11, %c0_12] : memref<336x16xbf16, #tpu.memory_space<vmem>>, vector<48x16xbf16>
    tpu.vector_store %arg9[%c48_11, %c0_12], %26 {strides = array<i32>} : memref<336x16xbf16, #tpu.memory_space<vmem>>, vector<48x16xbf16>,
    %c96 = arith.constant 96 : index
    %c0_13 = arith.constant 0 : index
    %28 = vector.load %arg1[%c96, %c0_13] : memref<336x104xbf16, #tpu.memory_space<vmem>>, vector<48x104xbf16>
    %c0_14 = arith.constant 0 : index
    %c0_15 = arith.constant 0 : index
    %29 = vector.load %arg2[%c0_14, %c0_15] : memref<104x64xbf16, #tpu.memory_space<vmem>>, vector<104x64xbf16>
    %cst_16 = arith.constant dense<0.000000e+00> : vector<48x64xf32>
    %30 = tpu.matmul %28, %29, %cst_16 {dimension_numbers = #tpu.dot_dimension_numbers<[1], [0], [0], [1], [0, 0, 1, 1], [], []>} : vector<48x104xbf16>, vector<104x64xbf16>, vector<48x64xf32> -> vector<48x64xf32>
    %31 = vector.extract_strided_slice %30 {offsets = [0, 0], sizes = [48, 16], strides = [1, 1]} : vector<48x64xf32> to vector<48x16xf32>
    %32 = vector.extract_strided_slice %30 {offsets = [0, 16], sizes = [48, 16], strides = [1, 1]} : vector<48x64xf32> to vector<48x16xf32>
    %33 = arith.maximumf %31, %32 : vector<48x16xf32>
    %34 = vector.extract_strided_slice %30 {offsets = [0, 32], sizes = [48, 16], strides = [1, 1]} : vector<48x64xf32> to vector<48x16xf32>
    %35 = vector.extract_strided_slice %30 {offsets = [0, 48], sizes = [48, 16], strides = [1, 1]} : vector<48x64xf32> to vector<48x16xf32>
    %36 = arith.maximumf %34, %35 : vector<48x16xf32>
    %37 = arith.maximumf %33, %36 : vector<48x16xf32>
    %cst_17 = arith.constant 0.000000e+00 : f32
    %38 = vector.broadcast %cst_17 : f32 to vector<48x16xf32>
    %39 = arith.maximumf %37, %38 : vector<48x16xf32>
    %40 = arith.truncf %39 : vector<48x16xf32> to vector<48x16xbf16>
    %c96_18 = arith.constant 96 : index
    %c0_19 = arith.constant 0 : index
    %41 = vector.load %arg9[%c96_18, %c0_19] : memref<336x16xbf16, #tpu.memory_space<vmem>>, vector<48x16xbf16>
    tpu.vector_store %arg9[%c96_18, %c0_19], %40 {strides = array<i32>} : memref<336x16xbf16, #tpu.memory_space<vmem>>, vector<48x16xbf16>,
    %c144 = arith.constant 144 : index
    %c0_20 = arith.constant 0 : index
    %42 = vector.load %arg1[%c144, %c0_20] : memref<336x104xbf16, #tpu.memory_space<vmem>>, vector<48x104xbf16>
    %c0_21 = arith.constant 0 : index
    %c0_22 = arith.constant 0 : index
    %43 = vector.load %arg2[%c0_21, %c0_22] : memref<104x64xbf16, #tpu.memory_space<vmem>>, vector<104x64xbf16>
    %cst_23 = arith.constant dense<0.000000e+00> : vector<48x64xf32>
    %44 = tpu.matmul %42, %43, %cst_23 {dimension_numbers = #tpu.dot_dimension_numbers<[1], [0], [0], [1], [0, 0, 1, 1], [], []>} : vector<48x104xbf16>, vector<104x64xbf16>, vector<48x64xf32> -> vector<48x64xf32>
    %45 = vector.extract_strided_slice %44 {offsets = [0, 0], sizes = [48, 16], strides = [1, 1]} : vector<48x64xf32> to vector<48x16xf32>
    %46 = vector.extract_strided_slice %44 {offsets = [0, 16], sizes = [48, 16], strides = [1, 1]} : vector<48x64xf32> to vector<48x16xf32>
    %47 = arith.maximumf %45, %46 : vector<48x16xf32>
    %48 = vector.extract_strided_slice %44 {offsets = [0, 32], sizes = [48, 16], strides = [1, 1]} : vector<48x64xf32> to vector<48x16xf32>
    %49 = vector.extract_strided_slice %44 {offsets = [0, 48], sizes = [48, 16], strides = [1, 1]} : vector<48x64xf32> to vector<48x16xf32>
    %50 = arith.maximumf %48, %49 : vector<48x16xf32>
    %51 = arith.maximumf %47, %50 : vector<48x16xf32>
    %cst_24 = arith.constant 0.000000e+00 : f32
    %52 = vector.broadcast %cst_24 : f32 to vector<48x16xf32>
    %53 = arith.maximumf %51, %52 : vector<48x16xf32>
    %54 = arith.truncf %53 : vector<48x16xf32> to vector<48x16xbf16>
    %c144_25 = arith.constant 144 : index
    %c0_26 = arith.constant 0 : index
    %55 = vector.load %arg9[%c144_25, %c0_26] : memref<336x16xbf16, #tpu.memory_space<vmem>>, vector<48x16xbf16>
    tpu.vector_store %arg9[%c144_25, %c0_26], %54 {strides = array<i32>} : memref<336x16xbf16, #tpu.memory_space<vmem>>, vector<48x16xbf16>,
    %c192 = arith.constant 192 : index
    %c0_27 = arith.constant 0 : index
    %56 = vector.load %arg1[%c192, %c0_27] : memref<336x104xbf16, #tpu.memory_space<vmem>>, vector<48x104xbf16>
    %c0_28 = arith.constant 0 : index
    %c0_29 = arith.constant 0 : index
    %57 = vector.load %arg2[%c0_28, %c0_29] : memref<104x64xbf16, #tpu.memory_space<vmem>>, vector<104x64xbf16>
    %cst_30 = arith.constant dense<0.000000e+00> : vector<48x64xf32>
    %58 = tpu.matmul %56, %57, %cst_30 {dimension_numbers = #tpu.dot_dimension_numbers<[1], [0], [0], [1], [0, 0, 1, 1], [], []>} : vector<48x104xbf16>, vector<104x64xbf16>, vector<48x64xf32> -> vector<48x64xf32>
    %59 = vector.extract_strided_slice %58 {offsets = [0, 0], sizes = [48, 16], strides = [1, 1]} : vector<48x64xf32> to vector<48x16xf32>
    %60 = vector.extract_strided_slice %58 {offsets = [0, 16], sizes = [48, 16], strides = [1, 1]} : vector<48x64xf32> to vector<48x16xf32>
    %61 = arith.maximumf %59, %60 : vector<48x16xf32>
    %62 = vector.extract_strided_slice %58 {offsets = [0, 32], sizes = [48, 16], strides = [1, 1]} : vector<48x64xf32> to vector<48x16xf32>
    %63 = vector.extract_strided_slice %58 {offsets = [0, 48], sizes = [48, 16], strides = [1, 1]} : vector<48x64xf32> to vector<48x16xf32>
    %64 = arith.maximumf %62, %63 : vector<48x16xf32>
    %65 = arith.maximumf %61, %64 : vector<48x16xf32>
    %cst_31 = arith.constant 0.000000e+00 : f32
    %66 = vector.broadcast %cst_31 : f32 to vector<48x16xf32>
    %67 = arith.maximumf %65, %66 : vector<48x16xf32>
    %68 = arith.truncf %67 : vector<48x16xf32> to vector<48x16xbf16>
    %c192_32 = arith.constant 192 : index
    %c0_33 = arith.constant 0 : index
    %69 = vector.load %arg9[%c192_32, %c0_33] : memref<336x16xbf16, #tpu.memory_space<vmem>>, vector<48x16xbf16>
    tpu.vector_store %arg9[%c192_32, %c0_33], %68 {strides = array<i32>} : memref<336x16xbf16, #tpu.memory_space<vmem>>, vector<48x16xbf16>,
    %c240 = arith.constant 240 : index
    %c0_34 = arith.constant 0 : index
    %70 = vector.load %arg1[%c240, %c0_34] : memref<336x104xbf16, #tpu.memory_space<vmem>>, vector<48x104xbf16>
    %c0_35 = arith.constant 0 : index
    %c0_36 = arith.constant 0 : index
    %71 = vector.load %arg2[%c0_35, %c0_36] : memref<104x64xbf16, #tpu.memory_space<vmem>>, vector<104x64xbf16>
    %cst_37 = arith.constant dense<0.000000e+00> : vector<48x64xf32>
    %72 = tpu.matmul %70, %71, %cst_37 {dimension_numbers = #tpu.dot_dimension_numbers<[1], [0], [0], [1], [0, 0, 1, 1], [], []>} : vector<48x104xbf16>, vector<104x64xbf16>, vector<48x64xf32> -> vector<48x64xf32>
    %73 = vector.extract_strided_slice %72 {offsets = [0, 0], sizes = [48, 16], strides = [1, 1]} : vector<48x64xf32> to vector<48x16xf32>
    %74 = vector.extract_strided_slice %72 {offsets = [0, 16], sizes = [48, 16], strides = [1, 1]} : vector<48x64xf32> to vector<48x16xf32>
    %75 = arith.maximumf %73, %74 : vector<48x16xf32>
    %76 = vector.extract_strided_slice %72 {offsets = [0, 32], sizes = [48, 16], strides = [1, 1]} : vector<48x64xf32> to vector<48x16xf32>
    %77 = vector.extract_strided_slice %72 {offsets = [0, 48], sizes = [48, 16], strides = [1, 1]} : vector<48x64xf32> to vector<48x16xf32>
    %78 = arith.maximumf %76, %77 : vector<48x16xf32>
    %79 = arith.maximumf %75, %78 : vector<48x16xf32>
    %cst_38 = arith.constant 0.000000e+00 : f32
    %80 = vector.broadcast %cst_38 : f32 to vector<48x16xf32>
    %81 = arith.maximumf %79, %80 : vector<48x16xf32>
    %82 = arith.truncf %81 : vector<48x16xf32> to vector<48x16xbf16>
    %c240_39 = arith.constant 240 : index
    %c0_40 = arith.constant 0 : index
    %83 = vector.load %arg9[%c240_39, %c0_40] : memref<336x16xbf16, #tpu.memory_space<vmem>>, vector<48x16xbf16>
    tpu.vector_store %arg9[%c240_39, %c0_40], %82 {strides = array<i32>} : memref<336x16xbf16, #tpu.memory_space<vmem>>, vector<48x16xbf16>,
    %c288 = arith.constant 288 : index
    %c0_41 = arith.constant 0 : index
    %84 = vector.load %arg1[%c288, %c0_41] : memref<336x104xbf16, #tpu.memory_space<vmem>>, vector<48x104xbf16>
    %c0_42 = arith.constant 0 : index
    %c0_43 = arith.constant 0 : index
    %85 = vector.load %arg2[%c0_42, %c0_43] : memref<104x64xbf16, #tpu.memory_space<vmem>>, vector<104x64xbf16>
    %cst_44 = arith.constant dense<0.000000e+00> : vector<48x64xf32>
    %86 = tpu.matmul %84, %85, %cst_44 {dimension_numbers = #tpu.dot_dimension_numbers<[1], [0], [0], [1], [0, 0, 1, 1], [], []>} : vector<48x104xbf16>, vector<104x64xbf16>, vector<48x64xf32> -> vector<48x64xf32>
    %87 = vector.extract_strided_slice %86 {offsets = [0, 0], sizes = [48, 16], strides = [1, 1]} : vector<48x64xf32> to vector<48x16xf32>
    %88 = vector.extract_strided_slice %86 {offsets = [0, 16], sizes = [48, 16], strides = [1, 1]} : vector<48x64xf32> to vector<48x16xf32>
    %89 = arith.maximumf %87, %88 : vector<48x16xf32>
    %90 = vector.extract_strided_slice %86 {offsets = [0, 32], sizes = [48, 16], strides = [1, 1]} : vector<48x64xf32> to vector<48x16xf32>
    %91 = vector.extract_strided_slice %86 {offsets = [0, 48], sizes = [48, 16], strides = [1, 1]} : vector<48x64xf32> to vector<48x16xf32>
    %92 = arith.maximumf %90, %91 : vector<48x16xf32>
    %93 = arith.maximumf %89, %92 : vector<48x16xf32>
    %cst_45 = arith.constant 0.000000e+00 : f32
    %94 = vector.broadcast %cst_45 : f32 to vector<48x16xf32>
    %95 = arith.maximumf %93, %94 : vector<48x16xf32>
    %96 = arith.truncf %95 : vector<48x16xf32> to vector<48x16xbf16>
    %c288_46 = arith.constant 288 : index
    %c0_47 = arith.constant 0 : index
    %97 = vector.load %arg9[%c288_46, %c0_47] : memref<336x16xbf16, #tpu.memory_space<vmem>>, vector<48x16xbf16>
    tpu.vector_store %arg9[%c288_46, %c0_47], %96 {strides = array<i32>} : memref<336x16xbf16, #tpu.memory_space<vmem>>, vector<48x16xbf16>,
    %c0_48 = arith.constant 0 : index
    %c0_49 = arith.constant 0 : index
    %98 = vector.load %arg9[%c0_48, %c0_49] : memref<336x16xbf16, #tpu.memory_space<vmem>>, vector<64x16xbf16>
    %c0_50 = arith.constant 0 : index
    %c0_51 = arith.constant 0 : index
    %99 = vector.load %arg3[%c0_50, %c0_51] : memref<400x32xbf16, #tpu.memory_space<vmem>>, vector<16x32xbf16>
    %cst_52 = arith.constant dense<0.000000e+00> : vector<64x32xf32>
    %100 = tpu.matmul %98, %99, %cst_52 {dimension_numbers = #tpu.dot_dimension_numbers<[1], [0], [0], [1], [0, 0, 1, 1], [], []>} : vector<64x16xbf16>, vector<16x32xbf16>, vector<64x32xf32> -> vector<64x32xf32>
    %c1 = arith.constant 1 : index
    %c0_53 = arith.constant 0 : index
    %101 = vector.load %arg9[%c1, %c0_53] : memref<336x16xbf16, #tpu.memory_space<vmem>>, vector<64x16xbf16>
    %c16 = arith.constant 16 : index
    %c0_54 = arith.constant 0 : index
    %102 = vector.load %arg3[%c16, %c0_54] : memref<400x32xbf16, #tpu.memory_space<vmem>>, vector<16x32xbf16>
    %cst_55 = arith.constant dense<0.000000e+00> : vector<64x32xf32>
    %103 = tpu.matmul %101, %102, %cst_55 {dimension_numbers = #tpu.dot_dimension_numbers<[1], [0], [0], [1], [0, 0, 1, 1], [], []>} : vector<64x16xbf16>, vector<16x32xbf16>, vector<64x32xf32> -> vector<64x32xf32>
    %104 = arith.addf %100, %103 : vector<64x32xf32>
    %c2 = arith.constant 2 : index
    %c0_56 = arith.constant 0 : index
    %105 = vector.load %arg9[%c2, %c0_56] : memref<336x16xbf16, #tpu.memory_space<vmem>>, vector<64x16xbf16>
    %c32 = arith.constant 32 : index
    %c0_57 = arith.constant 0 : index
    %106 = vector.load %arg3[%c32, %c0_57] : memref<400x32xbf16, #tpu.memory_space<vmem>>, vector<16x32xbf16>
    %cst_58 = arith.constant dense<0.000000e+00> : vector<64x32xf32>
    %107 = tpu.matmul %105, %106, %cst_58 {dimension_numbers = #tpu.dot_dimension_numbers<[1], [0], [0], [1], [0, 0, 1, 1], [], []>} : vector<64x16xbf16>, vector<16x32xbf16>, vector<64x32xf32> -> vector<64x32xf32>
    %108 = arith.addf %104, %107 : vector<64x32xf32>
    %c3 = arith.constant 3 : index
    %c0_59 = arith.constant 0 : index
    %109 = vector.load %arg9[%c3, %c0_59] : memref<336x16xbf16, #tpu.memory_space<vmem>>, vector<64x16xbf16>
    %c48_60 = arith.constant 48 : index
    %c0_61 = arith.constant 0 : index
    %110 = vector.load %arg3[%c48_60, %c0_61] : memref<400x32xbf16, #tpu.memory_space<vmem>>, vector<16x32xbf16>
    %cst_62 = arith.constant dense<0.000000e+00> : vector<64x32xf32>
    %111 = tpu.matmul %109, %110, %cst_62 {dimension_numbers = #tpu.dot_dimension_numbers<[1], [0], [0], [1], [0, 0, 1, 1], [], []>} : vector<64x16xbf16>, vector<16x32xbf16>, vector<64x32xf32> -> vector<64x32xf32>
    %112 = arith.addf %108, %111 : vector<64x32xf32>
    %c4 = arith.constant 4 : index
    %c0_63 = arith.constant 0 : index
    %113 = vector.load %arg9[%c4, %c0_63] : memref<336x16xbf16, #tpu.memory_space<vmem>>, vector<64x16xbf16>
    %c64 = arith.constant 64 : index
    %c0_64 = arith.constant 0 : index
    %114 = vector.load %arg3[%c64, %c0_64] : memref<400x32xbf16, #tpu.memory_space<vmem>>, vector<16x32xbf16>
    %cst_65 = arith.constant dense<0.000000e+00> : vector<64x32xf32>
    %115 = tpu.matmul %113, %114, %cst_65 {dimension_numbers = #tpu.dot_dimension_numbers<[1], [0], [0], [1], [0, 0, 1, 1], [], []>} : vector<64x16xbf16>, vector<16x32xbf16>, vector<64x32xf32> -> vector<64x32xf32>
    %116 = arith.addf %112, %115 : vector<64x32xf32>
    %c18 = arith.constant 18 : index
    %c0_66 = arith.constant 0 : index
    %117 = vector.load %arg9[%c18, %c0_66] : memref<336x16xbf16, #tpu.memory_space<vmem>>, vector<64x16xbf16>
    %c80 = arith.constant 80 : index
    %c0_67 = arith.constant 0 : index
    %118 = vector.load %arg3[%c80, %c0_67] : memref<400x32xbf16, #tpu.memory_space<vmem>>, vector<16x32xbf16>
    %cst_68 = arith.constant dense<0.000000e+00> : vector<64x32xf32>
    %119 = tpu.matmul %117, %118, %cst_68 {dimension_numbers = #tpu.dot_dimension_numbers<[1], [0], [0], [1], [0, 0, 1, 1], [], []>} : vector<64x16xbf16>, vector<16x32xbf16>, vector<64x32xf32> -> vector<64x32xf32>
    %120 = arith.addf %116, %119 : vector<64x32xf32>
    %c19 = arith.constant 19 : index
    %c0_69 = arith.constant 0 : index
    %121 = vector.load %arg9[%c19, %c0_69] : memref<336x16xbf16, #tpu.memory_space<vmem>>, vector<64x16xbf16>
    %c96_70 = arith.constant 96 : index
    %c0_71 = arith.constant 0 : index
    %122 = vector.load %arg3[%c96_70, %c0_71] : memref<400x32xbf16, #tpu.memory_space<vmem>>, vector<16x32xbf16>
    %cst_72 = arith.constant dense<0.000000e+00> : vector<64x32xf32>
    %123 = tpu.matmul %121, %122, %cst_72 {dimension_numbers = #tpu.dot_dimension_numbers<[1], [0], [0], [1], [0, 0, 1, 1], [], []>} : vector<64x16xbf16>, vector<16x32xbf16>, vector<64x32xf32> -> vector<64x32xf32>
    %124 = arith.addf %120, %123 : vector<64x32xf32>
    %c20 = arith.constant 20 : index
    %c0_73 = arith.constant 0 : index
    %125 = vector.load %arg9[%c20, %c0_73] : memref<336x16xbf16, #tpu.memory_space<vmem>>, vector<64x16xbf16>
    %c112 = arith.constant 112 : index
    %c0_74 = arith.constant 0 : index
    %126 = vector.load %arg3[%c112, %c0_74] : memref<400x32xbf16, #tpu.memory_space<vmem>>, vector<16x32xbf16>
    %cst_75 = arith.constant dense<0.000000e+00> : vector<64x32xf32>
    %127 = tpu.matmul %125, %126, %cst_75 {dimension_numbers = #tpu.dot_dimension_numbers<[1], [0], [0], [1], [0, 0, 1, 1], [], []>} : vector<64x16xbf16>, vector<16x32xbf16>, vector<64x32xf32> -> vector<64x32xf32>
    %128 = arith.addf %124, %127 : vector<64x32xf32>
    %c21 = arith.constant 21 : index
    %c0_76 = arith.constant 0 : index
    %129 = vector.load %arg9[%c21, %c0_76] : memref<336x16xbf16, #tpu.memory_space<vmem>>, vector<64x16xbf16>
    %c128 = arith.constant 128 : index
    %c0_77 = arith.constant 0 : index
    %130 = vector.load %arg3[%c128, %c0_77] : memref<400x32xbf16, #tpu.memory_space<vmem>>, vector<16x32xbf16>
    %cst_78 = arith.constant dense<0.000000e+00> : vector<64x32xf32>
    %131 = tpu.matmul %129, %130, %cst_78 {dimension_numbers = #tpu.dot_dimension_numbers<[1], [0], [0], [1], [0, 0, 1, 1], [], []>} : vector<64x16xbf16>, vector<16x32xbf16>, vector<64x32xf32> -> vector<64x32xf32>
    %132 = arith.addf %128, %131 : vector<64x32xf32>
    %c22 = arith.constant 22 : index
    %c0_79 = arith.constant 0 : index
    %133 = vector.load %arg9[%c22, %c0_79] : memref<336x16xbf16, #tpu.memory_space<vmem>>, vector<64x16xbf16>
    %c144_80 = arith.constant 144 : index
    %c0_81 = arith.constant 0 : index
    %134 = vector.load %arg3[%c144_80, %c0_81] : memref<400x32xbf16, #tpu.memory_space<vmem>>, vector<16x32xbf16>
    %cst_82 = arith.constant dense<0.000000e+00> : vector<64x32xf32>
    %135 = tpu.matmul %133, %134, %cst_82 {dimension_numbers = #tpu.dot_dimension_numbers<[1], [0], [0], [1], [0, 0, 1, 1], [], []>} : vector<64x16xbf16>, vector<16x32xbf16>, vector<64x32xf32> -> vector<64x32xf32>
    %136 = arith.addf %132, %135 : vector<64x32xf32>
    %c36 = arith.constant 36 : index
    %c0_83 = arith.constant 0 : index
    %137 = vector.load %arg9[%c36, %c0_83] : memref<336x16xbf16, #tpu.memory_space<vmem>>, vector<64x16xbf16>
    %c160 = arith.constant 160 : index
    %c0_84 = arith.constant 0 : index
    %138 = vector.load %arg3[%c160, %c0_84] : memref<400x32xbf16, #tpu.memory_space<vmem>>, vector<16x32xbf16>
    %cst_85 = arith.constant dense<0.000000e+00> : vector<64x32xf32>
    %139 = tpu.matmul %137, %138, %cst_85 {dimension_numbers = #tpu.dot_dimension_numbers<[1], [0], [0], [1], [0, 0, 1, 1], [], []>} : vector<64x16xbf16>, vector<16x32xbf16>, vector<64x32xf32> -> vector<64x32xf32>
    %140 = arith.addf %136, %139 : vector<64x32xf32>
    %c37 = arith.constant 37 : index
    %c0_86 = arith.constant 0 : index
    %141 = vector.load %arg9[%c37, %c0_86] : memref<336x16xbf16, #tpu.memory_space<vmem>>, vector<64x16xbf16>
    %c176 = arith.constant 176 : index
    %c0_87 = arith.constant 0 : index
    %142 = vector.load %arg3[%c176, %c0_87] : memref<400x32xbf16, #tpu.memory_space<vmem>>, vector<16x32xbf16>
    %cst_88 = arith.constant dense<0.000000e+00> : vector<64x32xf32>
    %143 = tpu.matmul %141, %142, %cst_88 {dimension_numbers = #tpu.dot_dimension_numbers<[1], [0], [0], [1], [0, 0, 1, 1], [], []>} : vector<64x16xbf16>, vector<16x32xbf16>, vector<64x32xf32> -> vector<64x32xf32>
    %144 = arith.addf %140, %143 : vector<64x32xf32>
    %c38 = arith.constant 38 : index
    %c0_89 = arith.constant 0 : index
    %145 = vector.load %arg9[%c38, %c0_89] : memref<336x16xbf16, #tpu.memory_space<vmem>>, vector<64x16xbf16>
    %c192_90 = arith.constant 192 : index
    %c0_91 = arith.constant 0 : index
    %146 = vector.load %arg3[%c192_90, %c0_91] : memref<400x32xbf16, #tpu.memory_space<vmem>>, vector<16x32xbf16>
    %cst_92 = arith.constant dense<0.000000e+00> : vector<64x32xf32>
    %147 = tpu.matmul %145, %146, %cst_92 {dimension_numbers = #tpu.dot_dimension_numbers<[1], [0], [0], [1], [0, 0, 1, 1], [], []>} : vector<64x16xbf16>, vector<16x32xbf16>, vector<64x32xf32> -> vector<64x32xf32>
    %148 = arith.addf %144, %147 : vector<64x32xf32>
    %c39 = arith.constant 39 : index
    %c0_93 = arith.constant 0 : index
    %149 = vector.load %arg9[%c39, %c0_93] : memref<336x16xbf16, #tpu.memory_space<vmem>>, vector<64x16xbf16>
    %c208 = arith.constant 208 : index
    %c0_94 = arith.constant 0 : index
    %150 = vector.load %arg3[%c208, %c0_94] : memref<400x32xbf16, #tpu.memory_space<vmem>>, vector<16x32xbf16>
    %cst_95 = arith.constant dense<0.000000e+00> : vector<64x32xf32>
    %151 = tpu.matmul %149, %150, %cst_95 {dimension_numbers = #tpu.dot_dimension_numbers<[1], [0], [0], [1], [0, 0, 1, 1], [], []>} : vector<64x16xbf16>, vector<16x32xbf16>, vector<64x32xf32> -> vector<64x32xf32>
    %152 = arith.addf %148, %151 : vector<64x32xf32>
    %c40 = arith.constant 40 : index
    %c0_96 = arith.constant 0 : index
    %153 = vector.load %arg9[%c40, %c0_96] : memref<336x16xbf16, #tpu.memory_space<vmem>>, vector<64x16xbf16>
    %c224 = arith.constant 224 : index
    %c0_97 = arith.constant 0 : index
    %154 = vector.load %arg3[%c224, %c0_97] : memref<400x32xbf16, #tpu.memory_space<vmem>>, vector<16x32xbf16>
    %cst_98 = arith.constant dense<0.000000e+00> : vector<64x32xf32>
    %155 = tpu.matmul %153, %154, %cst_98 {dimension_numbers = #tpu.dot_dimension_numbers<[1], [0], [0], [1], [0, 0, 1, 1], [], []>} : vector<64x16xbf16>, vector<16x32xbf16>, vector<64x32xf32> -> vector<64x32xf32>
    %156 = arith.addf %152, %155 : vector<64x32xf32>
    %c54 = arith.constant 54 : index
    %c0_99 = arith.constant 0 : index
    %157 = vector.load %arg9[%c54, %c0_99] : memref<336x16xbf16, #tpu.memory_space<vmem>>, vector<64x16xbf16>
    %c240_100 = arith.constant 240 : index
    %c0_101 = arith.constant 0 : index
    %158 = vector.load %arg3[%c240_100, %c0_101] : memref<400x32xbf16, #tpu.memory_space<vmem>>, vector<16x32xbf16>
    %cst_102 = arith.constant dense<0.000000e+00> : vector<64x32xf32>
    %159 = tpu.matmul %157, %158, %cst_102 {dimension_numbers = #tpu.dot_dimension_numbers<[1], [0], [0], [1], [0, 0, 1, 1], [], []>} : vector<64x16xbf16>, vector<16x32xbf16>, vector<64x32xf32> -> vector<64x32xf32>
    %160 = arith.addf %156, %159 : vector<64x32xf32>
    %c55 = arith.constant 55 : index
    %c0_103 = arith.constant 0 : index
    %161 = vector.load %arg9[%c55, %c0_103] : memref<336x16xbf16, #tpu.memory_space<vmem>>, vector<64x16xbf16>
    %c256 = arith.constant 256 : index
    %c0_104 = arith.constant 0 : index
    %162 = vector.load %arg3[%c256, %c0_104] : memref<400x32xbf16, #tpu.memory_space<vmem>>, vector<16x32xbf16>
    %cst_105 = arith.constant dense<0.000000e+00> : vector<64x32xf32>
    %163 = tpu.matmul %161, %162, %cst_105 {dimension_numbers = #tpu.dot_dimension_numbers<[1], [0], [0], [1], [0, 0, 1, 1], [], []>} : vector<64x16xbf16>, vector<16x32xbf16>, vector<64x32xf32> -> vector<64x32xf32>
    %164 = arith.addf %160, %163 : vector<64x32xf32>
    %c56 = arith.constant 56 : index
    %c0_106 = arith.constant 0 : index
    %165 = vector.load %arg9[%c56, %c0_106] : memref<336x16xbf16, #tpu.memory_space<vmem>>, vector<64x16xbf16>
    %c272 = arith.constant 272 : index
    %c0_107 = arith.constant 0 : index
    %166 = vector.load %arg3[%c272, %c0_107] : memref<400x32xbf16, #tpu.memory_space<vmem>>, vector<16x32xbf16>
    %cst_108 = arith.constant dense<0.000000e+00> : vector<64x32xf32>
    %167 = tpu.matmul %165, %166, %cst_108 {dimension_numbers = #tpu.dot_dimension_numbers<[1], [0], [0], [1], [0, 0, 1, 1], [], []>} : vector<64x16xbf16>, vector<16x32xbf16>, vector<64x32xf32> -> vector<64x32xf32>
    %168 = arith.addf %164, %167 : vector<64x32xf32>
    %c57 = arith.constant 57 : index
    %c0_109 = arith.constant 0 : index
    %169 = vector.load %arg9[%c57, %c0_109] : memref<336x16xbf16, #tpu.memory_space<vmem>>, vector<64x16xbf16>
    %c288_110 = arith.constant 288 : index
    %c0_111 = arith.constant 0 : index
    %170 = vector.load %arg3[%c288_110, %c0_111] : memref<400x32xbf16, #tpu.memory_space<vmem>>, vector<16x32xbf16>
    %cst_112 = arith.constant dense<0.000000e+00> : vector<64x32xf32>
    %171 = tpu.matmul %169, %170, %cst_112 {dimension_numbers = #tpu.dot_dimension_numbers<[1], [0], [0], [1], [0, 0, 1, 1], [], []>} : vector<64x16xbf16>, vector<16x32xbf16>, vector<64x32xf32> -> vector<64x32xf32>
    %172 = arith.addf %168, %171 : vector<64x32xf32>
    %c58 = arith.constant 58 : index
    %c0_113 = arith.constant 0 : index
    %173 = vector.load %arg9[%c58, %c0_113] : memref<336x16xbf16, #tpu.memory_space<vmem>>, vector<64x16xbf16>
    %c304 = arith.constant 304 : index
    %c0_114 = arith.constant 0 : index
    %174 = vector.load %arg3[%c304, %c0_114] : memref<400x32xbf16, #tpu.memory_space<vmem>>, vector<16x32xbf16>
    %cst_115 = arith.constant dense<0.000000e+00> : vector<64x32xf32>
    %175 = tpu.matmul %173, %174, %cst_115 {dimension_numbers = #tpu.dot_dimension_numbers<[1], [0], [0], [1], [0, 0, 1, 1], [], []>} : vector<64x16xbf16>, vector<16x32xbf16>, vector<64x32xf32> -> vector<64x32xf32>
    %176 = arith.addf %172, %175 : vector<64x32xf32>
    %c72 = arith.constant 72 : index
    %c0_116 = arith.constant 0 : index
    %177 = vector.load %arg9[%c72, %c0_116] : memref<336x16xbf16, #tpu.memory_space<vmem>>, vector<64x16xbf16>
    %c320 = arith.constant 320 : index
    %c0_117 = arith.constant 0 : index
    %178 = vector.load %arg3[%c320, %c0_117] : memref<400x32xbf16, #tpu.memory_space<vmem>>, vector<16x32xbf16>
    %cst_118 = arith.constant dense<0.000000e+00> : vector<64x32xf32>
    %179 = tpu.matmul %177, %178, %cst_118 {dimension_numbers = #tpu.dot_dimension_numbers<[1], [0], [0], [1], [0, 0, 1, 1], [], []>} : vector<64x16xbf16>, vector<16x32xbf16>, vector<64x32xf32> -> vector<64x32xf32>
    %180 = arith.addf %176, %179 : vector<64x32xf32>
    %c73 = arith.constant 73 : index
    %c0_119 = arith.constant 0 : index
    %181 = vector.load %arg9[%c73, %c0_119] : memref<336x16xbf16, #tpu.memory_space<vmem>>, vector<64x16xbf16>
    %c336 = arith.constant 336 : index
    %c0_120 = arith.constant 0 : index
    %182 = vector.load %arg3[%c336, %c0_120] : memref<400x32xbf16, #tpu.memory_space<vmem>>, vector<16x32xbf16>
    %cst_121 = arith.constant dense<0.000000e+00> : vector<64x32xf32>
    %183 = tpu.matmul %181, %182, %cst_121 {dimension_numbers = #tpu.dot_dimension_numbers<[1], [0], [0], [1], [0, 0, 1, 1], [], []>} : vector<64x16xbf16>, vector<16x32xbf16>, vector<64x32xf32> -> vector<64x32xf32>
    %184 = arith.addf %180, %183 : vector<64x32xf32>
    %c74 = arith.constant 74 : index
    %c0_122 = arith.constant 0 : index
    %185 = vector.load %arg9[%c74, %c0_122] : memref<336x16xbf16, #tpu.memory_space<vmem>>, vector<64x16xbf16>
    %c352 = arith.constant 352 : index
    %c0_123 = arith.constant 0 : index
    %186 = vector.load %arg3[%c352, %c0_123] : memref<400x32xbf16, #tpu.memory_space<vmem>>, vector<16x32xbf16>
    %cst_124 = arith.constant dense<0.000000e+00> : vector<64x32xf32>
    %187 = tpu.matmul %185, %186, %cst_124 {dimension_numbers = #tpu.dot_dimension_numbers<[1], [0], [0], [1], [0, 0, 1, 1], [], []>} : vector<64x16xbf16>, vector<16x32xbf16>, vector<64x32xf32> -> vector<64x32xf32>
    %188 = arith.addf %184, %187 : vector<64x32xf32>
    %c75 = arith.constant 75 : index
    %c0_125 = arith.constant 0 : index
    %189 = vector.load %arg9[%c75, %c0_125] : memref<336x16xbf16, #tpu.memory_space<vmem>>, vector<64x16xbf16>
    %c368 = arith.constant 368 : index
    %c0_126 = arith.constant 0 : index
    %190 = vector.load %arg3[%c368, %c0_126] : memref<400x32xbf16, #tpu.memory_space<vmem>>, vector<16x32xbf16>
    %cst_127 = arith.constant dense<0.000000e+00> : vector<64x32xf32>
    %191 = tpu.matmul %189, %190, %cst_127 {dimension_numbers = #tpu.dot_dimension_numbers<[1], [0], [0], [1], [0, 0, 1, 1], [], []>} : vector<64x16xbf16>, vector<16x32xbf16>, vector<64x32xf32> -> vector<64x32xf32>
    %192 = arith.addf %188, %191 : vector<64x32xf32>
    %c76 = arith.constant 76 : index
    %c0_128 = arith.constant 0 : index
    %193 = vector.load %arg9[%c76, %c0_128] : memref<336x16xbf16, #tpu.memory_space<vmem>>, vector<64x16xbf16>
    %c384 = arith.constant 384 : index
    %c0_129 = arith.constant 0 : index
    %194 = vector.load %arg3[%c384, %c0_129] : memref<400x32xbf16, #tpu.memory_space<vmem>>, vector<16x32xbf16>
    %cst_130 = arith.constant dense<0.000000e+00> : vector<64x32xf32>
    %195 = tpu.matmul %193, %194, %cst_130 {dimension_numbers = #tpu.dot_dimension_numbers<[1], [0], [0], [1], [0, 0, 1, 1], [], []>} : vector<64x16xbf16>, vector<16x32xbf16>, vector<64x32xf32> -> vector<64x32xf32>
    %196 = arith.addf %192, %195 : vector<64x32xf32>
    %c0_131 = arith.constant 0 : index
    %c0_132 = arith.constant 0 : index
    %197 = vector.load %arg10[%c0_131, %c0_132] : memref<248x32xf32, #tpu.memory_space<vmem>>, vector<64x32xf32>
    tpu.vector_store %arg10[%c0_131, %c0_132], %196 {strides = array<i32>} : memref<248x32xf32, #tpu.memory_space<vmem>>, vector<64x32xf32>,
    %c64_133 = arith.constant 64 : index
    %c0_134 = arith.constant 0 : index
    %198 = vector.load %arg9[%c64_133, %c0_134] : memref<336x16xbf16, #tpu.memory_space<vmem>>, vector<64x16xbf16>
    %c0_135 = arith.constant 0 : index
    %c0_136 = arith.constant 0 : index
    %199 = vector.load %arg3[%c0_135, %c0_136] : memref<400x32xbf16, #tpu.memory_space<vmem>>, vector<16x32xbf16>
    %cst_137 = arith.constant dense<0.000000e+00> : vector<64x32xf32>
    %200 = tpu.matmul %198, %199, %cst_137 {dimension_numbers = #tpu.dot_dimension_numbers<[1], [0], [0], [1], [0, 0, 1, 1], [], []>} : vector<64x16xbf16>, vector<16x32xbf16>, vector<64x32xf32> -> vector<64x32xf32>
    %c65 = arith.constant 65 : index
    %c0_138 = arith.constant 0 : index
    %201 = vector.load %arg9[%c65, %c0_138] : memref<336x16xbf16, #tpu.memory_space<vmem>>, vector<64x16xbf16>
    %c16_139 = arith.constant 16 : index
    %c0_140 = arith.constant 0 : index
    %202 = vector.load %arg3[%c16_139, %c0_140] : memref<400x32xbf16, #tpu.memory_space<vmem>>, vector<16x32xbf16>
    %cst_141 = arith.constant dense<0.000000e+00> : vector<64x32xf32>
    %203 = tpu.matmul %201, %202, %cst_141 {dimension_numbers = #tpu.dot_dimension_numbers<[1], [0], [0], [1], [0, 0, 1, 1], [], []>} : vector<64x16xbf16>, vector<16x32xbf16>, vector<64x32xf32> -> vector<64x32xf32>
    %204 = arith.addf %200, %203 : vector<64x32xf32>
    %c66 = arith.constant 66 : index
    %c0_142 = arith.constant 0 : index
    %205 = vector.load %arg9[%c66, %c0_142] : memref<336x16xbf16, #tpu.memory_space<vmem>>, vector<64x16xbf16>
    %c32_143 = arith.constant 32 : index
    %c0_144 = arith.constant 0 : index
    %206 = vector.load %arg3[%c32_143, %c0_144] : memref<400x32xbf16, #tpu.memory_space<vmem>>, vector<16x32xbf16>
    %cst_145 = arith.constant dense<0.000000e+00> : vector<64x32xf32>
    %207 = tpu.matmul %205, %206, %cst_145 {dimension_numbers = #tpu.dot_dimension_numbers<[1], [0], [0], [1], [0, 0, 1, 1], [], []>} : vector<64x16xbf16>, vector<16x32xbf16>, vector<64x32xf32> -> vector<64x32xf32>
    %208 = arith.addf %204, %207 : vector<64x32xf32>
    %c67 = arith.constant 67 : index
    %c0_146 = arith.constant 0 : index
    %209 = vector.load %arg9[%c67, %c0_146] : memref<336x16xbf16, #tpu.memory_space<vmem>>, vector<64x16xbf16>
    %c48_147 = arith.constant 48 : index
    %c0_148 = arith.constant 0 : index
    %210 = vector.load %arg3[%c48_147, %c0_148] : memref<400x32xbf16, #tpu.memory_space<vmem>>, vector<16x32xbf16>
    %cst_149 = arith.constant dense<0.000000e+00> : vector<64x32xf32>
    %211 = tpu.matmul %209, %210, %cst_149 {dimension_numbers = #tpu.dot_dimension_numbers<[1], [0], [0], [1], [0, 0, 1, 1], [], []>} : vector<64x16xbf16>, vector<16x32xbf16>, vector<64x32xf32> -> vector<64x32xf32>
    %212 = arith.addf %208, %211 : vector<64x32xf32>
    %c68 = arith.constant 68 : index
    %c0_150 = arith.constant 0 : index
    %213 = vector.load %arg9[%c68, %c0_150] : memref<336x16xbf16, #tpu.memory_space<vmem>>, vector<64x16xbf16>
    %c64_151 = arith.constant 64 : index
    %c0_152 = arith.constant 0 : index
    %214 = vector.load %arg3[%c64_151, %c0_152] : memref<400x32xbf16, #tpu.memory_space<vmem>>, vector<16x32xbf16>
    %cst_153 = arith.constant dense<0.000000e+00> : vector<64x32xf32>
    %215 = tpu.matmul %213, %214, %cst_153 {dimension_numbers = #tpu.dot_dimension_numbers<[1], [0], [0], [1], [0, 0, 1, 1], [], []>} : vector<64x16xbf16>, vector<16x32xbf16>, vector<64x32xf32> -> vector<64x32xf32>
    %216 = arith.addf %212, %215 : vector<64x32xf32>
    %c82 = arith.constant 82 : index
    %c0_154 = arith.constant 0 : index
    %217 = vector.load %arg9[%c82, %c0_154] : memref<336x16xbf16, #tpu.memory_space<vmem>>, vector<64x16xbf16>
    %c80_155 = arith.constant 80 : index
    %c0_156 = arith.constant 0 : index
    %218 = vector.load %arg3[%c80_155, %c0_156] : memref<400x32xbf16, #tpu.memory_space<vmem>>, vector<16x32xbf16>
    %cst_157 = arith.constant dense<0.000000e+00> : vector<64x32xf32>
    %219 = tpu.matmul %217, %218, %cst_157 {dimension_numbers = #tpu.dot_dimension_numbers<[1], [0], [0], [1], [0, 0, 1, 1], [], []>} : vector<64x16xbf16>, vector<16x32xbf16>, vector<64x32xf32> -> vector<64x32xf32>
    %220 = arith.addf %216, %219 : vector<64x32xf32>
    %c83 = arith.constant 83 : index
    %c0_158 = arith.constant 0 : index
    %221 = vector.load %arg9[%c83, %c0_158] : memref<336x16xbf16, #tpu.memory_space<vmem>>, vector<64x16xbf16>
    %c96_159 = arith.constant 96 : index
    %c0_160 = arith.constant 0 : index
    %222 = vector.load %arg3[%c96_159, %c0_160] : memref<400x32xbf16, #tpu.memory_space<vmem>>, vector<16x32xbf16>
    %cst_161 = arith.constant dense<0.000000e+00> : vector<64x32xf32>
    %223 = tpu.matmul %221, %222, %cst_161 {dimension_numbers = #tpu.dot_dimension_numbers<[1], [0], [0], [1], [0, 0, 1, 1], [], []>} : vector<64x16xbf16>, vector<16x32xbf16>, vector<64x32xf32> -> vector<64x32xf32>
    %224 = arith.addf %220, %223 : vector<64x32xf32>
    %c84 = arith.constant 84 : index
    %c0_162 = arith.constant 0 : index
    %225 = vector.load %arg9[%c84, %c0_162] : memref<336x16xbf16, #tpu.memory_space<vmem>>, vector<64x16xbf16>
    %c112_163 = arith.constant 112 : index
    %c0_164 = arith.constant 0 : index
    %226 = vector.load %arg3[%c112_163, %c0_164] : memref<400x32xbf16, #tpu.memory_space<vmem>>, vector<16x32xbf16>
    %cst_165 = arith.constant dense<0.000000e+00> : vector<64x32xf32>
    %227 = tpu.matmul %225, %226, %cst_165 {dimension_numbers = #tpu.dot_dimension_numbers<[1], [0], [0], [1], [0, 0, 1, 1], [], []>} : vector<64x16xbf16>, vector<16x32xbf16>, vector<64x32xf32> -> vector<64x32xf32>
    %228 = arith.addf %224, %227 : vector<64x32xf32>
    %c85 = arith.constant 85 : index
    %c0_166 = arith.constant 0 : index
    %229 = vector.load %arg9[%c85, %c0_166] : memref<336x16xbf16, #tpu.memory_space<vmem>>, vector<64x16xbf16>
    %c128_167 = arith.constant 128 : index
    %c0_168 = arith.constant 0 : index
    %230 = vector.load %arg3[%c128_167, %c0_168] : memref<400x32xbf16, #tpu.memory_space<vmem>>, vector<16x32xbf16>
    %cst_169 = arith.constant dense<0.000000e+00> : vector<64x32xf32>
    %231 = tpu.matmul %229, %230, %cst_169 {dimension_numbers = #tpu.dot_dimension_numbers<[1], [0], [0], [1], [0, 0, 1, 1], [], []>} : vector<64x16xbf16>, vector<16x32xbf16>, vector<64x32xf32> -> vector<64x32xf32>
    %232 = arith.addf %228, %231 : vector<64x32xf32>
    %c86 = arith.constant 86 : index
    %c0_170 = arith.constant 0 : index
    %233 = vector.load %arg9[%c86, %c0_170] : memref<336x16xbf16, #tpu.memory_space<vmem>>, vector<64x16xbf16>
    %c144_171 = arith.constant 144 : index
    %c0_172 = arith.constant 0 : index
    %234 = vector.load %arg3[%c144_171, %c0_172] : memref<400x32xbf16, #tpu.memory_space<vmem>>, vector<16x32xbf16>
    %cst_173 = arith.constant dense<0.000000e+00> : vector<64x32xf32>
    %235 = tpu.matmul %233, %234, %cst_173 {dimension_numbers = #tpu.dot_dimension_numbers<[1], [0], [0], [1], [0, 0, 1, 1], [], []>} : vector<64x16xbf16>, vector<16x32xbf16>, vector<64x32xf32> -> vector<64x32xf32>
    %236 = arith.addf %232, %235 : vector<64x32xf32>
    %c100 = arith.constant 100 : index
    %c0_174 = arith.constant 0 : index
    %237 = vector.load %arg9[%c100, %c0_174] : memref<336x16xbf16, #tpu.memory_space<vmem>>, vector<64x16xbf16>
    %c160_175 = arith.constant 160 : index
    %c0_176 = arith.constant 0 : index
    %238 = vector.load %arg3[%c160_175, %c0_176] : memref<400x32xbf16, #tpu.memory_space<vmem>>, vector<16x32xbf16>
    %cst_177 = arith.constant dense<0.000000e+00> : vector<64x32xf32>
    %239 = tpu.matmul %237, %238, %cst_177 {dimension_numbers = #tpu.dot_dimension_numbers<[1], [0], [0], [1], [0, 0, 1, 1], [], []>} : vector<64x16xbf16>, vector<16x32xbf16>, vector<64x32xf32> -> vector<64x32xf32>
    %240 = arith.addf %236, %239 : vector<64x32xf32>
    %c101 = arith.constant 101 : index
    %c0_178 = arith.constant 0 : index
    %241 = vector.load %arg9[%c101, %c0_178] : memref<336x16xbf16, #tpu.memory_space<vmem>>, vector<64x16xbf16>
    %c176_179 = arith.constant 176 : index
    %c0_180 = arith.constant 0 : index
    %242 = vector.load %arg3[%c176_179, %c0_180] : memref<400x32xbf16, #tpu.memory_space<vmem>>, vector<16x32xbf16>
    %cst_181 = arith.constant dense<0.000000e+00> : vector<64x32xf32>
    %243 = tpu.matmul %241, %242, %cst_181 {dimension_numbers = #tpu.dot_dimension_numbers<[1], [0], [0], [1], [0, 0, 1, 1], [], []>} : vector<64x16xbf16>, vector<16x32xbf16>, vector<64x32xf32> -> vector<64x32xf32>
    %244 = arith.addf %240, %243 : vector<64x32xf32>
    %c102 = arith.constant 102 : index
    %c0_182 = arith.constant 0 : index
    %245 = vector.load %arg9[%c102, %c0_182] : memref<336x16xbf16, #tpu.memory_space<vmem>>, vector<64x16xbf16>
    %c192_183 = arith.constant 192 : index
    %c0_184 = arith.constant 0 : index
    %246 = vector.load %arg3[%c192_183, %c0_184] : memref<400x32xbf16, #tpu.memory_space<vmem>>, vector<16x32xbf16>
    %cst_185 = arith.constant dense<0.000000e+00> : vector<64x32xf32>
    %247 = tpu.matmul %245, %246, %cst_185 {dimension_numbers = #tpu.dot_dimension_numbers<[1], [0], [0], [1], [0, 0, 1, 1], [], []>} : vector<64x16xbf16>, vector<16x32xbf16>, vector<64x32xf32> -> vector<64x32xf32>
    %248 = arith.addf %244, %247 : vector<64x32xf32>
    %c103 = arith.constant 103 : index
    %c0_186 = arith.constant 0 : index
    %249 = vector.load %arg9[%c103, %c0_186] : memref<336x16xbf16, #tpu.memory_space<vmem>>, vector<64x16xbf16>
    %c208_187 = arith.constant 208 : index
    %c0_188 = arith.constant 0 : index
    %250 = vector.load %arg3[%c208_187, %c0_188] : memref<400x32xbf16, #tpu.memory_space<vmem>>, vector<16x32xbf16>
    %cst_189 = arith.constant dense<0.000000e+00> : vector<64x32xf32>
    %251 = tpu.matmul %249, %250, %cst_189 {dimension_numbers = #tpu.dot_dimension_numbers<[1], [0], [0], [1], [0, 0, 1, 1], [], []>} : vector<64x16xbf16>, vector<16x32xbf16>, vector<64x32xf32> -> vector<64x32xf32>
    %252 = arith.addf %248, %251 : vector<64x32xf32>
    %c104 = arith.constant 104 : index
    %c0_190 = arith.constant 0 : index
    %253 = vector.load %arg9[%c104, %c0_190] : memref<336x16xbf16, #tpu.memory_space<vmem>>, vector<64x16xbf16>
    %c224_191 = arith.constant 224 : index
    %c0_192 = arith.constant 0 : index
    %254 = vector.load %arg3[%c224_191, %c0_192] : memref<400x32xbf16, #tpu.memory_space<vmem>>, vector<16x32xbf16>
    %cst_193 = arith.constant dense<0.000000e+00> : vector<64x32xf32>
    %255 = tpu.matmul %253, %254, %cst_193 {dimension_numbers = #tpu.dot_dimension_numbers<[1], [0], [0], [1], [0, 0, 1, 1], [], []>} : vector<64x16xbf16>, vector<16x32xbf16>, vector<64x32xf32> -> vector<64x32xf32>
    %256 = arith.addf %252, %255 : vector<64x32xf32>
    %c118 = arith.constant 118 : index
    %c0_194 = arith.constant 0 : index
    %257 = vector.load %arg9[%c118, %c0_194] : memref<336x16xbf16, #tpu.memory_space<vmem>>, vector<64x16xbf16>
    %c240_195 = arith.constant 240 : index
    %c0_196 = arith.constant 0 : index
    %258 = vector.load %arg3[%c240_195, %c0_196] : memref<400x32xbf16, #tpu.memory_space<vmem>>, vector<16x32xbf16>
    %cst_197 = arith.constant dense<0.000000e+00> : vector<64x32xf32>
    %259 = tpu.matmul %257, %258, %cst_197 {dimension_numbers = #tpu.dot_dimension_numbers<[1], [0], [0], [1], [0, 0, 1, 1], [], []>} : vector<64x16xbf16>, vector<16x32xbf16>, vector<64x32xf32> -> vector<64x32xf32>
    %260 = arith.addf %256, %259 : vector<64x32xf32>
    %c119 = arith.constant 119 : index
    %c0_198 = arith.constant 0 : index
    %261 = vector.load %arg9[%c119, %c0_198] : memref<336x16xbf16, #tpu.memory_space<vmem>>, vector<64x16xbf16>
    %c256_199 = arith.constant 256 : index
    %c0_200 = arith.constant 0 : index
    %262 = vector.load %arg3[%c256_199, %c0_200] : memref<400x32xbf16, #tpu.memory_space<vmem>>, vector<16x32xbf16>
    %cst_201 = arith.constant dense<0.000000e+00> : vector<64x32xf32>
    %263 = tpu.matmul %261, %262, %cst_201 {dimension_numbers = #tpu.dot_dimension_numbers<[1], [0], [0], [1], [0, 0, 1, 1], [], []>} : vector<64x16xbf16>, vector<16x32xbf16>, vector<64x32xf32> -> vector<64x32xf32>
    %264 = arith.addf %260, %263 : vector<64x32xf32>
    %c120 = arith.constant 120 : index
    %c0_202 = arith.constant 0 : index
    %265 = vector.load %arg9[%c120, %c0_202] : memref<336x16xbf16, #tpu.memory_space<vmem>>, vector<64x16xbf16>
    %c272_203 = arith.constant 272 : index
    %c0_204 = arith.constant 0 : index
    %266 = vector.load %arg3[%c272_203, %c0_204] : memref<400x32xbf16, #tpu.memory_space<vmem>>, vector<16x32xbf16>
    %cst_205 = arith.constant dense<0.000000e+00> : vector<64x32xf32>
    %267 = tpu.matmul %265, %266, %cst_205 {dimension_numbers = #tpu.dot_dimension_numbers<[1], [0], [0], [1], [0, 0, 1, 1], [], []>} : vector<64x16xbf16>, vector<16x32xbf16>, vector<64x32xf32> -> vector<64x32xf32>
    %268 = arith.addf %264, %267 : vector<64x32xf32>
    %c121 = arith.constant 121 : index
    %c0_206 = arith.constant 0 : index
    %269 = vector.load %arg9[%c121, %c0_206] : memref<336x16xbf16, #tpu.memory_space<vmem>>, vector<64x16xbf16>
    %c288_207 = arith.constant 288 : index
    %c0_208 = arith.constant 0 : index
    %270 = vector.load %arg3[%c288_207, %c0_208] : memref<400x32xbf16, #tpu.memory_space<vmem>>, vector<16x32xbf16>
    %cst_209 = arith.constant dense<0.000000e+00> : vector<64x32xf32>
    %271 = tpu.matmul %269, %270, %cst_209 {dimension_numbers = #tpu.dot_dimension_numbers<[1], [0], [0], [1], [0, 0, 1, 1], [], []>} : vector<64x16xbf16>, vector<16x32xbf16>, vector<64x32xf32> -> vector<64x32xf32>
    %272 = arith.addf %268, %271 : vector<64x32xf32>
    %c122 = arith.constant 122 : index
    %c0_210 = arith.constant 0 : index
    %273 = vector.load %arg9[%c122, %c0_210] : memref<336x16xbf16, #tpu.memory_space<vmem>>, vector<64x16xbf16>
    %c304_211 = arith.constant 304 : index
    %c0_212 = arith.constant 0 : index
    %274 = vector.load %arg3[%c304_211, %c0_212] : memref<400x32xbf16, #tpu.memory_space<vmem>>, vector<16x32xbf16>
    %cst_213 = arith.constant dense<0.000000e+00> : vector<64x32xf32>
    %275 = tpu.matmul %273, %274, %cst_213 {dimension_numbers = #tpu.dot_dimension_numbers<[1], [0], [0], [1], [0, 0, 1, 1], [], []>} : vector<64x16xbf16>, vector<16x32xbf16>, vector<64x32xf32> -> vector<64x32xf32>
    %276 = arith.addf %272, %275 : vector<64x32xf32>
    %c136 = arith.constant 136 : index
    %c0_214 = arith.constant 0 : index
    %277 = vector.load %arg9[%c136, %c0_214] : memref<336x16xbf16, #tpu.memory_space<vmem>>, vector<64x16xbf16>
    %c320_215 = arith.constant 320 : index
    %c0_216 = arith.constant 0 : index
    %278 = vector.load %arg3[%c320_215, %c0_216] : memref<400x32xbf16, #tpu.memory_space<vmem>>, vector<16x32xbf16>
    %cst_217 = arith.constant dense<0.000000e+00> : vector<64x32xf32>
    %279 = tpu.matmul %277, %278, %cst_217 {dimension_numbers = #tpu.dot_dimension_numbers<[1], [0], [0], [1], [0, 0, 1, 1], [], []>} : vector<64x16xbf16>, vector<16x32xbf16>, vector<64x32xf32> -> vector<64x32xf32>
    %280 = arith.addf %276, %279 : vector<64x32xf32>
    %c137 = arith.constant 137 : index
    %c0_218 = arith.constant 0 : index
    %281 = vector.load %arg9[%c137, %c0_218] : memref<336x16xbf16, #tpu.memory_space<vmem>>, vector<64x16xbf16>
    %c336_219 = arith.constant 336 : index
    %c0_220 = arith.constant 0 : index
    %282 = vector.load %arg3[%c336_219, %c0_220] : memref<400x32xbf16, #tpu.memory_space<vmem>>, vector<16x32xbf16>
    %cst_221 = arith.constant dense<0.000000e+00> : vector<64x32xf32>
    %283 = tpu.matmul %281, %282, %cst_221 {dimension_numbers = #tpu.dot_dimension_numbers<[1], [0], [0], [1], [0, 0, 1, 1], [], []>} : vector<64x16xbf16>, vector<16x32xbf16>, vector<64x32xf32> -> vector<64x32xf32>
    %284 = arith.addf %280, %283 : vector<64x32xf32>
    %c138 = arith.constant 138 : index
    %c0_222 = arith.constant 0 : index
    %285 = vector.load %arg9[%c138, %c0_222] : memref<336x16xbf16, #tpu.memory_space<vmem>>, vector<64x16xbf16>
    %c352_223 = arith.constant 352 : index
    %c0_224 = arith.constant 0 : index
    %286 = vector.load %arg3[%c352_223, %c0_224] : memref<400x32xbf16, #tpu.memory_space<vmem>>, vector<16x32xbf16>
    %cst_225 = arith.constant dense<0.000000e+00> : vector<64x32xf32>
    %287 = tpu.matmul %285, %286, %cst_225 {dimension_numbers = #tpu.dot_dimension_numbers<[1], [0], [0], [1], [0, 0, 1, 1], [], []>} : vector<64x16xbf16>, vector<16x32xbf16>, vector<64x32xf32> -> vector<64x32xf32>
    %288 = arith.addf %284, %287 : vector<64x32xf32>
    %c139 = arith.constant 139 : index
    %c0_226 = arith.constant 0 : index
    %289 = vector.load %arg9[%c139, %c0_226] : memref<336x16xbf16, #tpu.memory_space<vmem>>, vector<64x16xbf16>
    %c368_227 = arith.constant 368 : index
    %c0_228 = arith.constant 0 : index
    %290 = vector.load %arg3[%c368_227, %c0_228] : memref<400x32xbf16, #tpu.memory_space<vmem>>, vector<16x32xbf16>
    %cst_229 = arith.constant dense<0.000000e+00> : vector<64x32xf32>
    %291 = tpu.matmul %289, %290, %cst_229 {dimension_numbers = #tpu.dot_dimension_numbers<[1], [0], [0], [1], [0, 0, 1, 1], [], []>} : vector<64x16xbf16>, vector<16x32xbf16>, vector<64x32xf32> -> vector<64x32xf32>
    %292 = arith.addf %288, %291 : vector<64x32xf32>
    %c140 = arith.constant 140 : index
    %c0_230 = arith.constant 0 : index
    %293 = vector.load %arg9[%c140, %c0_230] : memref<336x16xbf16, #tpu.memory_space<vmem>>, vector<64x16xbf16>
    %c384_231 = arith.constant 384 : index
    %c0_232 = arith.constant 0 : index
    %294 = vector.load %arg3[%c384_231, %c0_232] : memref<400x32xbf16, #tpu.memory_space<vmem>>, vector<16x32xbf16>
    %cst_233 = arith.constant dense<0.000000e+00> : vector<64x32xf32>
    %295 = tpu.matmul %293, %294, %cst_233 {dimension_numbers = #tpu.dot_dimension_numbers<[1], [0], [0], [1], [0, 0, 1, 1], [], []>} : vector<64x16xbf16>, vector<16x32xbf16>, vector<64x32xf32> -> vector<64x32xf32>
    %296 = arith.addf %292, %295 : vector<64x32xf32>
    %c64_234 = arith.constant 64 : index
    %c0_235 = arith.constant 0 : index
    %297 = vector.load %arg10[%c64_234, %c0_235] : memref<248x32xf32, #tpu.memory_space<vmem>>, vector<64x32xf32>
    tpu.vector_store %arg10[%c64_234, %c0_235], %296 {strides = array<i32>} : memref<248x32xf32, #tpu.memory_space<vmem>>, vector<64x32xf32>,
    %c128_236 = arith.constant 128 : index
    %c0_237 = arith.constant 0 : index
    %298 = vector.load %arg9[%c128_236, %c0_237] : memref<336x16xbf16, #tpu.memory_space<vmem>>, vector<64x16xbf16>
    %c0_238 = arith.constant 0 : index
    %c0_239 = arith.constant 0 : index
    %299 = vector.load %arg3[%c0_238, %c0_239] : memref<400x32xbf16, #tpu.memory_space<vmem>>, vector<16x32xbf16>
    %cst_240 = arith.constant dense<0.000000e+00> : vector<64x32xf32>
    %300 = tpu.matmul %298, %299, %cst_240 {dimension_numbers = #tpu.dot_dimension_numbers<[1], [0], [0], [1], [0, 0, 1, 1], [], []>} : vector<64x16xbf16>, vector<16x32xbf16>, vector<64x32xf32> -> vector<64x32xf32>
    %c129 = arith.constant 129 : index
    %c0_241 = arith.constant 0 : index
    %301 = vector.load %arg9[%c129, %c0_241] : memref<336x16xbf16, #tpu.memory_space<vmem>>, vector<64x16xbf16>
    %c16_242 = arith.constant 16 : index
    %c0_243 = arith.constant 0 : index
    %302 = vector.load %arg3[%c16_242, %c0_243] : memref<400x32xbf16, #tpu.memory_space<vmem>>, vector<16x32xbf16>
    %cst_244 = arith.constant dense<0.000000e+00> : vector<64x32xf32>
    %303 = tpu.matmul %301, %302, %cst_244 {dimension_numbers = #tpu.dot_dimension_numbers<[1], [0], [0], [1], [0, 0, 1, 1], [], []>} : vector<64x16xbf16>, vector<16x32xbf16>, vector<64x32xf32> -> vector<64x32xf32>
    %304 = arith.addf %300, %303 : vector<64x32xf32>
    %c130 = arith.constant 130 : index
    %c0_245 = arith.constant 0 : index
    %305 = vector.load %arg9[%c130, %c0_245] : memref<336x16xbf16, #tpu.memory_space<vmem>>, vector<64x16xbf16>
    %c32_246 = arith.constant 32 : index
    %c0_247 = arith.constant 0 : index
    %306 = vector.load %arg3[%c32_246, %c0_247] : memref<400x32xbf16, #tpu.memory_space<vmem>>, vector<16x32xbf16>
    %cst_248 = arith.constant dense<0.000000e+00> : vector<64x32xf32>
    %307 = tpu.matmul %305, %306, %cst_248 {dimension_numbers = #tpu.dot_dimension_numbers<[1], [0], [0], [1], [0, 0, 1, 1], [], []>} : vector<64x16xbf16>, vector<16x32xbf16>, vector<64x32xf32> -> vector<64x32xf32>
    %308 = arith.addf %304, %307 : vector<64x32xf32>
    %c131 = arith.constant 131 : index
    %c0_249 = arith.constant 0 : index
    %309 = vector.load %arg9[%c131, %c0_249] : memref<336x16xbf16, #tpu.memory_space<vmem>>, vector<64x16xbf16>
    %c48_250 = arith.constant 48 : index
    %c0_251 = arith.constant 0 : index
    %310 = vector.load %arg3[%c48_250, %c0_251] : memref<400x32xbf16, #tpu.memory_space<vmem>>, vector<16x32xbf16>
    %cst_252 = arith.constant dense<0.000000e+00> : vector<64x32xf32>
    %311 = tpu.matmul %309, %310, %cst_252 {dimension_numbers = #tpu.dot_dimension_numbers<[1], [0], [0], [1], [0, 0, 1, 1], [], []>} : vector<64x16xbf16>, vector<16x32xbf16>, vector<64x32xf32> -> vector<64x32xf32>
    %312 = arith.addf %308, %311 : vector<64x32xf32>
    %c132 = arith.constant 132 : index
    %c0_253 = arith.constant 0 : index
    %313 = vector.load %arg9[%c132, %c0_253] : memref<336x16xbf16, #tpu.memory_space<vmem>>, vector<64x16xbf16>
    %c64_254 = arith.constant 64 : index
    %c0_255 = arith.constant 0 : index
    %314 = vector.load %arg3[%c64_254, %c0_255] : memref<400x32xbf16, #tpu.memory_space<vmem>>, vector<16x32xbf16>
    %cst_256 = arith.constant dense<0.000000e+00> : vector<64x32xf32>
    %315 = tpu.matmul %313, %314, %cst_256 {dimension_numbers = #tpu.dot_dimension_numbers<[1], [0], [0], [1], [0, 0, 1, 1], [], []>} : vector<64x16xbf16>, vector<16x32xbf16>, vector<64x32xf32> -> vector<64x32xf32>
    %316 = arith.addf %312, %315 : vector<64x32xf32>
    %c146 = arith.constant 146 : index
    %c0_257 = arith.constant 0 : index
    %317 = vector.load %arg9[%c146, %c0_257] : memref<336x16xbf16, #tpu.memory_space<vmem>>, vector<64x16xbf16>
    %c80_258 = arith.constant 80 : index
    %c0_259 = arith.constant 0 : index
    %318 = vector.load %arg3[%c80_258, %c0_259] : memref<400x32xbf16, #tpu.memory_space<vmem>>, vector<16x32xbf16>
    %cst_260 = arith.constant dense<0.000000e+00> : vector<64x32xf32>
    %319 = tpu.matmul %317, %318, %cst_260 {dimension_numbers = #tpu.dot_dimension_numbers<[1], [0], [0], [1], [0, 0, 1, 1], [], []>} : vector<64x16xbf16>, vector<16x32xbf16>, vector<64x32xf32> -> vector<64x32xf32>
    %320 = arith.addf %316, %319 : vector<64x32xf32>
    %c147 = arith.constant 147 : index
    %c0_261 = arith.constant 0 : index
    %321 = vector.load %arg9[%c147, %c0_261] : memref<336x16xbf16, #tpu.memory_space<vmem>>, vector<64x16xbf16>
    %c96_262 = arith.constant 96 : index
    %c0_263 = arith.constant 0 : index
    %322 = vector.load %arg3[%c96_262, %c0_263] : memref<400x32xbf16, #tpu.memory_space<vmem>>, vector<16x32xbf16>
    %cst_264 = arith.constant dense<0.000000e+00> : vector<64x32xf32>
    %323 = tpu.matmul %321, %322, %cst_264 {dimension_numbers = #tpu.dot_dimension_numbers<[1], [0], [0], [1], [0, 0, 1, 1], [], []>} : vector<64x16xbf16>, vector<16x32xbf16>, vector<64x32xf32> -> vector<64x32xf32>
    %324 = arith.addf %320, %323 : vector<64x32xf32>
    %c148 = arith.constant 148 : index
    %c0_265 = arith.constant 0 : index
    %325 = vector.load %arg9[%c148, %c0_265] : memref<336x16xbf16, #tpu.memory_space<vmem>>, vector<64x16xbf16>
    %c112_266 = arith.constant 112 : index
    %c0_267 = arith.constant 0 : index
    %326 = vector.load %arg3[%c112_266, %c0_267] : memref<400x32xbf16, #tpu.memory_space<vmem>>, vector<16x32xbf16>
    %cst_268 = arith.constant dense<0.000000e+00> : vector<64x32xf32>
    %327 = tpu.matmul %325, %326, %cst_268 {dimension_numbers = #tpu.dot_dimension_numbers<[1], [0], [0], [1], [0, 0, 1, 1], [], []>} : vector<64x16xbf16>, vector<16x32xbf16>, vector<64x32xf32> -> vector<64x32xf32>
    %328 = arith.addf %324, %327 : vector<64x32xf32>
    %c149 = arith.constant 149 : index
    %c0_269 = arith.constant 0 : index
    %329 = vector.load %arg9[%c149, %c0_269] : memref<336x16xbf16, #tpu.memory_space<vmem>>, vector<64x16xbf16>
    %c128_270 = arith.constant 128 : index
    %c0_271 = arith.constant 0 : index
    %330 = vector.load %arg3[%c128_270, %c0_271] : memref<400x32xbf16, #tpu.memory_space<vmem>>, vector<16x32xbf16>
    %cst_272 = arith.constant dense<0.000000e+00> : vector<64x32xf32>
    %331 = tpu.matmul %329, %330, %cst_272 {dimension_numbers = #tpu.dot_dimension_numbers<[1], [0], [0], [1], [0, 0, 1, 1], [], []>} : vector<64x16xbf16>, vector<16x32xbf16>, vector<64x32xf32> -> vector<64x32xf32>
    %332 = arith.addf %328, %331 : vector<64x32xf32>
    %c150 = arith.constant 150 : index
    %c0_273 = arith.constant 0 : index
    %333 = vector.load %arg9[%c150, %c0_273] : memref<336x16xbf16, #tpu.memory_space<vmem>>, vector<64x16xbf16>
    %c144_274 = arith.constant 144 : index
    %c0_275 = arith.constant 0 : index
    %334 = vector.load %arg3[%c144_274, %c0_275] : memref<400x32xbf16, #tpu.memory_space<vmem>>, vector<16x32xbf16>
    %cst_276 = arith.constant dense<0.000000e+00> : vector<64x32xf32>
    %335 = tpu.matmul %333, %334, %cst_276 {dimension_numbers = #tpu.dot_dimension_numbers<[1], [0], [0], [1], [0, 0, 1, 1], [], []>} : vector<64x16xbf16>, vector<16x32xbf16>, vector<64x32xf32> -> vector<64x32xf32>
    %336 = arith.addf %332, %335 : vector<64x32xf32>
    %c164 = arith.constant 164 : index
    %c0_277 = arith.constant 0 : index
    %337 = vector.load %arg9[%c164, %c0_277] : memref<336x16xbf16, #tpu.memory_space<vmem>>, vector<64x16xbf16>
    %c160_278 = arith.constant 160 : index
    %c0_279 = arith.constant 0 : index
    %338 = vector.load %arg3[%c160_278, %c0_279] : memref<400x32xbf16, #tpu.memory_space<vmem>>, vector<16x32xbf16>
    %cst_280 = arith.constant dense<0.000000e+00> : vector<64x32xf32>
    %339 = tpu.matmul %337, %338, %cst_280 {dimension_numbers = #tpu.dot_dimension_numbers<[1], [0], [0], [1], [0, 0, 1, 1], [], []>} : vector<64x16xbf16>, vector<16x32xbf16>, vector<64x32xf32> -> vector<64x32xf32>
    %340 = arith.addf %336, %339 : vector<64x32xf32>
    %c165 = arith.constant 165 : index
    %c0_281 = arith.constant 0 : index
    %341 = vector.load %arg9[%c165, %c0_281] : memref<336x16xbf16, #tpu.memory_space<vmem>>, vector<64x16xbf16>
    %c176_282 = arith.constant 176 : index
    %c0_283 = arith.constant 0 : index
    %342 = vector.load %arg3[%c176_282, %c0_283] : memref<400x32xbf16, #tpu.memory_space<vmem>>, vector<16x32xbf16>
    %cst_284 = arith.constant dense<0.000000e+00> : vector<64x32xf32>
    %343 = tpu.matmul %341, %342, %cst_284 {dimension_numbers = #tpu.dot_dimension_numbers<[1], [0], [0], [1], [0, 0, 1, 1], [], []>} : vector<64x16xbf16>, vector<16x32xbf16>, vector<64x32xf32> -> vector<64x32xf32>
    %344 = arith.addf %340, %343 : vector<64x32xf32>
    %c166 = arith.constant 166 : index
    %c0_285 = arith.constant 0 : index
    %345 = vector.load %arg9[%c166, %c0_285] : memref<336x16xbf16, #tpu.memory_space<vmem>>, vector<64x16xbf16>
    %c192_286 = arith.constant 192 : index
    %c0_287 = arith.constant 0 : index
    %346 = vector.load %arg3[%c192_286, %c0_287] : memref<400x32xbf16, #tpu.memory_space<vmem>>, vector<16x32xbf16>
    %cst_288 = arith.constant dense<0.000000e+00> : vector<64x32xf32>
    %347 = tpu.matmul %345, %346, %cst_288 {dimension_numbers = #tpu.dot_dimension_numbers<[1], [0], [0], [1], [0, 0, 1, 1], [], []>} : vector<64x16xbf16>, vector<16x32xbf16>, vector<64x32xf32> -> vector<64x32xf32>
    %348 = arith.addf %344, %347 : vector<64x32xf32>
    %c167 = arith.constant 167 : index
    %c0_289 = arith.constant 0 : index
    %349 = vector.load %arg9[%c167, %c0_289] : memref<336x16xbf16, #tpu.memory_space<vmem>>, vector<64x16xbf16>
    %c208_290 = arith.constant 208 : index
    %c0_291 = arith.constant 0 : index
    %350 = vector.load %arg3[%c208_290, %c0_291] : memref<400x32xbf16, #tpu.memory_space<vmem>>, vector<16x32xbf16>
    %cst_292 = arith.constant dense<0.000000e+00> : vector<64x32xf32>
    %351 = tpu.matmul %349, %350, %cst_292 {dimension_numbers = #tpu.dot_dimension_numbers<[1], [0], [0], [1], [0, 0, 1, 1], [], []>} : vector<64x16xbf16>, vector<16x32xbf16>, vector<64x32xf32> -> vector<64x32xf32>
    %352 = arith.addf %348, %351 : vector<64x32xf32>
    %c168 = arith.constant 168 : index
    %c0_293 = arith.constant 0 : index
    %353 = vector.load %arg9[%c168, %c0_293] : memref<336x16xbf16, #tpu.memory_space<vmem>>, vector<64x16xbf16>
    %c224_294 = arith.constant 224 : index
    %c0_295 = arith.constant 0 : index
    %354 = vector.load %arg3[%c224_294, %c0_295] : memref<400x32xbf16, #tpu.memory_space<vmem>>, vector<16x32xbf16>
    %cst_296 = arith.constant dense<0.000000e+00> : vector<64x32xf32>
    %355 = tpu.matmul %353, %354, %cst_296 {dimension_numbers = #tpu.dot_dimension_numbers<[1], [0], [0], [1], [0, 0, 1, 1], [], []>} : vector<64x16xbf16>, vector<16x32xbf16>, vector<64x32xf32> -> vector<64x32xf32>
    %356 = arith.addf %352, %355 : vector<64x32xf32>
    %c182 = arith.constant 182 : index
    %c0_297 = arith.constant 0 : index
    %357 = vector.load %arg9[%c182, %c0_297] : memref<336x16xbf16, #tpu.memory_space<vmem>>, vector<64x16xbf16>
    %c240_298 = arith.constant 240 : index
    %c0_299 = arith.constant 0 : index
    %358 = vector.load %arg3[%c240_298, %c0_299] : memref<400x32xbf16, #tpu.memory_space<vmem>>, vector<16x32xbf16>
    %cst_300 = arith.constant dense<0.000000e+00> : vector<64x32xf32>
    %359 = tpu.matmul %357, %358, %cst_300 {dimension_numbers = #tpu.dot_dimension_numbers<[1], [0], [0], [1], [0, 0, 1, 1], [], []>} : vector<64x16xbf16>, vector<16x32xbf16>, vector<64x32xf32> -> vector<64x32xf32>
    %360 = arith.addf %356, %359 : vector<64x32xf32>
    %c183 = arith.constant 183 : index
    %c0_301 = arith.constant 0 : index
    %361 = vector.load %arg9[%c183, %c0_301] : memref<336x16xbf16, #tpu.memory_space<vmem>>, vector<64x16xbf16>
    %c256_302 = arith.constant 256 : index
    %c0_303 = arith.constant 0 : index
    %362 = vector.load %arg3[%c256_302, %c0_303] : memref<400x32xbf16, #tpu.memory_space<vmem>>, vector<16x32xbf16>
    %cst_304 = arith.constant dense<0.000000e+00> : vector<64x32xf32>
    %363 = tpu.matmul %361, %362, %cst_304 {dimension_numbers = #tpu.dot_dimension_numbers<[1], [0], [0], [1], [0, 0, 1, 1], [], []>} : vector<64x16xbf16>, vector<16x32xbf16>, vector<64x32xf32> -> vector<64x32xf32>
    %364 = arith.addf %360, %363 : vector<64x32xf32>
    %c184 = arith.constant 184 : index
    %c0_305 = arith.constant 0 : index
    %365 = vector.load %arg9[%c184, %c0_305] : memref<336x16xbf16, #tpu.memory_space<vmem>>, vector<64x16xbf16>
    %c272_306 = arith.constant 272 : index
    %c0_307 = arith.constant 0 : index
    %366 = vector.load %arg3[%c272_306, %c0_307] : memref<400x32xbf16, #tpu.memory_space<vmem>>, vector<16x32xbf16>
    %cst_308 = arith.constant dense<0.000000e+00> : vector<64x32xf32>
    %367 = tpu.matmul %365, %366, %cst_308 {dimension_numbers = #tpu.dot_dimension_numbers<[1], [0], [0], [1], [0, 0, 1, 1], [], []>} : vector<64x16xbf16>, vector<16x32xbf16>, vector<64x32xf32> -> vector<64x32xf32>
    %368 = arith.addf %364, %367 : vector<64x32xf32>
    %c185 = arith.constant 185 : index
    %c0_309 = arith.constant 0 : index
    %369 = vector.load %arg9[%c185, %c0_309] : memref<336x16xbf16, #tpu.memory_space<vmem>>, vector<64x16xbf16>
    %c288_310 = arith.constant 288 : index
    %c0_311 = arith.constant 0 : index
    %370 = vector.load %arg3[%c288_310, %c0_311] : memref<400x32xbf16, #tpu.memory_space<vmem>>, vector<16x32xbf16>
    %cst_312 = arith.constant dense<0.000000e+00> : vector<64x32xf32>
    %371 = tpu.matmul %369, %370, %cst_312 {dimension_numbers = #tpu.dot_dimension_numbers<[1], [0], [0], [1], [0, 0, 1, 1], [], []>} : vector<64x16xbf16>, vector<16x32xbf16>, vector<64x32xf32> -> vector<64x32xf32>
    %372 = arith.addf %368, %371 : vector<64x32xf32>
    %c186 = arith.constant 186 : index
    %c0_313 = arith.constant 0 : index
    %373 = vector.load %arg9[%c186, %c0_313] : memref<336x16xbf16, #tpu.memory_space<vmem>>, vector<64x16xbf16>
    %c304_314 = arith.constant 304 : index
    %c0_315 = arith.constant 0 : index
    %374 = vector.load %arg3[%c304_314, %c0_315] : memref<400x32xbf16, #tpu.memory_space<vmem>>, vector<16x32xbf16>
    %cst_316 = arith.constant dense<0.000000e+00> : vector<64x32xf32>
    %375 = tpu.matmul %373, %374, %cst_316 {dimension_numbers = #tpu.dot_dimension_numbers<[1], [0], [0], [1], [0, 0, 1, 1], [], []>} : vector<64x16xbf16>, vector<16x32xbf16>, vector<64x32xf32> -> vector<64x32xf32>
    %376 = arith.addf %372, %375 : vector<64x32xf32>
    %c200 = arith.constant 200 : index
    %c0_317 = arith.constant 0 : index
    %377 = vector.load %arg9[%c200, %c0_317] : memref<336x16xbf16, #tpu.memory_space<vmem>>, vector<64x16xbf16>
    %c320_318 = arith.constant 320 : index
    %c0_319 = arith.constant 0 : index
    %378 = vector.load %arg3[%c320_318, %c0_319] : memref<400x32xbf16, #tpu.memory_space<vmem>>, vector<16x32xbf16>
    %cst_320 = arith.constant dense<0.000000e+00> : vector<64x32xf32>
    %379 = tpu.matmul %377, %378, %cst_320 {dimension_numbers = #tpu.dot_dimension_numbers<[1], [0], [0], [1], [0, 0, 1, 1], [], []>} : vector<64x16xbf16>, vector<16x32xbf16>, vector<64x32xf32> -> vector<64x32xf32>
    %380 = arith.addf %376, %379 : vector<64x32xf32>
    %c201 = arith.constant 201 : index
    %c0_321 = arith.constant 0 : index
    %381 = vector.load %arg9[%c201, %c0_321] : memref<336x16xbf16, #tpu.memory_space<vmem>>, vector<64x16xbf16>
    %c336_322 = arith.constant 336 : index
    %c0_323 = arith.constant 0 : index
    %382 = vector.load %arg3[%c336_322, %c0_323] : memref<400x32xbf16, #tpu.memory_space<vmem>>, vector<16x32xbf16>
    %cst_324 = arith.constant dense<0.000000e+00> : vector<64x32xf32>
    %383 = tpu.matmul %381, %382, %cst_324 {dimension_numbers = #tpu.dot_dimension_numbers<[1], [0], [0], [1], [0, 0, 1, 1], [], []>} : vector<64x16xbf16>, vector<16x32xbf16>, vector<64x32xf32> -> vector<64x32xf32>
    %384 = arith.addf %380, %383 : vector<64x32xf32>
    %c202 = arith.constant 202 : index
    %c0_325 = arith.constant 0 : index
    %385 = vector.load %arg9[%c202, %c0_325] : memref<336x16xbf16, #tpu.memory_space<vmem>>, vector<64x16xbf16>
    %c352_326 = arith.constant 352 : index
    %c0_327 = arith.constant 0 : index
    %386 = vector.load %arg3[%c352_326, %c0_327] : memref<400x32xbf16, #tpu.memory_space<vmem>>, vector<16x32xbf16>
    %cst_328 = arith.constant dense<0.000000e+00> : vector<64x32xf32>
    %387 = tpu.matmul %385, %386, %cst_328 {dimension_numbers = #tpu.dot_dimension_numbers<[1], [0], [0], [1], [0, 0, 1, 1], [], []>} : vector<64x16xbf16>, vector<16x32xbf16>, vector<64x32xf32> -> vector<64x32xf32>
    %388 = arith.addf %384, %387 : vector<64x32xf32>
    %c203 = arith.constant 203 : index
    %c0_329 = arith.constant 0 : index
    %389 = vector.load %arg9[%c203, %c0_329] : memref<336x16xbf16, #tpu.memory_space<vmem>>, vector<64x16xbf16>
    %c368_330 = arith.constant 368 : index
    %c0_331 = arith.constant 0 : index
    %390 = vector.load %arg3[%c368_330, %c0_331] : memref<400x32xbf16, #tpu.memory_space<vmem>>, vector<16x32xbf16>
    %cst_332 = arith.constant dense<0.000000e+00> : vector<64x32xf32>
    %391 = tpu.matmul %389, %390, %cst_332 {dimension_numbers = #tpu.dot_dimension_numbers<[1], [0], [0], [1], [0, 0, 1, 1], [], []>} : vector<64x16xbf16>, vector<16x32xbf16>, vector<64x32xf32> -> vector<64x32xf32>
    %392 = arith.addf %388, %391 : vector<64x32xf32>
    %c204 = arith.constant 204 : index
    %c0_333 = arith.constant 0 : index
    %393 = vector.load %arg9[%c204, %c0_333] : memref<336x16xbf16, #tpu.memory_space<vmem>>, vector<64x16xbf16>
    %c384_334 = arith.constant 384 : index
    %c0_335 = arith.constant 0 : index
    %394 = vector.load %arg3[%c384_334, %c0_335] : memref<400x32xbf16, #tpu.memory_space<vmem>>, vector<16x32xbf16>
    %cst_336 = arith.constant dense<0.000000e+00> : vector<64x32xf32>
    %395 = tpu.matmul %393, %394, %cst_336 {dimension_numbers = #tpu.dot_dimension_numbers<[1], [0], [0], [1], [0, 0, 1, 1], [], []>} : vector<64x16xbf16>, vector<16x32xbf16>, vector<64x32xf32> -> vector<64x32xf32>
    %396 = arith.addf %392, %395 : vector<64x32xf32>
    %c128_337 = arith.constant 128 : index
    %c0_338 = arith.constant 0 : index
    %397 = vector.load %arg10[%c128_337, %c0_338] : memref<248x32xf32, #tpu.memory_space<vmem>>, vector<64x32xf32>
    tpu.vector_store %arg10[%c128_337, %c0_338], %396 {strides = array<i32>} : memref<248x32xf32, #tpu.memory_space<vmem>>, vector<64x32xf32>,
    %c192_339 = arith.constant 192 : index
    %c0_340 = arith.constant 0 : index
    %398 = vector.load %arg9[%c192_339, %c0_340] : memref<336x16xbf16, #tpu.memory_space<vmem>>, vector<56x16xbf16>
    %c0_341 = arith.constant 0 : index
    %c0_342 = arith.constant 0 : index
    %399 = vector.load %arg3[%c0_341, %c0_342] : memref<400x32xbf16, #tpu.memory_space<vmem>>, vector<16x32xbf16>
    %cst_343 = arith.constant dense<0.000000e+00> : vector<56x32xf32>
    %400 = tpu.matmul %398, %399, %cst_343 {dimension_numbers = #tpu.dot_dimension_numbers<[1], [0], [0], [1], [0, 0, 1, 1], [], []>} : vector<56x16xbf16>, vector<16x32xbf16>, vector<56x32xf32> -> vector<56x32xf32>
    %c193 = arith.constant 193 : index
    %c0_344 = arith.constant 0 : index
    %401 = vector.load %arg9[%c193, %c0_344] : memref<336x16xbf16, #tpu.memory_space<vmem>>, vector<56x16xbf16>
    %c16_345 = arith.constant 16 : index
    %c0_346 = arith.constant 0 : index
    %402 = vector.load %arg3[%c16_345, %c0_346] : memref<400x32xbf16, #tpu.memory_space<vmem>>, vector<16x32xbf16>
    %cst_347 = arith.constant dense<0.000000e+00> : vector<56x32xf32>
    %403 = tpu.matmul %401, %402, %cst_347 {dimension_numbers = #tpu.dot_dimension_numbers<[1], [0], [0], [1], [0, 0, 1, 1], [], []>} : vector<56x16xbf16>, vector<16x32xbf16>, vector<56x32xf32> -> vector<56x32xf32>
    %404 = arith.addf %400, %403 : vector<56x32xf32>
    %c194 = arith.constant 194 : index
    %c0_348 = arith.constant 0 : index
    %405 = vector.load %arg9[%c194, %c0_348] : memref<336x16xbf16, #tpu.memory_space<vmem>>, vector<56x16xbf16>
    %c32_349 = arith.constant 32 : index
    %c0_350 = arith.constant 0 : index
    %406 = vector.load %arg3[%c32_349, %c0_350] : memref<400x32xbf16, #tpu.memory_space<vmem>>, vector<16x32xbf16>
    %cst_351 = arith.constant dense<0.000000e+00> : vector<56x32xf32>
    %407 = tpu.matmul %405, %406, %cst_351 {dimension_numbers = #tpu.dot_dimension_numbers<[1], [0], [0], [1], [0, 0, 1, 1], [], []>} : vector<56x16xbf16>, vector<16x32xbf16>, vector<56x32xf32> -> vector<56x32xf32>
    %408 = arith.addf %404, %407 : vector<56x32xf32>
    %c195 = arith.constant 195 : index
    %c0_352 = arith.constant 0 : index
    %409 = vector.load %arg9[%c195, %c0_352] : memref<336x16xbf16, #tpu.memory_space<vmem>>, vector<56x16xbf16>
    %c48_353 = arith.constant 48 : index
    %c0_354 = arith.constant 0 : index
    %410 = vector.load %arg3[%c48_353, %c0_354] : memref<400x32xbf16, #tpu.memory_space<vmem>>, vector<16x32xbf16>
    %cst_355 = arith.constant dense<0.000000e+00> : vector<56x32xf32>
    %411 = tpu.matmul %409, %410, %cst_355 {dimension_numbers = #tpu.dot_dimension_numbers<[1], [0], [0], [1], [0, 0, 1, 1], [], []>} : vector<56x16xbf16>, vector<16x32xbf16>, vector<56x32xf32> -> vector<56x32xf32>
    %412 = arith.addf %408, %411 : vector<56x32xf32>
    %c196 = arith.constant 196 : index
    %c0_356 = arith.constant 0 : index
    %413 = vector.load %arg9[%c196, %c0_356] : memref<336x16xbf16, #tpu.memory_space<vmem>>, vector<56x16xbf16>
    %c64_357 = arith.constant 64 : index
    %c0_358 = arith.constant 0 : index
    %414 = vector.load %arg3[%c64_357, %c0_358] : memref<400x32xbf16, #tpu.memory_space<vmem>>, vector<16x32xbf16>
    %cst_359 = arith.constant dense<0.000000e+00> : vector<56x32xf32>
    %415 = tpu.matmul %413, %414, %cst_359 {dimension_numbers = #tpu.dot_dimension_numbers<[1], [0], [0], [1], [0, 0, 1, 1], [], []>} : vector<56x16xbf16>, vector<16x32xbf16>, vector<56x32xf32> -> vector<56x32xf32>
    %416 = arith.addf %412, %415 : vector<56x32xf32>
    %c210 = arith.constant 210 : index
    %c0_360 = arith.constant 0 : index
    %417 = vector.load %arg9[%c210, %c0_360] : memref<336x16xbf16, #tpu.memory_space<vmem>>, vector<56x16xbf16>
    %c80_361 = arith.constant 80 : index
    %c0_362 = arith.constant 0 : index
    %418 = vector.load %arg3[%c80_361, %c0_362] : memref<400x32xbf16, #tpu.memory_space<vmem>>, vector<16x32xbf16>
    %cst_363 = arith.constant dense<0.000000e+00> : vector<56x32xf32>
    %419 = tpu.matmul %417, %418, %cst_363 {dimension_numbers = #tpu.dot_dimension_numbers<[1], [0], [0], [1], [0, 0, 1, 1], [], []>} : vector<56x16xbf16>, vector<16x32xbf16>, vector<56x32xf32> -> vector<56x32xf32>
    %420 = arith.addf %416, %419 : vector<56x32xf32>
    %c211 = arith.constant 211 : index
    %c0_364 = arith.constant 0 : index
    %421 = vector.load %arg9[%c211, %c0_364] : memref<336x16xbf16, #tpu.memory_space<vmem>>, vector<56x16xbf16>
    %c96_365 = arith.constant 96 : index
    %c0_366 = arith.constant 0 : index
    %422 = vector.load %arg3[%c96_365, %c0_366] : memref<400x32xbf16, #tpu.memory_space<vmem>>, vector<16x32xbf16>
    %cst_367 = arith.constant dense<0.000000e+00> : vector<56x32xf32>
    %423 = tpu.matmul %421, %422, %cst_367 {dimension_numbers = #tpu.dot_dimension_numbers<[1], [0], [0], [1], [0, 0, 1, 1], [], []>} : vector<56x16xbf16>, vector<16x32xbf16>, vector<56x32xf32> -> vector<56x32xf32>
    %424 = arith.addf %420, %423 : vector<56x32xf32>
    %c212 = arith.constant 212 : index
    %c0_368 = arith.constant 0 : index
    %425 = vector.load %arg9[%c212, %c0_368] : memref<336x16xbf16, #tpu.memory_space<vmem>>, vector<56x16xbf16>
    %c112_369 = arith.constant 112 : index
    %c0_370 = arith.constant 0 : index
    %426 = vector.load %arg3[%c112_369, %c0_370] : memref<400x32xbf16, #tpu.memory_space<vmem>>, vector<16x32xbf16>
    %cst_371 = arith.constant dense<0.000000e+00> : vector<56x32xf32>
    %427 = tpu.matmul %425, %426, %cst_371 {dimension_numbers = #tpu.dot_dimension_numbers<[1], [0], [0], [1], [0, 0, 1, 1], [], []>} : vector<56x16xbf16>, vector<16x32xbf16>, vector<56x32xf32> -> vector<56x32xf32>
    %428 = arith.addf %424, %427 : vector<56x32xf32>
    %c213 = arith.constant 213 : index
    %c0_372 = arith.constant 0 : index
    %429 = vector.load %arg9[%c213, %c0_372] : memref<336x16xbf16, #tpu.memory_space<vmem>>, vector<56x16xbf16>
    %c128_373 = arith.constant 128 : index
    %c0_374 = arith.constant 0 : index
    %430 = vector.load %arg3[%c128_373, %c0_374] : memref<400x32xbf16, #tpu.memory_space<vmem>>, vector<16x32xbf16>
    %cst_375 = arith.constant dense<0.000000e+00> : vector<56x32xf32>
    %431 = tpu.matmul %429, %430, %cst_375 {dimension_numbers = #tpu.dot_dimension_numbers<[1], [0], [0], [1], [0, 0, 1, 1], [], []>} : vector<56x16xbf16>, vector<16x32xbf16>, vector<56x32xf32> -> vector<56x32xf32>
    %432 = arith.addf %428, %431 : vector<56x32xf32>
    %c214 = arith.constant 214 : index
    %c0_376 = arith.constant 0 : index
    %433 = vector.load %arg9[%c214, %c0_376] : memref<336x16xbf16, #tpu.memory_space<vmem>>, vector<56x16xbf16>
    %c144_377 = arith.constant 144 : index
    %c0_378 = arith.constant 0 : index
    %434 = vector.load %arg3[%c144_377, %c0_378] : memref<400x32xbf16, #tpu.memory_space<vmem>>, vector<16x32xbf16>
    %cst_379 = arith.constant dense<0.000000e+00> : vector<56x32xf32>
    %435 = tpu.matmul %433, %434, %cst_379 {dimension_numbers = #tpu.dot_dimension_numbers<[1], [0], [0], [1], [0, 0, 1, 1], [], []>} : vector<56x16xbf16>, vector<16x32xbf16>, vector<56x32xf32> -> vector<56x32xf32>
    %436 = arith.addf %432, %435 : vector<56x32xf32>
    %c228 = arith.constant 228 : index
    %c0_380 = arith.constant 0 : index
    %437 = vector.load %arg9[%c228, %c0_380] : memref<336x16xbf16, #tpu.memory_space<vmem>>, vector<56x16xbf16>
    %c160_381 = arith.constant 160 : index
    %c0_382 = arith.constant 0 : index
    %438 = vector.load %arg3[%c160_381, %c0_382] : memref<400x32xbf16, #tpu.memory_space<vmem>>, vector<16x32xbf16>
    %cst_383 = arith.constant dense<0.000000e+00> : vector<56x32xf32>
    %439 = tpu.matmul %437, %438, %cst_383 {dimension_numbers = #tpu.dot_dimension_numbers<[1], [0], [0], [1], [0, 0, 1, 1], [], []>} : vector<56x16xbf16>, vector<16x32xbf16>, vector<56x32xf32> -> vector<56x32xf32>
    %440 = arith.addf %436, %439 : vector<56x32xf32>
    %c229 = arith.constant 229 : index
    %c0_384 = arith.constant 0 : index
    %441 = vector.load %arg9[%c229, %c0_384] : memref<336x16xbf16, #tpu.memory_space<vmem>>, vector<56x16xbf16>
    %c176_385 = arith.constant 176 : index
    %c0_386 = arith.constant 0 : index
    %442 = vector.load %arg3[%c176_385, %c0_386] : memref<400x32xbf16, #tpu.memory_space<vmem>>, vector<16x32xbf16>
    %cst_387 = arith.constant dense<0.000000e+00> : vector<56x32xf32>
    %443 = tpu.matmul %441, %442, %cst_387 {dimension_numbers = #tpu.dot_dimension_numbers<[1], [0], [0], [1], [0, 0, 1, 1], [], []>} : vector<56x16xbf16>, vector<16x32xbf16>, vector<56x32xf32> -> vector<56x32xf32>
    %444 = arith.addf %440, %443 : vector<56x32xf32>
    %c230 = arith.constant 230 : index
    %c0_388 = arith.constant 0 : index
    %445 = vector.load %arg9[%c230, %c0_388] : memref<336x16xbf16, #tpu.memory_space<vmem>>, vector<56x16xbf16>
    %c192_389 = arith.constant 192 : index
    %c0_390 = arith.constant 0 : index
    %446 = vector.load %arg3[%c192_389, %c0_390] : memref<400x32xbf16, #tpu.memory_space<vmem>>, vector<16x32xbf16>
    %cst_391 = arith.constant dense<0.000000e+00> : vector<56x32xf32>
    %447 = tpu.matmul %445, %446, %cst_391 {dimension_numbers = #tpu.dot_dimension_numbers<[1], [0], [0], [1], [0, 0, 1, 1], [], []>} : vector<56x16xbf16>, vector<16x32xbf16>, vector<56x32xf32> -> vector<56x32xf32>
    %448 = arith.addf %444, %447 : vector<56x32xf32>
    %c231 = arith.constant 231 : index
    %c0_392 = arith.constant 0 : index
    %449 = vector.load %arg9[%c231, %c0_392] : memref<336x16xbf16, #tpu.memory_space<vmem>>, vector<56x16xbf16>
    %c208_393 = arith.constant 208 : index
    %c0_394 = arith.constant 0 : index
    %450 = vector.load %arg3[%c208_393, %c0_394] : memref<400x32xbf16, #tpu.memory_space<vmem>>, vector<16x32xbf16>
    %cst_395 = arith.constant dense<0.000000e+00> : vector<56x32xf32>
    %451 = tpu.matmul %449, %450, %cst_395 {dimension_numbers = #tpu.dot_dimension_numbers<[1], [0], [0], [1], [0, 0, 1, 1], [], []>} : vector<56x16xbf16>, vector<16x32xbf16>, vector<56x32xf32> -> vector<56x32xf32>
    %452 = arith.addf %448, %451 : vector<56x32xf32>
    %c232 = arith.constant 232 : index
    %c0_396 = arith.constant 0 : index
    %453 = vector.load %arg9[%c232, %c0_396] : memref<336x16xbf16, #tpu.memory_space<vmem>>, vector<56x16xbf16>
    %c224_397 = arith.constant 224 : index
    %c0_398 = arith.constant 0 : index
    %454 = vector.load %arg3[%c224_397, %c0_398] : memref<400x32xbf16, #tpu.memory_space<vmem>>, vector<16x32xbf16>
    %cst_399 = arith.constant dense<0.000000e+00> : vector<56x32xf32>
    %455 = tpu.matmul %453, %454, %cst_399 {dimension_numbers = #tpu.dot_dimension_numbers<[1], [0], [0], [1], [0, 0, 1, 1], [], []>} : vector<56x16xbf16>, vector<16x32xbf16>, vector<56x32xf32> -> vector<56x32xf32>
    %456 = arith.addf %452, %455 : vector<56x32xf32>
    %c246 = arith.constant 246 : index
    %c0_400 = arith.constant 0 : index
    %457 = vector.load %arg9[%c246, %c0_400] : memref<336x16xbf16, #tpu.memory_space<vmem>>, vector<56x16xbf16>
    %c240_401 = arith.constant 240 : index
    %c0_402 = arith.constant 0 : index
    %458 = vector.load %arg3[%c240_401, %c0_402] : memref<400x32xbf16, #tpu.memory_space<vmem>>, vector<16x32xbf16>
    %cst_403 = arith.constant dense<0.000000e+00> : vector<56x32xf32>
    %459 = tpu.matmul %457, %458, %cst_403 {dimension_numbers = #tpu.dot_dimension_numbers<[1], [0], [0], [1], [0, 0, 1, 1], [], []>} : vector<56x16xbf16>, vector<16x32xbf16>, vector<56x32xf32> -> vector<56x32xf32>
    %460 = arith.addf %456, %459 : vector<56x32xf32>
    %c247 = arith.constant 247 : index
    %c0_404 = arith.constant 0 : index
    %461 = vector.load %arg9[%c247, %c0_404] : memref<336x16xbf16, #tpu.memory_space<vmem>>, vector<56x16xbf16>
    %c256_405 = arith.constant 256 : index
    %c0_406 = arith.constant 0 : index
    %462 = vector.load %arg3[%c256_405, %c0_406] : memref<400x32xbf16, #tpu.memory_space<vmem>>, vector<16x32xbf16>
    %cst_407 = arith.constant dense<0.000000e+00> : vector<56x32xf32>
    %463 = tpu.matmul %461, %462, %cst_407 {dimension_numbers = #tpu.dot_dimension_numbers<[1], [0], [0], [1], [0, 0, 1, 1], [], []>} : vector<56x16xbf16>, vector<16x32xbf16>, vector<56x32xf32> -> vector<56x32xf32>
    %464 = arith.addf %460, %463 : vector<56x32xf32>
    %c248 = arith.constant 248 : index
    %c0_408 = arith.constant 0 : index
    %465 = vector.load %arg9[%c248, %c0_408] : memref<336x16xbf16, #tpu.memory_space<vmem>>, vector<56x16xbf16>
    %c272_409 = arith.constant 272 : index
    %c0_410 = arith.constant 0 : index
    %466 = vector.load %arg3[%c272_409, %c0_410] : memref<400x32xbf16, #tpu.memory_space<vmem>>, vector<16x32xbf16>
    %cst_411 = arith.constant dense<0.000000e+00> : vector<56x32xf32>
    %467 = tpu.matmul %465, %466, %cst_411 {dimension_numbers = #tpu.dot_dimension_numbers<[1], [0], [0], [1], [0, 0, 1, 1], [], []>} : vector<56x16xbf16>, vector<16x32xbf16>, vector<56x32xf32> -> vector<56x32xf32>
    %468 = arith.addf %464, %467 : vector<56x32xf32>
    %c249 = arith.constant 249 : index
    %c0_412 = arith.constant 0 : index
    %469 = vector.load %arg9[%c249, %c0_412] : memref<336x16xbf16, #tpu.memory_space<vmem>>, vector<56x16xbf16>
    %c288_413 = arith.constant 288 : index
    %c0_414 = arith.constant 0 : index
    %470 = vector.load %arg3[%c288_413, %c0_414] : memref<400x32xbf16, #tpu.memory_space<vmem>>, vector<16x32xbf16>
    %cst_415 = arith.constant dense<0.000000e+00> : vector<56x32xf32>
    %471 = tpu.matmul %469, %470, %cst_415 {dimension_numbers = #tpu.dot_dimension_numbers<[1], [0], [0], [1], [0, 0, 1, 1], [], []>} : vector<56x16xbf16>, vector<16x32xbf16>, vector<56x32xf32> -> vector<56x32xf32>
    %472 = arith.addf %468, %471 : vector<56x32xf32>
    %c250 = arith.constant 250 : index
    %c0_416 = arith.constant 0 : index
    %473 = vector.load %arg9[%c250, %c0_416] : memref<336x16xbf16, #tpu.memory_space<vmem>>, vector<56x16xbf16>
    %c304_417 = arith.constant 304 : index
    %c0_418 = arith.constant 0 : index
    %474 = vector.load %arg3[%c304_417, %c0_418] : memref<400x32xbf16, #tpu.memory_space<vmem>>, vector<16x32xbf16>
    %cst_419 = arith.constant dense<0.000000e+00> : vector<56x32xf32>
    %475 = tpu.matmul %473, %474, %cst_419 {dimension_numbers = #tpu.dot_dimension_numbers<[1], [0], [0], [1], [0, 0, 1, 1], [], []>} : vector<56x16xbf16>, vector<16x32xbf16>, vector<56x32xf32> -> vector<56x32xf32>
    %476 = arith.addf %472, %475 : vector<56x32xf32>
    %c264 = arith.constant 264 : index
    %c0_420 = arith.constant 0 : index
    %477 = vector.load %arg9[%c264, %c0_420] : memref<336x16xbf16, #tpu.memory_space<vmem>>, vector<56x16xbf16>
    %c320_421 = arith.constant 320 : index
    %c0_422 = arith.constant 0 : index
    %478 = vector.load %arg3[%c320_421, %c0_422] : memref<400x32xbf16, #tpu.memory_space<vmem>>, vector<16x32xbf16>
    %cst_423 = arith.constant dense<0.000000e+00> : vector<56x32xf32>
    %479 = tpu.matmul %477, %478, %cst_423 {dimension_numbers = #tpu.dot_dimension_numbers<[1], [0], [0], [1], [0, 0, 1, 1], [], []>} : vector<56x16xbf16>, vector<16x32xbf16>, vector<56x32xf32> -> vector<56x32xf32>
    %480 = arith.addf %476, %479 : vector<56x32xf32>
    %c265 = arith.constant 265 : index
    %c0_424 = arith.constant 0 : index
    %481 = vector.load %arg9[%c265, %c0_424] : memref<336x16xbf16, #tpu.memory_space<vmem>>, vector<56x16xbf16>
    %c336_425 = arith.constant 336 : index
    %c0_426 = arith.constant 0 : index
    %482 = vector.load %arg3[%c336_425, %c0_426] : memref<400x32xbf16, #tpu.memory_space<vmem>>, vector<16x32xbf16>
    %cst_427 = arith.constant dense<0.000000e+00> : vector<56x32xf32>
    %483 = tpu.matmul %481, %482, %cst_427 {dimension_numbers = #tpu.dot_dimension_numbers<[1], [0], [0], [1], [0, 0, 1, 1], [], []>} : vector<56x16xbf16>, vector<16x32xbf16>, vector<56x32xf32> -> vector<56x32xf32>
    %484 = arith.addf %480, %483 : vector<56x32xf32>
    %c266 = arith.constant 266 : index
    %c0_428 = arith.constant 0 : index
    %485 = vector.load %arg9[%c266, %c0_428] : memref<336x16xbf16, #tpu.memory_space<vmem>>, vector<56x16xbf16>
    %c352_429 = arith.constant 352 : index
    %c0_430 = arith.constant 0 : index
    %486 = vector.load %arg3[%c352_429, %c0_430] : memref<400x32xbf16, #tpu.memory_space<vmem>>, vector<16x32xbf16>
    %cst_431 = arith.constant dense<0.000000e+00> : vector<56x32xf32>
    %487 = tpu.matmul %485, %486, %cst_431 {dimension_numbers = #tpu.dot_dimension_numbers<[1], [0], [0], [1], [0, 0, 1, 1], [], []>} : vector<56x16xbf16>, vector<16x32xbf16>, vector<56x32xf32> -> vector<56x32xf32>
    %488 = arith.addf %484, %487 : vector<56x32xf32>
    %c267 = arith.constant 267 : index
    %c0_432 = arith.constant 0 : index
    %489 = vector.load %arg9[%c267, %c0_432] : memref<336x16xbf16, #tpu.memory_space<vmem>>, vector<56x16xbf16>
    %c368_433 = arith.constant 368 : index
    %c0_434 = arith.constant 0 : index
    %490 = vector.load %arg3[%c368_433, %c0_434] : memref<400x32xbf16, #tpu.memory_space<vmem>>, vector<16x32xbf16>
    %cst_435 = arith.constant dense<0.000000e+00> : vector<56x32xf32>
    %491 = tpu.matmul %489, %490, %cst_435 {dimension_numbers = #tpu.dot_dimension_numbers<[1], [0], [0], [1], [0, 0, 1, 1], [], []>} : vector<56x16xbf16>, vector<16x32xbf16>, vector<56x32xf32> -> vector<56x32xf32>
    %492 = arith.addf %488, %491 : vector<56x32xf32>
    %c268 = arith.constant 268 : index
    %c0_436 = arith.constant 0 : index
    %493 = vector.load %arg9[%c268, %c0_436] : memref<336x16xbf16, #tpu.memory_space<vmem>>, vector<56x16xbf16>
    %c384_437 = arith.constant 384 : index
    %c0_438 = arith.constant 0 : index
    %494 = vector.load %arg3[%c384_437, %c0_438] : memref<400x32xbf16, #tpu.memory_space<vmem>>, vector<16x32xbf16>
    %cst_439 = arith.constant dense<0.000000e+00> : vector<56x32xf32>
    %495 = tpu.matmul %493, %494, %cst_439 {dimension_numbers = #tpu.dot_dimension_numbers<[1], [0], [0], [1], [0, 0, 1, 1], [], []>} : vector<56x16xbf16>, vector<16x32xbf16>, vector<56x32xf32> -> vector<56x32xf32>
    %496 = arith.addf %492, %495 : vector<56x32xf32>
    %c192_440 = arith.constant 192 : index
    %c0_441 = arith.constant 0 : index
    %497 = vector.load %arg10[%c192_440, %c0_441] : memref<248x32xf32, #tpu.memory_space<vmem>>, vector<56x32xf32>
    tpu.vector_store %arg10[%c192_440, %c0_441], %496 {strides = array<i32>} : memref<248x32xf32, #tpu.memory_space<vmem>>, vector<56x32xf32>,
    %c0_442 = arith.constant 0 : index
    %c0_443 = arith.constant 0 : index
    %498 = tpu.strided_load %arg10[%c0_442, %c0_443] {strides = array<i32: 2, 1>} : memref<248x32xf32, #tpu.memory_space<vmem>>, vector<7x32xf32>
    %c1_444 = arith.constant 1 : index
    %c0_445 = arith.constant 0 : index
    %499 = tpu.strided_load %arg10[%c1_444, %c0_445] {strides = array<i32: 2, 1>} : memref<248x32xf32, #tpu.memory_space<vmem>>, vector<7x32xf32>
    %500 = arith.maximumf %498, %499 : vector<7x32xf32>
    %c18_446 = arith.constant 18 : index
    %c0_447 = arith.constant 0 : index
    %501 = tpu.strided_load %arg10[%c18_446, %c0_447] {strides = array<i32: 2, 1>} : memref<248x32xf32, #tpu.memory_space<vmem>>, vector<7x32xf32>
    %c19_448 = arith.constant 19 : index
    %c0_449 = arith.constant 0 : index
    %502 = tpu.strided_load %arg10[%c19_448, %c0_449] {strides = array<i32: 2, 1>} : memref<248x32xf32, #tpu.memory_space<vmem>>, vector<7x32xf32>
    %503 = arith.maximumf %501, %502 : vector<7x32xf32>
    %504 = arith.maximumf %500, %503 : vector<7x32xf32>
    %c36_450 = arith.constant 36 : index
    %c0_451 = arith.constant 0 : index
    %505 = tpu.strided_load %arg10[%c36_450, %c0_451] {strides = array<i32: 2, 1>} : memref<248x32xf32, #tpu.memory_space<vmem>>, vector<7x32xf32>
    %c37_452 = arith.constant 37 : index
    %c0_453 = arith.constant 0 : index
    %506 = tpu.strided_load %arg10[%c37_452, %c0_453] {strides = array<i32: 2, 1>} : memref<248x32xf32, #tpu.memory_space<vmem>>, vector<7x32xf32>
    %507 = arith.maximumf %505, %506 : vector<7x32xf32>
    %c54_454 = arith.constant 54 : index
    %c0_455 = arith.constant 0 : index
    %508 = tpu.strided_load %arg10[%c54_454, %c0_455] {strides = array<i32: 2, 1>} : memref<248x32xf32, #tpu.memory_space<vmem>>, vector<7x32xf32>
    %c55_456 = arith.constant 55 : index
    %c0_457 = arith.constant 0 : index
    %509 = tpu.strided_load %arg10[%c55_456, %c0_457] {strides = array<i32: 2, 1>} : memref<248x32xf32, #tpu.memory_space<vmem>>, vector<7x32xf32>
    %510 = arith.maximumf %508, %509 : vector<7x32xf32>
    %511 = arith.maximumf %507, %510 : vector<7x32xf32>
    %c72_458 = arith.constant 72 : index
    %c0_459 = arith.constant 0 : index
    %512 = tpu.strided_load %arg10[%c72_458, %c0_459] {strides = array<i32: 2, 1>} : memref<248x32xf32, #tpu.memory_space<vmem>>, vector<7x32xf32>
    %c73_460 = arith.constant 73 : index
    %c0_461 = arith.constant 0 : index
    %513 = tpu.strided_load %arg10[%c73_460, %c0_461] {strides = array<i32: 2, 1>} : memref<248x32xf32, #tpu.memory_space<vmem>>, vector<7x32xf32>
    %514 = arith.maximumf %512, %513 : vector<7x32xf32>
    %c90 = arith.constant 90 : index
    %c0_462 = arith.constant 0 : index
    %515 = tpu.strided_load %arg10[%c90, %c0_462] {strides = array<i32: 2, 1>} : memref<248x32xf32, #tpu.memory_space<vmem>>, vector<7x32xf32>
    %c91 = arith.constant 91 : index
    %c0_463 = arith.constant 0 : index
    %516 = tpu.strided_load %arg10[%c91, %c0_463] {strides = array<i32: 2, 1>} : memref<248x32xf32, #tpu.memory_space<vmem>>, vector<7x32xf32>
    %517 = arith.maximumf %515, %516 : vector<7x32xf32>
    %518 = arith.maximumf %514, %517 : vector<7x32xf32>
    %c108 = arith.constant 108 : index
    %c0_464 = arith.constant 0 : index
    %519 = tpu.strided_load %arg10[%c108, %c0_464] {strides = array<i32: 2, 1>} : memref<248x32xf32, #tpu.memory_space<vmem>>, vector<7x32xf32>
    %c109 = arith.constant 109 : index
    %c0_465 = arith.constant 0 : index
    %520 = tpu.strided_load %arg10[%c109, %c0_465] {strides = array<i32: 2, 1>} : memref<248x32xf32, #tpu.memory_space<vmem>>, vector<7x32xf32>
    %521 = arith.maximumf %519, %520 : vector<7x32xf32>
    %c126 = arith.constant 126 : index
    %c0_466 = arith.constant 0 : index
    %522 = tpu.strided_load %arg10[%c126, %c0_466] {strides = array<i32: 2, 1>} : memref<248x32xf32, #tpu.memory_space<vmem>>, vector<7x32xf32>
    %c127 = arith.constant 127 : index
    %c0_467 = arith.constant 0 : index
    %523 = tpu.strided_load %arg10[%c127, %c0_467] {strides = array<i32: 2, 1>} : memref<248x32xf32, #tpu.memory_space<vmem>>, vector<7x32xf32>
    %524 = arith.maximumf %522, %523 : vector<7x32xf32>
    %525 = arith.maximumf %521, %524 : vector<7x32xf32>
    %c144_468 = arith.constant 144 : index
    %c0_469 = arith.constant 0 : index
    %526 = tpu.strided_load %arg10[%c144_468, %c0_469] {strides = array<i32: 2, 1>} : memref<248x32xf32, #tpu.memory_space<vmem>>, vector<7x32xf32>
    %c145 = arith.constant 145 : index
    %c0_470 = arith.constant 0 : index
    %527 = tpu.strided_load %arg10[%c145, %c0_470] {strides = array<i32: 2, 1>} : memref<248x32xf32, #tpu.memory_space<vmem>>, vector<7x32xf32>
    %528 = arith.maximumf %526, %527 : vector<7x32xf32>
    %c162 = arith.constant 162 : index
    %c0_471 = arith.constant 0 : index
    %529 = tpu.strided_load %arg10[%c162, %c0_471] {strides = array<i32: 2, 1>} : memref<248x32xf32, #tpu.memory_space<vmem>>, vector<7x32xf32>
    %c163 = arith.constant 163 : index
    %c0_472 = arith.constant 0 : index
    %530 = tpu.strided_load %arg10[%c163, %c0_472] {strides = array<i32: 2, 1>} : memref<248x32xf32, #tpu.memory_space<vmem>>, vector<7x32xf32>
    %531 = arith.maximumf %529, %530 : vector<7x32xf32>
    %532 = arith.maximumf %528, %531 : vector<7x32xf32>
    %c180 = arith.constant 180 : index
    %c0_473 = arith.constant 0 : index
    %533 = tpu.strided_load %arg10[%c180, %c0_473] {strides = array<i32: 2, 1>} : memref<248x32xf32, #tpu.memory_space<vmem>>, vector<7x32xf32>
    %c181 = arith.constant 181 : index
    %c0_474 = arith.constant 0 : index
    %534 = tpu.strided_load %arg10[%c181, %c0_474] {strides = array<i32: 2, 1>} : memref<248x32xf32, #tpu.memory_space<vmem>>, vector<7x32xf32>
    %535 = arith.maximumf %533, %534 : vector<7x32xf32>
    %c198 = arith.constant 198 : index
    %c0_475 = arith.constant 0 : index
    %536 = tpu.strided_load %arg10[%c198, %c0_475] {strides = array<i32: 2, 1>} : memref<248x32xf32, #tpu.memory_space<vmem>>, vector<7x32xf32>
    %c199 = arith.constant 199 : index
    %c0_476 = arith.constant 0 : index
    %537 = tpu.strided_load %arg10[%c199, %c0_476] {strides = array<i32: 2, 1>} : memref<248x32xf32, #tpu.memory_space<vmem>>, vector<7x32xf32>
    %538 = arith.maximumf %536, %537 : vector<7x32xf32>
    %539 = arith.maximumf %535, %538 : vector<7x32xf32>
    %c216 = arith.constant 216 : index
    %c0_477 = arith.constant 0 : index
    %540 = tpu.strided_load %arg10[%c216, %c0_477] {strides = array<i32: 2, 1>} : memref<248x32xf32, #tpu.memory_space<vmem>>, vector<7x32xf32>
    %c217 = arith.constant 217 : index
    %c0_478 = arith.constant 0 : index
    %541 = tpu.strided_load %arg10[%c217, %c0_478] {strides = array<i32: 2, 1>} : memref<248x32xf32, #tpu.memory_space<vmem>>, vector<7x32xf32>
    %542 = arith.maximumf %540, %541 : vector<7x32xf32>
    %c234 = arith.constant 234 : index
    %c0_479 = arith.constant 0 : index
    %543 = tpu.strided_load %arg10[%c234, %c0_479] {strides = array<i32: 2, 1>} : memref<248x32xf32, #tpu.memory_space<vmem>>, vector<7x32xf32>
    %c235 = arith.constant 235 : index
    %c0_480 = arith.constant 0 : index
    %544 = tpu.strided_load %arg10[%c235, %c0_480] {strides = array<i32: 2, 1>} : memref<248x32xf32, #tpu.memory_space<vmem>>, vector<7x32xf32>
    %545 = arith.maximumf %543, %544 : vector<7x32xf32>
    %546 = arith.maximumf %542, %545 : vector<7x32xf32>
    %547 = tpu.concatenate %504, %511, %518, %525, %532, %539, %546 in 0 : vector<7x32xf32>, vector<7x32xf32>, vector<7x32xf32>, vector<7x32xf32>, vector<7x32xf32>, vector<7x32xf32>, vector<7x32xf32> -> vector<49x32xf32>
    %c0_481 = arith.constant 0 : index
    %c0_482 = arith.constant 0 : index
    %548 = vector.load %arg4[%c0_481, %c0_482] : memref<1x32xf32, #tpu.memory_space<vmem>>, vector<1x32xf32>
    %549 = vector.broadcast %548 : vector<1x32xf32> to vector<49x32xf32>
    %550 = arith.addf %547, %549 : vector<49x32xf32>
    %cst_483 = arith.constant 0.000000e+00 : f32
    %551 = vector.broadcast %cst_483 : f32 to vector<49x32xf32>
    %552 = arith.maximumf %550, %551 : vector<49x32xf32>
    %553 = arith.truncf %552 : vector<49x32xf32> to vector<49x32xbf16>
    %c0_484 = arith.constant 0 : index
    %c0_485 = arith.constant 0 : index
    %554 = vector.load %arg5[%c0_484, %c0_485] : memref<32x490xbf16, #tpu.memory_space<vmem>>, vector<32x490xbf16>
    %cst_486 = arith.constant dense<0.000000e+00> : vector<49x490xf32>
    %555 = tpu.matmul %553, %554, %cst_486 {dimension_numbers = #tpu.dot_dimension_numbers<[1], [0], [0], [1], [0, 0, 1, 1], [], []>} : vector<49x32xbf16>, vector<32x490xbf16>, vector<49x490xf32> -> vector<49x490xf32>
    %556 = tpu.iota {dimensions = array<i32: 0>} : vector<49x490xi32>
    %c10_i32 = arith.constant 10 : i32
    %557 = vector.broadcast %c10_i32 : i32 to vector<49x490xi32>
    %558 = arith.muli %556, %557 : vector<49x490xi32>
    %559 = tpu.iota {dimensions = array<i32: 1>} : vector<49x490xi32>
    %560 = arith.cmpi sge, %559, %558 : vector<49x490xi32>
    %c10_i32_487 = arith.constant 10 : i32
    %561 = vector.broadcast %c10_i32_487 : i32 to vector<49x490xi32>
    %562 = arith.addi %558, %561 : vector<49x490xi32>
    %563 = arith.cmpi slt, %559, %562 : vector<49x490xi32>
    %564 = arith.andi %560, %563 : vector<49x490xi1>
    %cst_488 = arith.constant 0.000000e+00 : f32
    %565 = vector.broadcast %cst_488 : f32 to vector<49x490xf32>
    %566 = arith.select %564, %555, %565 : vector<49x490xi1>, vector<49x490xf32>
    %cst_489 = arith.constant dense<0.000000e+00> : vector<490xf32>
    %567 = vector.multi_reduction <add>, %566, %cst_489 [0] : vector<49x490xf32> to vector<490xf32>
    %568 = vector.shape_cast %567 : vector<490xf32> to vector<1x490xf32>
    %c0_490 = arith.constant 0 : index
    %c0_491 = arith.constant 0 : index
    %569 = vector.load %arg6[%c0_490, %c0_491] : memref<490x10xf32, #tpu.memory_space<vmem>>, vector<490x10xf32>
    %cst_492 = arith.constant dense<0.000000e+00> : vector<1x10xf32>
    %570 = tpu.matmul %568, %569, %cst_492 {dimension_numbers = #tpu.dot_dimension_numbers<[1], [0], [0], [1], [0, 0, 1, 1], [], []>} : vector<1x490xf32>, vector<490x10xf32>, vector<1x10xf32> -> vector<1x10xf32>
    %c0_493 = arith.constant 0 : index
    %c0_494 = arith.constant 0 : index
    %571 = vector.load %arg7[%c0_493, %c0_494] : memref<1x10xf32, #tpu.memory_space<vmem>>, vector<1x10xf32>
    %572 = arith.addf %570, %571 : vector<1x10xf32>
    %573 = vector.shape_cast %572 : vector<1x10xf32> to vector<1x10xf32>
    %574 = vector.broadcast %573 : vector<1x10xf32> to vector<8x10xf32>
    %c0_495 = arith.constant 0 : index
    %c0_496 = arith.constant 0 : index
    %575 = vector.load %arg8[%c0_495, %c0_496] : memref<8x10xf32, #tpu.memory_space<vmem>>, vector<8x10xf32>
    tpu.vector_store %arg8[%c0_495, %c0_496], %574 {strides = array<i32>} : memref<8x10xf32, #tpu.memory_space<vmem>>, vector<8x10xf32>,
    return
  }
  func.func @transform_0(%arg0: i32) -> (i32, i32) {
    %c0_i32 = arith.constant 0 : i32
    %c0_i32_0 = arith.constant 0 : i32
    return %arg0, %c0_i32 : i32, i32
  }
  func.func @transform_1(%arg0: i32) -> (i32, i32) {
    %c0_i32 = arith.constant 0 : i32
    %c0_i32_0 = arith.constant 0 : i32
    %c0_i32_1 = arith.constant 0 : i32
    return %c0_i32, %c0_i32_0 : i32, i32
  }
  func.func @transform_2(%arg0: i32) -> (i32, i32) {
    %c0_i32 = arith.constant 0 : i32
    %c0_i32_0 = arith.constant 0 : i32
    %c0_i32_1 = arith.constant 0 : i32
    return %c0_i32, %c0_i32_0 : i32, i32
  }
  func.func @transform_3(%arg0: i32) -> (i32, i32) {
    %c0_i32 = arith.constant 0 : i32
    %c0_i32_0 = arith.constant 0 : i32
    %c0_i32_1 = arith.constant 0 : i32
    return %c0_i32, %c0_i32_0 : i32, i32
  }
  func.func @transform_4(%arg0: i32) -> (i32, i32) {
    %c0_i32 = arith.constant 0 : i32
    %c0_i32_0 = arith.constant 0 : i32
    %c0_i32_1 = arith.constant 0 : i32
    return %c0_i32, %c0_i32_0 : i32, i32
  }
  func.func @transform_5(%arg0: i32) -> (i32, i32) {
    %c0_i32 = arith.constant 0 : i32
    %c0_i32_0 = arith.constant 0 : i32
    %c0_i32_1 = arith.constant 0 : i32
    return %c0_i32, %c0_i32_0 : i32, i32
  }
  func.func @transform_6(%arg0: i32) -> (i32, i32) {
    %c0_i32 = arith.constant 0 : i32
    %c0_i32_0 = arith.constant 0 : i32
    %c0_i32_1 = arith.constant 0 : i32
    return %c0_i32, %c0_i32_0 : i32, i32
  }
  func.func @transform_7(%arg0: i32) -> (i32, i32) {
    %c0_i32 = arith.constant 0 : i32
    %c0_i32_0 = arith.constant 0 : i32
    return %arg0, %c0_i32 : i32, i32
  }
}

</mosaic_0001>

<bundles_post_ra>
// kernel: cnn_forward.1
= control target key start
LH: loop header
LB: loop body
LE: loop exit
PB: predicated region body
PF: predicated region fallthrough
CT: control target
= control target key end

     0   :  { %s17753_s24 = smov 0   ;;  %s21721_s0 = inlined_call_operand.vmem [shape: bf16[672,104], index: 0, kind: input, shape index: {}]   ;;  %s21722_s1 = inlined_call_operand.vmem [shape: bf16[104,64], index: 1, kind: input, shape index: {}]   ;;  %s21723_s2 = inlined_call_operand.vmem [shape: bf16[400,32], index: 2, kind: input, shape index: {}]   ;;  %s21724_s3 = inlined_call_operand.vmem [shape: f32[1,32], index: 3, kind: input, shape index: {}]   ;;  %s21725_s4 = inlined_call_operand.vmem [shape: bf16[32,490], index: 4, kind: input, shape index: {}]   ;;  %s21726_s5 = inlined_call_operand.vmem [shape: f32[490,10], index: 5, kind: input, shape index: {}]   ;;  %s21727_s6 = inlined_call_operand.vmem [shape: f32[1,10], index: 6, kind: input, shape index: {}]   ;;  %s21728_s7 = inlined_call_operand.vmem [shape: f32[16,10], index: 7, kind: output, shape index: {}]  }
   0x1 LB: > { %s17759_s25 = sadd.s32 4294967295, %s17704_s24   ;;  %p14024_p0 = scmp.ge.s32.totalorder %s17704_s24, 1  ;;  %s17704_s24 = sphi %s17753_s24, %s17_s24  }
   0x2   : > { %p238_p1 = scmp.lt.s32.totalorder %s17704_s24, 3 }
   0x4   : > { %p239_p2 = pnand %p14024_p0, %p238_p1 }
   0x6   : > { %242 = sbr.rel (%p239_p2) target bundleno = 2087 (0x827), region = 48 }
   0xd   : > { %v17497_v0 = vld [vmem:[%s21722_s1] sm:$0xff]   ;;  %v17706_v1 = vmov 0.0   ;;  %v17498_v2 = vld [vmem:[%s21722_s1 + $0x8] sm:$0xff]   ;;  %vm17707_vm0 = vmmov 0   ;;  %s269_s30 = smul.u32 42, %s17759_s25  ;;  %v17499_v3 = vld [vmem:[%s21722_s1 + $0x10] sm:$0xff]  }
   0xe   : > { %15244 = vmatprep.subr.bf16.mxu1 %v17706_v1  ;;  %15296 = vmatprep.subr.bf16.mxu0 %v17706_v1  ;;  %v17503_v4 = vld [vmem:[%s21722_s1] sm:$0xff]   ;;  %v17505_v5 = vld [vmem:[%s21722_s1 + $0x8] sm:$0xff]   ;;  %v17500_v6 = vld [vmem:[%s21722_s1 + $0x18] sm:$0xff]   ;;  %vm363_vm1 = vcmask 1043456   ;;  %vm353_vm2 = vcmask 850944   ;;  %s17708_s11 = smov 112  }
   0xf   : > { %15245 = vmatpush3.bf16.msra.mxu1 %v17497_v0  ;;  %15258 = vmatprep.mubr.msk.bf16.mxu1 %vm17707_vm0, %v17706_v1  ;;  %p270_p3 = scmp.lt.s32.totalorder %s269_s30, 83  ;;  %v17508_v7 = vld [vmem:[%s21722_s1 + $0x10] sm:$0xff]   ;;  %v17501_v8 = vld [vmem:[%s21722_s1 + $0x20] sm:$0xff]   ;;  %v17510_v9 = vld [vmem:[%s21722_s1 + $0x18] sm:$0xff]   ;;  %s17709_s29 = smov 96   ;;  %vm493_vm3 = vcmask 130048  }
  0x10   : > { %15246 = vmatprep.subr.bf16.mxu1 %v17706_v1  ;;  %15310 = vmatprep.mubr.msk.bf16.mxu0 %vm17707_vm0, %v17706_v1  ;;  %v17502_v10 = vld [vmem:[%s21722_s1 + $0x28] sm:$0xff]   ;;  %v17504_v11 = vld [vmem:[%s21722_s1 + $0x30] ss:$0 sps:$4 sm:$0xff]   ;;  %v17513_v12 = vld [vmem:[%s21722_s1 + $0x20] sm:$0xff]   ;;  %vm1790_vm4 = vsmask.f32 7424 }
  0x11   : > { %15297 = vmatpush3.bf16.msra.mxu0 %v17503_v4  ;;  %s22091_s30 = smov (!%p270_p3, %s269_s30), 83  ;;  %v365_v13 = vsel %vm363_vm1, %v17504_v11, 0  ;;  %v17515_v15 = vld [vmem:[%s21722_s1 + $0x28] sm:$0xff]   ;;  %v17518_v16 = vld [vmem:[%s21722_s1 + $0x30] ss:$0 sps:$4 sm:$0xff]   ;;  %v17507_v17 = vld [vmem:[%s21722_s1] sm:$0xff]  }
  0x12   : > { %15298 = vmatprep.subr.bf16.mxu0 %v17706_v1  ;;  %s14025_s16 = sshll.u32 %s22091_s30, 2  ;;  %v794_v18 = vsel %vm363_vm1, %v17518_v16, 0  ;;  %v17509_v19 = vld [vmem:[%s21722_s1 + $0x8] sm:$0xff]   ;;  %v17512_v22 = vld [vmem:[%s21722_s1 + $0x10] sm:$0xff]   ;;  %v17533_v23 = vld [vmem:[%s21722_s1] sm:$0xff]   ;;  %vm2227_vm5 = vcmask 1045504  }
  0x13   : > { %15247 = vmatpush3.bf16.msra.mxu1 %v17498_v2  ;;  %s17795_s19 = scalar_lea.vmem %s21721_s0, %s14025_s16  ;;  %v17535_v24 = vld [vmem:[%s21722_s1 + $0x8] sm:$0xff]   ;;  %v17514_v25 = vld [vmem:[%s21722_s1 + $0x18] sm:$0xff]   ;;  %v17517_v28 = vld [vmem:[%s21722_s1 + $0x20] sm:$0xff]   ;;  %vm1997_vm6 = vcmask 1046528   ;;  %vm2101_vm7 = vsmask.f32 6400 }
  0x14   : > { %15248 = vmatprep.subr.bf16.mxu1 %v17706_v1  ;;  %v17506_v14 = vld [vmem:[%s17795_s19] sm:$0xff]   ;;  %v17519_v20 = vld [vmem:[%s17795_s19 + $0x30] sm:$0xff]   ;;  %v17511_v21 = vld [vmem:[%s17795_s19 + $0x8] sm:$0xff]   ;;  %vm2686_vm8 = vsmask.f32 5376  ;;  %vm2812_vm9 = vcmask 1044480  }
  0x15   : > { %15299 = vmatpush3.bf16.msra.mxu0 %v17505_v5  ;;  %v17516_v26 = vld [vmem:[%s17795_s19 + $0x10] sm:$0xff]   ;;  %v17523_v27 = vld [vmem:[%s17795_s19 + $0x38] sm:$0xff]   ;;  %v17520_v32 = vld [vmem:[%s21722_s1 + $0x28] sm:$0xff]   ;;  %vm3271_vm10 = vsmask.f32 4352  ;;  %vm3982_vm11 = vcmask 1042432  }
  0x16   : > { %15300 = vmatprep.subr.bf16.mxu0 %v17706_v1  ;;  %v17521_v29 = vld [vmem:[%s21722_s1 + $0x30] ss:$0 sps:$4 sm:$0xff]   ;;  %v17538_v34 = vld [vmem:[%s21722_s1 + $0x18] sm:$0xff]   ;;  %v17525_v36 = vld [vmem:[%s17795_s19 + $0x40] sm:$0xff]   ;;  %vm4441_vm12 = vsmask.f32 2304 }
  0x17   : > { %15249 = vmatpush3.bf16.msra.mxu1 %v17499_v3  ;;  %v17537_v30 = vld [vmem:[%s21722_s1 + $0x10] sm:$0xff]   ;;  %v580_v33 = vsel %vm363_vm1, %v17521_v29, 0  ;;  %v17540_v38 = vld [vmem:[%s21722_s1 + $0x20] sm:$0xff]   ;;  %v17522_v40 = vld [vmem:[%s17795_s19 + $0x18] sm:$0xff]   ;;  %vm21837_vm13 = vcmask 1041408   ;;  %vm4668_vm15 = vcmask 261120  }
  0x18   : > { %15250 = vmatprep.subr.bf16.mxu1 %v17706_v1  ;;  %v17534_v31 = vld [vmem:[%s21722_s1 + $0x30] ss:$0 sps:$4 sm:$0xff]   ;;  %v17541_v41 = vld [vmem:[%s21722_s1 + $0x28] sm:$0xff]   ;;  %v17527_v42 = vld [vmem:[%s21722_s1] sm:$0xff]   ;;  %vm3856_vm14 = vsmask.f32 3328 }
  0x19   : > { %15301 = vmatpush3.bf16.msra.mxu0 %v17508_v7  ;;  %v17543_v35 = vld [vmem:[%s21722_s1 + $0x30] ss:$0 sps:$4 sm:$0xff]   ;;  %v1008_v37 = vsel %vm363_vm1, %v17534_v31, 0  ;;  %v17528_v43 = vld [vmem:[%s21722_s1 + $0x8] sm:$0xff]   ;;  %v17544_v44 = vld [vmem:[%s17795_s19 + $0x60] sm:$0xff]   ;;  %p275_p4 = scmp.lt.s32.totalorder %s17759_s25, 1 }
  0x1a   : > { %15302 = vmatprep.subr.bf16.mxu0 %v17706_v1  ;;  %v1222_v39 = vsel %vm363_vm1, %v17543_v35, 0  ;;  %v17524_v45 = vld [vmem:[%s17795_s19 + $0x20] sm:$0xff]   ;;  %v17529_v46 = vld [vmem:[%s21722_s1 + $0x10] sm:$0xff]   ;;  %v17530_v47 = vld [vmem:[%s21722_s1 + $0x18] sm:$0xff]  }
  0x1b   : > { %15251 = vmatpush3.bf16.msra.mxu1 %v17500_v6  ;;  %v17545_v48 = vld [vmem:[%s17795_s19 + $0x68] sm:$0xff]   ;;  %v17531_v50 = vld [vmem:[%s21722_s1 + $0x20] sm:$0xff]   ;;  %v17539_v53 = vld [vmem:[%s17795_s19 + $0x50] sm:$0xff]   ;;  %s22093_s25 = smov (!%p275_p4, %s17759_s25), 1 }
  0x1c   : > { %15252 = vmatprep.subr.bf16.mxu1 %v17706_v1  ;;  %v17526_v49 = vld [vmem:[%s17795_s19 + $0x28] sm:$0xff]   ;;  %v17542_v54 = vld [vmem:[%s17795_s19 + $0x58] sm:$0xff]   ;;  %v17546_v55 = vld [vmem:[%s21722_s1] sm:$0xff]   ;;  %s14026_s23 = sshll.u32 %s22093_s25, 3 }
  0x1d   : > { %15303 = vmatpush3.bf16.msra.mxu0 %v17510_v9  ;;  %v17532_v51 = vld [vmem:[%s21722_s1 + $0x28] sm:$0xff]   ;;  %v17548_v57 = vld [vmem:[%s21722_s1 + $0x10] sm:$0xff]   ;;  %v17549_v58 = vld [vmem:[%s21722_s1 + $0x18] sm:$0xff]   ;;  %s278_s28 = scalar_lea.vmem %s21728_s7, %s14026_s23 }
  0x1e   : > { %15304 = vmatprep.subr.bf16.mxu0 %v17706_v1  ;;  %v17536_v52 = vld [vmem:[%s17795_s19 + $0x48] sm:$0xff]   ;;  %v17550_v59 = vld [vmem:[%s21722_s1 + $0x20] sm:$0xff]   ;;  %v17552_v61 = vld [vmem:[%s21722_s1 + $0x30] ss:$0 sps:$4 sm:$0xff]  }
  0x1f   : > { %15253 = vmatpush3.bf16.msra.mxu1 %v17501_v8  ;;  %v17547_v56 = vld [vmem:[%s21722_s1 + $0x8] sm:$0xff]   ;;  %v1436_v62 = vsel %vm363_vm1, %v17552_v61, 0  ;;  %v17553_v63 = vld [vmem:[%s17795_s19 + $0x78] sm:$0xff]   ;;  %v17554_v0 = vld [vmem:[%s17795_s19 + $0x70] sm:$0xff]  }
  0x20   : > { %15254 = vmatprep.subr.bf16.mxu1 %v17706_v1  ;;  %v17551_v60 = vld [vmem:[%s21722_s1 + $0x28] sm:$0xff]  }
  0x21   : > { %15305 = vmatpush3.bf16.msra.mxu0 %v17513_v12 }
  0x22   : > { %15306 = vmatprep.subr.bf16.mxu0 %v17706_v1 }
  0x23   : > { %15255 = vmatpush3.bf16.msra.mxu1 %v17502_v10 }
  0x24   : > { %15256 = vmatprep.subr.bf16.mxu1 %v17706_v1 }
  0x25   : > { %15307 = vmatpush3.bf16.msra.mxu0 %v17515_v15 }
  0x26   : > { %15308 = vmatprep.subr.bf16.mxu0 %v17706_v1 }
  0x27   : > { %15257 = vmatpush3.bf16.msra.mxu1 %v365_v13 }
  0x28   : > { %15270 = vmatprep.subr.bf16.mxu1 %v17706_v1 }
  0x29   : > { %15309 = vmatpush3.bf16.msra.mxu0 %v794_v18 }
  0x2a   : > { %15259 = vmatmul.mubr.msk.bf16.vlgmr.msra.gmra.mrb[0].mxu1 %vm353_vm2, %v17506_v14  ;;  %15348 = vmatprep.subr.bf16.mxu0 %v17706_v1 }
  0x2b   : > { %15271 = vmatpush3.bf16.msra.mxu1 %v17507_v17  ;;  %15262 = vmatprep.mubr.msk.bf16.mxu1 %vm17707_vm0, %v17706_v1 }
  0x2c   : > { %15272 = vmatprep.subr.bf16.mxu1 %v17706_v1  ;;  %15311 = vmatmul.mubr.msk.bf16.vlgmr.msra.gmra.mrb[0].mxu0 %vm353_vm2, %v17519_v20 }
  0x2d   : > { %15314 = vmatprep.mubr.msk.bf16.mxu0 %vm17707_vm0, %v17706_v1  ;;  %15349 = vmatpush3.bf16.msra.mxu0 %v17533_v23 }
  0x2e   : > { %15350 = vmatprep.subr.bf16.mxu0 %v17706_v1 }
  0x2f   : > { %15273 = vmatpush3.bf16.msra.mxu1 %v17509_v19 }
  0x30   : > { %15274 = vmatprep.subr.bf16.mxu1 %v17706_v1 }
  0x31   : > { %15351 = vmatpush3.bf16.msra.mxu0 %v17535_v24 }
  0x32   : > { %15263 = vmatmul.mubr.msk.bf16.gmra.mrb[4].mxu1 %vm353_vm2, %v17511_v21  ;;  %15352 = vmatprep.subr.bf16.mxu0 %v17706_v1 }
  0x33   : > { %15275 = vmatpush3.bf16.msra.mxu1 %v17512_v22  ;;  %15266 = vmatprep.mubr.msk.bf16.mxu1 %vm17707_vm0, %v17706_v1 }
  0x34   : > { %15276 = vmatprep.subr.bf16.mxu1 %v17706_v1  ;;  %15315 = vmatmul.mubr.msk.bf16.gmra.mrb[4].mxu0 %vm353_vm2, %v17523_v27 }
  0x35   : > { %15318 = vmatprep.mubr.msk.bf16.mxu0 %vm17707_vm0, %v17706_v1  ;;  %15353 = vmatpush3.bf16.msra.mxu0 %v17537_v30 }
  0x36   : > { %15354 = vmatprep.subr.bf16.mxu0 %v17706_v1 }
  0x37   : > { %15277 = vmatpush3.bf16.msra.mxu1 %v17514_v25 }
  0x38   : > { %15278 = vmatprep.subr.bf16.mxu1 %v17706_v1 }
  0x39   : > { %15355 = vmatpush3.bf16.msra.mxu0 %v17538_v34 }
  0x3a   : > { %15267 = vmatmul.mubr.msk.bf16.gmra.mrb[8].mxu1 %vm353_vm2, %v17516_v26  ;;  %15356 = vmatprep.subr.bf16.mxu0 %v17706_v1 }
  0x3b   : > { %15279 = vmatpush3.bf16.msra.mxu1 %v17517_v28  ;;  %15284 = vmatprep.mubr.msk.bf16.mxu1 %vm17707_vm0, %v17706_v1 }
  0x3c   : > { %15280 = vmatprep.subr.bf16.mxu1 %v17706_v1  ;;  %15319 = vmatmul.mubr.msk.bf16.gmra.mrb[8].mxu0 %vm353_vm2, %v17525_v36 }
  0x3d   : > { %15362 = vmatprep.mubr.msk.bf16.mxu0 %vm17707_vm0, %v17706_v1  ;;  %15357 = vmatpush3.bf16.msra.mxu0 %v17540_v38 }
  0x3e   : > { %15358 = vmatprep.subr.bf16.mxu0 %v17706_v1 }
  0x3f   : > { %15281 = vmatpush3.bf16.msra.mxu1 %v17520_v32 }
  0x40   : > { %15282 = vmatprep.subr.bf16.mxu1 %v17706_v1 }
  0x41   : > { %15359 = vmatpush3.bf16.msra.mxu0 %v17541_v41 }
  0x42   : > { %15360 = vmatprep.subr.bf16.mxu0 %v17706_v1 }
  0x43   : > { %15283 = vmatpush3.bf16.msra.mxu1 %v580_v33 }
  0x44   : > { %15322 = vmatprep.subr.bf16.mxu1 %v17706_v1 }
  0x45   : > { %15361 = vmatpush3.bf16.msra.mxu0 %v1222_v39 }
  0x46   : > { %15285 = vmatmul.mubr.msk.bf16.vlgmr.msra.gmra.mrb[12].mxu1 %vm353_vm2, %v17522_v40  ;;  %15400 = vmatprep.subr.bf16.mxu0 %v17706_v1 }
  0x47   : > { %15288 = vmatprep.mubr.msk.bf16.mxu1 %vm17707_vm0, %v17706_v1  ;;  %15323 = vmatpush3.bf16.msra.mxu1 %v17527_v42 }
  0x48   : > { %15324 = vmatprep.subr.bf16.mxu1 %v17706_v1  ;;  %15363 = vmatmul.mubr.msk.bf16.vlgmr.msra.gmra.mrb[12].mxu0 %vm353_vm2, %v17544_v44 }
  0x49   : > { %15366 = vmatprep.mubr.msk.bf16.mxu0 %vm17707_vm0, %v17706_v1 }
  0x4b   : > { %15325 = vmatpush3.bf16.msra.mxu1 %v17528_v43 }
  0x4c   : > { %15326 = vmatprep.subr.bf16.mxu1 %v17706_v1 }
  0x4e   : > { %15289 = vmatmul.mubr.msk.bf16.gmra.mrb[16].mxu1 %vm353_vm2, %v17524_v45 }
  0x4f   : > { %15292 = vmatprep.mubr.msk.bf16.mxu1 %vm17707_vm0, %v17706_v1  ;;  %15327 = vmatpush3.bf16.msra.mxu1 %v17529_v46 }
  0x50   : > { %15328 = vmatprep.subr.bf16.mxu1 %v17706_v1  ;;  %15367 = vmatmul.mubr.msk.bf16.gmra.mrb[16].mxu0 %vm353_vm2, %v17545_v48 }
  0x51   : > { %15370 = vmatprep.mubr.msk.bf16.mxu0 %vm17707_vm0, %v17706_v1 }
  0x53   : > { %15329 = vmatpush3.bf16.msra.mxu1 %v17530_v47 }
  0x54   : > { %15330 = vmatprep.subr.bf16.mxu1 %v17706_v1 }
  0x56   : > { %15293 = vmatmul.mubr.msk.bf16.gmra.mrb[20].mxu1 %vm353_vm2, %v17526_v49 }
  0x57   : > { %15331 = vmatpush3.bf16.msra.mxu1 %v17531_v50  ;;  %15336 = vmatprep.mubr.msk.bf16.mxu1 %vm17707_vm0, %v17706_v1 }
  0x58   : > { %15332 = vmatprep.subr.bf16.mxu1 %v17706_v1  ;;  %15371 = vmatmul.mubr.msk.bf16.gmra.mrb[20].mxu0 %vm353_vm2, %v17554_v0 }
  0x59   : > { %15414 = vmatprep.mubr.msk.bf16.mxu0 %vm17707_vm0, %v17706_v1 }
  0x5b   : > { %15333 = vmatpush3.bf16.msra.mxu1 %v17532_v51 }
  0x5c   : > { %15334 = vmatprep.subr.bf16.mxu1 %v17706_v1 }
  0x5f   : > { %15335 = vmatpush3.bf16.msra.mxu1 %v1008_v37 }
  0x60   : > { %15374 = vmatprep.subr.bf16.mxu1 %v17706_v1 }
  0x62   : > { %15337 = vmatmul.mubr.msk.bf16.vlgmr.msra.gmra.mrb[24].mxu1 %vm353_vm2, %v17536_v52 }
  0x63   : > { %15340 = vmatprep.mubr.msk.bf16.mxu1 %vm17707_vm0, %v17706_v1  ;;  %15375 = vmatpush3.bf16.msra.mxu1 %v17546_v55 }
  0x64   : > { %15376 = vmatprep.subr.bf16.mxu1 %v17706_v1 }
  0x67   : > { %15377 = vmatpush3.bf16.msra.mxu1 %v17547_v56 }
  0x68   : > { %15378 = vmatprep.subr.bf16.mxu1 %v17706_v1 }
  0x6a   : > { %15341 = vmatmul.mubr.msk.bf16.gmra.mrb[28].mxu1 %vm353_vm2, %v17539_v53 }
  0x6b   : > { %15344 = vmatprep.mubr.msk.bf16.mxu1 %vm17707_vm0, %v17706_v1  ;;  %15379 = vmatpush3.bf16.msra.mxu1 %v17548_v57 }
  0x6c   : > { %15380 = vmatprep.subr.bf16.mxu1 %v17706_v1 }
  0x6f   : > { %15381 = vmatpush3.bf16.msra.mxu1 %v17549_v58 }
  0x70   : > { %15382 = vmatprep.subr.bf16.mxu1 %v17706_v1 }
  0x72   : > { %15345 = vmatmul.mubr.msk.bf16.gmra.mrb[32].mxu1 %vm353_vm2, %v17542_v54 }
  0x73   : > { %15388 = vmatprep.mubr.msk.bf16.mxu1 %vm17707_vm0, %v17706_v1  ;;  %15383 = vmatpush3.bf16.msra.mxu1 %v17550_v59 }
  0x74   : > { %15384 = vmatprep.subr.bf16.mxu1 %v17706_v1 }
  0x77   : > { %15385 = vmatpush3.bf16.msra.mxu1 %v17551_v60 }
  0x78   : > { %15386 = vmatprep.subr.bf16.mxu1 %v17706_v1 }
  0x7b   : > { %15387 = vmatpush3.bf16.msra.mxu1 %v1436_v62 }
  0x7e   : > { %15389 = vmatmul.mubr.msk.bf16.vlgmr.msra.gmra.mrb[36].mxu1 %vm353_vm2, %v17553_v63 }
  0x7f   : > { %15392 = vmatprep.mubr.msk.bf16.mxu1 %vm17707_vm0, %v17706_v1 }
  0xfd   : > { %v18012_v2 = vpop.f32.mrb[0].mxu1 }
  0xfe   : > { %v15260_v3 = vpop.f32.mrb[1].mxu1 }
  0xff   : > { %v18014_v4 = vpop.f32.mrb[2].mxu1  ;;  %v18019_v7 = vpop.f32.mrb[0].mxu0  ;;  %v17555_v3 = vld [vmem:[%s21722_s1] sm:$0xff]  }
 0x100   : > { %v15261_v5 = vpop.f32.mrb[3].mxu1  ;;  %v17287_v6 = vpack.i.bf16 %v18014_v4, %v18012_v2  ;;  %v15312_v8 = vpop.f32.mrb[1].mxu0  ;;  %15401 = vmatpush3.bf16.msra.mxu0 %v17555_v3 }
 0x101   : > { %v18023_v10 = vpop.f32.mrb[2].mxu0  ;;  %v17559_v8 = vld [vmem:[%s17795_s19 + $0x80] sm:$0xff]   ;;  %15402 = vmatprep.subr.bf16.mxu0 %v17706_v1 }
 0x102   : > { %17288 = vrot.lane.b32.xlu0 %v17287_v6, %s17708_s11  ;;  %v17317_v12 = vpack.i.bf16 %v18023_v10, %v18019_v7  ;;  %v15313_v13 = vpop.f32.mrb[3].mxu0  ;;  %15393 = vmatmul.mubr.msk.bf16.gmra.mrb[40].mxu1 %vm353_vm2, %v17559_v8 }
 0x103   : > { %15396 = vmatprep.mubr.msk.bf16.mxu1 %vm17707_vm0, %v17706_v1  ;;  %v17557_v13 = vld [vmem:[%s21722_s1 + $0x10] sm:$0xff]  }
 0x105   : > { %v18021_v9 = vpop.f32.mrb[4].mxu1 }
 0x106   : > { %v15264_v11 = vpop.f32.mrb[5].mxu1 }
 0x107   : > { %v18027_v14 = vpop.f32.mrb[6].mxu1  ;;  %v18032_v17 = vpop.f32.mrb[4].mxu0  ;;  %v17556_v11 = vld [vmem:[%s21722_s1 + $0x8] sm:$0xff]  }
 0x108   : > { %v17292_v15 = vpack.i.bf16 %v18027_v14, %v18021_v9  ;;  %v15265_v16 = vpop.f32.mrb[7].mxu1  ;;  %v15316_v18 = vpop.f32.mrb[5].mxu0  ;;  %15403 = vmatpush3.bf16.msra.mxu0 %v17556_v11 }
 0x109   : > { %v18036_v20 = vpop.f32.mrb[6].mxu0  ;;  %15404 = vmatprep.subr.bf16.mxu0 %v17706_v1  ;;  %v17562_v16 = vld [vmem:[%s17795_s19 + $0x88] sm:$0xff]  }
 0x10a   : > { %17293 = vrot.lane.b32.xlu0 %v17292_v15, %s17708_s11  ;;  %v17322_v22 = vpack.i.bf16 %v18036_v20, %v18032_v17  ;;  %v15317_v23 = vpop.f32.mrb[7].mxu0  ;;  %15397 = vmatmul.mubr.msk.bf16.gmra.mrb[44].mxu1 %vm353_vm2, %v17562_v16 }
 0x10b   : > { %v17558_v23 = vld [vmem:[%s21722_s1 + $0x18] sm:$0xff]  }
 0x10c   : > { %15405 = vmatpush3.bf16.msra.mxu0 %v17557_v13 }
 0x10d   : > { %v18034_v19 = vpop.f32.mrb[8].mxu1  ;;  %15406 = vmatprep.subr.bf16.mxu0 %v17706_v1 }
 0x10e   : > { %v15268_v21 = vpop.f32.mrb[9].mxu1 }
 0x10f   : > { %v18040_v24 = vpop.f32.mrb[10].mxu1  ;;  %v18045_v27 = vpop.f32.mrb[8].mxu0 }
 0x110   : > { %v15269_v25 = vpop.f32.mrb[11].mxu1  ;;  %v17297_v26 = vpack.i.bf16 %v18040_v24, %v18034_v19  ;;  %v15320_v28 = vpop.f32.mrb[9].mxu0  ;;  %15407 = vmatpush3.bf16.msra.mxu0 %v17558_v23 }
 0x111   : > { %v18047_v29 = vpop.f32.mrb[10].mxu0  ;;  %v17560_v25 = vld [vmem:[%s21722_s1 + $0x20] sm:$0xff]   ;;  %15408 = vmatprep.subr.bf16.mxu0 %v17706_v1  ;;  %v17563_v28 = vld [vmem:[%s21722_s1 + $0x30] ss:$0 sps:$4 sm:$0xff]  }
 0x112   : > { %17298 = vrot.lane.b32.xlu1 %v17297_v26, %s17708_s11  ;;  %v17327_v30 = vpack.i.bf16 %v18047_v29, %v18045_v27  ;;  %v15321_v31 = vpop.f32.mrb[11].mxu0  ;;  %v17561_v26 = vld [vmem:[%s21722_s1 + $0x28] sm:$0xff]  }
 0x113   : > { %v17564_v31 = vld [vmem:[%s17795_s19 + $0x90] sm:$0xff]  }
 0x114   : > { %15409 = vmatpush3.bf16.msra.mxu0 %v17560_v25 }
 0x115   : > { %15410 = vmatprep.subr.bf16.mxu0 %v17706_v1 }
 0x118   : > { %15411 = vmatpush3.bf16.msra.mxu0 %v17561_v26 }
 0x119   : > { %v18051_v32 = vpop.f32.mrb[12].mxu1  ;;  %15412 = vmatprep.subr.bf16.mxu0 %v17706_v1 }
 0x11a   : > { %v15286_v33 = vpop.f32.mrb[13].mxu1 }
 0x11b   : > { %v18053_v34 = vpop.f32.mrb[14].mxu1  ;;  %v18075_v47 = vpop.f32.mrb[12].mxu0 }
 0x11c   : > { %v17302_v35 = vpack.i.bf16 %v18053_v34, %v18051_v32  ;;  %v15287_v36 = vpop.f32.mrb[15].mxu1  ;;  %v15364_v48 = vpop.f32.mrb[13].mxu0 }
 0x11d   : > { %v18081_v52 = vpop.f32.mrb[14].mxu0 }
 0x11e   : > { %17303 = vrot.lane.b32.xlu0 %v17302_v35, %s17708_s11  ;;  %v17407_v55 = vpack.i.bf16 %v18081_v52, %v18075_v47  ;;  %v15365_v56 = vpop.f32.mrb[15].mxu0 }
 0x121   : > { %v18058_v37 = vpop.f32.mrb[16].mxu1 }
 0x122   : > { %17318 = vrot.lane.b32.xlu0 %v17317_v12, %s17708_s11  ;;  %v15290_v38 = vpop.f32.mrb[17].mxu1 }
 0x123   : > { %v18061_v39 = vpop.f32.mrb[18].mxu1  ;;  %v18087_v57 = vpop.f32.mrb[16].mxu0 }
 0x124   : > { %v17307_v40 = vpack.i.bf16 %v18061_v39, %v18058_v37  ;;  %v15291_v41 = vpop.f32.mrb[19].mxu1  ;;  %v15368_v58 = vpop.f32.mrb[17].mxu0 }
 0x125   : > { %v18091_v60 = vpop.f32.mrb[18].mxu0 }
 0x126   : > { %17328 = vrot.lane.b32.xlu0 %v17327_v30, %s17708_s11  ;;  %17308 = vrot.lane.b32.xlu1 %v17307_v40, %s17708_s11  ;;  %v17417_v62 = vpack.i.bf16 %v18091_v60, %v18087_v57  ;;  %v15369_v63 = vpop.f32.mrb[19].mxu0  ;;  %v1650_v30 = vsel %vm363_vm1, %v17563_v28, 0 }
 0x127   : > { %15413 = vmatpush3.bf16.msra.mxu0 %v1650_v30 }
 0x129   : > { %v18067_v42 = vpop.f32.mrb[20].mxu1 }
 0x12a   : > { %v15294_v43 = vpop.f32.mrb[21].mxu1  ;;  %15415 = vmatmul.mubr.msk.bf16.vlgmr.msra.gmra.mrb[24].mxu0 %vm353_vm2, %v17564_v31 }
 0x12b   : > { %v18069_v44 = vpop.f32.mrb[22].mxu1  ;;  %15418 = vmatprep.mubr.msk.bf16.mxu0 %vm17707_vm0, %v17706_v1 }
 0x12c   : > { %v17312_v45 = vpack.i.bf16 %v18069_v44, %v18067_v42  ;;  %v15295_v46 = vpop.f32.mrb[23].mxu1 }
 0x12e   : > { %17313 = vrot.lane.b32.xlu1 %v17312_v45, %s17708_s11 }
 0x132   : > { %17323 = vrot.lane.b32.xlu1 %v17322_v22, %s17708_s11 }
 0x135   : > { %v18077_v49 = vpop.f32.mrb[24].mxu1 }
 0x136   : > { %v15338_v50 = vpop.f32.mrb[25].mxu1 }
 0x137   : > { %v18079_v51 = vpop.f32.mrb[26].mxu1 }
 0x138   : > { %v17377_v53 = vpack.i.bf16 %v18079_v51, %v18077_v49  ;;  %v15339_v54 = vpop.f32.mrb[27].mxu1 }
 0x13d   : > { %v18089_v59 = vpop.f32.mrb[28].mxu1 }
 0x13e   : > { %v15342_v61 = vpop.f32.mrb[29].mxu1 }
 0x13f   : > { %v18095_v0 = vpop.f32.mrb[30].mxu1 }
 0x140   : > { %v17387_v5 = vpack.i.bf16 %v18095_v0, %v18089_v59  ;;  %v15343_v6 = vpop.f32.mrb[31].mxu1 }
 0x145   : > { %v18110_v12 = vpop.f32.mrb[32].mxu1 }
 0x146   : > { %v15346_v15 = vpop.f32.mrb[33].mxu1 }
 0x147   : > { %v18117_v18 = vpop.f32.mrb[34].mxu1 }
 0x148   : > { %v17397_v21 = vpack.i.bf16 %v18117_v18, %v18110_v12  ;;  %v15347_v22 = vpop.f32.mrb[35].mxu1 }
 0x151   : > { %v18143_v38 = vpop.f32.mrb[36].mxu1 }
 0x152   : > { %v15390_v43 = vpop.f32.mrb[37].mxu1 }
 0x153   : > { %v18151_v45 = vpop.f32.mrb[38].mxu1 }
 0x154   : > { %v17427_v48 = vpack.i.bf16 %v18151_v45, %v18143_v38  ;;  %v15391_v50 = vpop.f32.mrb[39].mxu1 }
 0x174   : > { %v17289_v33 = vpop.permute.xlu0 %17288 }
 0x175   : > { %v17291_v35 = vunpack.i.h.bf16 %v17289_v33  ;;  %v17290_v36 = vunpack.i.l.bf16 %v17289_v33 }
 0x177   : > { %v18146_v40 = vmax.f32 %v18014_v4, %v17291_v35  ;;  %v18149_v41 = vmax.f32 %v18012_v2, %v17290_v36 }
 0x179   : > { %v17332_v46 = vpack.i.bf16 %v18146_v40, %v18149_v41 }
 0x17b   : > { %17333 = vrot.lane.b32.xlu1 %v17332_v46, %s17709_s29 }
 0x17c   : > { %v17294_v54 = vpop.permute.xlu0 %17293 }
 0x17d   : > { %v17296_v56 = vunpack.i.h.bf16 %v17294_v54  ;;  %v17295_v4 = vunpack.i.l.bf16 %v17294_v54 }
 0x17f   : > { %v18159_v58 = vmax.f32 %v18027_v14, %v17296_v56  ;;  %v18162_v2 = vmax.f32 %v18021_v9, %v17295_v4  ;;  %v17565_v9 = vld [vmem:[%s21723_s2 + $0x8] sm:$0xff]  }
 0x180   : > { %15426 = vmatprep.subr.bf16.mxu1 %v17565_v9 }
 0x181   : > { %v17337_v61 = vpack.i.bf16 %v18159_v58, %v18162_v2  ;;  %15427 = vmatpush3.bf16.msra.mxu1 %v17565_v9 }
 0x183   : > { %17338 = vrot.lane.b32.xlu0 %v17337_v61, %s17709_s29 }
 0x184   : > { %v17299_v63 = vpop.permute.xlu1 %17298 }
 0x185   : > { %v17301_v3 = vunpack.i.h.bf16 %v17299_v63  ;;  %v17300_v6 = vunpack.i.l.bf16 %v17299_v63 }
 0x187   : > { %v18168_v8 = vmax.f32 %v18040_v24, %v17301_v3  ;;  %v18171_v11 = vmax.f32 %v18034_v19, %v17300_v6 }
 0x189   : > { %v17342_v14 = vpack.i.bf16 %v18168_v8, %v18171_v11 }
 0x18b   : > { %17343 = vrot.lane.b32.xlu1 %v17342_v14, %s17709_s29 }
 0x190   : > { %v17304_v13 = vpop.permute.xlu0 %17303 }
 0x191   : > { %v17306_v15 = vunpack.i.h.bf16 %v17304_v13  ;;  %v17305_v16 = vunpack.i.l.bf16 %v17304_v13 }
 0x193   : > { %v18180_v24 = vmax.f32 %v18053_v34, %v17306_v15  ;;  %v18183_v19 = vmax.f32 %v18051_v32, %v17305_v16 }
 0x194   : > { %v17319_v22 = vpop.permute.xlu0 %17318 }
 0x195   : > { %v17321_v23 = vunpack.i.h.bf16 %v17319_v22  ;;  %v17320_v25 = vunpack.i.l.bf16 %v17319_v22  ;;  %v17347_v26 = vpack.i.bf16 %v18180_v24, %v18183_v19 }
 0x197   : > { %v18188_v28 = vmax.f32 %v18023_v10, %v17321_v23  ;;  %v18191_v30 = vmax.f32 %v18019_v7, %v17320_v25  ;;  %17348 = vrot.lane.b32.xlu1 %v17347_v26, %s17709_s29 }
 0x198   : > { %v17329_v31 = vpop.permute.xlu0 %17328  ;;  %v17309_v34 = vpop.permute.xlu1 %17308 }
 0x199   : > { %v17331_v33 = vunpack.i.h.bf16 %v17329_v31  ;;  %v17330_v32 = vunpack.i.l.bf16 %v17329_v31  ;;  %v17311_v35 = vunpack.i.h.bf16 %v17309_v34  ;;  %v17310_v36 = vunpack.i.l.bf16 %v17309_v34 }
 0x19a   : > { %v17362_v43 = vpack.i.bf16 %v18188_v28, %v18191_v30 }
 0x19b   : > { %v18197_v46 = vmax.f32 %v18047_v29, %v17331_v33  ;;  %v18200_v10 = vmax.f32 %v18045_v27, %v17330_v32  ;;  %v18203_v7 = vmax.f32 %v18061_v39, %v17311_v35  ;;  %v18206_v50 = vmax.f32 %v18058_v37, %v17310_v36  ;;  %v17566_v29 = vld [vmem:[%s17795_s19 + $0x98] sm:$0xff]  }
 0x19c   : > { %17363 = vrot.lane.b32.xlu1 %v17362_v43, %s17709_s29  ;;  %15419 = vmatmul.mubr.msk.bf16.gmra.mrb[28].mxu0 %vm353_vm2, %v17566_v29 }
 0x19d   : > { %v17352_v54 = vpack.i.bf16 %v18203_v7, %v18206_v50  ;;  %v17372_v56 = vpack.i.bf16 %v18197_v46, %v18200_v10  ;;  %15422 = vmatprep.mubr.msk.bf16.mxu0 %vm17707_vm0, %v17706_v1  ;;  %v18241_v1 = vld [vmem:[%s21723_s2] sm:$0xff]  }
 0x19e   : > { %15436 = vmatprep.subr.bf16.mxu1 %v18241_v1 }
 0x19f   : > { %17353 = vrot.lane.b32.xlu0 %v17352_v54, %s17709_s29 }
 0x1a0   : > { %17373 = vrot.lane.b32.xlu1 %v17372_v56, %s17709_s29  ;;  %v17314_v27 = vpop.permute.xlu1 %17313 }
 0x1a1   : > { %v17316_v39 = vunpack.i.h.bf16 %v17314_v27  ;;  %v17315_v4 = vunpack.i.l.bf16 %v17314_v27 }
 0x1a3   : > { %v18218_v37 = vmax.f32 %v18069_v44, %v17316_v39  ;;  %v18221_v61 = vmax.f32 %v18067_v42, %v17315_v4  ;;  %v17567_v44 = vld [vmem:[%s17795_s19 + $0xa0] sm:$0xff]  }
 0x1a4   : > { %v17324_v63 = vpop.permute.xlu1 %17323  ;;  %15423 = vmatmul.mubr.msk.bf16.gmra.mrb[32].mxu0 %vm353_vm2, %v17567_v44 }
 0x1a5   : > { %v17326_v3 = vunpack.i.h.bf16 %v17324_v63  ;;  %v17325_v6 = vunpack.i.l.bf16 %v17324_v63  ;;  %v17357_v14 = vpack.i.bf16 %v18218_v37, %v18221_v61 }
 0x1a7   : > { %v18228_v9 = vmax.f32 %v18036_v20, %v17326_v3  ;;  %v18231_v13 = vmax.f32 %v18032_v17, %v17325_v6  ;;  %17358 = vrot.lane.b32.xlu0 %v17357_v14, %s17709_s29  ;;  %v17569_v17 = vld [vmem:[%s21723_s2 + $0x8] sm:$0xff]   ;;  %v18252_v20 = vpop.f32.mrb[20].mxu0 }
 0x1a8   : > { %15676 = vmatprep.subr.bf16.mxu0 %v17569_v17  ;;  %21839 = vst [vmem:[#allocation4_spill] sm:$0xff] %v18252_v20  ;;  %v15372_v15 = vpop.f32.mrb[21].mxu0 }
 0x1a9   : > { %v17367_v42 = vpack.i.bf16 %v18228_v9, %v18231_v13  ;;  %15677 = vmatpush3.bf16.msra.mxu0 %v17569_v17  ;;  %v18258_v16 = vpop.f32.mrb[22].mxu0 }
 0x1aa   : > { %21840 = vst [vmem:[#allocation5_spill] sm:$0xff] %v18258_v16  ;;  %v17422_v22 = vpack.i.bf16 %v18258_v16, %v18252_v20  ;;  %v15373_v23 = vpop.f32.mrb[23].mxu0 }
 0x1ab   : > { %17368 = vrot.lane.b32.xlu0 %v17367_v42, %s17709_s29 }
 0x1af   : > { %17378 = vrot.lane.b32.xlu0 %v17377_v53, %s17708_s11  ;;  %v18273_v53 = vld [vmem:[%s21723_s2] sm:$0xff]  }
 0x1b0   : > { %15686 = vmatprep.subr.bf16.mxu0 %v18273_v53 }
 0x1b3   : > { %17388 = vrot.lane.b32.xlu0 %v17387_v5, %s17708_s11 }
 0x1b7   : > { %17398 = vrot.lane.b32.xlu0 %v17397_v21, %s17708_s11 }
 0x1bb   : > { %17408 = vrot.lane.b32.xlu0 %v17407_v55, %s17708_s11 }
 0x1bf   : > { %17418 = vrot.lane.b32.xlu0 %v17417_v62, %s17708_s11 }
 0x1c3   : > { %17428 = vrot.lane.b32.xlu0 %v17427_v48, %s17708_s11 }
 0x1ed   : > { %v17334_v5 = vpop.permute.xlu1 %17333 }
 0x1ee   : > { %v17336_v21 = vunpack.i.h.bf16 %v17334_v5  ;;  %v17335_v55 = vunpack.i.l.bf16 %v17334_v5 }
 0x1f0   : > { %v479_v25 = vmax.f32 %v18146_v40, %v17336_v21  ;;  %v478_v26 = vmax.f32 %v18149_v41, %v17335_v55 }
 0x1f2   : > { %v485_v31 = vmax.f32 %v479_v25, 0.0  ;;  %v484_v34 = vmax.f32 %v478_v26, 0.0 }
 0x1f4   : > { %v490_v33 = vpack.c.bf16 %v485_v31, %v484_v34 }
 0x1f5   : > { %v17339_v32 = vpop.permute.xlu0 %17338 }
 0x1f6   : > { %494 = vst.msk [vmem:[#allocation2] sm:$0xff] %vm493_vm3, %v490_v33  ;;  %v17341_v62 = vunpack.i.h.bf16 %v17339_v32  ;;  %v17340_v35 = vunpack.i.l.bf16 %v17339_v32 }
 0x1f8   : > { %v481_v36 = vmax.f32 %v18159_v58, %v17341_v62  ;;  %v480_v48 = vmax.f32 %v18162_v2, %v17340_v35 }
 0x1fa   : > { %v487_v43 = vmax.f32 %v481_v36, 0.0  ;;  %v486_v54 = vmax.f32 %v480_v48, 0.0 }
 0x1fc   : > { %v491_v56 = vpack.c.bf16 %v487_v43, %v486_v54 }
 0x1fd   : > { %v17344_v27 = vpop.permute.xlu1 %17343  ;;  %v18289_v40 = vld [vmem:[#allocation2] sm:$0xff] }
 0x1fe   : > { %495 = vst.msk [vmem:[#allocation2 + $0x8] sm:$0xff] %vm493_vm3, %v491_v56  ;;  %v17346_v41 = vunpack.i.h.bf16 %v17344_v27  ;;  %v17345_v29 = vunpack.i.l.bf16 %v17344_v27  ;;  %v1794_v63 = vshll.u32 %v18289_v40, 16  ;;  %v1792_v44 = vshrl.u32 %v18289_v40, 16 }
 0x200   : > { %v483_v39 = vmax.f32 %v18168_v8, %v17346_v41  ;;  %v482_v4 = vmax.f32 %v18171_v11, %v17345_v29  ;;  %v1796_v2 = vrot.slane %v1794_v63, 1  ;;  %v18324_v41 = vld [vmem:[%s21723_s2 + $0x10] sm:$0xff]  }
 0x202   : > { %v489_v3 = vmax.f32 %v483_v39, 0.0  ;;  %v488_v58 = vmax.f32 %v482_v4, 0.0  ;;  %v1797_v17 = vor.u32 %v1796_v2, %v1792_v44 }
 0x204   : > { %v492_v6 = vpack.c.bf16 %v489_v3, %v488_v58 }
 0x205   : > { %v18295_v14 = vld [vmem:[#allocation2 + $0x8] sm:$0xff] }
 0x206   : > { %496 = vst.msk [vmem:[#allocation2 + $0x10] sm:$0xff] %vm493_vm3, %v492_v6  ;;  %v21730_v42 = vshll.u32 %v18295_v14, 16  ;;  %v21731_v34 = vshrl.u32 %v18295_v14, 16  ;;  %v21729_v36 = vrot.slane %v18295_v14, 2 }
 0x208   : > { %v1801_v8 = vrot.slane %v21730_v42, 1 }
 0x209   : > { %v17349_v11 = vpop.permute.xlu1 %17348 }
 0x20a   : > { %v17351_v15 = vunpack.i.h.bf16 %v17349_v11  ;;  %v17350_v23 = vunpack.i.l.bf16 %v17349_v11  ;;  %v1802_v5 = vsel %vm1790_vm4, %v1797_v17, %v1801_v8 }
 0x20b   : > { %15428 = vmatprep.mubr.msk.bf16.mxu1 %vm493_vm3, %v1802_v5 }
 0x20c   : > { %v694_v21 = vmax.f32 %v18180_v24, %v17351_v15  ;;  %v693_v55 = vmax.f32 %v18183_v19, %v17350_v23  ;;  %v1805_v19 = vor.u32 %v21731_v34, %v1801_v8 }
 0x20d   : > { %v18306_v25 = vld [vmem:[#allocation2 + $0x10] sm:$0xff] }
 0x20e   : > { %21841 = vst [vmem:[#allocation6_spill] sm:$0xff] %v18306_v25  ;;  %v700_v26 = vmax.f32 %v694_v21, 0.0  ;;  %v699_v31 = vmax.f32 %v693_v55, 0.0  ;;  %v17364_v33 = vpop.permute.xlu1 %17363  ;;  %v18310_v32 = vshll.u32 %v18306_v25, 16  ;;  %v18314_v48 = vrot.slane %v18306_v25, 2 }
 0x20f   : > { %v17366_v62 = vunpack.i.h.bf16 %v17364_v33  ;;  %v17365_v35 = vunpack.i.l.bf16 %v17364_v33 }
 0x210   : > { %v705_v24 = vpack.c.bf16 %v700_v26, %v699_v31  ;;  %v1809_v43 = vrot.slane %v18310_v32, 1  ;;  %v18330_v29 = vsel %vm2227_vm5, %v21729_v36, %v18314_v48 }
 0x211   : > { %v908_v54 = vmax.f32 %v18188_v28, %v17366_v62  ;;  %v907_v56 = vmax.f32 %v18191_v30, %v17365_v35  ;;  %v17354_v27 = vpop.permute.xlu0 %17353  ;;  %v18335_v30 = vshrl.u32 %v18306_v25, 16 }
 0x212   : > { %708 = vst.msk [vmem:[#allocation2 + $0x18] sm:$0xff] %vm493_vm3, %v705_v24  ;;  %v17356_v39 = vunpack.i.h.bf16 %v17354_v27  ;;  %v17355_v4 = vunpack.i.l.bf16 %v17354_v27  ;;  %v17374_v63 = vpop.permute.xlu1 %17373  ;;  %v1810_v28 = vsel %vm1790_vm4, %v1805_v19, %v1809_v43 }
 0x213   : > { %v914_v3 = vmax.f32 %v908_v54, 0.0  ;;  %v913_v58 = vmax.f32 %v907_v56, 0.0  ;;  %v17376_v6 = vunpack.i.h.bf16 %v17374_v63  ;;  %v17375_v2 = vunpack.i.l.bf16 %v17374_v63  ;;  %15429 = vmatmul.mubr.msk.bf16.vlgmr.msra.gmra.mrb[48].mxu1 %vm493_vm3, %v1810_v28 }
 0x214   : > { %v696_v44 = vmax.f32 %v18203_v7, %v17356_v39  ;;  %v695_v17 = vmax.f32 %v18206_v50, %v17355_v4  ;;  %15437 = vmatpush3.bf16.msra.mxu1 %v18241_v1  ;;  %v2695_v26 = vrot.slane %v18335_v30, 2  ;;  %v2696_v50 = vrot.slane %v18310_v32, 3 }
 0x215   : > { %v919_v8 = vpack.c.bf16 %v914_v3, %v913_v58  ;;  %v912_v11 = vmax.f32 %v18197_v46, %v17376_v6  ;;  %v911_v15 = vmax.f32 %v18200_v10, %v17375_v2  ;;  %15446 = vmatprep.subr.bf16.mxu1 %v18324_v41  ;;  %v1813_v39 = vor.u32 %v18335_v30, %v1809_v43 }
 0x216   : > { %v702_v23 = vmax.f32 %v696_v44, 0.0  ;;  %v701_v5 = vmax.f32 %v695_v17, 0.0  ;;  %v18357_v24 = vor.u32 %v2696_v50, %v2695_v26 }
 0x217   : > { %922 = vst.msk [vmem:[#allocation2 + $0x30] sm:$0xff] %vm493_vm3, %v919_v8  ;;  %v918_v21 = vmax.f32 %v912_v11, 0.0  ;;  %v917_v55 = vmax.f32 %v911_v15, 0.0 }
 0x218   : > { %v706_v7 = vpack.c.bf16 %v702_v23, %v701_v5 }
 0x219   : > { %v921_v31 = vpack.c.bf16 %v918_v21, %v917_v55  ;;  %v17359_v1 = vpop.permute.xlu0 %17358  ;;  %v18347_v33 = vld [vmem:[#allocation2 + $0x18] sm:$0xff] }
 0x21a   : > { %709 = vst.msk [vmem:[#allocation2 + $0x20] sm:$0xff] %vm493_vm3, %v706_v7  ;;  %v17361_v46 = vunpack.i.h.bf16 %v17359_v1  ;;  %v17360_v10 = vunpack.i.l.bf16 %v17359_v1  ;;  %v18351_v62 = vshll.u32 %v18347_v33, 16  ;;  %v18355_v35 = vrot.slane %v18347_v33, 2 }
 0x21b   : > { %924 = vst.msk [vmem:[#allocation2 + $0x40] sm:$0xff] %vm493_vm3, %v921_v31  ;;  %v18378_v5 = vshrl.u32 %v18347_v33, 16 }
 0x21c   : > { %v698_v19 = vmax.f32 %v18218_v37, %v17361_v46  ;;  %v697_v54 = vmax.f32 %v18221_v61, %v17360_v10  ;;  %v1817_v56 = vrot.slane %v18351_v62, 1  ;;  %v18366_v4 = vsel %vm2227_vm5, %v18314_v48, %v18355_v35 }
 0x21d   : > { %v17369_v27 = vpop.permute.xlu0 %17368 }
 0x21e   : > { %v704_v63 = vmax.f32 %v698_v19, 0.0  ;;  %v703_v28 = vmax.f32 %v697_v54, 0.0  ;;  %v17371_v3 = vunpack.i.h.bf16 %v17369_v27  ;;  %v17370_v58 = vunpack.i.l.bf16 %v17369_v27  ;;  %v18394_v19 = vld [vmem:[#allocation2 + $0x30] sm:$0xff] }
 0x21f   : > { %v1818_v6 = vsel %vm1790_vm4, %v1813_v39, %v1817_v56  ;;  %v1821_v50 = vor.u32 %v18378_v5, %v1817_v56 }
 0x220   : > { %v707_v2 = vpack.c.bf16 %v704_v63, %v703_v28  ;;  %v910_v37 = vmax.f32 %v18228_v9, %v17371_v3  ;;  %v909_v61 = vmax.f32 %v18231_v13, %v17370_v58  ;;  %15432 = vmatprep.mubr.msk.bf16.mxu1 %vm493_vm3, %v1818_v6  ;;  %v18414_v28 = vshll.u32 %v18394_v19, 16 }
 0x221   : > { %v17379_v44 = vpop.permute.xlu0 %17378  ;;  %v18372_v43 = vld [vmem:[#allocation2 + $0x20] sm:$0x1] }
 0x222   : > { %v18374_v17 = vld [vmem:[#allocation2 + $0x20] sm:$0xff]  ;;  %710 = vst.msk [vmem:[#allocation2 + $0x28] sm:$0xff] %vm493_vm3, %v707_v2  ;;  %v916_v8 = vmax.f32 %v910_v37, 0.0  ;;  %v915_v11 = vmax.f32 %v909_v61, 0.0  ;;  %v17381_v15 = vunpack.i.h.bf16 %v17379_v44  ;;  %v17380_v23 = vunpack.i.l.bf16 %v17379_v44 }
 0x223   : > { %v1823_v9 = vshll.u32 %v18372_v43, 16  ;;  %v18382_v13 = vshll.u32 %v18374_v17, 16  ;;  %v18411_v63 = vshrl.u32 %v18374_v17, 16 }
 0x224   : > { %v920_v21 = vpack.c.bf16 %v916_v8, %v915_v11  ;;  %v18385_v55 = vmax.f32 %v18079_v51, %v17381_v15  ;;  %v18388_v26 = vmax.f32 %v18077_v49, %v17380_v23  ;;  %v4704_v8 = vrot.slane %v18414_v28, 1 }
 0x225   : > { %v17389_v7 = vpop.permute.xlu0 %17388  ;;  %v1825_v31 = vrot.slane %v1823_v9, 1  ;;  %v4691_v51 = vrot.slane %v18382_v13, 1  ;;  %v2472_v42 = vrot.slane %v18411_v63, 1  ;;  %v2475_v34 = vrot.slane %v18382_v13, 2 }
 0x226   : > { %923 = vst.msk [vmem:[#allocation2 + $0x38] sm:$0xff] %vm493_vm3, %v920_v21  ;;  %v17391_v1 = vunpack.i.h.bf16 %v17389_v7  ;;  %v17390_v46 = vunpack.i.l.bf16 %v17389_v7  ;;  %v17382_v10 = vpack.i.bf16 %v18385_v55, %v18388_v26  ;;  %v18444_v7 = vshrl.u32 %v18394_v19, 16 }
 0x227   : > { %v1826_v54 = vsel %vm1790_vm4, %v1821_v50, %v1825_v31  ;;  %v4692_v6 = vor.u32 %v4691_v51, %v18411_v63  ;;  %v18452_v31 = vld [vmem:[%s21723_s2 + $0x18] sm:$0xff]   ;;  %v18558_v16 = vor.u32 %v2475_v34, %v2472_v42  ;;  %v2699_v34 = vrot.slane %v18378_v5, 2 }
 0x228   : > { %v18399_v49 = vmax.f32 %v18095_v0, %v17391_v1  ;;  %v18402_v27 = vmax.f32 %v18089_v59, %v17390_v46  ;;  %15433 = vmatmul.mubr.msk.bf16.gmra.mrb[52].mxu1 %vm493_vm3, %v1826_v54  ;;  %17383 = vrot.lane.b32.xlu1 %v17382_v10, %s17709_s29  ;;  %v18466_v54 = vld [vmem:[%s21723_s2 + $0x10] sm:$0xff]  }
 0x229   : > { %15438 = vmatprep.mubr.msk.bf16.mxu1 %vm493_vm3, %v18289_v40  ;;  %v17399_v56 = vpop.permute.xlu0 %17398  ;;  %v18408_v39 = vld [vmem:[#allocation2 + $0x28] sm:$0xff] }
 0x22a   : > { %21842 = vst [vmem:[#allocation7_spill] sm:$0xff] %v18399_v49  ;;  %21843 = vst [vmem:[#allocation8_spill] sm:$0xff] %v18402_v27  ;;  %v17401_v0 = vunpack.i.h.bf16 %v17399_v56  ;;  %v17400_v3 = vunpack.i.l.bf16 %v17399_v56  ;;  %v17392_v59 = vpack.i.bf16 %v18399_v49, %v18402_v27  ;;  %v18419_v58 = vshll.u32 %v18408_v39, 16 }
 0x22b   : > { %v18431_v61 = vshrl.u32 %v18408_v39, 16 }
 0x22c   : > { %v18423_v40 = vmax.f32 %v18117_v18, %v17401_v0  ;;  %v18426_v2 = vmax.f32 %v18110_v12, %v17400_v3  ;;  %17393 = vrot.lane.b32.xlu1 %v17392_v59, %s17709_s29  ;;  %v4696_v37 = vrot.slane %v18419_v58, 1  ;;  %v18438_v12 = vld [vmem:[#allocation2 + $0x40] sm:$0x1] }
 0x22d   : > { %v17409_v44 = vpop.permute.xlu0 %17408  ;;  %v18434_v11 = vld [vmem:[#allocation2 + $0x38] sm:$0xff]  ;;  %v4718_v56 = vshll.u32 %v18438_v12, 16 }
 0x22e   : > { %21844 = vst [vmem:[#allocation9_spill] sm:$0xff] %v18423_v40  ;;  %21845 = vst [vmem:[#allocation10_spill] sm:$0xff] %v18426_v2  ;;  %v17411_v15 = vunpack.i.h.bf16 %v17409_v44  ;;  %v17410_v23 = vunpack.i.l.bf16 %v17409_v44  ;;  %v4697_v18 = vsel %vm1790_vm4, %v4692_v6, %v4696_v37  ;;  %v4700_v9 = vor.u32 %v18431_v61, %v4696_v37  ;;  %v1989_v44 = vld [vmem:[#allocation2] sm:$0xfe] }
 0x22f   : > { %15678 = vmatprep.mubr.msk.bf16.mxu0 %vm493_vm3, %v4697_v18  ;;  %v17402_v21 = vpack.i.bf16 %v18423_v40, %v18426_v2  ;;  %v18447_v50 = vshll.u32 %v18434_v11, 16  ;;  %v18478_v6 = vshrl.u32 %v18434_v11, 16  ;;  %v1998_v18 = vrot.slane %v1989_v44, 1 }
 0x230   : > { %v18455_v1 = vmax.f32 %v18081_v52, %v17411_v15  ;;  %v18458_v46 = vmax.f32 %v18075_v47, %v17410_v23  ;;  %15439 = vmatmul.mubr.msk.bf16.vlgmr.msra.gmra.mrb[48].mxu1 %vm493_vm3, %v18295_v14  ;;  %v4705_v10 = vsel %vm1790_vm4, %v4700_v9, %v4704_v8  ;;  %v4708_v52 = vor.u32 %v18444_v7, %v4704_v8 }
 0x231   : > { %15442 = vmatprep.mubr.msk.bf16.mxu1 %vm493_vm3, %v18306_v25  ;;  %17403 = vrot.lane.b32.xlu1 %v17402_v21, %s17709_s29  ;;  %v4712_v47 = vrot.slane %v18447_v50, 1  ;;  %v17419_v51 = vpop.permute.xlu0 %17418  ;;  %v1999_v8 = vrot.slane %v18295_v14, 1  ;;  %v4720_v9 = vrot.slane %v4718_v56, 1  ;;  %v18511_v56 = vrot.slane %v18394_v19, 2 }
 0x232   : > { %21846 = vst [vmem:[#allocation11_spill] sm:$0xff] %v18455_v1  ;;  %21847 = vst [vmem:[#allocation12_spill] sm:$0xff] %v18458_v46  ;;  %15679 = vmatmul.mubr.msk.bf16.vlgmr.msra.gmra.mrb[36].mxu0 %vm493_vm3, %v4705_v10  ;;  %v17412_v0 = vpack.i.bf16 %v18455_v1, %v18458_v46  ;;  %v17421_v3 = vunpack.i.h.bf16 %v17419_v51  ;;  %v17420_v59 = vunpack.i.l.bf16 %v17419_v51  ;;  %15447 = vmatpush3.bf16.msra.mxu1 %v18324_v41  ;;  %v18501_v51 = vpop.f32.mrb[24].mxu0  ;;  %v21741_v1 = vrot.slane %v18306_v25, 3 }
 0x233   : > { %v4713_v37 = vsel %vm1790_vm4, %v4708_v52, %v4712_v47  ;;  %15687 = vmatpush3.bf16.msra.mxu0 %v18273_v53  ;;  %15456 = vmatprep.subr.bf16.mxu1 %v18452_v31  ;;  %v4716_v15 = vor.u32 %v18478_v6, %v4712_v47  ;;  %v2000_v21 = vsel %vm1997_vm6, %v1998_v18, %v1999_v8  ;;  %v18499_v47 = vpop.f32.mrb[40].mxu1  ;;  %v2816_v2 = vrot.slane %v18347_v33, 3 }
 0x234   : > { %15682 = vmatprep.mubr.msk.bf16.mxu0 %vm493_vm3, %v4713_v37  ;;  %15696 = vmatprep.subr.bf16.mxu0 %v18466_v54  ;;  %v18490_v23 = vmax.f32 %v18091_v60, %v17421_v3  ;;  %v18493_v41 = vmax.f32 %v18087_v57, %v17420_v59  ;;  %21850 = vst [vmem:[#allocation15_spill] sm:$0xff] %v18499_v47  ;;  %21851 = vst [vmem:[#allocation16_spill] sm:$0xff] %v18501_v51  ;;  %v15394_v3 = vpop.f32.mrb[41].mxu1  ;;  %v15416_v59 = vpop.f32.mrb[25].mxu0  ;;  %v2103_v37 = vshrl.u32 %v1989_v44, 16 }
 0x235   : > { %17413 = vrot.lane.b32.xlu1 %v17412_v0, %s17709_s29  ;;  %v17429_v53 = vpop.permute.xlu0 %17428  ;;  %v4721_v10 = vsel %vm1790_vm4, %v4716_v15, %v4720_v9  ;;  %v18514_v0 = vrot.slane %v18434_v11, 2  ;;  %v2106_v15 = vshll.u32 %v1989_v44, 16  ;;  %v18517_v18 = vpop.f32.mrb[42].mxu1  ;;  %v5586_v47 = vrot.slane %v18444_v7, 2 }
 0x236   : > { %21848 = vst [vmem:[#allocation13_spill] sm:$0xff] %v18490_v23  ;;  %21849 = vst [vmem:[#allocation14_spill] sm:$0xff] %v18493_v41  ;;  %v17431_v52 = vunpack.i.h.bf16 %v17429_v53  ;;  %v17432_v57 = vpack.i.bf16 %v18490_v23, %v18493_v41  ;;  %v17430_v60 = vunpack.i.l.bf16 %v17429_v53  ;;  %v18519_v9 = vpop.f32.mrb[26].mxu0  ;;  %v21857_v23 = vshrl.u32 %v18295_v14, 16 }
 0x237   : > { %21852 = vst [vmem:[#allocation17_spill] sm:$0xff] %v18517_v18  ;;  %21853 = vst [vmem:[#allocation18_spill] sm:$0xff] %v18519_v9  ;;  %v18529_v53 = vsel %vm2227_vm5, %v18511_v56, %v18514_v0  ;;  %v15417_v3 = vpop.f32.mrb[27].mxu0  ;;  %v5587_v18 = vrot.slane %v18414_v28, 3 }
 0x238   : > { %15443 = vmatmul.mubr.msk.bf16.gmra.mrb[52].mxu1 %vm493_vm3, %v18347_v33  ;;  %v18535_v44 = vmax.f32 %v18151_v45, %v17431_v52  ;;  %v18538_v59 = vmax.f32 %v18143_v38, %v17430_v60  ;;  %v2108_v3 = vrot.slane %v2106_v15, 2  ;;  %v2110_v20 = vrot.slane %v21857_v23, 1  ;;  %v18550_v45 = vld [vmem:[%s21723_s2 + $0x20] sm:$0xff]  }
 0x239   : > { %15448 = vmatprep.mubr.msk.bf16.mxu1 %vm493_vm3, %v2000_v21  ;;  %17423 = vrot.lane.b32.xlu1 %v17422_v22, %s17708_s11  ;;  %v18524_v22 = vrot.slane %v18306_v25, 1  ;;  %v15395_v21 = vpop.f32.mrb[43].mxu1  ;;  %v2700_v15 = vrot.slane %v18351_v62, 3  ;;  %v2222_v25 = vld [vmem:[#allocation2] sm:$0xfc] }
 0x23a   : > { %15683 = vmatmul.mubr.msk.bf16.gmra.mrb[40].mxu0 %vm493_vm3, %v4721_v10  ;;  %v18532_v10 = vrot.slane %v18347_v33, 1  ;;  %21854 = vst [vmem:[#allocation19_spill] sm:$0xff] %v18535_v44  ;;  %21855 = vst [vmem:[#allocation20_spill] sm:$0xff] %v18538_v59  ;;  %v18540_v36 = vpop.f32.mrb[44].mxu1  ;;  %v2105_v21 = vrot.slane %v2103_v37, 1  ;;  %v17442_v42 = vpack.i.bf16 %v18535_v44, %v18538_v59  ;;  %v2704_v44 = vrot.slane %v18382_v13, 3 }
 0x23b   : > { %15688 = vmatprep.mubr.msk.bf16.mxu0 %vm493_vm3, %v18374_v17  ;;  %21856 = vst [vmem:[#allocation21_spill] sm:$0xff] %v18540_v36  ;;  %v15398_v41 = vpop.f32.mrb[45].mxu1  ;;  %v2002_v52 = vsel %vm1997_vm6, %v1999_v8, %v18524_v22  ;;  %v18572_v8 = vld [vmem:[%s21723_s2 + $0x18] sm:$0xff]   ;;  %v2701_v59 = vor.u32 %v2700_v15, %v2699_v34  ;;  %v2119_v33 = vrot.slane %v18351_v62, 2  ;;  %v18629_v15 = vrot.slane %v18408_v39, 2 }
 0x23c   : > { %v18552_v38 = vpop.f32.mrb[46].mxu1  ;;  %v18561_v41 = vrot.slane %v18374_v17, 2  ;;  %v18567_v23 = vsel %vm1997_vm6, %v18524_v22, %v18532_v10  ;;  %v2228_v27 = vrot.slane %v2222_v25, 2  ;;  %v21866_v25 = vrot.slane %v18295_v14, 2 }
 0x23d   : > { %17433 = vrot.lane.b32.xlu1 %v17432_v57, %s17709_s29  ;;  %21858 = vst [vmem:[#allocation22_spill] sm:$0xff] %v18552_v38  ;;  %v21859_v57 = vshll.u32 %v18295_v14, 16  ;;  %v15399_v37 = vpop.f32.mrb[47].mxu1  ;;  %v18603_v34 = vsel %vm2686_vm8, %v18357_v24, %v2701_v59  ;;  %v18696_v38 = vld [vmem:[%s21723_s2 + $0x20] sm:$0xff]  }
 0x23e   : > { %v2109_v37 = vor.u32 %v2108_v3, %v2105_v21  ;;  %v2114_v21 = vrot.slane %v18335_v30, 1  ;;  %v2115_v3 = vrot.slane %v18310_v32, 2  ;;  %v18613_v32 = vsel %vm2812_vm9, %v21741_v1, %v2816_v2  ;;  %v18633_v1 = vld [vmem:[#allocation2 + $0x20] sm:$0x3] }
 0x23f   : > { %v2111_v60 = vrot.slane %v21859_v57, 2  ;;  %v2703_v57 = vrot.slane %v18411_v63, 2  ;;  %21860 = vst [vmem:[#allocation23_spill] sm:$0xff] %v18613_v32  ;;  %v18635_v32 = vld [vmem:[#allocation2 + $0x40] sm:$0xff]  ;;  %v2123_v36 = vshrl.u32 %v18633_v1, 16 }
 0x240   : > { %15449 = vmatmul.mubr.msk.bf16.vlgmr.msra.gmra.mrb[48].mxu1 %vm493_vm3, %v2002_v52  ;;  %v18584_v52 = vsel %vm2227_vm5, %v18355_v35, %v18561_v41 }
 0x241   : > { %15452 = vmatprep.mubr.msk.bf16.mxu1 %vm493_vm3, %v18567_v23  ;;  %15457 = vmatpush3.bf16.msra.mxu1 %v18452_v31  ;;  %v2005_v31 = vrot.slane %v18372_v43, 1  ;;  %v2112_v46 = vor.u32 %v2111_v60, %v2110_v20  ;;  %v18605_v43 = vor.u32 %v2704_v44, %v2703_v57  ;;  %v4884_v20 = vld [vmem:[#allocation2 + $0x20] sm:$0xfe]  ;;  %v2118_v60 = vrot.slane %v18378_v5, 1 }
 0x242   : > { %15689 = vmatmul.mubr.msk.bf16.vlgmr.msra.gmra.mrb[36].mxu0 %vm493_vm3, %v18408_v39  ;;  %15466 = vmatprep.subr.bf16.mxu1 %v18550_v45  ;;  %v4892_v57 = vrot.slane %v4884_v20, 1  ;;  %v18657_v5 = vsel %vm2227_vm5, %v18561_v41, %v18629_v15  ;;  %v2125_v9 = vrot.slane %v2123_v36, 1  ;;  %v5003_v36 = vrot.slane %v18431_v61, 1 }
 0x243   : > { %15692 = vmatprep.mubr.msk.bf16.mxu0 %vm493_vm3, %v18394_v19  ;;  %15697 = vmatpush3.bf16.msra.mxu0 %v18466_v54  ;;  %v4893_v54 = vrot.slane %v18408_v39, 1  ;;  %v18617_v30 = vsel %vm2686_vm8, %v2701_v59, %v18605_v43  ;;  %v2006_v62 = vsel %vm1997_vm6, %v18532_v10, %v2005_v31  ;;  %v2113_v59 = vsel %vm2101_vm7, %v2109_v37, %v2112_v46 }
 0x244   : > { %15706 = vmatprep.subr.bf16.mxu0 %v18572_v8  ;;  %17443 = vrot.lane.b32.xlu1 %v17442_v42, %s17709_s29  ;;  %21861 = vst [vmem:[#allocation24_spill] sm:$0xff] %v18617_v30  ;;  %v18620_v42 = vrot.slane %v18374_v17, 3  ;;  %v18647_v37 = vor.u32 %v2115_v3, %v2114_v21  ;;  %21863 = vst [vmem:[#allocation26_spill] sm:$0xff] %v18657_v5  ;;  %v18666_v21 = vrot.slane %v18394_v19, 1  ;;  %v18683_v5 = vld [vmem:[%s21723_s2 + $0x28] sm:$0xff]  }
 0x245   : > { %v4894_v31 = vsel %vm1997_vm6, %v4892_v57, %v4893_v54  ;;  %v18663_v57 = vrot.slane %v18434_v11, 1 }
 0x246   : > { %v18639_v44 = vsel %vm2812_vm9, %v2816_v2, %v18620_v42  ;;  %v2126_v2 = vshll.u32 %v18633_v1, 16  ;;  %v4896_v51 = vsel %vm1997_vm6, %v4893_v54, %v18666_v21  ;;  %v18707_v54 = vor.u32 %v5587_v18, %v5586_v47 }
 0x247   : > { %21862 = vst [vmem:[#allocation25_spill] sm:$0xff] %v18639_v44 }
 0x248   : > { %15453 = vmatmul.mubr.msk.bf16.gmra.mrb[52].mxu1 %vm493_vm3, %v2006_v62  ;;  %v18649_v62 = vor.u32 %v2119_v33, %v2118_v60  ;;  %v2117_v60 = vsel %vm2101_vm7, %v2112_v46, %v18647_v37  ;;  %v18691_v46 = vsel %vm1997_vm6, %v18666_v21, %v18663_v57 }
 0x249   : > { %15458 = vmatprep.mubr.msk.bf16.mxu1 %vm493_vm3, %v2113_v59  ;;  %v18660_v59 = vrot.slane %v18635_v32, 2 }
 0x24a   : > { %15693 = vmatmul.mubr.msk.bf16.gmra.mrb[40].mxu0 %vm493_vm3, %v18434_v11  ;;  %v18678_v33 = vsel %vm2101_vm7, %v18647_v37, %v18649_v62 }
 0x24b   : > { %15698 = vmatprep.mubr.msk.bf16.mxu0 %vm493_vm3, %v4894_v31  ;;  %21864 = vst [vmem:[#allocation27_spill] sm:$0xff] %v18660_v59  ;;  %v18671_v3 = vsel %vm2227_vm5, %v18514_v0, %v18660_v59  ;;  %v4996_v31 = vshrl.u32 %v4884_v20, 16  ;;  %v2128_v59 = vrot.slane %v2126_v2, 2  ;;  %v3057_v2 = vrot.slane %v18431_v61, 2 }
 0x24c   : > { %21865 = vst [vmem:[#allocation28_spill] sm:$0xff] %v18671_v3  ;;  %v4999_v3 = vshll.u32 %v4884_v20, 16  ;;  %v5004_v20 = vrot.slane %v18419_v58, 2 }
 0x24d   : > { %v2129_v44 = vor.u32 %v2128_v59, %v2125_v9  ;;  %v4998_v40 = vrot.slane %v4996_v31, 1  ;;  %v4899_v59 = vrot.slane %v18438_v12, 1  ;;  %v2230_v31 = vsel %vm2227_vm5, %v2228_v27, %v21866_v25  ;;  %v18778_v25 = vld [vmem:[#allocation2 + $0x18] sm:$0xff] }
 0x24e   : > { %v5001_v30 = vrot.slane %v4999_v3, 2  ;;  %v5005_v49 = vor.u32 %v5004_v20, %v5003_v36  ;;  %v5011_v20 = vrot.slane %v18478_v6, 1  ;;  %v5012_v27 = vrot.slane %v18447_v50, 2 }
 0x24f   : > { %v2130_v9 = vsel %vm2101_vm7, %v18649_v62, %v2129_v44  ;;  %v21760_v44 = vrot.slane %v18408_v39, 3  ;;  %v4900_v12 = vsel %vm1997_vm6, %v18663_v57, %v4899_v59  ;;  %v3285_v59 = vrot.slane %v18382_v13, 4  ;;  %v17579_v13 = vld [vmem:[%s21723_s2 + $0x28] sm:$0xff]  }
 0x250   : > { %15459 = vmatmul.mubr.msk.bf16.vlgmr.msra.gmra.mrb[48].mxu1 %vm493_vm3, %v2117_v60  ;;  %v5590_v60 = vrot.slane %v18478_v6, 2  ;;  %v5002_v36 = vor.u32 %v5001_v30, %v4998_v40  ;;  %v18755_v30 = vrot.slane %v18635_v32, 3  ;;  %v5007_v6 = vrot.slane %v18444_v7, 1 }
 0x251   : > { %15462 = vmatprep.mubr.msk.bf16.mxu1 %vm493_vm3, %v18678_v33  ;;  %15467 = vmatpush3.bf16.msra.mxu1 %v18550_v45  ;;  %v3060_v45 = vrot.slane %v18419_v58, 3  ;;  %v18752_v40 = vsel %vm2812_vm9, %v18620_v42, %v21760_v44  ;;  %v18773_v7 = vor.u32 %v5012_v27, %v5011_v20 }
 0x252   : > { %15699 = vmatmul.mubr.msk.bf16.vlgmr.msra.gmra.mrb[36].mxu0 %vm493_vm3, %v4896_v51  ;;  %15476 = vmatprep.subr.bf16.mxu1 %v18683_v5  ;;  %v5591_v51 = vrot.slane %v18447_v50, 3  ;;  %v5006_v14 = vsel %vm2101_vm7, %v5002_v36, %v5005_v49  ;;  %v18765_v50 = vld [vmem:[#allocation2 + $0x40] sm:$0x3]  ;;  %v3289_v36 = vrot.slane %v18419_v58, 4 }
 0x253   : > { %15702 = vmatprep.mubr.msk.bf16.mxu0 %vm493_vm3, %v18691_v46  ;;  %15707 = vmatpush3.bf16.msra.mxu0 %v18572_v8  ;;  %v18717_v47 = vor.u32 %v3060_v45, %v3057_v2  ;;  %v21763_v2 = vrot.slane %v18394_v19, 3 }
 0x254   : > { %15716 = vmatprep.subr.bf16.mxu0 %v18696_v38  ;;  %v18719_v18 = vor.u32 %v5591_v51, %v5590_v60  ;;  %v5706_v60 = vrot.slane %v18434_v11, 3  ;;  %v5008_v11 = vrot.slane %v18414_v28, 2  ;;  %v17578_v28 = vld [vmem:[%s21723_s2 + $0x30] sm:$0xff]  }
 0x255   : > { %v18727_v8 = vsel %vm2686_vm8, %v18605_v43, %v18717_v47 }
 0x256   : > { %v18732_v3 = vsel %vm2686_vm8, %v18707_v54, %v18719_v18  ;;  %v18763_v45 = vsel %vm2812_vm9, %v21763_v2, %v5706_v60  ;;  %v18769_v51 = vsel %vm2812_vm9, %v5706_v60, %v18755_v30  ;;  %v5016_v60 = vshrl.u32 %v18765_v50, 16 }
 0x257   : > { %v21765_v2 = vrot.slane %v18635_v32, 4 }
 0x258   : > { %15463 = vmatmul.mubr.msk.bf16.gmra.mrb[52].mxu1 %vm493_vm3, %v2130_v9  ;;  %v3284_v9 = vrot.slane %v18411_v63, 3  ;;  %v5019_v63 = vshll.u32 %v18765_v50, 16 }
 0x259   : > { %15468 = vmatprep.mubr.msk.bf16.mxu1 %vm493_vm3, %v2230_v31  ;;  %v3288_v31 = vrot.slane %v18431_v61, 3  ;;  %v21761_v61 = vrot.slane %v18778_v25, 4 }
 0x25a   : > { %15703 = vmatmul.mubr.msk.bf16.gmra.mrb[40].mxu0 %vm493_vm3, %v4900_v12  ;;  %v18782_v12 = vor.u32 %v5008_v11, %v5007_v6  ;;  %v18791_v20 = vor.u32 %v3285_v59, %v3284_v9  ;;  %v5018_v11 = vrot.slane %v5016_v60, 1  ;;  %v5021_v9 = vrot.slane %v5019_v63, 2 }
 0x25b   : > { %15708 = vmatprep.mubr.msk.bf16.mxu0 %vm493_vm3, %v5006_v14  ;;  %v18793_v14 = vor.u32 %v3289_v36, %v3288_v31  ;;  %v21762_v31 = vrot.slane %v18408_v39, 4  ;;  %v5115_v36 = vld [vmem:[#allocation2 + $0x20] sm:$0xfc] }
 0x25c   : > { %v5010_v58 = vsel %vm2101_vm7, %v5005_v49, %v18782_v12  ;;  %v18806_v27 = vsel %vm2101_vm7, %v18782_v12, %v18773_v7  ;;  %v2235_v49 = vrot.slane %v18633_v1, 2  ;;  %v5022_v60 = vor.u32 %v5021_v9, %v5018_v11 }
 0x25d   : > { %v18811_v6 = vsel %vm3271_vm10, %v18791_v20, %v18793_v14  ;;  %v5120_v63 = vrot.slane %v5115_v36, 2  ;;  %v17580_v36 = vld [vmem:[%s21723_s2 + $0x38] sm:$0xff]  }
 0x25e   : > { %v2236_v1 = vsel %vm2227_vm5, %v18355_v35, %v2235_v49  ;;  %v2345_v35 = vrot.slane %v18374_v17, 1  ;;  %v18842_v49 = vshrl.u32 %v18635_v32, 16 }
 0x260   : > { %15469 = vmatmul.mubr.msk.bf16.vlgmr.msra.gmra.mrb[48].mxu1 %vm493_vm3, %v18330_v29  ;;  %v3401_v29 = vrot.slane %v18374_v17, 4  ;;  %v17582_v17 = vld [vmem:[%s21723_s2 + $0x30] sm:$0xff]  }
 0x261   : > { %15472 = vmatprep.mubr.msk.bf16.mxu1 %vm493_vm3, %v18366_v4  ;;  %15477 = vmatpush3.bf16.msra.mxu1 %v18683_v5  ;;  %v2328_v5 = vld [vmem:[#allocation2 + $0x8] sm:$0xfe] }
 0x262   : > { %15709 = vmatmul.mubr.msk.bf16.vlgmr.msra.gmra.mrb[36].mxu0 %vm493_vm3, %v5010_v58  ;;  %15486 = vmatprep.subr.bf16.mxu1 %v17578_v28  ;;  %v18820_v59 = vsel %vm363_vm1, %v21761_v61, %v3401_v29  ;;  %v2340_v58 = vrot.slane %v2328_v5, 1  ;;  %v18826_v44 = vsel %vm363_vm1, %v3401_v29, %v21762_v31  ;;  %v5023_v61 = vsel %vm2101_vm7, %v18773_v7, %v5022_v60 }
 0x263   : > { %15712 = vmatprep.mubr.msk.bf16.mxu0 %vm493_vm3, %v18806_v27  ;;  %15717 = vmatpush3.bf16.msra.mxu0 %v18696_v38  ;;  %v5122_v29 = vsel %vm2227_vm5, %v5120_v63, %v18629_v15  ;;  %v2444_v11 = vshrl.u32 %v2328_v5, 16  ;;  %v2447_v9 = vshll.u32 %v2328_v5, 16  ;;  %v5124_v5 = vsel %vm2227_vm5, %v18629_v15, %v18511_v56 }
 0x264   : > { %15726 = vmatprep.subr.bf16.mxu0 %v17579_v13  ;;  %v2342_v38 = vsel %vm1997_vm6, %v2340_v58, %v18524_v22  ;;  %v18845_v22 = vshll.u32 %v18635_v32, 16  ;;  %v2332_v58 = vld [vmem:[#allocation2 + $0x28] sm:$0x1] }
 0x265   : > { %v2347_v63 = vrot.slane %v2332_v58, 1  ;;  %v18882_v58 = vld [vmem:[#allocation2 + $0x28] sm:$0x3] }
 0x266   : > { %v6174_v60 = vrot.slane %v18845_v22, 4 }
 0x268   : > { %15473 = vmatmul.mubr.msk.bf16.gmra.mrb[52].mxu1 %vm493_vm3, %v2236_v1  ;;  %v6173_v1 = vrot.slane %v18842_v49, 3 }
 0x269   : > { %15478 = vmatprep.mubr.msk.bf16.mxu1 %vm493_vm3, %v2342_v38  ;;  %v18864_v38 = vld [vmem:[#allocation2 + $0x38] sm:$0xff] }
 0x26a   : > { %15713 = vmatmul.mubr.msk.bf16.gmra.mrb[40].mxu0 %vm493_vm3, %v5023_v61  ;;  %v2346_v61 = vsel %vm1997_vm6, %v18532_v10, %v2345_v35  ;;  %v2449_v10 = vrot.slane %v2447_v9, 2  ;;  %v2348_v9 = vsel %vm1997_vm6, %v2345_v35, %v2347_v63 }
 0x26b   : > { %15718 = vmatprep.mubr.msk.bf16.mxu0 %vm493_vm3, %v5122_v29  ;;  %v18868_v29 = vld [vmem:[#allocation2 + $0x28] sm:$0xfe] }
 0x270   : > { %15479 = vmatmul.mubr.msk.bf16.vlgmr.msra.gmra.mrb[48].mxu1 %vm493_vm3, %v18567_v23  ;;  %v2446_v23 = vrot.slane %v2444_v11, 1  ;;  %v5232_v11 = vrot.slane %v18868_v29, 1 }
 0x271   : > { %15482 = vmatprep.mubr.msk.bf16.mxu1 %vm493_vm3, %v2346_v61  ;;  %15487 = vmatpush3.bf16.msra.mxu1 %v17578_v28  ;;  %v18870_v61 = vor.u32 %v6174_v60, %v6173_v1  ;;  %v18873_v28 = vrot.slane %v18864_v38, 4  ;;  %v18899_v60 = vld [vmem:[#allocation2 + $0x20] sm:$0xff] }
 0x272   : > { %15719 = vmatmul.mubr.msk.bf16.vlgmr.msra.gmra.mrb[36].mxu0 %vm493_vm3, %v5124_v5  ;;  %15496 = vmatprep.subr.bf16.mxu1 %v17580_v36  ;;  %v2450_v31 = vor.u32 %v2449_v10, %v2446_v23  ;;  %v5127_v5 = vrot.slane %v18765_v50, 2  ;;  %v5234_v50 = vsel %vm1997_vm6, %v5232_v11, %v18666_v21  ;;  %v17581_v23 = vld [vmem:[%s21723_s2 + $0x40] sm:$0xff]   ;;  %v18906_v10 = vld [vmem:[#allocation2 + $0x30] sm:$0xff]  ;;  %v21764_v21 = vrot.slane %v18899_v60, 5 }
 0x273   : > { %15722 = vmatprep.mubr.msk.bf16.mxu0 %vm493_vm3, %v18529_v53  ;;  %15727 = vmatpush3.bf16.msra.mxu0 %v17579_v13  ;;  %21867 = vst [vmem:[#allocation29_spill] sm:$0xff] %v18870_v61  ;;  %21868 = vst [vmem:[#allocation30_spill] sm:$0xff] %v18873_v28  ;;  %v18891_v35 = vsel %vm363_vm1, %v18873_v28, %v21765_v2 }
 0x274   : > { %15736 = vmatprep.subr.bf16.mxu0 %v17582_v17  ;;  %v2459_v13 = vsel %vm2101_vm7, %v2450_v31, %v18647_v37  ;;  %v5128_v1 = vsel %vm2227_vm5, %v18514_v0, %v5127_v5  ;;  %21869 = vst [vmem:[#allocation31_spill] sm:$0xff] %v18891_v35  ;;  %v2479_v37 = vshrl.u32 %v18882_v58, 16  ;;  %v2482_v31 = vshll.u32 %v18882_v58, 16  ;;  %v18901_v0 = vld [vmem:[#allocation2 + $0x28] sm:$0xff] }
 0x275   : > { %v18910_v11 = vrot.slane %v18901_v0, 5  ;;  %v2477_v5 = vsel %vm2101_vm7, %v18649_v62, %v18558_v16  ;;  %v18964_v2 = vshll.u32 %v18901_v0, 16 }
 0x276   : > { %v2481_v63 = vrot.slane %v2479_v37, 1  ;;  %v2578_v37 = vld [vmem:[#allocation2 + $0x8] sm:$0xfc] }
 0x277   : > { %21870 = vst [vmem:[#allocation32_spill] sm:$0xff] %v18910_v11  ;;  %21875 = vst [vmem:[#allocation37_spill] sm:$0xff] %v18964_v2 }
 0x278   : > { %15483 = vmatmul.mubr.msk.bf16.gmra.mrb[52].mxu1 %vm493_vm3, %v2348_v9  ;;  %v2484_v9 = vrot.slane %v2482_v31, 2 }
 0x279   : > { %15488 = vmatprep.mubr.msk.bf16.mxu1 %vm493_vm3, %v2459_v13  ;;  %v21766_v13 = vrot.slane %v18635_v32, 1 }
 0x27a   : > { %15723 = vmatmul.mubr.msk.bf16.gmra.mrb[40].mxu0 %vm493_vm3, %v5128_v1  ;;  %v18921_v1 = vld [vmem:[%s21723_s2 + $0x38] sm:$0xff]  }
 0x27b   : > { %15728 = vmatprep.mubr.msk.bf16.mxu0 %vm493_vm3, %v5234_v50  ;;  %v18931_v50 = vrot.slane %v18906_v10, 5  ;;  %v5238_v62 = vsel %vm1997_vm6, %v18663_v57, %v21766_v13  ;;  %v2583_v57 = vrot.slane %v2578_v37, 2 }
 0x27d   : > { %21872 = vst [vmem:[#allocation34_spill] sm:$0xff] %v18931_v50  ;;  %v18943_v31 = vsel %vm3982_vm11, %v18910_v11, %v18931_v50 }
 0x27e   : > { %21873 = vst [vmem:[#allocation35_spill] sm:$0xff] %v18943_v31 }
 0x280   : > { %15489 = vmatmul.mubr.msk.bf16.vlgmr.msra.gmra.mrb[48].mxu1 %vm493_vm3, %v18678_v33  ;;  %v18928_v33 = vsel %vm3982_vm11, %v21764_v21, %v18910_v11  ;;  %v18961_v21 = vshrl.u32 %v18901_v0, 16  ;;  %v4451_v11 = vrot.slane %v18964_v2, 6 }
 0x281   : > { %15492 = vmatprep.mubr.msk.bf16.mxu1 %vm493_vm3, %v2477_v5  ;;  %15497 = vmatpush3.bf16.msra.mxu1 %v17580_v36  ;;  %21871 = vst [vmem:[#allocation33_spill] sm:$0xff] %v18928_v33  ;;  %v2485_v36 = vor.u32 %v2484_v9, %v2481_v63  ;;  %v18950_v5 = vshll.u32 %v18864_v38, 16  ;;  %v18994_v33 = vpop.f32.mrb[28].mxu0 }
 0x282   : > { %15729 = vmatmul.mubr.msk.bf16.vlgmr.msra.gmra.mrb[36].mxu0 %vm493_vm3, %v18691_v46  ;;  %15506 = vmatprep.subr.bf16.mxu1 %v17581_v23  ;;  %v18947_v46 = vshrl.u32 %v18864_v38, 16  ;;  %21874 = vst [vmem:[#allocation36_spill] sm:$0xff] %v18961_v21  ;;  %21880 = vst [vmem:[#allocation42_spill] sm:$0xff] %v18994_v33  ;;  %v15420_v28 = vpop.f32.mrb[29].mxu0  ;;  %v21895_v33 = vld [vmem:[#allocation10_spill] sm:$0xff] }
 0x283   : > { %15732 = vmatprep.mubr.msk.bf16.mxu0 %vm493_vm3, %v5238_v62  ;;  %15737 = vmatpush3.bf16.msra.mxu0 %v17582_v17  ;;  %v2486_v62 = vsel %vm2101_vm7, %v18558_v16, %v2485_v36  ;;  %v2585_v17 = vsel %vm2227_vm5, %v2583_v57, %v18314_v48  ;;  %v4230_v9 = vrot.slane %v18950_v5, 5  ;;  %v18969_v16 = vshrl.u32 %v18906_v10, 16 }
 0x284   : > { %15746 = vmatprep.subr.bf16.mxu0 %v18921_v1  ;;  %v4227_v63 = vrot.slane %v18947_v46, 4  ;;  %v18972_v36 = vshll.u32 %v18906_v10, 16  ;;  %v21770_v48 = vrot.slane %v18864_v38, 5  ;;  %v2688_v57 = vshrl.u32 %v2578_v37, 16 }
 0x285   : > { %21877 = vst [vmem:[#allocation39_spill] sm:$0xff] %v18969_v16  ;;  %v4571_v28 = vrot.slane %v18906_v10, 6 }
 0x286   : > { %v18966_v13 = vor.u32 %v4230_v9, %v4227_v63  ;;  %21878 = vst [vmem:[#allocation40_spill] sm:$0xff] %v18972_v36  ;;  %v18984_v63 = vsel %vm3982_vm11, %v18931_v50, %v21770_v48  ;;  %v4450_v9 = vrot.slane %v18961_v21, 5  ;;  %v4455_v31 = vrot.slane %v18972_v36, 6 }
 0x287   : > { %21879 = vst [vmem:[#allocation41_spill] sm:$0xff] %v18984_v63  ;;  %v4458_v63 = vrot.slane %v18947_v46, 5  ;;  %v4459_v50 = vrot.slane %v18950_v5, 6  ;;  %v2690_v35 = vrot.slane %v2688_v57, 2  ;;  %v2590_v36 = vrot.slane %v18882_v58, 2 }
 0x288   : > { %15493 = vmatmul.mubr.msk.bf16.gmra.mrb[52].mxu1 %vm493_vm3, %v2486_v62  ;;  %21876 = vst [vmem:[#allocation38_spill] sm:$0xff] %v18966_v13  ;;  %v2691_v62 = vshll.u32 %v2578_v37, 16  ;;  %v6387_v13 = vld [vmem:[#allocation2 + $0x40] sm:$0xff]  ;;  %v4454_v37 = vrot.slane %v18969_v16, 5  ;;  %v18996_v48 = vor.u32 %v4451_v11, %v4450_v9  ;;  %v21781_v58 = vrot.slane %v18864_v38, 6 }
 0x289   : > { %15498 = vmatprep.mubr.msk.bf16.mxu1 %vm493_vm3, %v2585_v17  ;;  %v18978_v17 = vld [vmem:[%s21723_s2 + $0x48] sm:$0xff]   ;;  %v19002_v16 = vshll.u32 %v6387_v13, 16 }
 0x28a   : > { %21881 = vst [vmem:[#allocation43_spill] sm:$0xff] %v18996_v48  ;;  %v4456_v61 = vor.u32 %v4455_v31, %v4454_v37  ;;  %v19032_v37 = vpop.f32.mrb[30].mxu0 }
 0x28b   : > { %21882 = vst [vmem:[#allocation44_spill] sm:$0xff] %v19002_v16  ;;  %21888 = vst [vmem:[#allocation50_spill] sm:$0xff] %v19032_v37 }
 0x28c   : > { %v19009_v11 = vsel %vm4441_vm12, %v18996_v48, %v4456_v61 }
 0x28d   : > { %21884 = vst [vmem:[#allocation46_spill] sm:$0xff] %v19009_v11 }
 0x290   : > { %15499 = vmatmul.mubr.msk.bf16.vlgmr.msra.gmra.mrb[48].mxu1 %vm493_vm3, %v18366_v4  ;;  %v2693_v4 = vrot.slane %v2691_v62, 3  ;;  %v19019_v62 = vld [vmem:[#allocation2 + $0x28] sm:$0x7] }
 0x291   : > { %15502 = vmatprep.mubr.msk.bf16.mxu1 %vm493_vm3, %v18584_v52  ;;  %15507 = vmatpush3.bf16.msra.mxu1 %v17581_v23  ;;  %v19004_v52 = vor.u32 %v4459_v50, %v4458_v63  ;;  %v21779_v23 = vrot.slane %v18901_v0, 6  ;;  %v2591_v50 = vsel %vm2227_vm5, %v18561_v41, %v2590_v36  ;;  %v19021_v63 = vshrl.u32 %v6387_v13, 16 }
 0x292   : > { %15516 = vmatprep.subr.bf16.mxu1 %v18978_v17  ;;  %v2694_v31 = vor.u32 %v2693_v4, %v2690_v35  ;;  %v19037_v36 = vsel %vm21837_vm13, %v4571_v28, %v21781_v58  ;;  %v15421_v4 = vpop.f32.mrb[31].mxu0 }
 0x293   : > { %21883 = vst [vmem:[#allocation45_spill] sm:$0xff] %v19004_v52  ;;  %v19013_v57 = vsel %vm4441_vm12, %v4456_v61, %v19004_v52  ;;  %21886 = vst [vmem:[#allocation48_spill] sm:$0xff] %v19021_v63  ;;  %v19026_v9 = vsel %vm21837_vm13, %v21779_v23, %v4571_v28  ;;  %v7574_v61 = vrot.slane %v19002_v16, 1 }
 0x294   : > { %21885 = vst [vmem:[#allocation47_spill] sm:$0xff] %v19013_v57  ;;  %21887 = vst [vmem:[#allocation49_spill] sm:$0xff] %v19026_v9  ;;  %v2698_v35 = vsel %vm2686_vm8, %v2694_v31, %v18357_v24  ;;  %v2708_v9 = vshrl.u32 %v19019_v62, 16  ;;  %v2711_v24 = vshll.u32 %v19019_v62, 16  ;;  %v19047_v31 = vpop.f32.mrb[32].mxu0 }
 0x295   : > { %21889 = vst [vmem:[#allocation51_spill] sm:$0xff] %v19037_v36  ;;  %v19043_v23 = vor.u32 %v7574_v61, %v19021_v63  ;;  %v15424_v28 = vpop.f32.mrb[33].mxu0  ;;  %v19054_v61 = vld [vmem:[%s21723_s2 + $0x50] sm:$0xff]  }
 0x296   : > { %v2710_v13 = vrot.slane %v2708_v9, 2  ;;  %v2713_v4 = vrot.slane %v2711_v24, 3  ;;  %v21893_v24 = vld [vmem:[#allocation24_spill] sm:$0xff] }
 0x297   : > { %21890 = vst [vmem:[#allocation52_spill] sm:$0xff] %v19043_v23 }
 0x298   : > { %15503 = vmatmul.mubr.msk.bf16.gmra.mrb[52].mxu1 %vm493_vm3, %v2591_v50 }
 0x299   : > { %15508 = vmatprep.mubr.msk.bf16.mxu1 %vm493_vm3, %v2698_v35 }
 0x29a   : > { %v17384_v50 = vpop.permute.xlu1 %17383 }
 0x29b   : > { %v17386_v52 = vunpack.i.h.bf16 %v17384_v50  ;;  %v17385_v57 = vunpack.i.l.bf16 %v17384_v50  ;;  %v19058_v50 = vpop.f32.mrb[34].mxu0 }
 0x29c   : > { %v15425_v28 = vpop.f32.mrb[35].mxu0 }
 0x29d   : > { %v1122_v58 = vmax.f32 %v18385_v55, %v17386_v52  ;;  %v1121_v35 = vmax.f32 %v18388_v26, %v17385_v57  ;;  %v21891_v52 = vld [vmem:[#allocation7_spill] sm:$0xff]  ;;  %v21892_v57 = vld [vmem:[#allocation8_spill] sm:$0xff]  ;;  %v21894_v28 = vld [vmem:[#allocation9_spill] sm:$0xff] }
 0x29e   : > { %v17394_v36 = vpop.permute.xlu1 %17393 }
 0x29f   : > { %v1128_v23 = vmax.f32 %v1122_v58, 0.0  ;;  %v1127_v11 = vmax.f32 %v1121_v35, 0.0  ;;  %v17396_v48 = vunpack.i.h.bf16 %v17394_v36  ;;  %v17395_v16 = vunpack.i.l.bf16 %v17394_v36  ;;  %v2807_v58 = vld [vmem:[#allocation2 + $0x8] sm:$0xf8] }
 0x2a0   : > { %15509 = vmatmul.mubr.msk.bf16.vlgmr.msra.gmra.mrb[48].mxu1 %vm493_vm3, %v18603_v34  ;;  %v5336_v35 = vshrl.u32 %v18868_v29, 16  ;;  %v5339_v36 = vshll.u32 %v18868_v29, 16  ;;  %v21795_v34 = vshrl.u32 %v18778_v25, 16 }
 0x2a1   : > { %v1133_v55 = vpack.c.bf16 %v1128_v23, %v1127_v11  ;;  %v1124_v26 = vmax.f32 %v21891_v52, %v17396_v48  ;;  %v1123_v9 = vmax.f32 %v21892_v57, %v17395_v16  ;;  %15512 = vmatprep.mubr.msk.bf16.mxu1 %vm493_vm3, %v21893_v24  ;;  %15517 = vmatpush3.bf16.msra.mxu1 %v18978_v17  ;;  %v2813_v24 = vrot.slane %v2807_v58, 3 }
 0x2a2   : > { %15526 = vmatprep.subr.bf16.mxu1 %v19054_v61  ;;  %v2714_v11 = vor.u32 %v2713_v4, %v2710_v13  ;;  %v5338_v29 = vrot.slane %v5336_v35, 1  ;;  %v5341_v2 = vrot.slane %v5339_v36, 2  ;;  %v21898_v35 = vld [vmem:[#allocation11_spill] sm:$0xff] }
 0x2a3   : > { %1136 = vst.msk [vmem:[#allocation2 + $0x48] sm:$0xff] %vm493_vm3, %v1133_v55  ;;  %v1130_v48 = vmax.f32 %v1124_v26, 0.0  ;;  %v1129_v16 = vmax.f32 %v1123_v9, 0.0  ;;  %v17404_v23 = vpop.permute.xlu1 %17403  ;;  %v21896_v26 = vld [vmem:[#allocation6_spill] sm:$0xff] }
 0x2a4   : > { %v17406_v52 = vunpack.i.h.bf16 %v17404_v23  ;;  %v17405_v57 = vunpack.i.l.bf16 %v17404_v23  ;;  %v2715_v55 = vsel %vm2686_vm8, %v18605_v43, %v2714_v11  ;;  %v21897_v9 = vrot.slane %v21896_v26, 3 }
 0x2a5   : > { %v1134_v17 = vpack.c.bf16 %v1130_v48, %v1129_v16  ;;  %v21899_v16 = vld [vmem:[#allocation12_spill] sm:$0xff] }
 0x2a6   : > { %v1126_v63 = vmax.f32 %v21894_v28, %v17406_v52  ;;  %v1125_v37 = vmax.f32 %v21895_v33, %v17405_v57  ;;  %v2815_v13 = vsel %vm2812_vm9, %v2813_v24, %v21897_v9 }
 0x2a7   : > { %1137 = vst.msk [vmem:[#allocation2 + $0x50] sm:$0xff] %vm493_vm3, %v1134_v17  ;;  %v17414_v21 = vpop.permute.xlu1 %17413  ;;  %v5342_v17 = vor.u32 %v5341_v2, %v5338_v29 }
 0x2a8   : > { %v1132_v4 = vmax.f32 %v1126_v63, 0.0  ;;  %v1131_v23 = vmax.f32 %v1125_v37, 0.0  ;;  %v17416_v48 = vunpack.i.h.bf16 %v17414_v21  ;;  %v17415_v58 = vunpack.i.l.bf16 %v17414_v21  ;;  %15513 = vmatmul.mubr.msk.bf16.gmra.mrb[52].mxu1 %vm493_vm3, %v2715_v55 }
 0x2a9   : > { %15518 = vmatprep.mubr.msk.bf16.mxu1 %vm493_vm3, %v2815_v13  ;;  %v21900_v21 = vrot.slane %v18635_v32, 1  ;;  %v21901_v13 = vld [vmem:[#allocation5_spill] sm:$0xff]  ;;  %v5351_v2 = vsel %vm2101_vm7, %v5342_v17, %v18782_v12 }
 0x2aa   : > { %v1135_v33 = vpack.c.bf16 %v1132_v4, %v1131_v23  ;;  %v1336_v36 = vmax.f32 %v21898_v35, %v17416_v48  ;;  %v1335_v52 = vmax.f32 %v21899_v16, %v17415_v58  ;;  %v5224_v57 = vld [vmem:[#allocation2 + $0x48] sm:$0x1]  ;;  %v21902_v23 = vld [vmem:[#allocation4_spill] sm:$0xff]  ;;  %v19101_v58 = vld [vmem:[%s21723_s2 + $0x58] sm:$0xff]   ;;  %v5364_v35 = vrot.slane %v18842_v49, 1 }
 0x2ab   : > { %v17424_v11 = vpop.permute.xlu1 %17423  ;;  %v5239_v28 = vrot.slane %v5224_v57, 1  ;;  %v19096_v29 = vld [vmem:[#allocation2 + $0x48] sm:$0x3]  ;;  %v5367_v57 = vrot.slane %v18845_v22, 2 }
 0x2ac   : > { %1138 = vst.msk [vmem:[#allocation2 + $0x58] sm:$0xff] %vm493_vm3, %v1135_v33  ;;  %v1342_v24 = vmax.f32 %v1336_v36, 0.0  ;;  %v1341_v63 = vmax.f32 %v1335_v52, 0.0  ;;  %v17426_v37 = vunpack.i.h.bf16 %v17424_v11  ;;  %v17425_v26 = vunpack.i.l.bf16 %v17424_v11  ;;  %v21903_v52 = vld [vmem:[#allocation23_spill] sm:$0xff]  ;;  %v21904_v17 = vld [vmem:[#allocation25_spill] sm:$0xff] }
 0x2ad   : > { %v5240_v55 = vsel %vm1997_vm6, %v21900_v21, %v5239_v28  ;;  %v5371_v11 = vshrl.u32 %v19096_v29, 16  ;;  %v5374_v28 = vshll.u32 %v19096_v29, 16  ;;  %v2820_v21 = vrot.slane %v19019_v62, 3 }
 0x2ae   : > { %v1347_v9 = vpack.c.bf16 %v1342_v24, %v1341_v63  ;;  %v19088_v4 = vmax.f32 %v21901_v13, %v17426_v37  ;;  %v19091_v48 = vmax.f32 %v21902_v23, %v17425_v26  ;;  %15733 = vmatmul.mubr.msk.bf16.gmra.mrb[40].mxu0 %vm493_vm3, %v5240_v55  ;;  %v21905_v24 = vld [vmem:[#allocation13_spill] sm:$0xff]  ;;  %v21906_v37 = vld [vmem:[#allocation14_spill] sm:$0xff]  ;;  %v5368_v23 = vor.u32 %v5367_v57, %v5364_v35 }
 0x2af   : > { %v17434_v33 = vpop.permute.xlu1 %17433  ;;  %15738 = vmatprep.mubr.msk.bf16.mxu0 %vm493_vm3, %v5351_v2  ;;  %v2913_v55 = vld [vmem:[#allocation2 + $0x10] sm:$0xfc]  ;;  %v19125_v2 = vld [vmem:[%s21723_s2 + $0x40] sm:$0xff]  }
 0x2b0   : > { %1350 = vst.msk [vmem:[#allocation2 + $0x60] sm:$0xff] %vm493_vm3, %v1347_v9  ;;  %v17436_v36 = vunpack.i.h.bf16 %v17434_v33  ;;  %v17435_v16 = vunpack.i.l.bf16 %v17434_v33  ;;  %15519 = vmatmul.mubr.msk.bf16.vlgmr.msra.gmra.mrb[48].mxu1 %vm493_vm3, %v21903_v52  ;;  %v17437_v12 = vpack.i.bf16 %v19088_v4, %v19091_v48  ;;  %v5373_v33 = vrot.slane %v5371_v11, 1  ;;  %v21907_v52 = vld [vmem:[#allocation17_spill] sm:$0xff] }
 0x2b1   : > { %15522 = vmatprep.mubr.msk.bf16.mxu1 %vm493_vm3, %v21904_v17  ;;  %15527 = vmatpush3.bf16.msra.mxu1 %v19054_v61  ;;  %v2926_v61 = vrot.slane %v18778_v25, 2  ;;  %v5369_v62 = vsel %vm2101_vm7, %v18773_v7, %v5368_v23  ;;  %v2925_v35 = vrot.slane %v2913_v55, 2  ;;  %v2821_v11 = vsel %vm2812_vm9, %v18620_v42, %v2820_v21  ;;  %v21911_v21 = vld [vmem:[#allocation20_spill] sm:$0xff] }
 0x2b2   : > { %v1338_v63 = vmax.f32 %v21905_v24, %v17436_v36  ;;  %v1337_v26 = vmax.f32 %v21906_v37, %v17435_v16  ;;  %17438 = vrot.lane.b32.xlu0 %v17437_v12, %s17709_s29  ;;  %15536 = vmatprep.subr.bf16.mxu1 %v19101_v58  ;;  %v5376_v36 = vrot.slane %v5374_v28, 2  ;;  %v21908_v12 = vld [vmem:[#allocation15_spill] sm:$0xff]  ;;  %v5470_v28 = vld [vmem:[#allocation2 + $0x28] sm:$0xfc] }
 0x2b3   : > { %v21909_v17 = vpack.i.bf16 %v21907_v52, %v21908_v12  ;;  %v19139_v37 = vld [vmem:[#allocation2 + $0x48] sm:$0xff]  ;;  %v2927_v7 = vsel %vm2227_vm5, %v2925_v35, %v2926_v61 }
 0x2b4   : > { %v1344_v9 = vmax.f32 %v1338_v63, 0.0  ;;  %v1343_v13 = vmax.f32 %v1337_v26, 0.0 }
 0x2b6   : > { %v1348_v16 = vpack.c.bf16 %v1344_v9, %v1343_v13  ;;  %17448 = vrot.lane.b32.xlu0 %v21909_v17, %s17708_s11  ;;  %15739 = vmatmul.mubr.msk.bf16.vlgmr.msra.gmra.mrb[36].mxu0 %vm493_vm3, %v18806_v27  ;;  %v17444_v57 = vpop.permute.xlu1 %17443  ;;  %v5377_v27 = vor.u32 %v5376_v36, %v5373_v33  ;;  %v21912_v13 = vld [vmem:[#allocation22_spill] sm:$0xff]  ;;  %v21913_v17 = vld [vmem:[#allocation21_spill] sm:$0xff]  ;;  %v21916_v33 = vrot.slane %v18635_v32, 4 }
 0x2b7   : > { %15747 = vmatpush3.bf16.msra.mxu0 %v18921_v1  ;;  %15742 = vmatprep.mubr.msk.bf16.mxu0 %vm493_vm3, %v5369_v62  ;;  %v17446_v24 = vunpack.i.h.bf16 %v17444_v57  ;;  %v17445_v63 = vunpack.i.l.bf16 %v17444_v57  ;;  %v21910_v1 = vld [vmem:[#allocation19_spill] sm:$0xff]  ;;  %v21914_v62 = vpack.i.bf16 %v21912_v13, %v21913_v17  ;;  %v5475_v57 = vrot.slane %v5470_v28, 2 }
 0x2b8   : > { %1351 = vst.msk [vmem:[#allocation2 + $0x68] sm:$0xff] %vm493_vm3, %v1348_v16  ;;  %15523 = vmatmul.mubr.msk.bf16.gmra.mrb[52].mxu1 %vm493_vm3, %v2821_v11  ;;  %15756 = vmatprep.subr.bf16.mxu0 %v19125_v2  ;;  %v19153_v16 = vrot.slane %v19139_v37, 4 }
 0x2b9   : > { %15528 = vmatprep.mubr.msk.bf16.mxu1 %vm493_vm3, %v2927_v7  ;;  %v1550_v26 = vmax.f32 %v21910_v1, %v17446_v24  ;;  %v1549_v9 = vmax.f32 %v21911_v21, %v17445_v63  ;;  %v5378_v24 = vsel %vm2101_vm7, %v5368_v23, %v5377_v27  ;;  %v3029_v63 = vshrl.u32 %v2913_v55, 16  ;;  %v17589_v23 = vld [vmem:[%s21723_s2 + $0x60] sm:$0xff]  }
 0x2ba   : > { %17458 = vrot.lane.b32.xlu0 %v21914_v62, %s17708_s11  ;;  %21915 = vst [vmem:[#allocation7_spill] sm:$0xff] %v19153_v16  ;;  %v19161_v36 = vsel %vm363_vm1, %v21916_v33, %v19153_v16  ;;  %v19165_v21 = vshrl.u32 %v19139_v37, 16  ;;  %v5477_v32 = vsel %vm2227_vm5, %v5475_v57, %v18511_v56  ;;  %v3032_v7 = vshll.u32 %v2913_v55, 16 }
 0x2bb   : > { %v1556_v11 = vmax.f32 %v1550_v26, 0.0  ;;  %v1555_v35 = vmax.f32 %v1549_v9, 0.0  ;;  %v21917_v26 = vld [vmem:[#allocation18_spill] sm:$0xff]  ;;  %v21918_v9 = vld [vmem:[#allocation16_spill] sm:$0xff]  ;;  %v19178_v27 = vshll.u32 %v19139_v37, 16  ;;  %v3039_v56 = vrot.slane %v21795_v34, 2 }
 0x2bc   : > { %v21919_v62 = vpack.i.bf16 %v21917_v26, %v21918_v9  ;;  %v21920_v55 = vshll.u32 %v18778_v25, 16  ;;  %v3031_v33 = vrot.slane %v3029_v63, 2  ;;  %v19199_v63 = vld [vmem:[#allocation2 + $0x50] sm:$0xff] }
 0x2bd   : > { %v1561_v1 = vpack.c.bf16 %v1556_v11, %v1555_v35  ;;  %v2929_v11 = vsel %vm2227_vm5, %v2926_v61, %v18561_v41  ;;  %v21921_v35 = vld [vmem:[#allocation26_spill] sm:$0xff]  ;;  %v6756_v41 = vrot.slane %v19165_v21, 4 }
 0x2be   : > { %17468 = vrot.lane.b32.xlu0 %v21919_v62, %s17708_s11  ;;  %15743 = vmatmul.mubr.msk.bf16.gmra.mrb[40].mxu0 %vm493_vm3, %v5378_v24  ;;  %v3042_v57 = vrot.slane %v21920_v55, 3  ;;  %v2917_v61 = vld [vmem:[#allocation2 + $0x30] sm:$0x3]  ;;  %v3034_v24 = vrot.slane %v3032_v7, 3  ;;  %v5579_v62 = vshrl.u32 %v5470_v28, 16  ;;  %v17588_v55 = vld [vmem:[%s21723_s2 + $0x48] sm:$0xff]  }
 0x2bf   : > { %15748 = vmatprep.mubr.msk.bf16.mxu0 %vm493_vm3, %v5477_v32  ;;  %1564 = vst.msk [vmem:[#allocation2 + $0x78] sm:$0xff] %vm493_vm3, %v1561_v1  ;;  %v5582_v1 = vshll.u32 %v5470_v28, 16  ;;  %v6757_v32 = vrot.slane %v19178_v27, 5 }
 0x2c0   : > { %15529 = vmatmul.mubr.msk.bf16.vlgmr.msra.gmra.mrb[48].mxu1 %vm493_vm3, %v2929_v11  ;;  %v3043_v11 = vor.u32 %v3042_v57, %v3039_v56  ;;  %v5581_v7 = vrot.slane %v5579_v62, 2  ;;  %v21922_v56 = vld [vmem:[#allocation28_spill] sm:$0xff] }
 0x2c1   : > { %15532 = vmatprep.mubr.msk.bf16.mxu1 %vm493_vm3, %v21921_v35  ;;  %15537 = vmatpush3.bf16.msra.mxu1 %v19101_v58  ;;  %v19197_v34 = vor.u32 %v6757_v32, %v6756_v41  ;;  %v2932_v35 = vrot.slane %v2917_v61, 2  ;;  %v3035_v58 = vor.u32 %v3034_v24, %v3031_v33  ;;  %v5584_v16 = vrot.slane %v5582_v1, 3  ;;  %v21923_v24 = vld [vmem:[#allocation27_spill] sm:$0xff] }
 0x2c2   : > { %15546 = vmatprep.subr.bf16.mxu1 %v17589_v23  ;;  %v19211_v41 = vshll.u32 %v19199_v63, 16 }
 0x2c3   : > { %v2933_v28 = vsel %vm2227_vm5, %v18629_v15, %v2932_v35  ;;  %v3044_v57 = vsel %vm2686_vm8, %v3035_v58, %v3043_v11  ;;  %v5585_v33 = vor.u32 %v5584_v16, %v5581_v7  ;;  %v19218_v15 = vshrl.u32 %v19199_v63, 16  ;;  %v19228_v16 = vld [vmem:[#allocation2 + $0x48] sm:$0x7] }
 0x2c4   : > { %v21798_v61 = vrot.slane %v19211_v41, 1  ;;  %v17591_v35 = vld [vmem:[%s21723_s2 + $0x68] sm:$0xff]   ;;  %v3053_v7 = vsel %vm2686_vm8, %v3043_v11, %v18605_v43  ;;  %v3163_v43 = vld [vmem:[#allocation2 + $0x10] sm:$0xf8] }
 0x2c6   : > { %15749 = vmatmul.mubr.msk.bf16.vlgmr.msra.gmra.mrb[36].mxu0 %vm493_vm3, %v18529_v53  ;;  %v5482_v53 = vrot.slane %v19096_v29, 2  ;;  %v5589_v29 = vsel %vm2686_vm8, %v5585_v33, %v18707_v54  ;;  %v19236_v58 = vor.u32 %v21798_v61, %v19218_v15  ;;  %v5594_v54 = vrot.slane %v18842_v49, 2  ;;  %v17590_v49 = vld [vmem:[%s21723_s2 + $0x50] sm:$0xff]   ;;  %v5698_v61 = vld [vmem:[#allocation2 + $0x28] sm:$0xf8] }
 0x2c7   : > { %15757 = vmatpush3.bf16.msra.mxu0 %v19125_v2  ;;  %15752 = vmatprep.mubr.msk.bf16.mxu0 %vm493_vm3, %v21922_v56  ;;  %v19215_v2 = vld [vmem:[#allocation2 + $0x30] sm:$0x7]  ;;  %v5602_v33 = vshll.u32 %v19228_v16, 16 }
 0x2c8   : > { %15533 = vmatmul.mubr.msk.bf16.gmra.mrb[52].mxu1 %vm493_vm3, %v2933_v28  ;;  %15766 = vmatprep.subr.bf16.mxu0 %v17588_v55  ;;  %v5483_v62 = vsel %vm2227_vm5, %v21923_v24, %v5482_v53  ;;  %v3064_v1 = vshrl.u32 %v19215_v2, 16  ;;  %v3067_v32 = vshll.u32 %v19215_v2, 16  ;;  %v5595_v28 = vrot.slane %v18845_v22, 3 }
 0x2c9   : > { %15538 = vmatprep.mubr.msk.bf16.mxu1 %vm493_vm3, %v3044_v57  ;;  %v5599_v53 = vshrl.u32 %v19228_v16, 16  ;;  %v7339_v22 = vrot.slane %v19218_v15, 5 }
 0x2ca   : > { %v3066_v56 = vrot.slane %v3064_v1, 2  ;;  %v3069_v57 = vrot.slane %v3067_v32, 3  ;;  %v19248_v11 = vor.u32 %v5595_v28, %v5594_v54  ;;  %v5604_v32 = vrot.slane %v5602_v33, 3 }
 0x2cc   : > { %v3070_v1 = vor.u32 %v3069_v57, %v3066_v56  ;;  %v5703_v57 = vrot.slane %v5698_v61, 3 }
 0x2ce   : > { %15753 = vmatmul.mubr.msk.bf16.gmra.mrb[40].mxu0 %vm493_vm3, %v5483_v62  ;;  %v3169_v62 = vrot.slane %v18778_v25, 3  ;;  %v3071_v28 = vsel %vm2686_vm8, %v18717_v47, %v3070_v1  ;;  %v21924_v47 = vrot.slane %v18394_v19, 3  ;;  %v17593_v1 = vld [vmem:[%s21723_s2 + $0x70] sm:$0xff]  }
 0x2cf   : > { %15758 = vmatprep.mubr.msk.bf16.mxu0 %vm493_vm3, %v5589_v29  ;;  %v5597_v29 = vsel %vm2686_vm8, %v18719_v18, %v19248_v11  ;;  %v7890_v18 = vrot.slane %v19218_v15, 1 }
 0x2d0   : > { %15539 = vmatmul.mubr.msk.bf16.vlgmr.msra.gmra.mrb[48].mxu1 %vm493_vm3, %v3053_v7  ;;  %v3168_v7 = vrot.slane %v3163_v43, 3  ;;  %v5705_v33 = vsel %vm2812_vm9, %v5703_v57, %v21924_v47  ;;  %v3175_v57 = vrot.slane %v19215_v2, 3  ;;  %v5803_v47 = vld [vmem:[#allocation2 + $0x30] sm:$0xfc] }
 0x2d1   : > { %15542 = vmatprep.mubr.msk.bf16.mxu1 %vm493_vm3, %v18727_v8  ;;  %15547 = vmatpush3.bf16.msra.mxu1 %v17589_v23  ;;  %v7340_v8 = vrot.slane %v19211_v41, 6  ;;  %v5601_v23 = vrot.slane %v5599_v53, 2  ;;  %v7891_v53 = vrot.slane %v19211_v41, 2 }
 0x2d2   : > { %15556 = vmatprep.subr.bf16.mxu1 %v17591_v35  ;;  %v3170_v56 = vsel %vm2812_vm9, %v3168_v7, %v3169_v62 }
 0x2d3   : > { %v19261_v54 = vor.u32 %v7340_v8, %v7339_v22  ;;  %v3273_v22 = vshrl.u32 %v3163_v43, 16  ;;  %v3276_v8 = vshll.u32 %v3163_v43, 16  ;;  %v19280_v61 = vor.u32 %v7891_v53, %v7890_v18  ;;  %v6972_v43 = vld [vmem:[#allocation2 + $0x58] sm:$0xff] }
 0x2d4   : > { %v19298_v18 = vshll.u32 %v6972_v43, 16 }
 0x2d6   : > { %15759 = vmatmul.mubr.msk.bf16.vlgmr.msra.gmra.mrb[36].mxu0 %vm493_vm3, %v18732_v3  ;;  %v5605_v3 = vor.u32 %v5604_v32, %v5601_v23  ;;  %v3172_v23 = vsel %vm2812_vm9, %v3169_v62, %v18620_v42  ;;  %v21925_v32 = vshrl.u32 %v18778_v25, 16  ;;  %v17592_v42 = vld [vmem:[%s21723_s2 + $0x58] sm:$0xff]   ;;  %v19295_v62 = vshrl.u32 %v6972_v43, 16 }
 0x2d7   : > { %15767 = vmatpush3.bf16.msra.mxu0 %v17588_v55  ;;  %15762 = vmatprep.mubr.msk.bf16.mxu0 %vm493_vm3, %v5597_v29  ;;  %v21926_v29 = vshll.u32 %v18778_v25, 16 }
 0x2d8   : > { %15543 = vmatmul.mubr.msk.bf16.gmra.mrb[52].mxu1 %vm493_vm3, %v3071_v28  ;;  %15776 = vmatprep.subr.bf16.mxu0 %v17590_v49  ;;  %v5606_v55 = vsel %vm2686_vm8, %v19248_v11, %v5605_v3  ;;  %v3280_v19 = vrot.slane %v21925_v32, 3  ;;  %v3275_v28 = vrot.slane %v3273_v22, 3  ;;  %v8238_v2 = vrot.slane %v19295_v62, 1  ;;  %v19314_v22 = vld [vmem:[#allocation2 + $0x30] sm:$0xf] }
 0x2d9   : > { %15548 = vmatprep.mubr.msk.bf16.mxu1 %vm493_vm3, %v3170_v56  ;;  %v3281_v7 = vrot.slane %v21926_v29, 4  ;;  %v3278_v56 = vrot.slane %v3276_v8, 4  ;;  %v3293_v32 = vshrl.u32 %v19314_v22, 16  ;;  %v17595_v29 = vld [vmem:[%s21723_s2 + $0x78] sm:$0xff]  }
 0x2db   : > { %v3282_v3 = vor.u32 %v3281_v7, %v3280_v19  ;;  %v3296_v19 = vshll.u32 %v19314_v22, 16  ;;  %v3295_v43 = vrot.slane %v3293_v32, 3 }
 0x2dd   : > { %v3287_v7 = vsel %vm3271_vm10, %v3282_v3, %v18791_v20  ;;  %v17594_v20 = vld [vmem:[%s21723_s2 + $0x60] sm:$0xff]  }
 0x2de   : > { %15763 = vmatmul.mubr.msk.bf16.gmra.mrb[40].mxu0 %vm493_vm3, %v5606_v55 }
 0x2df   : > { %15768 = vmatprep.mubr.msk.bf16.mxu0 %vm493_vm3, %v5705_v33  ;;  %v5816_v33 = vrot.slane %v18864_v38, 2 }
 0x2e0   : > { %15549 = vmatmul.mubr.msk.bf16.vlgmr.msra.gmra.mrb[48].mxu1 %vm493_vm3, %v3172_v23 }
 0x2e1   : > { %15552 = vmatprep.mubr.msk.bf16.mxu1 %vm493_vm3, %v18752_v40  ;;  %15557 = vmatpush3.bf16.msra.mxu1 %v17591_v35  ;;  %v3279_v40 = vor.u32 %v3278_v56, %v3275_v28  ;;  %v21927_v35 = vrot.slane %v18408_v39, 3  ;;  %v3298_v28 = vrot.slane %v3296_v19, 4  ;;  %v10443_v56 = vld [vmem:[#allocation2 + $0x60] sm:$0xff] }
 0x2e2   : > { %15566 = vmatprep.subr.bf16.mxu1 %v17593_v1 }
 0x2e3   : > { %v3176_v53 = vsel %vm2812_vm9, %v21927_v35, %v3175_v57  ;;  %v3283_v55 = vsel %vm3271_vm10, %v3279_v40, %v3282_v3  ;;  %v5820_v57 = vrot.slane %v19139_v37, 2  ;;  %v3392_v40 = vld [vmem:[#allocation2 + $0x10] sm:$0xf0]  ;;  %v5919_v35 = vshrl.u32 %v5803_v47, 16 }
 0x2e4   : > { %v19337_v3 = vshrl.u32 %v10443_v56, 16 }
 0x2e6   : > { %15769 = vmatmul.mubr.msk.bf16.vlgmr.msra.gmra.mrb[36].mxu0 %vm493_vm3, %v18763_v45  ;;  %v5710_v45 = vrot.slane %v19228_v16, 3 }
 0x2e7   : > { %15777 = vmatpush3.bf16.msra.mxu0 %v17590_v49  ;;  %15772 = vmatprep.mubr.msk.bf16.mxu0 %vm493_vm3, %v18769_v51  ;;  %v8241_v49 = vrot.slane %v19298_v18, 2  ;;  %v5815_v51 = vrot.slane %v5803_v47, 2 }
 0x2e8   : > { %15553 = vmatmul.mubr.msk.bf16.gmra.mrb[52].mxu1 %vm493_vm3, %v3176_v53  ;;  %15786 = vmatprep.subr.bf16.mxu0 %v17592_v42  ;;  %v5711_v23 = vsel %vm2812_vm9, %v18755_v30, %v5710_v45  ;;  %v5922_v53 = vshll.u32 %v5803_v47, 16  ;;  %v5821_v45 = vsel %vm2227_vm5, %v21923_v24, %v5820_v57  ;;  %v5929_v47 = vrot.slane %v18947_v46, 2 }
 0x2e9   : > { %15558 = vmatprep.mubr.msk.bf16.mxu1 %vm493_vm3, %v3283_v55  ;;  %v19316_v8 = vor.u32 %v8241_v49, %v8238_v2  ;;  %v5817_v16 = vsel %vm2227_vm5, %v5815_v51, %v5816_v33  ;;  %v19339_v55 = vshll.u32 %v10443_v56, 16  ;;  %v3299_v2 = vor.u32 %v3298_v28, %v3295_v43  ;;  %v5807_v49 = vld [vmem:[#allocation2 + $0x50] sm:$0x3] }
 0x2ea   : > { %v5932_v51 = vrot.slane %v18950_v5, 3  ;;  %v8477_v43 = vrot.slane %v19337_v3, 2 }
 0x2eb   : > { %21928 = vst [vmem:[#allocation8_spill] sm:$0xff] %v19316_v8  ;;  %v3300_v32 = vsel %vm3271_vm10, %v18793_v14, %v3299_v2  ;;  %v5822_v14 = vrot.slane %v5807_v49, 2  ;;  %v5947_v2 = vrot.slane %v19165_v21, 2  ;;  %v19379_v49 = vld [vmem:[%s21723_s2 + $0x80] sm:$0xff]  }
 0x2ec   : > { %v5933_v56 = vor.u32 %v5932_v51, %v5929_v47  ;;  %v10444_v47 = vld [vmem:[#allocation2 + $0x68] sm:$0xff] }
 0x2ee   : > { %15773 = vmatmul.mubr.msk.bf16.gmra.mrb[40].mxu0 %vm493_vm3, %v5711_v23  ;;  %v8473_v23 = vrot.slane %v19295_v62, 2 }
 0x2ef   : > { %15778 = vmatprep.mubr.msk.bf16.mxu0 %vm493_vm3, %v5817_v16  ;;  %v8474_v16 = vrot.slane %v19298_v18, 3 }
 0x2f0   : > { %15559 = vmatmul.mubr.msk.bf16.vlgmr.msra.gmra.mrb[48].mxu1 %vm493_vm3, %v3287_v7  ;;  %v5924_v7 = vrot.slane %v5922_v53, 3 }
 0x2f1   : > { %15562 = vmatprep.mubr.msk.bf16.mxu1 %vm493_vm3, %v18811_v6  ;;  %15567 = vmatpush3.bf16.msra.mxu1 %v17593_v1  ;;  %v5819_v6 = vsel %vm2227_vm5, %v5816_v33, %v21923_v24  ;;  %v3398_v1 = vrot.slane %v3392_v40, 4  ;;  %v21929_v33 = vrot.slane %v18778_v25, 4  ;;  %v5921_v24 = vrot.slane %v5919_v35, 2 }
 0x2f2   : > { %15576 = vmatprep.subr.bf16.mxu1 %v17595_v29  ;;  %v19360_v28 = vor.u32 %v8474_v16, %v8473_v23  ;;  %v5823_v35 = vsel %vm2227_vm5, %v5820_v57, %v5822_v14  ;;  %v19388_v23 = vshrl.u32 %v10444_v47, 16  ;;  %v3405_v16 = vrot.slane %v19314_v22, 4 }
 0x2f3   : > { %v3400_v19 = vsel %vm363_vm1, %v3398_v1, %v21929_v33  ;;  %v5925_v40 = vor.u32 %v5924_v7, %v5921_v24  ;;  %v5950_v1 = vrot.slane %v19178_v27, 3  ;;  %v19391_v33 = vshll.u32 %v10444_v47, 16 }
 0x2f4   : > { %21930 = vst [vmem:[#allocation24_spill] sm:$0xff] %v19360_v28  ;;  %21933 = vst [vmem:[#allocation6_spill] sm:$0xff] %v19388_v23 }
 0x2f5   : > { %v5934_v53 = vsel %vm2686_vm8, %v5925_v40, %v5933_v56  ;;  %v8833_v14 = vrot.slane %v19391_v33, 3  ;;  %v21934_v40 = vrot.slane %v18408_v39, 4 }
 0x2f6   : > { %15779 = vmatmul.mubr.msk.bf16.vlgmr.msra.gmra.mrb[36].mxu0 %vm493_vm3, %v5819_v6 }
 0x2f7   : > { %15787 = vmatpush3.bf16.msra.mxu0 %v17592_v42  ;;  %15782 = vmatprep.mubr.msk.bf16.mxu0 %vm493_vm3, %v5821_v45  ;;  %v8478_v42 = vrot.slane %v19339_v55, 3  ;;  %v19374_v45 = vld [vmem:[#allocation2 + $0x50] sm:$0x7] }
 0x2f8   : > { %15563 = vmatmul.mubr.msk.bf16.gmra.mrb[52].mxu1 %vm493_vm3, %v3300_v32  ;;  %15796 = vmatprep.subr.bf16.mxu0 %v17594_v20  ;;  %v5954_v57 = vshrl.u32 %v19374_v45, 16  ;;  %v5957_v51 = vshll.u32 %v19374_v45, 16  ;;  %v5951_v32 = vor.u32 %v5950_v1, %v5947_v2  ;;  %v3513_v1 = vrot.slane %v18901_v0, 3 }
 0x2f9   : > { %15568 = vmatprep.mubr.msk.bf16.mxu1 %vm493_vm3, %v3400_v19  ;;  %v19362_v25 = vor.u32 %v8478_v42, %v8477_v43  ;;  %v3498_v19 = vld [vmem:[#allocation2 + $0x18] sm:$0xf8]  ;;  %v8830_v43 = vrot.slane %v19388_v23, 2 }
 0x2fa   : > { %v5956_v24 = vrot.slane %v5954_v57, 2  ;;  %v5959_v7 = vrot.slane %v5957_v51, 3  ;;  %v5952_v42 = vsel %vm2686_vm8, %v19248_v11, %v5951_v32  ;;  %v3510_v22 = vrot.slane %v3498_v19, 3 }
 0x2fb   : > { %21931 = vst [vmem:[#allocation9_spill] sm:$0xff] %v19362_v25  ;;  %v19367_v6 = vsel %vm2686_vm8, %v19360_v28, %v19362_v25  ;;  %v19414_v2 = vor.u32 %v8833_v14, %v8830_v43  ;;  %v21800_v57 = vshrl.u32 %v18899_v60, 16  ;;  %v10967_v43 = vld [vmem:[#allocation2 + $0x78] sm:$0xff]  ;;  %v21966_v28 = vld [vmem:[#allocation48_spill] sm:$0xff] }
 0x2fc   : > { %21932 = vst [vmem:[#allocation10_spill] sm:$0xff] %v19367_v6 }
 0x2fd   : > { %21935 = vst [vmem:[#allocation11_spill] sm:$0xff] %v19414_v2  ;;  %v19421_v39 = vsel %vm2686_vm8, %v19362_v25, %v19414_v2 }
 0x2fe   : > { %15783 = vmatmul.mubr.msk.bf16.gmra.mrb[40].mxu0 %vm493_vm3, %v5823_v35  ;;  %v3406_v35 = vsel %vm363_vm1, %v21934_v40, %v3405_v16  ;;  %21936 = vst [vmem:[#allocation12_spill] sm:$0xff] %v19421_v39  ;;  %v9056_v16 = vrot.slane %v19337_v3, 3  ;;  %v3614_v40 = vshrl.u32 %v3498_v19, 16  ;;  %v19451_v39 = vshrl.u32 %v10967_v43, 16 }
 0x2ff   : > { %15788 = vmatprep.mubr.msk.bf16.mxu0 %vm493_vm3, %v5934_v53  ;;  %v6053_v53 = vld [vmem:[#allocation2 + $0x30] sm:$0xf8] }
 0x300   : > { %15569 = vmatmul.mubr.msk.bf16.vlgmr.msra.gmra.mrb[48].mxu1 %vm493_vm3, %v18820_v59  ;;  %v3511_v59 = vrot.slane %v18899_v60, 3  ;;  %v6058_v47 = vrot.slane %v6053_v53, 3  ;;  %21940 = vst [vmem:[#allocation23_spill] sm:$0xff] %v19451_v39 }
 0x301   : > { %15572 = vmatprep.mubr.msk.bf16.mxu1 %vm493_vm3, %v18826_v44  ;;  %15577 = vmatpush3.bf16.msra.mxu1 %v17595_v29  ;;  %v19398_v44 = vld [vmem:[%s21723_s2 + $0x68] sm:$0xff]   ;;  %v5943_v29 = vsel %vm2686_vm8, %v5933_v56, %v19248_v11  ;;  %v5960_v11 = vor.u32 %v5959_v7, %v5956_v24  ;;  %v3515_v7 = vrot.slane %v18906_v10, 3 }
 0x302   : > { %15586 = vmatprep.subr.bf16.mxu1 %v19379_v49  ;;  %v3512_v56 = vsel %vm2812_vm9, %v3510_v22, %v3511_v59  ;;  %v9061_v22 = vrot.slane %v19391_v33, 4  ;;  %v3514_v10 = vsel %vm2812_vm9, %v3511_v59, %v3513_v1  ;;  %v19455_v59 = vshll.u32 %v10967_v43, 16 }
 0x303   : > { %v5961_v24 = vsel %vm2686_vm8, %v5951_v32, %v5960_v11  ;;  %v3502_v32 = vld [vmem:[#allocation2 + $0x38] sm:$0x7]  ;;  %v11862_v43 = vrot.slane %v19451_v39, 3  ;;  %v17605_v39 = vld [vmem:[%s21723_s2 + $0xa0] sm:$0xff]  }
 0x304   : > { %21941 = vst [vmem:[#allocation25_spill] sm:$0xff] %v19455_v59 }
 0x306   : > { %15789 = vmatmul.mubr.msk.bf16.vlgmr.msra.gmra.mrb[36].mxu0 %vm493_vm3, %v5943_v29  ;;  %v9057_v29 = vrot.slane %v19339_v55, 4 }
 0x307   : > { %15797 = vmatpush3.bf16.msra.mxu0 %v17594_v20  ;;  %15792 = vmatprep.mubr.msk.bf16.mxu0 %vm493_vm3, %v5952_v42  ;;  %v6059_v20 = vrot.slane %v18864_v38, 3  ;;  %v9060_v42 = vrot.slane %v19388_v23, 3  ;;  %v6512_v23 = vrot.slane %v21966_v28, 3 }
 0x308   : > { %15573 = vmatmul.mubr.msk.bf16.gmra.mrb[52].mxu1 %vm493_vm3, %v3406_v35  ;;  %15806 = vmatprep.subr.bf16.mxu0 %v19398_v44  ;;  %v3617_v35 = vshll.u32 %v3498_v19, 16  ;;  %v19439_v51 = vor.u32 %v9057_v29, %v9056_v16  ;;  %v3624_v19 = vrot.slane %v21800_v57, 3  ;;  %v19463_v29 = vrot.slane %v19139_v37, 3 }
 0x309   : > { %15578 = vmatprep.mubr.msk.bf16.mxu1 %vm493_vm3, %v3512_v56  ;;  %v6060_v14 = vsel %vm2812_vm9, %v6058_v47, %v6059_v20  ;;  %v19437_v56 = vld [vmem:[%s21723_s2 + $0x88] sm:$0xff]   ;;  %v19443_v11 = vor.u32 %v9061_v22, %v9060_v42  ;;  %v3516_v47 = vsel %vm2812_vm9, %v3513_v1, %v3515_v7  ;;  %v3517_v1 = vrot.slane %v3502_v32, 3 }
 0x30a   : > { %21937 = vst [vmem:[#allocation5_spill] sm:$0xff] %v19439_v51  ;;  %v3616_v42 = vrot.slane %v3614_v40, 3  ;;  %v3619_v22 = vrot.slane %v3617_v35, 4  ;;  %v6062_v32 = vsel %vm2812_vm9, %v6059_v20, %v18755_v30  ;;  %v6169_v37 = vrot.slane %v18947_v46, 3  ;;  %v21944_v46 = vld [vmem:[#allocation37_spill] sm:$0xff] }
 0x30b   : > { %21938 = vst [vmem:[#allocation4_spill] sm:$0xff] %v19443_v11  ;;  %v19460_v16 = vsel %vm3271_vm10, %v19439_v51, %v19443_v11  ;;  %v6170_v40 = vrot.slane %v18950_v5, 4  ;;  %v11863_v35 = vrot.slane %v19455_v59, 4  ;;  %v3636_v20 = vrot.slane %v21944_v46, 4 }
 0x30c   : > { %21942 = vst [vmem:[#allocation13_spill] sm:$0xff] %v19460_v16 }
 0x30d   : > { %v19486_v16 = vor.u32 %v11863_v35, %v11862_v43 }
 0x30e   : > { %15793 = vmatmul.mubr.msk.bf16.gmra.mrb[40].mxu0 %vm493_vm3, %v5961_v24  ;;  %v21939_v24 = vshll.u32 %v18899_v60, 16 }
 0x30f   : > { %15798 = vmatprep.mubr.msk.bf16.mxu0 %vm493_vm3, %v6060_v14  ;;  %v6162_v14 = vshrl.u32 %v6053_v53, 16  ;;  %21945 = vst [vmem:[#allocation14_spill] sm:$0xff] %v19486_v16 }
 0x310   : > { %15579 = vmatmul.mubr.msk.bf16.vlgmr.msra.gmra.mrb[48].mxu1 %vm493_vm3, %v3514_v10  ;;  %v3627_v2 = vrot.slane %v21939_v24, 4  ;;  %v6165_v10 = vshll.u32 %v6053_v53, 16  ;;  %v3518_v53 = vsel %vm2812_vm9, %v3515_v7, %v3517_v1  ;;  %v21943_v24 = vld [vmem:[#allocation36_spill] sm:$0xff]  ;;  %v6171_v1 = vor.u32 %v6170_v40, %v6169_v37  ;;  %v19506_v40 = vld [vmem:[#allocation2 + $0x50] sm:$0xf] }
 0x311   : > { %15582 = vmatprep.mubr.msk.bf16.mxu1 %vm493_vm3, %v3516_v47  ;;  %15587 = vmatpush3.bf16.msra.mxu1 %v19379_v49  ;;  %v19469_v49 = vld [vmem:[%s21723_s2 + $0x70] sm:$0xff]   ;;  %v3633_v57 = vrot.slane %v21943_v24, 3  ;;  %v6164_v5 = vrot.slane %v6162_v14, 3 }
 0x312   : > { %15596 = vmatprep.subr.bf16.mxu1 %v19437_v56  ;;  %v3628_v47 = vor.u32 %v3627_v2, %v3624_v19  ;;  %v6064_v2 = vsel %vm2812_vm9, %v18755_v30, %v19463_v29  ;;  %v3620_v19 = vor.u32 %v3619_v22, %v3616_v42  ;;  %v6167_v11 = vrot.slane %v6165_v10, 4  ;;  %v19491_v30 = vld [vmem:[#allocation2 + $0x38] sm:$0xf] }
 0x313   : > { %v21946_v42 = vld [vmem:[#allocation39_spill] sm:$0xff]  ;;  %v3637_v10 = vor.u32 %v3636_v20, %v3633_v57  ;;  %v3649_v35 = vshrl.u32 %v19491_v30, 16  ;;  %v6177_v57 = vrot.slane %v19165_v21, 3  ;;  %v19514_v20 = vld [vmem:[%s21723_s2 + $0x90] sm:$0xff]  }
 0x314   : > { %v3629_v7 = vsel %vm3271_vm10, %v3620_v19, %v3628_v47  ;;  %v3642_v22 = vrot.slane %v21946_v42, 3  ;;  %v6168_v43 = vor.u32 %v6167_v11, %v6164_v5  ;;  %v19501_v19 = vld [vmem:[#allocation2 + $0x68] sm:$0xff]  ;;  %v6178_v11 = vrot.slane %v19178_v27, 4 }
 0x315   : > { %21949 = vst [vmem:[#allocation15_spill] sm:$0xff] %v19501_v19  ;;  %v6182_v27 = vshrl.u32 %v19506_v40, 16 }
 0x316   : > { %15799 = vmatmul.mubr.msk.bf16.vlgmr.msra.gmra.mrb[36].mxu0 %vm493_vm3, %v6062_v32  ;;  %v21947_v32 = vld [vmem:[#allocation40_spill] sm:$0xff] }
 0x317   : > { %15807 = vmatpush3.bf16.msra.mxu0 %v19398_v44  ;;  %15802 = vmatprep.mubr.msk.bf16.mxu0 %vm493_vm3, %v6064_v2  ;;  %v6065_v44 = vrot.slane %v19374_v45, 3  ;;  %v3645_v14 = vrot.slane %v21947_v32, 4  ;;  %v19499_v2 = vld [vmem:[#allocation2 + $0x60] sm:$0xff]  ;;  %v6172_v45 = vsel %vm3271_vm10, %v6168_v43, %v6171_v1  ;;  %v6184_v51 = vrot.slane %v6182_v27, 3 }
 0x318   : > { %15583 = vmatmul.mubr.msk.bf16.gmra.mrb[52].mxu1 %vm493_vm3, %v3518_v53  ;;  %15816 = vmatprep.subr.bf16.mxu0 %v19469_v49  ;;  %v3652_v53 = vshll.u32 %v19491_v30, 16  ;;  %21948 = vst [vmem:[#allocation17_spill] sm:$0xff] %v19499_v2  ;;  %v21806_v5 = vrot.slane %v19499_v2, 5 }
 0x319   : > { %15588 = vmatprep.mubr.msk.bf16.mxu1 %vm493_vm3, %v3629_v7  ;;  %v6066_v7 = vsel %vm2812_vm9, %v19463_v29, %v6065_v44  ;;  %v3646_v37 = vor.u32 %v3645_v14, %v3642_v22  ;;  %v19518_v44 = vrot.slane %v19501_v19, 5  ;;  %v3638_v22 = vsel %vm3271_vm10, %v3628_v47, %v3637_v10 }
 0x31a   : > { %v3651_v14 = vrot.slane %v3649_v35, 3  ;;  %v3654_v43 = vrot.slane %v3652_v53, 4  ;;  %v19534_v47 = vor.u32 %v6178_v11, %v6177_v57 }
 0x31b   : > { %v3647_v21 = vsel %vm3271_vm10, %v3637_v10, %v3646_v37  ;;  %v19530_v16 = vsel %vm3982_vm11, %v21806_v5, %v19518_v44  ;;  %v19537_v10 = vld [vmem:[#allocation2 + $0x18] sm:$0xf0] }
 0x31c   : > { %21950 = vst [vmem:[#allocation19_spill] sm:$0xff] %v19530_v16  ;;  %v3655_v35 = vor.u32 %v3654_v43, %v3651_v14  ;;  %v19542_v5 = vld [vmem:[%s21723_s2 + $0x78] sm:$0xff]   ;;  %v3753_v14 = vrot.slane %v19537_v10, 4 }
 0x31e   : > { %15803 = vmatmul.mubr.msk.bf16.gmra.mrb[40].mxu0 %vm493_vm3, %v6066_v7  ;;  %v6185_v7 = vshll.u32 %v19506_v40, 16 }
 0x31f   : > { %15808 = vmatprep.mubr.msk.bf16.mxu0 %vm493_vm3, %v6172_v45  ;;  %v17679_v45 = vld [vmem:[#allocation2 + $0x20] sm:$0xff] }
 0x320   : > { %15589 = vmatmul.mubr.msk.bf16.vlgmr.msra.gmra.mrb[48].mxu1 %vm493_vm3, %v3638_v22  ;;  %v3754_v22 = vrot.slane %v17679_v45, 4  ;;  %v6187_v59 = vrot.slane %v6185_v7, 4  ;;  %v3656_v7 = vsel %vm3271_vm10, %v3646_v37, %v3655_v35  ;;  %v6281_v35 = vld [vmem:[#allocation2 + $0x30] sm:$0xf0] }
 0x321   : > { %15592 = vmatprep.mubr.msk.bf16.mxu1 %vm493_vm3, %v3647_v21  ;;  %15597 = vmatpush3.bf16.msra.mxu1 %v19437_v56  ;;  %v21951_v56 = vld [vmem:[#allocation29_spill] sm:$0xff] }
 0x322   : > { %15606 = vmatprep.subr.bf16.mxu1 %v19514_v20  ;;  %v6176_v57 = vsel %vm3271_vm10, %v6171_v1, %v21951_v56  ;;  %v6180_v11 = vsel %vm3271_vm10, %v21951_v56, %v19534_v47  ;;  %v19557_v1 = vshrl.u32 %v19501_v19, 16  ;;  %v3755_v45 = vsel %vm363_vm1, %v3753_v14, %v3754_v22 }
 0x323   : > { %v6188_v56 = vor.u32 %v6187_v59, %v6184_v51 }
 0x324   : > { %v17439_v53 = vpop.permute.xlu0 %17438  ;;  %21952 = vst [vmem:[#allocation20_spill] sm:$0xff] %v19557_v1  ;;  %v10218_v59 = vrot.slane %v19557_v1, 5 }
 0x325   : > { %v17441_v21 = vunpack.i.h.bf16 %v17439_v53  ;;  %v17440_v16 = vunpack.i.l.bf16 %v17439_v53 }
 0x326   : > { %15809 = vmatmul.mubr.msk.bf16.vlgmr.msra.gmra.mrb[36].mxu0 %vm493_vm3, %v6176_v57 }
 0x327   : > { %v1340_v43 = vmax.f32 %v19088_v4, %v17441_v21  ;;  %v1339_v27 = vmax.f32 %v19091_v48, %v17440_v16  ;;  %15817 = vmatpush3.bf16.msra.mxu0 %v19469_v49  ;;  %15812 = vmatprep.mubr.msk.bf16.mxu0 %vm493_vm3, %v6180_v11  ;;  %v19563_v4 = vshll.u32 %v19501_v19, 16  ;;  %v17680_v21 = vld [vmem:[#allocation2 + $0x28] sm:$0xff] }
 0x328   : > { %15593 = vmatmul.mubr.msk.bf16.gmra.mrb[52].mxu1 %vm493_vm3, %v3656_v7  ;;  %v17449_v53 = vpop.permute.xlu0 %17448  ;;  %15826 = vmatprep.subr.bf16.mxu0 %v19542_v5  ;;  %v19566_v57 = vrot.slane %v17680_v21, 4 }
 0x329   : > { %21953 = vst [vmem:[#allocation22_spill] sm:$0xff] %v19563_v4  ;;  %v1346_v48 = vmax.f32 %v1340_v43, 0.0  ;;  %v1345_v16 = vmax.f32 %v1339_v27, 0.0  ;;  %v17451_v49 = vunpack.i.h.bf16 %v17449_v53  ;;  %v17450_v37 = vunpack.i.l.bf16 %v17449_v53  ;;  %15598 = vmatprep.mubr.msk.bf16.mxu1 %vm493_vm3, %v3755_v45  ;;  %v17681_v27 = vld [vmem:[#allocation2 + $0x30] sm:$0xff] }
 0x32a   : > { %v6286_v43 = vrot.slane %v6281_v35, 4  ;;  %v19575_v2 = vrot.slane %v17681_v27, 4  ;;  %v10219_v53 = vrot.slane %v19563_v4, 6  ;;  %v19591_v35 = vld [vmem:[%s21723_s2 + $0x98] sm:$0xff]  }
 0x32b   : > { %v1349_v11 = vpack.c.bf16 %v1346_v48, %v1345_v16  ;;  %v19569_v7 = vmax.f32 %v21907_v52, %v17451_v49  ;;  %v19572_v51 = vmax.f32 %v21908_v12, %v17450_v37  ;;  %v6189_v52 = vsel %vm3271_vm10, %v19534_v47, %v6188_v56  ;;  %v21954_v48 = vld [vmem:[#allocation30_spill] sm:$0xff] }
 0x32c   : > { %v17459_v14 = vpop.permute.xlu0 %17458  ;;  %v6288_v16 = vsel %vm363_vm1, %v6286_v43, %v21954_v48  ;;  %v3858_v49 = vshrl.u32 %v19537_v10, 16  ;;  %v3861_v37 = vshll.u32 %v19537_v10, 16  ;;  %v3757_v43 = vsel %vm363_vm1, %v3754_v22, %v19566_v57 }
 0x32d   : > { %1352 = vst.msk [vmem:[#allocation2 + $0x70] sm:$0xff] %vm493_vm3, %v1349_v11  ;;  %v17461_v45 = vunpack.i.h.bf16 %v17459_v14  ;;  %v17460_v21 = vunpack.i.l.bf16 %v17459_v14  ;;  %v17452_v12 = vpack.i.bf16 %v19569_v7, %v19572_v51  ;;  %v19593_v11 = vor.u32 %v10219_v53, %v10218_v59 }
 0x32e   : > { %15813 = vmatmul.mubr.msk.bf16.gmra.mrb[40].mxu0 %vm493_vm3, %v6189_v52  ;;  %v19609_v59 = vsel %vm363_vm1, %v19566_v57, %v19575_v2  ;;  %v3860_v52 = vrot.slane %v3858_v49, 4  ;;  %v21958_v49 = vld [vmem:[#allocation31_spill] sm:$0xff] }
 0x32f   : > { %v19596_v56 = vmax.f32 %v21912_v13, %v17461_v45  ;;  %v19599_v14 = vmax.f32 %v21913_v17, %v17460_v21  ;;  %17453 = vrot.lane.b32.xlu1 %v17452_v12, %s17709_s29  ;;  %15818 = vmatprep.mubr.msk.bf16.mxu0 %vm493_vm3, %v6288_v16  ;;  %v21955_v13 = vshrl.u32 %v18899_v60, 16  ;;  %v21956_v17 = vshll.u32 %v18899_v60, 16 }
 0x330   : > { %15599 = vmatmul.mubr.msk.bf16.vlgmr.msra.gmra.mrb[48].mxu1 %vm493_vm3, %v3757_v43  ;;  %v17469_v10 = vpop.permute.xlu0 %17468  ;;  %v3863_v12 = vrot.slane %v3861_v37, 5  ;;  %v3869_v37 = vrot.slane %v21943_v24, 4  ;;  %v6293_v24 = vrot.slane %v19506_v40, 4  ;;  %v21962_v40 = vpack.i.bf16 %v19058_v50, %v19047_v31 }
 0x331   : > { %v3865_v27 = vrot.slane %v21955_v13, 4  ;;  %v3866_v53 = vrot.slane %v21956_v17, 5  ;;  %v17471_v45 = vunpack.i.h.bf16 %v17469_v10  ;;  %v17470_v21 = vunpack.i.l.bf16 %v17469_v10  ;;  %15602 = vmatprep.mubr.msk.bf16.mxu1 %vm493_vm3, %v19609_v59  ;;  %15607 = vmatpush3.bf16.msra.mxu1 %v19514_v20 }
 0x332   : > { %v17462_v22 = vpack.i.bf16 %v19596_v56, %v19599_v14  ;;  %15616 = vmatprep.subr.bf16.mxu1 %v19591_v35  ;;  %v3760_v10 = vrot.slane %v19491_v30, 4 }
 0x333   : > { %v19622_v16 = vmax.f32 %v21917_v26, %v17471_v45  ;;  %v19625_v43 = vmax.f32 %v21918_v9, %v17470_v21  ;;  %v3867_v13 = vor.u32 %v3866_v53, %v3865_v27  ;;  %v3864_v26 = vor.u32 %v3863_v12, %v3860_v52  ;;  %v17602_v9 = vld [vmem:[%s21723_s2 + $0x80] sm:$0xff]   ;;  %v6386_v53 = vld [vmem:[#allocation2 + $0x38] sm:$0xf8]  ;;  %v21959_v21 = vld [vmem:[#allocation50_spill] sm:$0xff] }
 0x334   : > { %17463 = vrot.lane.b32.xlu1 %v17462_v22, %s17709_s29  ;;  %v10445_v17 = vld [vmem:[#allocation2 + $0x70] sm:$0xff]  ;;  %v3761_v30 = vsel %vm363_vm1, %v19575_v2, %v3760_v10  ;;  %v3870_v27 = vrot.slane %v21944_v46, 5  ;;  %v6398_v12 = vrot.slane %v6386_v53, 3  ;;  %v3873_v10 = vrot.slane %v21946_v42, 4 }
 0x335   : > { %v17477_v4 = vpack.i.bf16 %v19622_v16, %v19625_v43  ;;  %v19631_v20 = vshrl.u32 %v10445_v17, 16  ;;  %v19644_v45 = vshll.u32 %v10445_v17, 16  ;;  %v21960_v22 = vld [vmem:[#allocation42_spill] sm:$0xff]  ;;  %v3874_v17 = vrot.slane %v21947_v32, 5 }
 0x336   : > { %15819 = vmatmul.mubr.msk.bf16.vlgmr.msra.gmra.mrb[36].mxu0 %vm493_vm3, %v21958_v49  ;;  %v21961_v52 = vpack.i.bf16 %v21959_v21, %v21960_v22  ;;  %v19661_v49 = vor.u32 %v3870_v27, %v3869_v37 }
 0x337   : > { %21957 = vst [vmem:[#allocation21_spill] sm:$0xff] %v19631_v20  ;;  %15827 = vmatpush3.bf16.msra.mxu0 %v19542_v5  ;;  %17478 = vrot.lane.b32.xlu0 %v17477_v4, %s17709_s29  ;;  %v3868_v5 = vsel %vm3856_vm14, %v3864_v26, %v3867_v13  ;;  %v19652_v4 = vld [vmem:[#allocation2 + $0x38] sm:$0x1f]  ;;  %v11310_v46 = vrot.slane %v19631_v20, 2  ;;  %v19679_v1 = vor.u32 %v3874_v17, %v3873_v10  ;;  %v9272_v10 = vld [vmem:[#allocation2 + $0x70] sm:$0xff] }
 0x338   : > { %17473 = vrot.lane.b32.xlu1 %v21961_v52, %s17708_s11  ;;  %15603 = vmatmul.mubr.msk.bf16.gmra.mrb[52].mxu1 %vm493_vm3, %v3761_v30  ;;  %v3878_v26 = vshrl.u32 %v19652_v4, 16  ;;  %v3881_v30 = vshll.u32 %v19652_v4, 16  ;;  %v19670_v52 = vld [vmem:[#allocation2 + $0x40] sm:$0xff]  ;;  %v19727_v20 = vld [vmem:[#allocation2 + $0x78] sm:$0xff] }
 0x339   : > { %15822 = vmatprep.mubr.msk.bf16.mxu0 %vm493_vm3, %v19161_v36  ;;  %15608 = vmatprep.mubr.msk.bf16.mxu1 %vm493_vm3, %v3868_v5  ;;  %v11311_v36 = vrot.slane %v19644_v45, 3  ;;  %v6399_v42 = vrot.slane %v19670_v52, 3  ;;  %v21963_v5 = vld [vmem:[#allocation7_spill] sm:$0xff]  ;;  %21969 = vst [vmem:[#allocation26_spill] sm:$0xff] %v19727_v20 }
 0x33a   : > { %15836 = vmatprep.subr.bf16.mxu0 %v17602_v9  ;;  %v6294_v32 = vsel %vm363_vm1, %v21963_v5, %v6293_v24  ;;  %v3880_v25 = vrot.slane %v3878_v26, 4  ;;  %v3883_v6 = vrot.slane %v3881_v30, 5  ;;  %v19691_v24 = vsel %vm3856_vm14, %v19661_v49, %v19679_v1  ;;  %v3977_v26 = vld [vmem:[#allocation2 + $0x18] sm:$0xe0]  ;;  %v17604_v30 = vld [vmem:[%s21723_s2 + $0x88] sm:$0xff]  }
 0x33b   : > { %v19675_v37 = vor.u32 %v11311_v36, %v11310_v46  ;;  %v6400_v27 = vsel %vm2812_vm9, %v6398_v12, %v6399_v42  ;;  %v6502_v46 = vshrl.u32 %v6386_v53, 16  ;;  %v6505_v12 = vshll.u32 %v6386_v53, 16 }
 0x33c   : > { %17483 = vrot.lane.b32.xlu1 %v21962_v40, %s17708_s11  ;;  %v3872_v40 = vsel %vm3856_vm14, %v3867_v13, %v19661_v49  ;;  %v6403_v13 = vrot.slane %v19199_v63, 3  ;;  %v3884_v17 = vor.u32 %v3883_v6, %v3880_v25  ;;  %v19700_v36 = vshrl.u32 %v9272_v10, 16 }
 0x33d   : > { %21964 = vst [vmem:[#allocation18_spill] sm:$0xff] %v19675_v37  ;;  %v3983_v53 = vrot.slane %v3977_v26, 5  ;;  %v6390_v37 = vld [vmem:[#allocation2 + $0x58] sm:$0x7]  ;;  %v19707_v25 = vshll.u32 %v9272_v10, 16 }
 0x33e   : > { %15823 = vmatmul.mubr.msk.bf16.gmra.mrb[40].mxu0 %vm493_vm3, %v6294_v32  ;;  %21965 = vst [vmem:[#allocation16_spill] sm:$0xff] %v19700_v36  ;;  %v6402_v32 = vsel %vm2812_vm9, %v6399_v42, %v19463_v29  ;;  %v3885_v6 = vsel %vm3856_vm14, %v19679_v1, %v3884_v17  ;;  %v21967_v42 = vld [vmem:[#allocation44_spill] sm:$0xff]  ;;  %v6405_v17 = vrot.slane %v6390_v37, 3 }
 0x33f   : > { %15828 = vmatprep.mubr.msk.bf16.mxu0 %vm493_vm3, %v6400_v27  ;;  %v6504_v27 = vrot.slane %v6502_v46, 3  ;;  %v6515_v46 = vrot.slane %v21967_v42, 4 }
 0x340   : > { %15609 = vmatmul.mubr.msk.bf16.vlgmr.msra.gmra.mrb[48].mxu1 %vm493_vm3, %v3872_v40  ;;  %v6507_v40 = vrot.slane %v6505_v12, 4  ;;  %v19714_v12 = vrot.slane %v9272_v10, 5  ;;  %v6406_v37 = vsel %vm2812_vm9, %v6403_v13, %v6405_v17  ;;  %v21972_v17 = vld [vmem:[#allocation33_spill] sm:$0xff] }
 0x341   : > { %15612 = vmatprep.mubr.msk.bf16.mxu1 %vm493_vm3, %v19691_v24  ;;  %15617 = vmatpush3.bf16.msra.mxu1 %v19591_v35  ;;  %v6404_v35 = vsel %vm2812_vm9, %v19463_v29, %v6403_v13  ;;  %v21968_v29 = vrot.slane %v18899_v60, 5  ;;  %v6516_v8 = vor.u32 %v6515_v46, %v6512_v23  ;;  %v21825_v60 = vrot.slane %v19501_v19, 6 }
 0x342   : > { %15626 = vmatprep.subr.bf16.mxu1 %v17605_v39  ;;  %v6530_v23 = vrot.slane %v19218_v15, 3  ;;  %v6533_v46 = vrot.slane %v19211_v41, 4 }
 0x343   : > { %v3985_v26 = vsel %vm3982_vm11, %v3983_v53, %v21968_v29  ;;  %v10338_v53 = vrot.slane %v9272_v10, 6  ;;  %v19744_v10 = vld [vmem:[#allocation2 + $0x58] sm:$0xf] }
 0x346   : > { %15829 = vmatmul.mubr.msk.bf16.vlgmr.msra.gmra.mrb[36].mxu0 %vm493_vm3, %v6402_v32  ;;  %v6508_v32 = vor.u32 %v6507_v40, %v6504_v27  ;;  %v19739_v40 = vsel %vm21837_vm13, %v21825_v60, %v10338_v53  ;;  %v6534_v60 = vor.u32 %v6533_v46, %v6530_v23  ;;  %v21974_v23 = vld [vmem:[#allocation34_spill] sm:$0xff]  ;;  %v6636_v46 = vld [vmem:[#allocation2 + $0x38] sm:$0xf0] }
 0x347   : > { %15837 = vmatpush3.bf16.msra.mxu0 %v17602_v9  ;;  %15832 = vmatprep.mubr.msk.bf16.mxu0 %vm493_vm3, %v6404_v35  ;;  %v10222_v9 = vrot.slane %v19700_v36, 5  ;;  %v19725_v35 = vsel %vm3982_vm11, %v19518_v44, %v19714_v12  ;;  %v21827_v36 = vrot.slane %v19727_v20, 6  ;;  %21970 = vst [vmem:[#allocation28_spill] sm:$0xff] %v19739_v40  ;;  %v3990_v20 = vrot.slane %v19652_v4, 5  ;;  %v4083_v40 = vld [vmem:[#allocation2 + $0x20] sm:$0xf0] }
 0x348   : > { %15613 = vmatmul.mubr.msk.bf16.gmra.mrb[52].mxu1 %vm493_vm3, %v3885_v6  ;;  %15846 = vmatprep.subr.bf16.mxu0 %v17604_v30  ;;  %v10223_v6 = vrot.slane %v19707_v25, 6  ;;  %v6517_v27 = vsel %vm3271_vm10, %v6508_v32, %v6516_v8  ;;  %v21973_v32 = vld [vmem:[#allocation35_spill] sm:$0xff] }
 0x349   : > { %15618 = vmatprep.mubr.msk.bf16.mxu1 %vm493_vm3, %v3985_v26  ;;  %v17607_v26 = vld [vmem:[%s21723_s2 + $0xa8] sm:$0xff]   ;;  %v3991_v4 = vsel %vm3982_vm11, %v21974_v23, %v3990_v20  ;;  %v17609_v23 = vld [vmem:[%s21723_s2 + $0xb0] sm:$0xff]  }
 0x34a   : > { %v19731_v29 = vor.u32 %v10223_v6, %v10222_v9  ;;  %v19757_v9 = vsel %vm21837_vm13, %v10338_v53, %v21827_v36  ;;  %v6537_v6 = vshrl.u32 %v19744_v10, 16  ;;  %v17606_v53 = vld [vmem:[%s21723_s2 + $0x90] sm:$0xff]  }
 0x34b   : > { %21971 = vst [vmem:[#allocation27_spill] sm:$0xff] %v19757_v9  ;;  %v4095_v9 = vrot.slane %v4083_v40, 4 }
 0x34c   : > { %v19752_v13 = vsel %vm4441_vm12, %v19593_v11, %v19731_v29 }
 0x34e   : > { %15833 = vmatmul.mubr.msk.bf16.gmra.mrb[40].mxu0 %vm493_vm3, %v6406_v37  ;;  %v6540_v37 = vshll.u32 %v19744_v10, 16 }
 0x34f   : > { %15838 = vmatprep.mubr.msk.bf16.mxu0 %vm493_vm3, %v6517_v27  ;;  %v6526_v27 = vsel %vm3271_vm10, %v6516_v8, %v19534_v47  ;;  %v4097_v8 = vsel %vm363_vm1, %v4095_v9, %v19566_v57  ;;  %v4101_v57 = vsel %vm363_vm1, %v19575_v2, %v21954_v48 }
 0x350   : > { %15619 = vmatmul.mubr.msk.bf16.vlgmr.msra.gmra.mrb[48].mxu1 %vm493_vm3, %v21972_v17  ;;  %v6539_v17 = vrot.slane %v6537_v6, 3  ;;  %v6542_v36 = vrot.slane %v6540_v37, 4  ;;  %v6641_v37 = vrot.slane %v6636_v46, 4 }
 0x351   : > { %15622 = vmatprep.mubr.msk.bf16.mxu1 %vm493_vm3, %v21973_v32  ;;  %15627 = vmatpush3.bf16.msra.mxu1 %v17605_v39  ;;  %v6535_v39 = vsel %vm3271_vm10, %v19534_v47, %v6534_v60  ;;  %v6642_v47 = vrot.slane %v19670_v52, 4 }
 0x352   : > { %15636 = vmatprep.subr.bf16.mxu1 %v17607_v26  ;;  %v6543_v6 = vor.u32 %v6542_v36, %v6539_v17  ;;  %v6745_v36 = vshrl.u32 %v6636_v46, 16 }
 0x353   : > { %v6643_v20 = vsel %vm363_vm1, %v6641_v37, %v6642_v47 }
 0x356   : > { %15839 = vmatmul.mubr.msk.bf16.vlgmr.msra.gmra.mrb[36].mxu0 %vm493_vm3, %v6526_v27  ;;  %v4199_v27 = vshrl.u32 %v4083_v40, 16 }
 0x357   : > { %15847 = vmatpush3.bf16.msra.mxu0 %v17604_v30  ;;  %15842 = vmatprep.mubr.msk.bf16.mxu0 %vm493_vm3, %v6535_v39  ;;  %v6544_v30 = vsel %vm3271_vm10, %v6534_v60, %v6543_v6  ;;  %v4202_v39 = vshll.u32 %v4083_v40, 16  ;;  %v4087_v60 = vld [vmem:[#allocation2 + $0x40] sm:$0xf]  ;;  %v19797_v40 = vrot.slane %v19199_v63, 4  ;;  %v6747_v6 = vrot.slane %v6745_v36, 4 }
 0x358   : > { %15623 = vmatmul.mubr.msk.bf16.gmra.mrb[52].mxu1 %vm493_vm3, %v3991_v4  ;;  %15856 = vmatprep.subr.bf16.mxu0 %v17606_v53  ;;  %v4201_v9 = vrot.slane %v4199_v27, 4  ;;  %v6748_v4 = vshll.u32 %v6636_v46, 16  ;;  %v4102_v2 = vrot.slane %v4087_v60, 4  ;;  %v19818_v27 = vld [vmem:[#allocation2 + $0x40] sm:$0x1f]  ;;  %v6761_v36 = vrot.slane %v19211_v41, 5 }
 0x359   : > { %15628 = vmatprep.mubr.msk.bf16.mxu1 %vm493_vm3, %v4097_v8  ;;  %v4204_v17 = vrot.slane %v4202_v39, 5  ;;  %v6645_v8 = vsel %vm363_vm1, %v6642_v47, %v21963_v5  ;;  %v17611_v60 = vld [vmem:[%s21723_s2 + $0xb8] sm:$0xff]  }
 0x35a   : > { %v6750_v37 = vrot.slane %v6748_v4, 5  ;;  %v4103_v46 = vsel %vm363_vm1, %v21954_v48, %v4102_v2 }
 0x35b   : > { %v4205_v63 = vor.u32 %v4204_v17, %v4201_v9  ;;  %v21975_v9 = vld [vmem:[#allocation38_spill] sm:$0xff] }
 0x35c   : > { %v4232_v17 = vsel %vm3856_vm14, %v19679_v1, %v21975_v9 }
 0x35d   : > { %v4214_v47 = vsel %vm3856_vm14, %v4205_v63, %v19661_v49  ;;  %v4237_v49 = vshll.u32 %v19818_v27, 16  ;;  %v4333_v63 = vld [vmem:[#allocation2 + $0x20] sm:$0xe0] }
 0x35e   : > { %15843 = vmatmul.mubr.msk.bf16.gmra.mrb[40].mxu0 %vm493_vm3, %v6544_v30  ;;  %v6752_v30 = vrot.slane %v21966_v28, 4 }
 0x35f   : > { %15848 = vmatprep.mubr.msk.bf16.mxu0 %vm493_vm3, %v6643_v20  ;;  %v6753_v20 = vrot.slane %v21967_v42, 5  ;;  %v6760_v42 = vrot.slane %v19218_v15, 4  ;;  %v4239_v4 = vrot.slane %v4237_v49, 5  ;;  %v4443_v49 = vshrl.u32 %v4333_v63, 16 }
 0x360   : > { %15629 = vmatmul.mubr.msk.bf16.vlgmr.msra.gmra.mrb[48].mxu1 %vm493_vm3, %v19609_v59  ;;  %v17608_v59 = vld [vmem:[%s21723_s2 + $0x98] sm:$0xff]  }
 0x361   : > { %15632 = vmatprep.mubr.msk.bf16.mxu1 %vm493_vm3, %v4101_v57  ;;  %15637 = vmatpush3.bf16.msra.mxu1 %v17607_v26  ;;  %v6647_v26 = vsel %vm363_vm1, %v21963_v5, %v19797_v40  ;;  %v6648_v5 = vrot.slane %v19744_v10, 4  ;;  %v6754_v48 = vor.u32 %v6753_v20, %v6752_v30  ;;  %v4234_v57 = vshrl.u32 %v19818_v27, 16  ;;  %v19828_v10 = vld [vmem:[#allocation2 + $0x58] sm:$0x1f]  ;;  %v6864_v20 = vld [vmem:[#allocation2 + $0x38] sm:$0xe0] }
 0x362   : > { %15646 = vmatprep.subr.bf16.mxu1 %v17609_v23  ;;  %v6768_v2 = vshll.u32 %v19828_v10, 16 }
 0x363   : > { %v6649_v39 = vsel %vm363_vm1, %v19797_v40, %v6648_v5  ;;  %v4236_v15 = vrot.slane %v4234_v57, 4  ;;  %v6759_v1 = vsel %vm3856_vm14, %v6754_v48, %v19197_v34  ;;  %v21976_v5 = vld [vmem:[#allocation32_spill] sm:$0xff] }
 0x366   : > { %15849 = vmatmul.mubr.msk.bf16.vlgmr.msra.gmra.mrb[36].mxu0 %vm493_vm3, %v6645_v8  ;;  %v6765_v8 = vshrl.u32 %v19828_v10, 16 }
 0x367   : > { %15857 = vmatpush3.bf16.msra.mxu0 %v17606_v53  ;;  %15852 = vmatprep.mubr.msk.bf16.mxu0 %vm493_vm3, %v6647_v26  ;;  %v6751_v53 = vor.u32 %v6750_v37, %v6747_v6  ;;  %v19842_v26 = vor.u32 %v6761_v36, %v6760_v42  ;;  %v4240_v6 = vor.u32 %v4239_v4, %v4236_v15  ;;  %v17613_v42 = vld [vmem:[%s21723_s2 + $0xc0] sm:$0xff]   ;;  %v21977_v36 = vld [vmem:[#allocation41_spill] sm:$0xff]  ;;  %v19873_v15 = vld [vmem:[#allocation2 + $0x50] sm:$0xff] }
 0x368   : > { %15633 = vmatmul.mubr.msk.bf16.gmra.mrb[52].mxu1 %vm493_vm3, %v4103_v46  ;;  %15866 = vmatprep.subr.bf16.mxu0 %v17608_v59  ;;  %v6767_v37 = vrot.slane %v6765_v8, 4  ;;  %v6770_v46 = vrot.slane %v6768_v2, 5  ;;  %v19876_v4 = vrot.slane %v19873_v15, 5  ;;  %v4445_v8 = vrot.slane %v4443_v49, 5  ;;  %v21981_v49 = vld [vmem:[#allocation47_spill] sm:$0xff] }
 0x369   : > { %15638 = vmatprep.mubr.msk.bf16.mxu1 %vm493_vm3, %v4214_v47  ;;  %v6755_v28 = vsel %vm3856_vm14, %v6751_v53, %v6754_v48  ;;  %v4338_v47 = vrot.slane %v4333_v63, 5  ;;  %v4241_v30 = vsel %vm3856_vm14, %v21975_v9, %v4240_v6  ;;  %v17683_v9 = vld [vmem:[#allocation2 + $0x48] sm:$0xff] }
 0x36a   : > { %v6771_v48 = vor.u32 %v6770_v46, %v6767_v37  ;;  %v21978_v37 = vrot.slane %v18864_v38, 5 }
 0x36b   : > { %v4340_v53 = vsel %vm3982_vm11, %v4338_v47, %v21976_v5  ;;  %v21979_v47 = vld [vmem:[#allocation43_spill] sm:$0xff]  ;;  %v19898_v5 = vld [vmem:[#allocation2 + $0x40] sm:$0x3f] }
 0x36e   : > { %15853 = vmatmul.mubr.msk.bf16.gmra.mrb[40].mxu0 %vm493_vm3, %v6649_v39  ;;  %v6869_v39 = vrot.slane %v6864_v20, 5  ;;  %v6969_v20 = vld [vmem:[#allocation2 + $0x40] sm:$0xf0] }
 0x36f   : > { %15858 = vmatprep.mubr.msk.bf16.mxu0 %vm493_vm3, %v6755_v28  ;;  %v4446_v28 = vshll.u32 %v4333_v63, 16  ;;  %v17612_v63 = vld [vmem:[%s21723_s2 + $0xa8] sm:$0xff]  }
 0x370   : > { %15639 = vmatmul.mubr.msk.bf16.vlgmr.msra.gmra.mrb[48].mxu1 %vm493_vm3, %v19691_v24  ;;  %v17610_v24 = vld [vmem:[%s21723_s2 + $0xa0] sm:$0xff]  }
 0x371   : > { %15642 = vmatprep.mubr.msk.bf16.mxu1 %vm493_vm3, %v4232_v17  ;;  %15647 = vmatpush3.bf16.msra.mxu1 %v17609_v23  ;;  %v6763_v23 = vsel %vm3856_vm14, %v19197_v34, %v19842_v26  ;;  %v6870_v34 = vrot.slane %v19670_v52, 5  ;;  %v6872_v17 = vrot.slane %v17683_v9, 5  ;;  %v4448_v2 = vrot.slane %v4446_v28, 6  ;;  %v19914_v9 = vld [vmem:[#allocation2 + $0x58] sm:$0xff] }
 0x372   : > { %15656 = vmatprep.subr.bf16.mxu1 %v17611_v60 }
 0x373   : > { %v6871_v57 = vsel %vm3982_vm11, %v6869_v39, %v6870_v34  ;;  %v4449_v6 = vor.u32 %v4448_v2, %v4445_v8  ;;  %v4463_v39 = vshrl.u32 %v19898_v5, 16 }
 0x375   : > { %v4465_v28 = vrot.slane %v4463_v39, 5 }
 0x376   : > { %15859 = vmatmul.mubr.msk.bf16.vlgmr.msra.gmra.mrb[36].mxu0 %vm493_vm3, %v6759_v1  ;;  %v4345_v1 = vrot.slane %v19818_v27, 5  ;;  %v4453_v27 = vsel %vm4441_vm12, %v4449_v6, %v21979_v47  ;;  %v17614_v6 = vld [vmem:[%s21723_s2 + $0xb0] sm:$0xff]  }
 0x377   : > { %15867 = vmatpush3.bf16.msra.mxu0 %v17608_v59  ;;  %15862 = vmatprep.mubr.msk.bf16.mxu0 %vm493_vm3, %v6763_v23  ;;  %v6772_v59 = vsel %vm3856_vm14, %v19842_v26, %v6771_v48  ;;  %v19890_v23 = vld [vmem:[#allocation2 + $0x48] sm:$0xff] }
 0x378   : > { %15643 = vmatmul.mubr.msk.bf16.gmra.mrb[52].mxu1 %vm493_vm3, %v4241_v30  ;;  %15876 = vmatprep.subr.bf16.mxu0 %v17610_v24  ;;  %v4346_v46 = vsel %vm3982_vm11, %v21978_v37, %v4345_v1  ;;  %v6876_v30 = vrot.slane %v19828_v10, 5  ;;  %v17615_v10 = vld [vmem:[%s21723_s2 + $0x8] sm:$0xff]   ;;  %v19918_v8 = vshrl.u32 %v19890_v23, 16  ;;  %v19921_v2 = vshll.u32 %v19890_v23, 16 }
 0x379   : > { %15648 = vmatprep.mubr.msk.bf16.mxu1 %vm493_vm3, %v4340_v53  ;;  %v6981_v53 = vrot.slane %v6969_v20, 4  ;;  %v7085_v1 = vshrl.u32 %v6969_v20, 16 }
 0x37a   : > { %v6877_v48 = vsel %vm3982_vm11, %v19876_v4, %v6876_v30  ;;  %v7095_v30 = vrot.slane %v19918_v8, 4 }
 0x37e   : > { %15863 = vmatmul.mubr.msk.bf16.gmra.mrb[40].mxu0 %vm493_vm3, %v6772_v59 }
 0x37f   : > { %15868 = vmatprep.mubr.msk.bf16.mxu0 %vm493_vm3, %v6871_v57  ;;  %v21980_v57 = vld [vmem:[#allocation46_spill] sm:$0xff] }
 0x380   : > { %15649 = vmatmul.mubr.msk.bf16.vlgmr.msra.gmra.mrb[48].mxu1 %vm493_vm3, %v21973_v32  ;;  %v6873_v32 = vsel %vm3982_vm11, %v6870_v34, %v6872_v17  ;;  %v4466_v34 = vshll.u32 %v19898_v5, 16 }
 0x381   : > { %15652 = vmatprep.mubr.msk.bf16.mxu1 %vm493_vm3, %v21977_v36  ;;  %15657 = vmatpush3.bf16.msra.mxu1 %v17611_v60  ;;  %v6875_v60 = vsel %vm3982_vm11, %v6872_v17, %v19876_v4  ;;  %v6986_v17 = vrot.slane %v19914_v9, 4 }
 0x382   : > { %15666 = vmatprep.subr.bf16.mxu1 %v17613_v42  ;;  %v4468_v36 = vrot.slane %v4466_v34, 6  ;;  %v7087_v34 = vrot.slane %v7085_v1, 4  ;;  %v19951_v1 = vld [vmem:[%s21723_s2] sm:$0xff]  }
 0x384   : > { %v4469_v37 = vor.u32 %v4468_v36, %v4465_v28  ;;  %v7113_v28 = vrot.slane %v19295_v62, 4  ;;  %v7116_v36 = vrot.slane %v19298_v18, 5 }
 0x386   : > { %15869 = vmatmul.mubr.msk.bf16.vlgmr.msra.gmra.mrb[36].mxu0 %vm493_vm3, %v6873_v32  ;;  %v4562_v32 = vld [vmem:[#allocation2 + $0x20] sm:$0xc0] }
 0x387   : > { %15877 = vmatpush3.bf16.msra.mxu0 %v17610_v24  ;;  %15872 = vmatprep.mubr.msk.bf16.mxu0 %vm493_vm3, %v6875_v60  ;;  %v6982_v24 = vrot.slane %v19890_v23, 4  ;;  %v7088_v60 = vshll.u32 %v6969_v20, 16  ;;  %v4568_v47 = vrot.slane %v4562_v32, 6  ;;  %v21982_v20 = vld [vmem:[#allocation45_spill] sm:$0xff]  ;;  %v19946_v32 = vld [vmem:[#allocation2 + $0x60] sm:$0x1f] }
 0x388   : > { %15653 = vmatmul.mubr.msk.bf16.gmra.mrb[52].mxu1 %vm493_vm3, %v4346_v46  ;;  %15886 = vmatprep.subr.bf16.mxu0 %v17612_v63  ;;  %v6987_v46 = vsel %vm363_vm1, %v19797_v40, %v6986_v17 }
 0x389   : > { %15658 = vmatprep.mubr.msk.bf16.mxu1 %vm493_vm3, %v4453_v27  ;;  %v6983_v59 = vsel %vm363_vm1, %v6981_v53, %v6982_v24  ;;  %v6973_v27 = vld [vmem:[#allocation2 + $0x60] sm:$0xf]  ;;  %v7098_v53 = vrot.slane %v19921_v2, 5 }
 0x38e   : > { %15873 = vmatmul.mubr.msk.bf16.gmra.mrb[40].mxu0 %vm493_vm3, %v6877_v48  ;;  %v4470_v48 = vsel %vm4441_vm12, %v21982_v20, %v4469_v37  ;;  %v7117_v37 = vor.u32 %v7116_v36, %v7113_v28 }
 0x38f   : > { %15878 = vmatprep.mubr.msk.bf16.mxu0 %vm493_vm3, %v6983_v59  ;;  %v6988_v59 = vrot.slane %v6973_v27, 4 }
 0x390   : > { %15659 = vmatmul.mubr.msk.bf16.vlgmr.msra.gmra.mrb[48].mxu1 %vm493_vm3, %v21980_v57  ;;  %v7099_v57 = vor.u32 %v7098_v53, %v7095_v30  ;;  %v7579_v53 = vrot.slane %v19921_v2, 1 }
 0x391   : > { %15662 = vmatprep.mubr.msk.bf16.mxu1 %vm493_vm3, %v21981_v49  ;;  %15667 = vmatpush3.bf16.msra.mxu1 %v17613_v42  ;;  %v6985_v42 = vsel %vm363_vm1, %v6982_v24, %v19797_v40  ;;  %v21983_v24 = vrot.slane %v18901_v0, 6  ;;  %v7090_v40 = vrot.slane %v7088_v60, 5  ;;  %v21984_v60 = vld [vmem:[#allocation49_spill] sm:$0xff] }
 0x392   : > { %15926 = vmatprep.subr.bf16.mxu1 %v17615_v10 }
 0x393   : > { %v4570_v39 = vsel %vm21837_vm13, %v4568_v47, %v21983_v24  ;;  %v7091_v49 = vor.u32 %v7090_v40, %v7087_v34  ;;  %v7123_v47 = vshll.u32 %v19946_v32, 16  ;;  %v4575_v24 = vrot.slane %v19898_v5, 6 }
 0x394   : > { %v7109_v34 = vsel %vm3856_vm14, %v7099_v57, %v19842_v26  ;;  %v7118_v40 = vsel %vm3856_vm14, %v19842_v26, %v7117_v37  ;;  %v21986_v5 = vrot.slane %v18864_v38, 6 }
 0x395   : > { %v7100_v0 = vsel %vm3856_vm14, %v7091_v49, %v7099_v57  ;;  %v7125_v49 = vrot.slane %v7123_v47, 5 }
 0x396   : > { %15879 = vmatmul.mubr.msk.bf16.vlgmr.msra.gmra.mrb[36].mxu0 %vm493_vm3, %v6985_v42  ;;  %v4576_v36 = vsel %vm21837_vm13, %v21986_v5, %v4575_v24 }
 0x397   : > { %15887 = vmatpush3.bf16.msra.mxu0 %v17612_v63  ;;  %15882 = vmatprep.mubr.msk.bf16.mxu0 %vm493_vm3, %v6987_v46  ;;  %v6989_v63 = vsel %vm363_vm1, %v6986_v17, %v6988_v59  ;;  %v21985_v17 = vld [vmem:[#allocation51_spill] sm:$0xff]  ;;  %v7120_v46 = vshrl.u32 %v19946_v32, 16 }
 0x398   : > { %15663 = vmatmul.mubr.msk.bf16.gmra.mrb[52].mxu1 %vm493_vm3, %v4470_v48  ;;  %15896 = vmatprep.subr.bf16.mxu0 %v17614_v6 }
 0x399   : > { %15668 = vmatprep.mubr.msk.bf16.mxu1 %vm493_vm3, %v4570_v39  ;;  %v7122_v59 = vrot.slane %v7120_v46, 4  ;;  %v7225_v46 = vrot.slane %v19890_v23, 5 }
 0x39e   : > { %15883 = vmatmul.mubr.msk.bf16.gmra.mrb[40].mxu0 %vm493_vm3, %v6989_v63 }
 0x39f   : > { %15888 = vmatprep.mubr.msk.bf16.mxu0 %vm493_vm3, %v7100_v0  ;;  %v21987_v0 = vld [vmem:[#allocation52_spill] sm:$0xff] }
 0x3a0   : > { %15669 = vmatmul.mubr.msk.bf16.vlgmr.msra.gmra.mrb[48].mxu1 %vm493_vm3, %v21984_v60  ;;  %v7580_v57 = vsel %vm1790_vm4, %v21987_v0, %v7579_v53 }
 0x3a1   : > { %15672 = vmatprep.mubr.msk.bf16.mxu1 %vm493_vm3, %v21985_v17  ;;  %v17454_v42 = vpop.permute.xlu1 %17453  ;;  %15927 = vmatpush3.bf16.msra.mxu1 %v17615_v10  ;;  %v19968_v10 = vld [vmem:[%s21723_s2 + $0xb8] sm:$0xff]  }
 0x3a2   : > { %v17456_v27 = vunpack.i.h.bf16 %v17454_v42  ;;  %v17455_v30 = vunpack.i.l.bf16 %v17454_v42  ;;  %15936 = vmatprep.subr.bf16.mxu1 %v19951_v1  ;;  %v19984_v42 = vld [vmem:[#allocation2 + $0x40] sm:$0xe0] }
 0x3a4   : > { %v1552_v20 = vmax.f32 %v19569_v7, %v17456_v27  ;;  %v1551_v48 = vmax.f32 %v19572_v51, %v17455_v30 }
 0x3a6   : > { %v17464_v39 = vpop.permute.xlu1 %17463  ;;  %v1558_v63 = vmax.f32 %v1552_v20, 0.0  ;;  %v1557_v7 = vmax.f32 %v1551_v48, 0.0  ;;  %15889 = vmatmul.mubr.msk.bf16.vlgmr.msra.gmra.mrb[36].mxu0 %vm493_vm3, %v7109_v34 }
 0x3a7   : > { %v17466_v28 = vunpack.i.h.bf16 %v17464_v39  ;;  %v17465_v51 = vunpack.i.l.bf16 %v17464_v39  ;;  %15897 = vmatpush3.bf16.msra.mxu0 %v17614_v6  ;;  %15892 = vmatprep.mubr.msk.bf16.mxu0 %vm493_vm3, %v7118_v40  ;;  %v7126_v6 = vor.u32 %v7125_v49, %v7122_v59  ;;  %v7224_v39 = vrot.slane %v19984_v42, 5 }
 0x3a8   : > { %v1562_v60 = vpack.c.bf16 %v1558_v63, %v1557_v7  ;;  %15673 = vmatmul.mubr.msk.bf16.gmra.mrb[52].mxu1 %vm493_vm3, %v4576_v36  ;;  %15906 = vmatprep.subr.bf16.mxu0 %v19968_v10  ;;  %v7595_v49 = vrot.slane %v19298_v18, 1  ;;  %v19995_v63 = vld [vmem:[#allocation2 + $0x60] sm:$0x1] }
 0x3a9   : > { %v1554_v26 = vmax.f32 %v19596_v56, %v17466_v28  ;;  %v1553_v17 = vmax.f32 %v19599_v14, %v17465_v51  ;;  %15928 = vmatprep.mubr.msk.bf16.mxu1 %vm493_vm3, %v7580_v57  ;;  %v17479_v38 = vpop.permute.xlu0 %17478  ;;  %v7583_v14 = vor.u32 %v7579_v53, %v19918_v8  ;;  %v7127_v53 = vsel %vm3856_vm14, %v7117_v37, %v7126_v6 }
 0x3aa   : > { %1565 = vst.msk [vmem:[#allocation2 + $0x80] sm:$0xff] %vm493_vm3, %v1562_v60  ;;  %v17481_v30 = vunpack.i.h.bf16 %v17479_v38  ;;  %v17480_v56 = vunpack.i.l.bf16 %v17479_v38  ;;  %v17474_v20 = vpop.permute.xlu1 %17473  ;;  %v7601_v37 = vshll.u32 %v19995_v63, 16  ;;  %v17619_v60 = vld [vmem:[%s21723_s2 + $0x10] sm:$0xff]   ;;  %v7229_v6 = vrot.slane %v19914_v9, 5 }
 0x3ab   : > { %v1560_v47 = vmax.f32 %v1554_v26, 0.0  ;;  %v1559_v27 = vmax.f32 %v1553_v17, 0.0  ;;  %v17476_v48 = vunpack.i.h.bf16 %v17474_v20  ;;  %v17475_v24 = vunpack.i.l.bf16 %v17474_v20 }
 0x3ac   : > { %v1764_v40 = vmax.f32 %v19622_v16, %v17481_v30  ;;  %v1763_v59 = vmax.f32 %v19625_v43, %v17480_v56  ;;  %v7226_v16 = vsel %vm3982_vm11, %v7224_v39, %v7225_v46  ;;  %v21988_v43 = vrot.slane %v19211_v41, 1 }
 0x3ad   : > { %v1563_v34 = vpack.c.bf16 %v1560_v47, %v1559_v27  ;;  %v19998_v7 = vmax.f32 %v21959_v21, %v17476_v48  ;;  %v20001_v28 = vmax.f32 %v21960_v22, %v17475_v24  ;;  %v7596_v41 = vsel %vm1790_vm4, %v19236_v58, %v7595_v49  ;;  %v17618_v27 = vld [vmem:[%s21723_s2 + $0xc0] sm:$0xff]  }
 0x3ae   : > { %v1770_v51 = vmax.f32 %v1764_v40, 0.0  ;;  %v1769_v5 = vmax.f32 %v1763_v59, 0.0  ;;  %v17484_v36 = vpop.permute.xlu1 %17483  ;;  %15893 = vmatmul.mubr.msk.bf16.gmra.mrb[40].mxu0 %vm493_vm3, %v7127_v53  ;;  %v7588_v0 = vsel %vm1790_vm4, %v7583_v14, %v21988_v43  ;;  %v7603_v58 = vrot.slane %v7601_v37, 1 }
 0x3af   : > { %1566 = vst.msk [vmem:[#allocation2 + $0x88] sm:$0xff] %vm493_vm3, %v1563_v34  ;;  %v17486_v21 = vunpack.i.h.bf16 %v17484_v36  ;;  %v17485_v57 = vunpack.i.l.bf16 %v17484_v36  ;;  %15898 = vmatprep.mubr.msk.bf16.mxu0 %vm493_vm3, %v7226_v16  ;;  %v17487_v22 = vpack.i.bf16 %v19998_v7, %v20001_v28  ;;  %v7228_v30 = vsel %vm3982_vm11, %v7225_v46, %v19876_v4  ;;  %v20074_v36 = vld [vmem:[%s21723_s2 + $0x18] sm:$0xff]  }
 0x3b0   : > { %v1775_v26 = vpack.c.bf16 %v1770_v51, %v1769_v5  ;;  %15929 = vmatmul.mubr.msk.bf16.vlgmr.msra.gmra.mrb[56].mxu1 %vm493_vm3, %v7588_v0  ;;  %v7230_v56 = vsel %vm3982_vm11, %v19876_v4, %v7229_v6  ;;  %v7335_v20 = vrot.slane %v19918_v8, 5  ;;  %v7231_v4 = vrot.slane %v19946_v32, 5  ;;  %v20069_v5 = vld [vmem:[#allocation2 + $0x60] sm:$0x3f] }
 0x3b1   : > { %v20021_v17 = vmax.f32 %v19058_v50, %v17486_v21  ;;  %v20024_v38 = vmax.f32 %v19047_v31, %v17485_v57  ;;  %17488 = vrot.lane.b32.xlu0 %v17487_v22, %s17709_s29  ;;  %15932 = vmatprep.mubr.msk.bf16.mxu1 %vm493_vm3, %v7596_v41  ;;  %v7328_v50 = vshrl.u32 %v19984_v42, 16  ;;  %v7331_v31 = vshll.u32 %v19984_v42, 16  ;;  %v20054_v24 = vld [vmem:[#allocation2 + $0x80] sm:$0xff] }
 0x3b2   : > { %1778 = vst.msk [vmem:[#allocation2 + $0x90] sm:$0xff] %vm493_vm3, %v1775_v26  ;;  %15937 = vmatpush3.bf16.msra.mxu1 %v19951_v1  ;;  %v7599_v1 = vor.u32 %v7595_v49, %v19295_v62  ;;  %v7336_v42 = vrot.slane %v19921_v2, 6  ;;  %v20062_v49 = vrot.slane %v20054_v24, 4  ;;  %v7232_v53 = vsel %vm3982_vm11, %v7229_v6, %v7231_v4  ;;  %v7767_v41 = vld [vmem:[#allocation2 + $0x40] sm:$0xfe] }
 0x3b3   : > { %v17492_v47 = vpack.i.bf16 %v20021_v17, %v20024_v38  ;;  %15946 = vmatprep.subr.bf16.mxu1 %v17619_v60  ;;  %v7330_v46 = vrot.slane %v7328_v50, 5  ;;  %v7333_v48 = vrot.slane %v7331_v31, 6  ;;  %v7343_v51 = vrot.slane %v19295_v62, 5 }
 0x3b4   : > { %v7604_v14 = vsel %vm1790_vm4, %v7599_v1, %v7603_v58  ;;  %v7337_v39 = vor.u32 %v7336_v42, %v7335_v20  ;;  %v20077_v16 = vshrl.u32 %v20054_v24, 16  ;;  %v20080_v43 = vshll.u32 %v20054_v24, 16 }
 0x3b5   : > { %17493 = vrot.lane.b32.xlu1 %v17492_v47, %s17709_s29  ;;  %v7334_v34 = vor.u32 %v7333_v48, %v7330_v46  ;;  %v7348_v21 = vshrl.u32 %v20069_v5, 16  ;;  %v7351_v57 = vshll.u32 %v20069_v5, 16  ;;  %v7776_v58 = vrot.slane %v19890_v23, 1 }
 0x3b6   : > { %15899 = vmatmul.mubr.msk.bf16.vlgmr.msra.gmra.mrb[36].mxu0 %vm493_vm3, %v7228_v30  ;;  %v20056_v40 = vld [vmem:[#allocation2 + $0x88] sm:$0xff]  ;;  %v12421_v37 = vrot.slane %v20077_v16, 4  ;;  %v12424_v26 = vrot.slane %v20080_v43, 5  ;;  %v7342_v31 = vsel %vm4441_vm12, %v7337_v39, %v19261_v54  ;;  %v21828_v48 = vrot.slane %v20054_v24, 5 }
 0x3b7   : > { %15907 = vmatpush3.bf16.msra.mxu0 %v19968_v10  ;;  %15902 = vmatprep.mubr.msk.bf16.mxu0 %vm493_vm3, %v7230_v56  ;;  %21989 = vst [vmem:[#allocation36_spill] sm:$0xff] %v20056_v40  ;;  %v20058_v10 = vld [vmem:[#allocation2 + $0x78] sm:$0xff]  ;;  %v7338_v32 = vsel %vm4441_vm12, %v7334_v34, %v7337_v39  ;;  %v20093_v0 = vshll.u32 %v20056_v40, 16  ;;  %v7350_v30 = vrot.slane %v7348_v21, 5  ;;  %v7353_v1 = vrot.slane %v7351_v57, 6 }
 0x3b8   : > { %15933 = vmatmul.mubr.msk.bf16.gmra.mrb[60].mxu1 %vm493_vm3, %v7604_v14  ;;  %15916 = vmatprep.subr.bf16.mxu0 %v17618_v27  ;;  %v21829_v59 = vrot.slane %v20058_v10, 4  ;;  %v20112_v50 = vor.u32 %v12424_v26, %v12421_v37  ;;  %v7775_v14 = vrot.slane %v7767_v41, 1  ;;  %v20131_v4 = vrot.slane %v20056_v40, 5 }
 0x3b9   : > { %15938 = vmatprep.mubr.msk.bf16.mxu1 %vm493_vm3, %v19670_v52  ;;  %v7344_v52 = vrot.slane %v19298_v18, 6  ;;  %v20090_v18 = vshrl.u32 %v20056_v40, 16  ;;  %v12433_v47 = vrot.slane %v20093_v0, 5  ;;  %v20116_v56 = vld [vmem:[#allocation2 + $0x90] sm:$0xff]  ;;  %v7778_v21 = vrot.slane %v19873_v15, 1 }
 0x3ba   : > { %v20086_v62 = vsel %vm363_vm1, %v21829_v59, %v20062_v49  ;;  %v7777_v39 = vsel %vm1997_vm6, %v7775_v14, %v7776_v58  ;;  %v20141_v34 = vshll.u32 %v20116_v56, 16  ;;  %v20153_v57 = vrot.slane %v19914_v9, 1 }
 0x3bb   : > { %v7345_v22 = vor.u32 %v7344_v52, %v7343_v51  ;;  %v12430_v6 = vrot.slane %v20090_v18, 4  ;;  %v20148_v51 = vsel %vm3982_vm11, %v21828_v48, %v20131_v4  ;;  %v7453_v52 = vrot.slane %v19890_v23, 6 }
 0x3bc   : > { %v7879_v37 = vshrl.u32 %v7767_v41, 16  ;;  %v7779_v14 = vsel %vm1997_vm6, %v7776_v58, %v7778_v21  ;;  %v7455_v58 = vrot.slane %v19873_v15, 6 }
 0x3bd   : > { %v20118_v20 = vor.u32 %v12433_v47, %v12430_v6  ;;  %v7346_v42 = vsel %vm4441_vm12, %v19261_v54, %v7345_v22  ;;  %v7447_v54 = vld [vmem:[#allocation2 + $0x40] sm:$0xc0]  ;;  %v12777_v6 = vrot.slane %v20141_v34, 5 }
 0x3be   : > { %15903 = vmatmul.mubr.msk.bf16.gmra.mrb[40].mxu0 %vm493_vm3, %v7232_v53  ;;  %v7354_v53 = vor.u32 %v7353_v1, %v7350_v30  ;;  %v17623_v1 = vld [vmem:[%s21723_s2 + $0x20] sm:$0xff]   ;;  %v7456_v59 = vsel %vm21837_vm13, %v7453_v52, %v7455_v58 }
 0x3bf   : > { %15908 = vmatprep.mubr.msk.bf16.mxu0 %vm493_vm3, %v7338_v32  ;;  %21990 = vst [vmem:[#allocation37_spill] sm:$0xff] %v20118_v20  ;;  %v20127_v46 = vsel %vm3856_vm14, %v20112_v50, %v20118_v20  ;;  %v7452_v32 = vrot.slane %v7447_v54, 6  ;;  %v7886_v54 = vrot.slane %v19918_v8, 1  ;;  %v13001_v8 = vrot.slane %v20093_v0, 6 }
 0x3c0   : > { %15939 = vmatmul.mubr.msk.bf16.vlgmr.msra.gmra.mrb[56].mxu1 %vm493_vm3, %v19890_v23  ;;  %v7355_v47 = vsel %vm4441_vm12, %v7345_v22, %v7354_v53  ;;  %v7781_v22 = vsel %vm1997_vm6, %v7778_v21, %v20153_v57 }
 0x3c1   : > { %15942 = vmatprep.mubr.msk.bf16.mxu1 %vm493_vm3, %v19873_v15  ;;  %15947 = vmatpush3.bf16.msra.mxu1 %v17619_v60  ;;  %v20110_v60 = vld [vmem:[%s21723_s2 + $0x8] sm:$0xff]   ;;  %v7454_v30 = vsel %vm21837_vm13, %v7452_v32, %v7453_v52  ;;  %v13000_v32 = vrot.slane %v20090_v18, 5 }
 0x3c2   : > { %15956 = vmatprep.subr.bf16.mxu1 %v20074_v36 }
 0x3c6   : > { %15909 = vmatmul.mubr.msk.bf16.vlgmr.msra.gmra.mrb[36].mxu0 %vm493_vm3, %v7342_v31  ;;  %v7882_v31 = vshll.u32 %v7767_v41, 16  ;;  %v7887_v41 = vrot.slane %v19921_v2, 2  ;;  %v7457_v2 = vrot.slane %v19914_v9, 6 }
 0x3c7   : > { %15917 = vmatpush3.bf16.msra.mxu0 %v17618_v27  ;;  %15912 = vmatprep.mubr.msk.bf16.mxu0 %vm493_vm3, %v7346_v42  ;;  %v20138_v27 = vshrl.u32 %v20116_v56, 16 }
 0x3c8   : > { %15943 = vmatmul.mubr.msk.bf16.gmra.mrb[60].mxu1 %vm493_vm3, %v19914_v9  ;;  %16176 = vmatprep.subr.bf16.mxu0 %v20110_v60 }
 0x3c9   : > { %15948 = vmatprep.mubr.msk.bf16.mxu1 %vm493_vm3, %v7777_v39  ;;  %v12774_v26 = vrot.slane %v20138_v27, 4  ;;  %v7881_v39 = vrot.slane %v7879_v37, 1  ;;  %v7884_v37 = vrot.slane %v7882_v31, 2  ;;  %v13004_v21 = vrot.slane %v20138_v27, 5 }
 0x3ca   : > { %v7888_v31 = vor.u32 %v7887_v41, %v7886_v54 }
 0x3cb   : > { %v20163_v42 = vor.u32 %v12777_v6, %v12774_v26  ;;  %v13005_v26 = vrot.slane %v20141_v34, 6  ;;  %v21830_v6 = vrot.slane %v20056_v40, 6  ;;  %v7885_v54 = vor.u32 %v7884_v37, %v7881_v39  ;;  %v20217_v39 = vld [vmem:[#allocation2 + $0x60] sm:$0x3] }
 0x3cc   : > { %v7899_v37 = vshrl.u32 %v20217_v39, 16 }
 0x3cd   : > { %v20175_v53 = vsel %vm3856_vm14, %v20118_v20, %v20163_v42  ;;  %v7889_v52 = vsel %vm2101_vm7, %v7885_v54, %v7888_v31  ;;  %v10470_v54 = vrot.slane %v19644_v45, 1 }
 0x3ce   : > { %15913 = vmatmul.mubr.msk.bf16.gmra.mrb[40].mxu0 %vm493_vm3, %v7355_v47  ;;  %v21831_v47 = vrot.slane %v20116_v56, 6 }
 0x3cf   : > { %15918 = vmatprep.mubr.msk.bf16.mxu0 %vm493_vm3, %v7454_v30  ;;  %v7782_v30 = vrot.slane %v19995_v63, 1  ;;  %v7458_v63 = vsel %vm21837_vm13, %v7455_v58, %v7457_v2  ;;  %v7459_v58 = vrot.slane %v20069_v5, 6  ;;  %v17625_v5 = vld [vmem:[%s21723_s2 + $0x28] sm:$0xff]  }
 0x3d0   : > { %15949 = vmatmul.mubr.msk.bf16.vlgmr.msra.gmra.mrb[56].mxu1 %vm493_vm3, %v7779_v14  ;;  %v20188_v14 = vor.u32 %v13001_v8, %v13000_v32  ;;  %v20200_v48 = vsel %vm21837_vm13, %v21830_v6, %v21831_v47  ;;  %v7902_v8 = vshll.u32 %v20217_v39, 16  ;;  %v21997_v47 = vld [vmem:[#allocation6_spill] sm:$0xff] }
 0x3d1   : > { %15952 = vmatprep.mubr.msk.bf16.mxu1 %vm493_vm3, %v7781_v22  ;;  %15957 = vmatpush3.bf16.msra.mxu1 %v20074_v36  ;;  %v17622_v36 = vld [vmem:[%s21723_s2] sm:$0xff]   ;;  %v20193_v22 = vor.u32 %v13005_v26, %v13004_v21  ;;  %21993 = vst [vmem:[#allocation29_spill] sm:$0xff] %v20200_v48  ;;  %v7783_v32 = vsel %vm1997_vm6, %v20153_v57, %v7782_v30  ;;  %v20226_v30 = vld [vmem:[#allocation2 + $0x78] sm:$0x1f] }
 0x3d2   : > { %15966 = vmatprep.subr.bf16.mxu1 %v17623_v1  ;;  %21991 = vst [vmem:[#allocation39_spill] sm:$0xff] %v20188_v14  ;;  %v7460_v26 = vsel %vm21837_vm13, %v7457_v2, %v7459_v58  ;;  %v21995_v2 = vld [vmem:[#allocation8_spill] sm:$0xff] }
 0x3d3   : > { %21992 = vst [vmem:[#allocation40_spill] sm:$0xff] %v20193_v22  ;;  %v20208_v41 = vsel %vm4441_vm12, %v20188_v14, %v20193_v22  ;;  %v7897_v58 = vsel %vm2101_vm7, %v19280_v61, %v21995_v2 }
 0x3d4   : > { %21994 = vst [vmem:[#allocation30_spill] sm:$0xff] %v20208_v41 }
 0x3d6   : > { %15919 = vmatmul.mubr.msk.bf16.vlgmr.msra.gmra.mrb[36].mxu0 %vm493_vm3, %v7456_v59  ;;  %v10457_v59 = vrot.slane %v19339_v55, 1 }
 0x3d7   : > { %16177 = vmatpush3.bf16.msra.mxu0 %v20110_v60  ;;  %15922 = vmatprep.mubr.msk.bf16.mxu0 %vm493_vm3, %v7458_v63  ;;  %v10462_v60 = vrot.slane %v19391_v33, 1 }
 0x3d8   : > { %15953 = vmatmul.mubr.msk.bf16.gmra.mrb[60].mxu1 %vm493_vm3, %v7783_v32  ;;  %16186 = vmatprep.subr.bf16.mxu0 %v17622_v36  ;;  %v10458_v21 = vor.u32 %v10457_v59, %v19337_v3  ;;  %v7893_v32 = vsel %vm2101_vm7, %v7888_v31, %v19280_v61  ;;  %v7904_v59 = vrot.slane %v7902_v8, 2  ;;  %v8004_v8 = vrot.slane %v19890_v23, 2 }
 0x3d9   : > { %15958 = vmatprep.mubr.msk.bf16.mxu1 %vm493_vm3, %v7889_v52  ;;  %v7901_v52 = vrot.slane %v7899_v37, 1  ;;  %v10466_v31 = vor.u32 %v21997_v47, %v10462_v60 }
 0x3da   : > { %v10463_v63 = vsel %vm1790_vm4, %v10458_v21, %v10462_v60  ;;  %v10476_v21 = vshll.u32 %v20226_v30, 16 }
 0x3db   : > { %v7905_v48 = vor.u32 %v7904_v59, %v7901_v52  ;;  %v10471_v61 = vsel %vm1790_vm4, %v10466_v31, %v10470_v54  ;;  %v10480_v52 = vshrl.u32 %v20226_v30, 16  ;;  %v20276_v31 = vld [vmem:[#allocation2 + $0x50] sm:$0xff] }
 0x3dc   : > { %v10478_v37 = vrot.slane %v10476_v21, 1  ;;  %v20268_v21 = vld [vmem:[#allocation2 + $0x60] sm:$0xff] }
 0x3dd   : > { %v7906_v60 = vsel %vm2101_vm7, %v21995_v2, %v7905_v48  ;;  %v17627_v48 = vld [vmem:[%s21723_s2 + $0x30] sm:$0xff]  }
 0x3de   : > { %15923 = vmatmul.mubr.msk.bf16.gmra.mrb[40].mxu0 %vm493_vm3, %v7460_v26  ;;  %v21996_v26 = vld [vmem:[#allocation21_spill] sm:$0xff]  ;;  %v10482_v59 = vor.u32 %v10480_v52, %v10478_v37 }
 0x3df   : > { %16178 = vmatprep.mubr.msk.bf16.mxu0 %vm493_vm3, %v10463_v63  ;;  %v10474_v6 = vor.u32 %v21996_v26, %v10470_v54  ;;  %v7998_v63 = vld [vmem:[#allocation2 + $0x40] sm:$0xfc]  ;;  %v8006_v54 = vrot.slane %v19873_v15, 2 }
 0x3e0   : > { %15959 = vmatmul.mubr.msk.bf16.vlgmr.msra.gmra.mrb[56].mxu1 %vm493_vm3, %v7893_v32  ;;  %v17624_v32 = vld [vmem:[%s21723_s2 + $0x10] sm:$0xff]  }
 0x3e1   : > { %15962 = vmatprep.mubr.msk.bf16.mxu1 %vm493_vm3, %v7897_v58  ;;  %15967 = vmatpush3.bf16.msra.mxu1 %v17623_v1  ;;  %v10479_v1 = vsel %vm1790_vm4, %v10474_v6, %v10478_v37  ;;  %v8003_v58 = vrot.slane %v7998_v63, 2  ;;  %v20261_v6 = vrot.slane %v19914_v9, 2  ;;  %v8010_v63 = vrot.slane %v20217_v39, 2  ;;  %v8103_v37 = vld [vmem:[#allocation2 + $0x48] sm:$0xfe] }
 0x3e2   : > { %15976 = vmatprep.subr.bf16.mxu1 %v17625_v5 }
 0x3e3   : > { %v8005_v23 = vsel %vm2227_vm5, %v8003_v58, %v8004_v8  ;;  %v8009_v15 = vsel %vm2227_vm5, %v8006_v54, %v20261_v6  ;;  %v8115_v58 = vrot.slane %v8103_v37, 1 }
 0x3e6   : > { %16179 = vmatmul.mubr.msk.bf16.vlgmr.msra.gmra.mrb[44].mxu0 %vm493_vm3, %v10471_v61  ;;  %v17626_v61 = vld [vmem:[%s21723_s2 + $0x18] sm:$0xff]  }
 0x3e7   : > { %16187 = vmatpush3.bf16.msra.mxu0 %v17622_v36  ;;  %16182 = vmatprep.mubr.msk.bf16.mxu0 %vm493_vm3, %v10479_v1  ;;  %v8007_v36 = vsel %vm2227_vm5, %v8004_v8, %v8006_v54  ;;  %v8116_v8 = vrot.slane %v20276_v31, 1  ;;  %v20283_v1 = vld [vmem:[#allocation2 + $0x68] sm:$0xff] }
 0x3e8   : > { %15963 = vmatmul.mubr.msk.bf16.gmra.mrb[60].mxu1 %vm493_vm3, %v7906_v60  ;;  %16196 = vmatprep.subr.bf16.mxu0 %v17624_v32  ;;  %v20289_v60 = vld [vmem:[#allocation2 + $0x70] sm:$0xff]  ;;  %v10652_v52 = vrot.slane %v20283_v1, 1 }
 0x3e9   : > { %15968 = vmatprep.mubr.msk.bf16.mxu1 %vm493_vm3, %v8005_v23  ;;  %v8117_v39 = vsel %vm1997_vm6, %v8115_v58, %v8116_v8  ;;  %v10644_v23 = vld [vmem:[#allocation2 + $0x60] sm:$0xfe]  ;;  %v8222_v58 = vshll.u32 %v8103_v37, 16  ;;  %v8119_v40 = vsel %vm1997_vm6, %v8116_v8, %v20153_v57  ;;  %v20317_v41 = vrot.slane %v20289_v60, 1 }
 0x3ea   : > { %v10651_v54 = vrot.slane %v10644_v23, 1  ;;  %v10751_v14 = vshrl.u32 %v10644_v23, 16  ;;  %v10754_v19 = vshll.u32 %v10644_v23, 16 }
 0x3ee   : > { %16183 = vmatmul.mubr.msk.bf16.gmra.mrb[48].mxu0 %vm493_vm3, %v10482_v59  ;;  %v8107_v59 = vld [vmem:[#allocation2 + $0x68] sm:$0x1] }
 0x3ef   : > { %16188 = vmatprep.mubr.msk.bf16.mxu0 %vm493_vm3, %v20268_v21 }
 0x3f0   : > { %15969 = vmatmul.mubr.msk.bf16.vlgmr.msra.gmra.mrb[56].mxu1 %vm493_vm3, %v8007_v36 }
 0x3f1   : > { %15972 = vmatprep.mubr.msk.bf16.mxu1 %vm493_vm3, %v8009_v15  ;;  %15977 = vmatpush3.bf16.msra.mxu1 %v17625_v5  ;;  %v8011_v5 = vsel %vm2227_vm5, %v20261_v6, %v8010_v63  ;;  %v10446_v15 = vld [vmem:[#allocation2 + $0x78] sm:$0xf]  ;;  %v10653_v63 = vsel %vm1997_vm6, %v10651_v54, %v10652_v52 }
 0x3f2   : > { %15986 = vmatprep.subr.bf16.mxu1 %v17627_v48 }
 0x3f6   : > { %16189 = vmatmul.mubr.msk.bf16.vlgmr.msra.gmra.mrb[44].mxu0 %vm493_vm3, %v20283_v1 }
 0x3f7   : > { %16197 = vmatpush3.bf16.msra.mxu0 %v17624_v32  ;;  %16192 = vmatprep.mubr.msk.bf16.mxu0 %vm493_vm3, %v20289_v60  ;;  %v8120_v32 = vrot.slane %v20268_v21, 1 }
 0x3f8   : > { %15973 = vmatmul.mubr.msk.bf16.gmra.mrb[60].mxu1 %vm493_vm3, %v8011_v5  ;;  %16206 = vmatprep.subr.bf16.mxu0 %v17626_v61  ;;  %v8219_v5 = vshrl.u32 %v8103_v37, 16  ;;  %v21999_v37 = vshll.u32 %v20276_v31, 16 }
 0x3f9   : > { %15978 = vmatprep.mubr.msk.bf16.mxu1 %vm493_vm3, %v8117_v39  ;;  %v17629_v39 = vld [vmem:[%s21723_s2 + $0x38] sm:$0xff]   ;;  %v8121_v36 = vsel %vm1997_vm6, %v20153_v57, %v8120_v32  ;;  %v10656_v57 = vrot.slane %v20226_v30, 1  ;;  %v10753_v30 = vrot.slane %v10751_v14, 1 }
 0x3fa   : > { %v8232_v22 = vrot.slane %v21999_v37, 2  ;;  %v8221_v8 = vrot.slane %v8219_v5, 1  ;;  %v8250_v37 = vrot.slane %v19339_v55, 2  ;;  %v10762_v55 = vrot.slane %v21996_v26, 1 }
 0x3fe   : > { %16193 = vmatmul.mubr.msk.bf16.gmra.mrb[48].mxu0 %vm493_vm3, %v10446_v15  ;;  %v21998_v15 = vshrl.u32 %v20276_v31, 16 }
 0x3ff   : > { %16198 = vmatprep.mubr.msk.bf16.mxu0 %vm493_vm3, %v10653_v63  ;;  %v8224_v63 = vrot.slane %v8222_v58, 2  ;;  %v10759_v58 = vrot.slane %v19391_v33, 2  ;;  %v20339_v33 = vld [vmem:[#allocation2 + $0x78] sm:$0x3f] }
 0x400   : > { %15979 = vmatmul.mubr.msk.bf16.vlgmr.msra.gmra.mrb[56].mxu1 %vm493_vm3, %v8119_v40  ;;  %v8229_v54 = vrot.slane %v21998_v15, 1  ;;  %v8122_v40 = vrot.slane %v8107_v59, 1  ;;  %v17628_v15 = vld [vmem:[%s21723_s2 + $0x20] sm:$0xff]   ;;  %v10758_v59 = vrot.slane %v21997_v47, 1 }
 0x401   : > { %15982 = vmatprep.mubr.msk.bf16.mxu1 %vm493_vm3, %v8121_v36  ;;  %15987 = vmatpush3.bf16.msra.mxu1 %v17627_v48  ;;  %v10655_v36 = vsel %vm1997_vm6, %v10652_v52, %v20317_v41  ;;  %v10657_v48 = vsel %vm1997_vm6, %v20317_v41, %v10656_v57  ;;  %v8225_v5 = vor.u32 %v8224_v63, %v8221_v8  ;;  %v10756_v52 = vrot.slane %v10754_v19, 2  ;;  %v20336_v8 = vld [vmem:[#allocation2 + $0x68] sm:$0x3] }
 0x402   : > { %15996 = vmatprep.subr.bf16.mxu1 %v17629_v39  ;;  %v8233_v20 = vor.u32 %v8232_v22, %v8229_v54  ;;  %v8123_v22 = vsel %vm1997_vm6, %v8120_v32, %v8122_v40  ;;  %v8247_v54 = vrot.slane %v19337_v3, 1  ;;  %v10760_v47 = vor.u32 %v10759_v58, %v10758_v59 }
 0x403   : > { %v8257_v14 = vshll.u32 %v20336_v8, 16  ;;  %v10757_v32 = vor.u32 %v10756_v52, %v10753_v30  ;;  %v10767_v19 = vshrl.u32 %v20339_v33, 16  ;;  %v10770_v3 = vshll.u32 %v20339_v33, 16 }
 0x404   : > { %v8234_v23 = vsel %vm2101_vm7, %v8225_v5, %v8233_v20  ;;  %v8251_v63 = vor.u32 %v8250_v37, %v8247_v54  ;;  %v10763_v40 = vrot.slane %v19644_v45, 2  ;;  %v8243_v5 = vsel %vm2101_vm7, %v8233_v20, %v21995_v2  ;;  %v17630_v54 = vld [vmem:[%s21723_s2 + $0x28] sm:$0xff]  }
 0x405   : > { %v8259_v58 = vrot.slane %v8257_v14, 2  ;;  %v10769_v26 = vrot.slane %v10767_v19, 1  ;;  %v8359_v52 = vrot.slane %v20276_v31, 2 }
 0x406   : > { %16199 = vmatmul.mubr.msk.bf16.vlgmr.msra.gmra.mrb[44].mxu0 %vm493_vm3, %v10655_v36  ;;  %v10761_v36 = vsel %vm2101_vm7, %v10757_v32, %v10760_v47  ;;  %v8252_v45 = vsel %vm2101_vm7, %v21995_v2, %v8251_v63  ;;  %v10864_v32 = vld [vmem:[#allocation2 + $0x60] sm:$0xfc] }
 0x407   : > { %16207 = vmatpush3.bf16.msra.mxu0 %v17626_v61  ;;  %16202 = vmatprep.mubr.msk.bf16.mxu0 %vm493_vm3, %v10657_v48  ;;  %v8254_v61 = vshrl.u32 %v20336_v8, 16  ;;  %v17631_v48 = vld [vmem:[%s21723_s2 + $0x40] sm:$0xff]   ;;  %v10869_v19 = vrot.slane %v10864_v32, 2 }
 0x408   : > { %15983 = vmatmul.mubr.msk.bf16.gmra.mrb[60].mxu1 %vm493_vm3, %v8123_v22  ;;  %16216 = vmatprep.subr.bf16.mxu0 %v17628_v15  ;;  %v20359_v22 = vor.u32 %v10763_v40, %v10762_v55  ;;  %v17633_v40 = vld [vmem:[%s21723_s2 + $0x48] sm:$0xff]  }
 0x409   : > { %15988 = vmatprep.mubr.msk.bf16.mxu1 %vm493_vm3, %v8234_v23  ;;  %v8256_v59 = vrot.slane %v8254_v61, 1  ;;  %v8353_v23 = vld [vmem:[#allocation2 + $0x48] sm:$0xfc] }
 0x40a   : > { %v10765_v2 = vsel %vm2101_vm7, %v10760_v47, %v20359_v22  ;;  %v8358_v61 = vrot.slane %v8353_v23, 2  ;;  %v20376_v47 = vrot.slane %v20283_v1, 2  ;;  %v8465_v55 = vshll.u32 %v8353_v23, 16 }
 0x40b   : > { %v8260_v30 = vor.u32 %v8259_v58, %v8256_v59  ;;  %v22001_v58 = vshll.u32 %v20276_v31, 16 }
 0x40c   : > { %v8360_v14 = vsel %vm2227_vm5, %v8358_v61, %v8359_v52 }
 0x40e   : > { %16203 = vmatmul.mubr.msk.bf16.gmra.mrb[48].mxu0 %vm493_vm3, %v10656_v57  ;;  %v10772_v57 = vrot.slane %v10770_v3, 2  ;;  %v20379_v3 = vrot.slane %v20268_v21, 2 }
 0x40f   : > { %16208 = vmatprep.mubr.msk.bf16.mxu0 %vm493_vm3, %v10761_v36  ;;  %v8362_v36 = vsel %vm2227_vm5, %v8359_v52, %v20261_v6  ;;  %v8365_v52 = vrot.slane %v20336_v8, 2 }
 0x410   : > { %15989 = vmatmul.mubr.msk.bf16.vlgmr.msra.gmra.mrb[56].mxu1 %vm493_vm3, %v8243_v5  ;;  %v10773_v20 = vor.u32 %v10772_v57, %v10769_v26  ;;  %v22000_v5 = vshrl.u32 %v20276_v31, 16  ;;  %v8364_v26 = vsel %vm2227_vm5, %v20261_v6, %v20379_v3  ;;  %v20400_v57 = vrot.slane %v20289_v60, 2  ;;  %v17632_v6 = vld [vmem:[%s21723_s2 + $0x30] sm:$0xff]  }
 0x411   : > { %15992 = vmatprep.mubr.msk.bf16.mxu1 %vm493_vm3, %v8252_v45  ;;  %15997 = vmatpush3.bf16.msra.mxu1 %v17629_v39  ;;  %v8261_v39 = vsel %vm2101_vm7, %v8251_v63, %v8260_v30  ;;  %v10871_v63 = vsel %vm2227_vm5, %v10869_v19, %v20376_v47  ;;  %v8470_v45 = vrot.slane %v22001_v58, 3 }
 0x412   : > { %16006 = vmatprep.subr.bf16.mxu1 %v17631_v48  ;;  %v10774_v37 = vsel %vm2101_vm7, %v20359_v22, %v10773_v20  ;;  %v8469_v59 = vrot.slane %v22000_v5, 2 }
 0x416   : > { %16209 = vmatmul.mubr.msk.bf16.vlgmr.msra.gmra.mrb[44].mxu0 %vm493_vm3, %v10765_v2  ;;  %v8471_v2 = vor.u32 %v8470_v45, %v8469_v59  ;;  %v10965_v59 = vld [vmem:[#allocation2 + $0x68] sm:$0xfe] }
 0x417   : > { %16217 = vmatpush3.bf16.msra.mxu0 %v17628_v15  ;;  %16212 = vmatprep.mubr.msk.bf16.mxu0 %vm493_vm3, %v10774_v37  ;;  %v8462_v15 = vshrl.u32 %v8353_v23, 16  ;;  %v8467_v23 = vrot.slane %v8465_v55, 3 }
 0x418   : > { %15993 = vmatmul.mubr.msk.bf16.gmra.mrb[60].mxu1 %vm493_vm3, %v8261_v39  ;;  %16226 = vmatprep.subr.bf16.mxu0 %v17630_v54  ;;  %v10874_v39 = vrot.slane %v20339_v33, 2  ;;  %v8366_v33 = vsel %vm2227_vm5, %v20379_v3, %v8365_v52  ;;  %v10975_v52 = vrot.slane %v10965_v59, 1 }
 0x419   : > { %15998 = vmatprep.mubr.msk.bf16.mxu1 %vm493_vm3, %v8360_v14  ;;  %v8464_v30 = vrot.slane %v8462_v15, 2  ;;  %v10873_v14 = vsel %vm2227_vm5, %v20376_v47, %v20400_v57 }
 0x41a   : > { %v10875_v8 = vsel %vm2227_vm5, %v20400_v57, %v10874_v39 }
 0x41b   : > { %v8468_v32 = vor.u32 %v8467_v23, %v8464_v30 }
 0x41d   : > { %v8472_v55 = vsel %vm2686_vm8, %v8468_v32, %v8471_v2 }
 0x41e   : > { %16213 = vmatmul.mubr.msk.bf16.gmra.mrb[48].mxu0 %vm493_vm3, %v10773_v20 }
 0x41f   : > { %16218 = vmatprep.mubr.msk.bf16.mxu0 %vm493_vm3, %v10871_v63 }
 0x420   : > { %15999 = vmatmul.mubr.msk.bf16.vlgmr.msra.gmra.mrb[56].mxu1 %vm493_vm3, %v8362_v36 }
 0x421   : > { %16002 = vmatprep.mubr.msk.bf16.mxu1 %vm493_vm3, %v8364_v26  ;;  %16007 = vmatpush3.bf16.msra.mxu1 %v17631_v48 }
 0x422   : > { %16016 = vmatprep.subr.bf16.mxu1 %v17633_v40 }
 0x423   : > { %v17489_v20 = vpop.permute.xlu0 %17488 }
 0x424   : > { %v17491_v37 = vunpack.i.h.bf16 %v17489_v20  ;;  %v17490_v61 = vunpack.i.l.bf16 %v17489_v20 }
 0x426   : > { %v1766_v48 = vmax.f32 %v19998_v7, %v17491_v37  ;;  %v1765_v19 = vmax.f32 %v20001_v28, %v17490_v61  ;;  %16219 = vmatmul.mubr.msk.bf16.vlgmr.msra.gmra.mrb[44].mxu0 %vm493_vm3, %v10873_v14  ;;  %v20420_v28 = vld [vmem:[#allocation2 + $0x68] sm:$0x7]  ;;  %v10977_v61 = vsel %vm1997_vm6, %v10975_v52, %v20317_v41 }
 0x427   : > { %v17494_v15 = vpop.permute.xlu1 %17493  ;;  %16227 = vmatpush3.bf16.msra.mxu0 %v17630_v54  ;;  %16222 = vmatprep.mubr.msk.bf16.mxu0 %vm493_vm3, %v10875_v8  ;;  %v8482_v26 = vshrl.u32 %v20420_v28, 16  ;;  %v8485_v30 = vshll.u32 %v20420_v28, 16 }
 0x428   : > { %v1772_v63 = vmax.f32 %v1766_v48, 0.0  ;;  %v1771_v36 = vmax.f32 %v1765_v19, 0.0  ;;  %v17496_v5 = vunpack.i.h.bf16 %v17494_v15  ;;  %v17495_v7 = vunpack.i.l.bf16 %v17494_v15  ;;  %16003 = vmatmul.mubr.msk.bf16.gmra.mrb[60].mxu1 %vm493_vm3, %v8366_v33  ;;  %16236 = vmatprep.subr.bf16.mxu0 %v17632_v6  ;;  %v10968_v19 = vld [vmem:[#allocation2 + $0x80] sm:$0x1f] }
 0x429   : > { %16008 = vmatprep.mubr.msk.bf16.mxu1 %vm493_vm3, %v8472_v55  ;;  %v8484_v32 = vrot.slane %v8482_v26, 2  ;;  %v8487_v48 = vrot.slane %v8485_v30, 3  ;;  %v10980_v8 = vrot.slane %v10968_v19, 1  ;;  %v10978_v15 = vrot.slane %v20058_v10, 1  ;;  %v8581_v55 = vld [vmem:[#allocation2 + $0x48] sm:$0xf8] }
 0x42a   : > { %v1776_v54 = vpack.c.bf16 %v1772_v63, %v1771_v36  ;;  %v1768_v58 = vmax.f32 %v20021_v17, %v17496_v5  ;;  %v1767_v45 = vmax.f32 %v20024_v38, %v17495_v7  ;;  %v17635_v17 = vld [vmem:[%s21723_s2 + $0x50] sm:$0xff]   ;;  %v22002_v38 = vld [vmem:[#allocation24_spill] sm:$0xff]  ;;  %v8587_v63 = vrot.slane %v20276_v31, 3  ;;  %v17634_v7 = vld [vmem:[%s21723_s2 + $0x38] sm:$0xff]  }
 0x42b   : > { %v8476_v14 = vsel %vm2686_vm8, %v8471_v2, %v22002_v38  ;;  %v8488_v33 = vor.u32 %v8487_v48, %v8484_v32  ;;  %v11075_v36 = vshrl.u32 %v10965_v59, 16  ;;  %v11078_v5 = vshll.u32 %v10965_v59, 16  ;;  %v22004_v26 = vld [vmem:[#allocation9_spill] sm:$0xff]  ;;  %v20456_v59 = vld [vmem:[#allocation2 + $0x80] sm:$0x3f]  ;;  %v17637_v19 = vld [vmem:[%s21723_s2 + $0x58] sm:$0xff]  }
 0x42c   : > { %1779 = vst.msk [vmem:[#allocation2 + $0x98] sm:$0xff] %vm493_vm3, %v1776_v54  ;;  %v1774_v23 = vmax.f32 %v1768_v58, 0.0  ;;  %v1773_v20 = vmax.f32 %v1767_v45, 0.0  ;;  %v10979_v54 = vsel %vm1997_vm6, %v20317_v41, %v10978_v15  ;;  %v10981_v58 = vsel %vm1997_vm6, %v10978_v15, %v10980_v8 }
 0x42d   : > { %v8586_v45 = vrot.slane %v8581_v55, 3  ;;  %v8489_v31 = vsel %vm2686_vm8, %v22004_v26, %v8488_v33  ;;  %v11077_v41 = vrot.slane %v11075_v36, 1  ;;  %v11101_v52 = vshrl.u32 %v20456_v59, 16  ;;  %v22007_v33 = vld [vmem:[#allocation25_spill] sm:$0xff]  ;;  %v20488_v36 = vld [vmem:[#allocation2 + $0x58] sm:$0xff] }
 0x42e   : > { %v1777_v37 = vpack.c.bf16 %v1774_v23, %v1773_v20  ;;  %16223 = vmatmul.mubr.msk.bf16.gmra.mrb[48].mxu0 %vm493_vm3, %v10874_v39  ;;  %v22003_v39 = vld [vmem:[#allocation10_spill] sm:$0xff]  ;;  %v11080_v23 = vrot.slane %v11078_v5, 2  ;;  %v22005_v20 = vrot.slane %v20116_v56, 6  ;;  %v11097_v55 = vrot.slane %v22007_v33, 2 }
 0x42f   : > { %16228 = vmatprep.mubr.msk.bf16.mxu0 %vm493_vm3, %v10977_v61  ;;  %v8588_v30 = vsel %vm2812_vm9, %v8586_v45, %v8587_v63  ;;  %v8589_v61 = vrot.slane %v19914_v9, 3  ;;  %v11103_v32 = vrot.slane %v11101_v52, 1  ;;  %v22006_v9 = vld [vmem:[#allocation23_spill] sm:$0xff]  ;;  %v8699_v45 = vrot.slane %v20488_v36, 2 }
 0x430   : > { %1780 = vst.msk [vmem:[#allocation2 + $0xa0] sm:$0xff] %vm493_vm3, %v1777_v37  ;;  %16009 = vmatmul.mubr.msk.bf16.vlgmr.msra.gmra.mrb[56].mxu1 %vm493_vm3, %v8476_v14  ;;  %v11104_v37 = vshll.u32 %v20456_v59, 16  ;;  %v11081_v38 = vor.u32 %v11080_v23, %v11077_v41  ;;  %v20472_v14 = vrot.slane %v20268_v21, 3  ;;  %v11094_v15 = vrot.slane %v22006_v9, 1 }
 0x431   : > { %16012 = vmatprep.mubr.msk.bf16.mxu1 %vm493_vm3, %v22003_v39  ;;  %16017 = vmatpush3.bf16.msra.mxu1 %v17633_v40  ;;  %v8590_v39 = vsel %vm2812_vm9, %v8587_v63, %v8589_v61  ;;  %v8593_v63 = vrot.slane %v20420_v28, 3  ;;  %v8810_v52 = vshrl.u32 %v20488_v36, 16 }
 0x432   : > { %16026 = vmatprep.subr.bf16.mxu1 %v17635_v17  ;;  %v11090_v56 = vsel %vm2101_vm7, %v11081_v38, %v20359_v22  ;;  %v11106_v48 = vrot.slane %v11104_v37, 2  ;;  %v8813_v37 = vshll.u32 %v20488_v36, 16 }
 0x433   : > { %v20442_v2 = vld [vmem:[#allocation2 + $0x98] sm:$0xff]  ;;  %v8594_v23 = vsel %vm2812_vm9, %v20472_v14, %v8593_v63  ;;  %v20527_v63 = vrot.slane %v20058_v10, 2 }
 0x434   : > { %v13120_v40 = vrot.slane %v20442_v2, 6  ;;  %v11107_v5 = vor.u32 %v11106_v48, %v11103_v32  ;;  %v8702_v32 = vsel %vm2227_vm5, %v8699_v45, %v20379_v3  ;;  %v8704_v48 = vsel %vm2227_vm5, %v20379_v3, %v20376_v47 }
 0x436   : > { %16229 = vmatmul.mubr.msk.bf16.vlgmr.msra.gmra.mrb[44].mxu0 %vm493_vm3, %v10979_v54  ;;  %v11098_v54 = vor.u32 %v11097_v55, %v11094_v15  ;;  %v8812_v15 = vrot.slane %v8810_v52, 2  ;;  %v8815_v55 = vrot.slane %v8813_v37, 3 }
 0x437   : > { %16237 = vmatpush3.bf16.msra.mxu0 %v17632_v6  ;;  %16232 = vmatprep.mubr.msk.bf16.mxu0 %vm493_vm3, %v10981_v58  ;;  %v20465_v6 = vsel %vm21837_vm13, %v22005_v20, %v13120_v40  ;;  %v8686_v58 = vld [vmem:[#allocation2 + $0x50] sm:$0xfc]  ;;  %v11198_v20 = vld [vmem:[#allocation2 + $0x68] sm:$0xfc] }
 0x438   : > { %16013 = vmatmul.mubr.msk.bf16.gmra.mrb[60].mxu1 %vm493_vm3, %v8489_v31  ;;  %16246 = vmatprep.subr.bf16.mxu0 %v17634_v7  ;;  %v17636_v31 = vld [vmem:[%s21723_s2 + $0x40] sm:$0xff]   ;;  %v11108_v41 = vsel %vm2101_vm7, %v11098_v54, %v11107_v5  ;;  %v8805_v38 = vshll.u32 %v8686_v58, 16  ;;  %v8816_v3 = vor.u32 %v8815_v55, %v8812_v15  ;;  %v11314_v15 = vrot.slane %v22006_v9, 2 }
 0x439   : > { %16018 = vmatprep.mubr.msk.bf16.mxu1 %vm493_vm3, %v8588_v30  ;;  %v11099_v30 = vsel %vm2101_vm7, %v20359_v22, %v11098_v54  ;;  %v11203_v22 = vrot.slane %v11198_v20, 2 }
 0x43a   : > { %v8807_v54 = vrot.slane %v8805_v38, 3 }
 0x43e   : > { %16233 = vmatmul.mubr.msk.bf16.gmra.mrb[48].mxu0 %vm493_vm3, %v10980_v8  ;;  %v8592_v8 = vsel %vm2812_vm9, %v8589_v61, %v20472_v14  ;;  %v8802_v61 = vshrl.u32 %v8686_v58, 16 }
 0x43f   : > { %16238 = vmatprep.mubr.msk.bf16.mxu0 %vm493_vm3, %v11090_v56  ;;  %v17639_v56 = vld [vmem:[%s21723_s2 + $0x60] sm:$0xff]  }
 0x440   : > { %16019 = vmatmul.mubr.msk.bf16.vlgmr.msra.gmra.mrb[56].mxu1 %vm493_vm3, %v8590_v39  ;;  %v8690_v39 = vld [vmem:[#allocation2 + $0x70] sm:$0x3] }
 0x441   : > { %16022 = vmatprep.mubr.msk.bf16.mxu1 %vm493_vm3, %v8592_v8  ;;  %16027 = vmatpush3.bf16.msra.mxu1 %v17635_v17  ;;  %v8698_v17 = vrot.slane %v8686_v58, 2  ;;  %v11208_v8 = vrot.slane %v20456_v59, 2  ;;  %v8705_v58 = vrot.slane %v8690_v39, 2 }
 0x442   : > { %16036 = vmatprep.subr.bf16.mxu1 %v17637_v19 }
 0x443   : > { %v8700_v28 = vsel %vm2227_vm5, %v8698_v17, %v8699_v45  ;;  %v11303_v45 = vshrl.u32 %v11198_v20, 16  ;;  %v11209_v59 = vsel %vm2227_vm5, %v20527_v63, %v11208_v8 }
 0x446   : > { %16239 = vmatmul.mubr.msk.bf16.vlgmr.msra.gmra.mrb[44].mxu0 %vm493_vm3, %v11099_v30  ;;  %v11306_v30 = vshll.u32 %v11198_v20, 16 }
 0x447   : > { %16247 = vmatpush3.bf16.msra.mxu0 %v17634_v7  ;;  %16242 = vmatprep.mubr.msk.bf16.mxu0 %vm493_vm3, %v11108_v41  ;;  %v11205_v7 = vsel %vm2227_vm5, %v11203_v22, %v20400_v57  ;;  %v17638_v41 = vld [vmem:[%s21723_s2 + $0x48] sm:$0xff]   ;;  %v11305_v22 = vrot.slane %v11303_v45, 2  ;;  %v11315_v45 = vrot.slane %v22007_v33, 3  ;;  %v17640_v33 = vld [vmem:[%s21723_s2 + $0x50] sm:$0xff]  }
 0x448   : > { %16023 = vmatmul.mubr.msk.bf16.gmra.mrb[60].mxu1 %vm493_vm3, %v8594_v23  ;;  %16256 = vmatprep.subr.bf16.mxu0 %v17636_v31  ;;  %v8706_v23 = vsel %vm2227_vm5, %v20376_v47, %v8705_v58  ;;  %v8826_v58 = vsel %vm2686_vm8, %v8816_v3, %v22004_v26  ;;  %v8942_v26 = vrot.slane %v20488_v36, 3 }
 0x449   : > { %16028 = vmatprep.mubr.msk.bf16.mxu1 %vm493_vm3, %v8700_v28  ;;  %v20541_v28 = vld [vmem:[#allocation2 + $0x80] sm:$0x7f] }
 0x44e   : > { %16243 = vmatmul.mubr.msk.bf16.gmra.mrb[48].mxu0 %vm493_vm3, %v11107_v5  ;;  %v8804_v5 = vrot.slane %v8802_v61, 2  ;;  %v11322_v61 = vshll.u32 %v20541_v28, 16 }
 0x44f   : > { %16248 = vmatprep.mubr.msk.bf16.mxu0 %vm493_vm3, %v11205_v7  ;;  %v20545_v7 = vld [vmem:[#allocation2 + $0x70] sm:$0x7] }
 0x450   : > { %16029 = vmatmul.mubr.msk.bf16.vlgmr.msra.gmra.mrb[56].mxu1 %vm493_vm3, %v8702_v32  ;;  %v8808_v17 = vor.u32 %v8807_v54, %v8804_v5  ;;  %v8837_v47 = vshrl.u32 %v20545_v7, 16  ;;  %v8840_v38 = vshll.u32 %v20545_v7, 16  ;;  %v11324_v5 = vrot.slane %v11322_v61, 3  ;;  %v17641_v54 = vld [vmem:[%s21723_s2 + $0x68] sm:$0xff]  }
 0x451   : > { %16032 = vmatprep.mubr.msk.bf16.mxu1 %vm493_vm3, %v8704_v48  ;;  %16037 = vmatpush3.bf16.msra.mxu1 %v17637_v19  ;;  %v11207_v19 = vsel %vm2227_vm5, %v20400_v57, %v20527_v63  ;;  %v11308_v57 = vrot.slane %v11306_v30, 3  ;;  %v22008_v48 = vld [vmem:[#allocation18_spill] sm:$0xff]  ;;  %v11416_v61 = vld [vmem:[#allocation2 + $0x68] sm:$0xf8] }
 0x452   : > { %16046 = vmatprep.subr.bf16.mxu1 %v17639_v56  ;;  %v8817_v20 = vsel %vm2686_vm8, %v8808_v17, %v8816_v3  ;;  %v8839_v30 = vrot.slane %v8837_v47, 2  ;;  %v11422_v47 = vrot.slane %v20289_v60, 3 }
 0x453   : > { %v11309_v32 = vor.u32 %v11308_v57, %v11305_v22  ;;  %v22010_v22 = vld [vmem:[#allocation11_spill] sm:$0xff] }
 0x455   : > { %v11313_v39 = vsel %vm2686_vm8, %v11309_v32, %v22008_v48  ;;  %v8946_v32 = vrot.slane %v20283_v1, 3 }
 0x456   : > { %16249 = vmatmul.mubr.msk.bf16.vlgmr.msra.gmra.mrb[44].mxu0 %vm493_vm3, %v11207_v19  ;;  %v22009_v19 = vld [vmem:[#allocation12_spill] sm:$0xff] }
 0x457   : > { %16257 = vmatpush3.bf16.msra.mxu0 %v17636_v31  ;;  %16252 = vmatprep.mubr.msk.bf16.mxu0 %vm493_vm3, %v11209_v59  ;;  %v11319_v31 = vshrl.u32 %v20541_v28, 16  ;;  %v20566_v59 = vor.u32 %v11315_v45, %v11314_v15  ;;  %v17643_v15 = vld [vmem:[%s21723_s2 + $0x70] sm:$0xff]   ;;  %v8947_v60 = vsel %vm2812_vm9, %v20472_v14, %v8946_v32  ;;  %v11426_v45 = vrot.slane %v20541_v28, 3 }
 0x458   : > { %16033 = vmatmul.mubr.msk.bf16.gmra.mrb[60].mxu1 %vm493_vm3, %v8706_v23  ;;  %16266 = vmatprep.subr.bf16.mxu0 %v17638_v41  ;;  %v8936_v23 = vld [vmem:[#allocation2 + $0x50] sm:$0xf8] }
 0x459   : > { %16038 = vmatprep.mubr.msk.bf16.mxu1 %vm493_vm3, %v8817_v20  ;;  %v11321_v55 = vrot.slane %v11319_v31, 2  ;;  %v11317_v3 = vsel %vm2686_vm8, %v22008_v48, %v20566_v59  ;;  %v8941_v20 = vrot.slane %v8936_v23, 3  ;;  %v9045_v48 = vshrl.u32 %v8936_v23, 16 }
 0x45b   : > { %v11325_v9 = vor.u32 %v11324_v5, %v11321_v55  ;;  %v8943_v31 = vsel %vm2812_vm9, %v8941_v20, %v8942_v26  ;;  %v8945_v55 = vsel %vm2812_vm9, %v8942_v26, %v20472_v14  ;;  %v9052_v5 = vrot.slane %v8810_v52, 3 }
 0x45c   : > { %v8948_v14 = vrot.slane %v20545_v7, 3 }
 0x45e   : > { %16253 = vmatmul.mubr.msk.bf16.gmra.mrb[48].mxu0 %vm493_vm3, %v11208_v8  ;;  %v8842_v8 = vrot.slane %v8840_v38, 3  ;;  %v11421_v38 = vrot.slane %v11416_v61, 3 }
 0x45f   : > { %16258 = vmatprep.mubr.msk.bf16.mxu0 %vm493_vm3, %v11313_v39  ;;  %v9048_v39 = vshll.u32 %v8936_v23, 16 }
 0x460   : > { %16039 = vmatmul.mubr.msk.bf16.vlgmr.msra.gmra.mrb[56].mxu1 %vm493_vm3, %v8826_v58  ;;  %v8843_v17 = vor.u32 %v8842_v8, %v8839_v30  ;;  %v9053_v58 = vrot.slane %v8813_v37, 4  ;;  %v9047_v30 = vrot.slane %v9045_v48, 3  ;;  %v17642_v37 = vld [vmem:[%s21723_s2 + $0x58] sm:$0xff]  }
 0x461   : > { %16042 = vmatprep.mubr.msk.bf16.mxu1 %vm493_vm3, %v22009_v19  ;;  %16047 = vmatpush3.bf16.msra.mxu1 %v17639_v56  ;;  %v11326_v56 = vsel %vm2686_vm8, %v20566_v59, %v11325_v9  ;;  %v9050_v8 = vrot.slane %v9048_v39, 4  ;;  %v17645_v48 = vld [vmem:[%s21723_s2 + $0x78] sm:$0xff]   ;;  %v22011_v39 = vld [vmem:[#allocation5_spill] sm:$0xff] }
 0x462   : > { %16056 = vmatprep.subr.bf16.mxu1 %v17641_v54  ;;  %v8844_v57 = vsel %vm2686_vm8, %v22010_v22, %v8843_v17  ;;  %v9054_v17 = vor.u32 %v9053_v58, %v9052_v5  ;;  %v20623_v22 = vld [vmem:[#allocation2 + $0x70] sm:$0xf]  ;;  %v11520_v58 = vld [vmem:[#allocation2 + $0x88] sm:$0x3f] }
 0x463   : > { %v9051_v26 = vor.u32 %v9050_v8, %v9047_v30  ;;  %v9065_v61 = vshrl.u32 %v20623_v22, 16  ;;  %v20644_v30 = vld [vmem:[#allocation2 + $0x80] sm:$0xff] }
 0x464   : > { %v11530_v8 = vrot.slane %v20644_v30, 2 }
 0x465   : > { %v9055_v20 = vsel %vm3271_vm10, %v9051_v26, %v9054_v17 }
 0x466   : > { %16259 = vmatmul.mubr.msk.bf16.vlgmr.msra.gmra.mrb[44].mxu0 %vm493_vm3, %v11317_v3  ;;  %v8949_v3 = vsel %vm2812_vm9, %v8946_v32, %v8948_v14 }
 0x467   : > { %16267 = vmatpush3.bf16.msra.mxu0 %v17638_v41  ;;  %16262 = vmatprep.mubr.msk.bf16.mxu0 %vm493_vm3, %v11326_v56  ;;  %v11423_v41 = vsel %vm2812_vm9, %v11421_v38, %v11422_v47  ;;  %v11517_v56 = vld [vmem:[#allocation2 + $0x70] sm:$0xfc] }
 0x468   : > { %16043 = vmatmul.mubr.msk.bf16.gmra.mrb[60].mxu1 %vm493_vm3, %v8844_v57  ;;  %16276 = vmatprep.subr.bf16.mxu0 %v17640_v33  ;;  %v11527_v57 = vrot.slane %v11517_v56, 2  ;;  %v11627_v14 = vshrl.u32 %v11517_v56, 16 }
 0x469   : > { %16048 = vmatprep.mubr.msk.bf16.mxu1 %vm493_vm3, %v8943_v31 }
 0x46e   : > { %16263 = vmatmul.mubr.msk.bf16.gmra.mrb[48].mxu0 %vm493_vm3, %v11325_v9  ;;  %v20604_v9 = vrot.slane %v20058_v10, 3 }
 0x46f   : > { %16268 = vmatprep.mubr.msk.bf16.mxu0 %vm493_vm3, %v11423_v41  ;;  %v11529_v41 = vsel %vm2227_vm5, %v11527_v57, %v20527_v63 }
 0x470   : > { %16049 = vmatmul.mubr.msk.bf16.vlgmr.msra.gmra.mrb[56].mxu1 %vm493_vm3, %v8945_v55  ;;  %v11427_v7 = vsel %vm2812_vm9, %v20604_v9, %v11426_v45  ;;  %v9059_v55 = vsel %vm3271_vm10, %v9054_v17, %v22011_v39 }
 0x471   : > { %16052 = vmatprep.mubr.msk.bf16.mxu1 %vm493_vm3, %v8947_v60  ;;  %16057 = vmatpush3.bf16.msra.mxu1 %v17641_v54  ;;  %v11425_v54 = vsel %vm2812_vm9, %v11422_v47, %v20604_v9  ;;  %v9067_v60 = vrot.slane %v9065_v61, 3 }
 0x472   : > { %16066 = vmatprep.subr.bf16.mxu1 %v17643_v15 }
 0x473   : > { %v15670_v19 = vpop.f32.mrb[48].mxu1 }
 0x474   : > { %4671 = vst.msk [vmem:[#allocation3 + $0x10] sm:$0xff] %vm4668_vm15, %v15670_v19  ;;  %v4629_v52 = vpop.f32.mrb[49].mxu1  ;;  %v11532_v19 = vrot.slane %v11520_v58, 2 }
 0x475   : > { %4669 = vst.msk [vmem:[#allocation3] sm:$0xff] %vm4668_vm15, %v4629_v52  ;;  %v15671_v28 = vpop.f32.mrb[50].mxu1  ;;  %v11630_v52 = vshll.u32 %v11517_v56, 16  ;;  %v22013_v56 = vld [vmem:[#allocation4_spill] sm:$0xff] }
 0x476   : > { %4672 = vst.msk [vmem:[#allocation3 + $0x18] sm:$0xff] %vm4668_vm15, %v15671_v28  ;;  %v4632_v23 = vpop.f32.mrb[51].mxu1  ;;  %16269 = vmatmul.mubr.msk.bf16.vlgmr.msra.gmra.mrb[44].mxu0 %vm493_vm3, %v11425_v54  ;;  %v9164_v28 = vld [vmem:[#allocation2 + $0x50] sm:$0xf0]  ;;  %v9170_v54 = vrot.slane %v20488_v36, 4  ;;  %v11533_v26 = vsel %vm2227_vm5, %v11530_v8, %v11532_v19 }
 0x477   : > { %4670 = vst.msk [vmem:[#allocation3 + $0x8] sm:$0xff] %vm4668_vm15, %v4632_v23  ;;  %16277 = vmatpush3.bf16.msra.mxu0 %v17640_v33  ;;  %16272 = vmatprep.mubr.msk.bf16.mxu0 %vm493_vm3, %v11427_v7  ;;  %v9068_v33 = vshll.u32 %v20623_v22, 16  ;;  %v17644_v23 = vld [vmem:[%s21723_s2 + $0x60] sm:$0xff]   ;;  %v11531_v7 = vsel %vm2227_vm5, %v20527_v63, %v11530_v8  ;;  %v20658_v36 = vld [vmem:[#allocation2 + $0x88] sm:$0x7f] }
 0x478   : > { %16053 = vmatmul.mubr.msk.bf16.gmra.mrb[60].mxu1 %vm493_vm3, %v8949_v3  ;;  %16286 = vmatprep.subr.bf16.mxu0 %v17642_v37  ;;  %v11629_v3 = vrot.slane %v11627_v14, 2  ;;  %v11653_v61 = vshrl.u32 %v20658_v36, 16  ;;  %v9269_v8 = vld [vmem:[#allocation2 + $0x58] sm:$0xf8] }
 0x479   : > { %16058 = vmatprep.mubr.msk.bf16.mxu1 %vm493_vm3, %v9055_v20  ;;  %v9070_v5 = vrot.slane %v9068_v33, 4  ;;  %v11632_v20 = vrot.slane %v11630_v52, 3  ;;  %v11656_v33 = vshll.u32 %v20658_v36, 16  ;;  %v17646_v52 = vld [vmem:[%s21723_s2 + $0x68] sm:$0xff]  }
 0x47a   : > { %v11655_v39 = vrot.slane %v11653_v61, 2  ;;  %v20710_v61 = vld [vmem:[%s21723_s2 + $0x88] sm:$0xff]  }
 0x47b   : > { %v15674_v31 = vpop.f32.mrb[52].mxu1  ;;  %v9071_v17 = vor.u32 %v9070_v5, %v9067_v60  ;;  %v11633_v63 = vor.u32 %v11632_v20, %v11629_v3  ;;  %v17647_v60 = vld [vmem:[%s21723_s2 + $0x80] sm:$0xff]   ;;  %v20699_v3 = vld [vmem:[#allocation2 + $0x70] sm:$0xff] }
 0x47c   : > { %4675 = vst.msk [vmem:[#allocation3 + $0x30] sm:$0xff] %vm4668_vm15, %v15674_v31  ;;  %v4645_v47 = vpop.f32.mrb[53].mxu1 }
 0x47d   : > { %4673 = vst.msk [vmem:[#allocation3 + $0x20] sm:$0xff] %vm4668_vm15, %v4645_v47  ;;  %v15675_v38 = vpop.f32.mrb[54].mxu1  ;;  %v9072_v57 = vsel %vm3271_vm10, %v22013_v56, %v9071_v17  ;;  %v9174_v47 = vrot.slane %v20283_v1, 4 }
 0x47e   : > { %4676 = vst.msk [vmem:[#allocation3 + $0x38] sm:$0xff] %vm4668_vm15, %v15675_v38  ;;  %v4648_v32 = vpop.f32.mrb[55].mxu1  ;;  %16273 = vmatmul.mubr.msk.bf16.gmra.mrb[48].mxu0 %vm493_vm3, %v11426_v45  ;;  %v22012_v45 = vld [vmem:[#allocation13_spill] sm:$0xff]  ;;  %v11646_v38 = vrot.slane %v20077_v16, 2 }
 0x47f   : > { %4674 = vst.msk [vmem:[#allocation3 + $0x28] sm:$0xff] %vm4668_vm15, %v4648_v32  ;;  %16278 = vmatprep.mubr.msk.bf16.mxu0 %vm493_vm3, %v11529_v41  ;;  %v11649_v32 = vrot.slane %v20080_v43, 3  ;;  %v11642_v41 = vsel %vm2686_vm8, %v11633_v63, %v20566_v59  ;;  %v9388_v63 = vshll.u32 %v9269_v8, 16 }
 0x480   : > { %16059 = vmatmul.mubr.msk.bf16.vlgmr.msra.gmra.mrb[56].mxu1 %vm493_vm3, %v9059_v55  ;;  %v11658_v55 = vrot.slane %v11656_v33, 3 }
 0x481   : > { %16062 = vmatprep.mubr.msk.bf16.mxu1 %vm493_vm3, %v22012_v45  ;;  %16067 = vmatpush3.bf16.msra.mxu1 %v17643_v15  ;;  %v9169_v15 = vrot.slane %v9164_v28, 4  ;;  %v11650_v1 = vor.u32 %v11649_v32, %v11646_v38  ;;  %v9176_v45 = vrot.slane %v20623_v22, 4  ;;  %v9281_v28 = vrot.slane %v9269_v8, 3 }
 0x482   : > { %16076 = vmatprep.subr.bf16.mxu1 %v17645_v48  ;;  %v11659_v58 = vor.u32 %v11658_v55, %v11655_v39  ;;  %v20722_v32 = vrot.slane %v20644_v30, 3  ;;  %v9273_v39 = vld [vmem:[#allocation2 + $0x78] sm:$0x7]  ;;  %v11760_v55 = vrot.slane %v20658_v36, 3 }
 0x483   : > { %v9171_v31 = vsel %vm363_vm1, %v9169_v15, %v9170_v54  ;;  %v11651_v17 = vsel %vm2686_vm8, %v20566_v59, %v11650_v1  ;;  %v9177_v22 = vsel %vm363_vm1, %v9174_v47, %v9176_v45  ;;  %v20696_v59 = vld [vmem:[#allocation2 + $0x68] sm:$0xff]  ;;  %v20729_v45 = vld [vmem:[%s21723_s2 + $0x70] sm:$0xff]  }
 0x484   : > { %v9284_v15 = vrot.slane %v20696_v59, 3  ;;  %v11759_v30 = vsel %vm2812_vm9, %v20604_v9, %v20722_v32  ;;  %v11761_v36 = vsel %vm2812_vm9, %v20722_v32, %v11760_v55 }
 0x486   : > { %16279 = vmatmul.mubr.msk.bf16.vlgmr.msra.gmra.mrb[44].mxu0 %vm493_vm3, %v11531_v7 }
 0x487   : > { %16287 = vmatpush3.bf16.msra.mxu0 %v17642_v37  ;;  %16282 = vmatprep.mubr.msk.bf16.mxu0 %vm493_vm3, %v11533_v26  ;;  %v9172_v37 = vrot.slane %v20268_v21, 4 }
 0x488   : > { %16063 = vmatmul.mubr.msk.bf16.gmra.mrb[60].mxu1 %vm493_vm3, %v9072_v57  ;;  %16296 = vmatprep.subr.bf16.mxu0 %v17644_v23  ;;  %v9385_v57 = vshrl.u32 %v9269_v8, 16  ;;  %v9288_v8 = vrot.slane %v9273_v39, 3  ;;  %v11867_v39 = vrot.slane %v20080_v43, 4 }
 0x489   : > { %16068 = vmatprep.mubr.msk.bf16.mxu1 %vm493_vm3, %v9171_v31  ;;  %v9173_v5 = vsel %vm363_vm1, %v9170_v54, %v9172_v37  ;;  %v9175_v21 = vsel %vm363_vm1, %v9172_v37, %v9174_v47  ;;  %v11750_v54 = vld [vmem:[#allocation2 + $0x70] sm:$0xf8] }
 0x48a   : > { %v11755_v26 = vrot.slane %v11750_v54, 3 }
 0x48c   : > { %v11757_v31 = vsel %vm2812_vm9, %v11755_v26, %v20604_v9  ;;  %v22016_v26 = vld [vmem:[#allocation16_spill] sm:$0xff] }
 0x48e   : > { %16283 = vmatmul.mubr.msk.bf16.gmra.mrb[48].mxu0 %vm493_vm3, %v11532_v19  ;;  %v20681_v19 = vld [vmem:[#allocation2 + $0x60] sm:$0xff] }
 0x48f   : > { %16288 = vmatprep.mubr.msk.bf16.mxu0 %vm493_vm3, %v11642_v41  ;;  %v9282_v14 = vrot.slane %v20681_v19, 3  ;;  %v9393_v20 = vshrl.u32 %v20681_v19, 16  ;;  %v9396_v56 = vshll.u32 %v20681_v19, 16  ;;  %v9387_v41 = vrot.slane %v9385_v57, 3 }
 0x490   : > { %16069 = vmatmul.mubr.msk.bf16.vlgmr.msra.gmra.mrb[56].mxu1 %vm493_vm3, %v9173_v5  ;;  %v9390_v5 = vrot.slane %v9388_v63, 4  ;;  %v9416_v57 = vrot.slane %v19707_v25, 4  ;;  %v20748_v63 = vld [vmem:[#allocation2 + $0x78] sm:$0xf] }
 0x491   : > { %16072 = vmatprep.mubr.msk.bf16.mxu1 %vm493_vm3, %v9175_v21  ;;  %16077 = vmatpush3.bf16.msra.mxu1 %v17645_v48  ;;  %v11660_v48 = vsel %vm2686_vm8, %v11650_v1, %v11659_v58  ;;  %v9283_v7 = vsel %vm2812_vm9, %v9281_v28, %v9282_v14  ;;  %v9285_v33 = vsel %vm2812_vm9, %v9282_v14, %v9284_v15  ;;  %v9395_v47 = vrot.slane %v9393_v20, 3  ;;  %v22014_v28 = vld [vmem:[#allocation20_spill] sm:$0xff] }
 0x492   : > { %16086 = vmatprep.subr.bf16.mxu1 %v17647_v60  ;;  %v9398_v38 = vrot.slane %v9396_v56, 4  ;;  %v11855_v21 = vshrl.u32 %v11750_v54, 16  ;;  %v11858_v1 = vshll.u32 %v11750_v54, 16  ;;  %v22015_v54 = vld [vmem:[#allocation22_spill] sm:$0xff] }
 0x494   : > { %v11857_v14 = vrot.slane %v11855_v21, 3  ;;  %v9423_v21 = vshll.u32 %v20748_v63, 16 }
 0x496   : > { %16289 = vmatmul.mubr.msk.bf16.vlgmr.msra.gmra.mrb[44].mxu0 %vm493_vm3, %v11651_v17  ;;  %v11860_v17 = vrot.slane %v11858_v1, 4  ;;  %v22017_v1 = vld [vmem:[#allocation14_spill] sm:$0xff] }
 0x497   : > { %16297 = vmatpush3.bf16.msra.mxu0 %v17644_v23  ;;  %16292 = vmatprep.mubr.msk.bf16.mxu0 %vm493_vm3, %v11660_v48  ;;  %v9286_v23 = vrot.slane %v20699_v3, 3 }
 0x498   : > { %16073 = vmatmul.mubr.msk.bf16.gmra.mrb[60].mxu1 %vm493_vm3, %v9177_v22  ;;  %16306 = vmatprep.subr.bf16.mxu0 %v17646_v52  ;;  %v9404_v22 = vrot.slane %v22014_v28, 3 }
 0x499   : > { %16078 = vmatprep.mubr.msk.bf16.mxu1 %vm493_vm3, %v9283_v7  ;;  %v9287_v37 = vsel %vm2812_vm9, %v9284_v15, %v9286_v23  ;;  %v9289_v48 = vsel %vm2812_vm9, %v9286_v23, %v9288_v8  ;;  %v9407_v7 = vrot.slane %v22015_v54, 4  ;;  %v9413_v15 = vrot.slane %v22016_v26, 3 }
 0x49a   : > { %v11873_v8 = vrot.slane %v20090_v18, 3 }
 0x49e   : > { %16293 = vmatmul.mubr.msk.bf16.gmra.mrb[48].mxu0 %vm493_vm3, %v11659_v58  ;;  %v9399_v58 = vor.u32 %v9398_v38, %v9395_v47  ;;  %v9417_v38 = vor.u32 %v9416_v57, %v9413_v15  ;;  %v17650_v15 = vld [vmem:[%s21723_s2 + $0x78] sm:$0xff]  }
 0x49f   : > { %16298 = vmatprep.mubr.msk.bf16.mxu0 %vm493_vm3, %v11757_v31  ;;  %v11861_v31 = vor.u32 %v11860_v17, %v11857_v14  ;;  %v9425_v17 = vrot.slane %v9423_v21, 4 }
 0x4a0   : > { %16079 = vmatmul.mubr.msk.bf16.vlgmr.msra.gmra.mrb[56].mxu1 %vm493_vm3, %v9285_v33 }
 0x4a1   : > { %16082 = vmatprep.mubr.msk.bf16.mxu1 %vm493_vm3, %v9287_v37  ;;  %16087 = vmatpush3.bf16.msra.mxu1 %v17647_v60  ;;  %v9391_v60 = vor.u32 %v9390_v5, %v9387_v41  ;;  %v9408_v37 = vor.u32 %v9407_v7, %v9404_v22  ;;  %v11866_v41 = vrot.slane %v20077_v16, 3  ;;  %v9420_v5 = vshrl.u32 %v20748_v63, 16  ;;  %v9519_v22 = vld [vmem:[#allocation2 + $0x58] sm:$0xf0] }
 0x4a2   : > { %16096 = vmatprep.subr.bf16.mxu1 %v20710_v61  ;;  %v9631_v21 = vshll.u32 %v9519_v22, 16 }
 0x4a3   : > { %v9400_v9 = vsel %vm3271_vm10, %v9391_v60, %v9399_v58  ;;  %v17651_v60 = vld [vmem:[%s21723_s2 + $0x90] sm:$0xff]   ;;  %v9409_v16 = vsel %vm3271_vm10, %v9399_v58, %v9408_v37  ;;  %v9418_v43 = vsel %vm3271_vm10, %v9408_v37, %v9417_v38  ;;  %v20770_v14 = vor.u32 %v11867_v39, %v11866_v41 }
 0x4a4   : > { %v9422_v18 = vrot.slane %v9420_v5, 3  ;;  %v20800_v41 = vrot.slane %v20696_v59, 4  ;;  %v20803_v39 = vrot.slane %v20699_v3, 4  ;;  %v9628_v5 = vshrl.u32 %v9519_v22, 16 }
 0x4a6   : > { %16299 = vmatmul.mubr.msk.bf16.vlgmr.msra.gmra.mrb[44].mxu0 %vm493_vm3, %v11759_v30  ;;  %v11865_v30 = vsel %vm3271_vm10, %v11861_v31, %v22017_v1  ;;  %v9426_v57 = vor.u32 %v9425_v17, %v9422_v18  ;;  %v20820_v3 = vsel %vm363_vm1, %v20800_v41, %v20803_v39  ;;  %v17652_v18 = vld [vmem:[%s21723_s2 + $0x80] sm:$0xff]   ;;  %v9639_v17 = vrot.slane %v22014_v28, 4 }
 0x4a7   : > { %16307 = vmatpush3.bf16.msra.mxu0 %v17646_v52  ;;  %16302 = vmatprep.mubr.msk.bf16.mxu0 %vm493_vm3, %v11761_v36  ;;  %v11876_v36 = vrot.slane %v20093_v0, 4 }
 0x4a8   : > { %16083 = vmatmul.mubr.msk.bf16.gmra.mrb[60].mxu1 %vm493_vm3, %v9289_v48  ;;  %16316 = vmatprep.subr.bf16.mxu0 %v20729_v45  ;;  %v9427_v31 = vsel %vm3271_vm10, %v9417_v38, %v9426_v57 }
 0x4a9   : > { %16088 = vmatprep.mubr.msk.bf16.mxu1 %vm493_vm3, %v9400_v9  ;;  %v15920_v52 = vpop.f32.mrb[36].mxu0  ;;  %v20774_v48 = vor.u32 %v11876_v36, %v11873_v8  ;;  %v9525_v9 = vrot.slane %v20681_v19, 4  ;;  %v17694_v8 = vld [vmem:[#allocation2 + $0x88] sm:$0xff] }
 0x4aa   : > { %7554 = vst.msk [vmem:[#allocation3 + $0x50] sm:$0xff] %vm4668_vm15, %v15920_v52  ;;  %v7513_v23 = vpop.f32.mrb[37].mxu0  ;;  %v20828_v36 = vrot.slane %v17694_v8, 4 }
 0x4ab   : > { %7552 = vst.msk [vmem:[#allocation3 + $0x40] sm:$0xff] %vm4668_vm15, %v7513_v23  ;;  %v15921_v33 = vpop.f32.mrb[38].mxu0  ;;  %v20790_v52 = vsel %vm3271_vm10, %v20770_v14, %v20774_v48  ;;  %v9524_v23 = vrot.slane %v9519_v22, 4  ;;  %v9528_v59 = vsel %vm363_vm1, %v9525_v9, %v20800_v41  ;;  %v12069_v22 = vld [vmem:[#allocation2 + $0x78] sm:$0xf8] }
 0x4ac   : > { %7555 = vst.msk [vmem:[#allocation3 + $0x58] sm:$0xff] %vm4668_vm15, %v15921_v33  ;;  %v7516_v47 = vpop.f32.mrb[39].mxu0  ;;  %v11968_v33 = vld [vmem:[#allocation2 + $0x70] sm:$0xf0]  ;;  %v20839_v19 = vsel %vm363_vm1, %v20062_v49, %v20828_v36 }
 0x4ad   : > { %7553 = vst.msk [vmem:[#allocation3 + $0x48] sm:$0xff] %vm4668_vm15, %v7516_v47  ;;  %v9526_v37 = vsel %vm363_vm1, %v9524_v23, %v9525_v9  ;;  %v11973_v47 = vrot.slane %v11968_v33, 4  ;;  %v12072_v23 = vld [vmem:[#allocation2 + $0x90] sm:$0x7f]  ;;  %v12082_v33 = vrot.slane %v17694_v8, 3 }
 0x4ae   : > { %16303 = vmatmul.mubr.msk.bf16.gmra.mrb[48].mxu0 %vm493_vm3, %v11760_v55 }
 0x4af   : > { %16308 = vmatprep.mubr.msk.bf16.mxu0 %vm493_vm3, %v11865_v30  ;;  %v9636_v30 = vrot.slane %v9396_v56, 5 }
 0x4b0   : > { %16089 = vmatmul.mubr.msk.bf16.vlgmr.msra.gmra.mrb[56].mxu1 %vm493_vm3, %v9409_v16  ;;  %v9630_v16 = vrot.slane %v9628_v5, 4  ;;  %v12179_v5 = vshrl.u32 %v12069_v22, 16 }
 0x4b1   : > { %16092 = vmatprep.mubr.msk.bf16.mxu1 %vm493_vm3, %v9418_v43  ;;  %v15924_v55 = vpop.f32.mrb[40].mxu0  ;;  %16097 = vmatpush3.bf16.msra.mxu1 %v20710_v61  ;;  %v11869_v61 = vsel %vm3271_vm10, %v22017_v1, %v20770_v14  ;;  %v17653_v1 = vld [vmem:[%s21723_s2 + $0x98] sm:$0xff]   ;;  %v9633_v43 = vrot.slane %v9631_v21, 5  ;;  %v12182_v21 = vshll.u32 %v12069_v22, 16 }
 0x4b2   : > { %7558 = vst.msk [vmem:[#allocation3 + $0x70] sm:$0xff] %vm4668_vm15, %v15924_v55  ;;  %v7529_v0 = vpop.f32.mrb[41].mxu0  ;;  %16106 = vmatprep.subr.bf16.mxu1 %v17651_v60 }
 0x4b3   : > { %7556 = vst.msk [vmem:[#allocation3 + $0x60] sm:$0xff] %vm4668_vm15, %v7529_v0  ;;  %v15925_v58 = vpop.f32.mrb[42].mxu0  ;;  %v9634_v56 = vor.u32 %v9633_v43, %v9630_v16  ;;  %v9643_v0 = vrot.slane %v22016_v26, 4  ;;  %v22019_v43 = vld [vmem:[#allocation17_spill] sm:$0xff] }
 0x4b4   : > { %7559 = vst.msk [vmem:[#allocation3 + $0x78] sm:$0xff] %vm4668_vm15, %v15925_v58  ;;  %v7532_v7 = vpop.f32.mrb[43].mxu0  ;;  %v9644_v58 = vrot.slane %v19707_v25, 5  ;;  %v17655_v25 = vld [vmem:[%s21723_s2 + $0xa0] sm:$0xff]  }
 0x4b5   : > { %7557 = vst.msk [vmem:[#allocation3 + $0x68] sm:$0xff] %vm4668_vm15, %v7532_v7  ;;  %v9624_v7 = vld [vmem:[#allocation2 + $0x78] sm:$0x1f] }
 0x4b6   : > { %16309 = vmatmul.mubr.msk.bf16.vlgmr.msra.gmra.mrb[44].mxu0 %vm493_vm3, %v11869_v61  ;;  %v20854_v61 = vor.u32 %v9644_v58, %v9643_v0  ;;  %v9648_v28 = vshrl.u32 %v9624_v7, 16  ;;  %v22021_v0 = vld [vmem:[#allocation19_spill] sm:$0xff] }
 0x4b7   : > { %16317 = vmatpush3.bf16.msra.mxu0 %v20729_v45  ;;  %16312 = vmatprep.mubr.msk.bf16.mxu0 %vm493_vm3, %v20790_v52  ;;  %v22018_v45 = vrot.slane %v20058_v10, 4  ;;  %v9635_v10 = vrot.slane %v9393_v20, 4  ;;  %v9531_v20 = vrot.slane %v20748_v63, 4  ;;  %v9640_v63 = vrot.slane %v22015_v54, 5 }
 0x4b8   : > { %16093 = vmatmul.mubr.msk.bf16.gmra.mrb[60].mxu1 %vm493_vm3, %v9427_v31  ;;  %16326 = vmatprep.subr.bf16.mxu0 %v17650_v15  ;;  %v9651_v54 = vshll.u32 %v9624_v7, 16 }
 0x4b9   : > { %16098 = vmatprep.mubr.msk.bf16.mxu1 %vm493_vm3, %v9526_v37  ;;  %v11975_v38 = vsel %vm363_vm1, %v11973_v47, %v22018_v45  ;;  %v9637_v55 = vor.u32 %v9636_v30, %v9635_v10  ;;  %v20852_v9 = vor.u32 %v9640_v63, %v9639_v17  ;;  %v9650_v37 = vrot.slane %v9648_v28, 4 }
 0x4ba   : > { %v9653_v47 = vrot.slane %v9651_v54, 5  ;;  %v12084_v45 = vrot.slane %v12072_v23, 3  ;;  %v12083_v10 = vsel %vm2812_vm9, %v20722_v32, %v12082_v33  ;;  %v12207_v17 = vrot.slane %v20138_v27, 3  ;;  %v17656_v27 = vld [vmem:[%s21723_s2 + $0x90] sm:$0xff]  }
 0x4bb   : > { %v9642_v57 = vsel %vm3856_vm14, %v9637_v55, %v20852_v9  ;;  %v20870_v31 = vsel %vm3856_vm14, %v20852_v9, %v20854_v61  ;;  %v12210_v63 = vrot.slane %v20141_v34, 4  ;;  %v9759_v34 = vrot.slane %v9624_v7, 5  ;;  %v12302_v7 = vld [vmem:[#allocation2 + $0x78] sm:$0xf0] }
 0x4bc   : > { %v9654_v30 = vor.u32 %v9653_v47, %v9650_v37  ;;  %v12085_v8 = vsel %vm2812_vm9, %v12082_v33, %v12084_v45  ;;  %v9856_v37 = vld [vmem:[#allocation2 + $0x80] sm:$0xf]  ;;  %v20931_v47 = vld [vmem:[#allocation2 + $0x90] sm:$0xff] }
 0x4bd   : > { %v12211_v58 = vor.u32 %v12210_v63, %v12207_v17  ;;  %v9760_v28 = vsel %vm3982_vm11, %v19714_v12, %v9759_v34  ;;  %v10102_v34 = vld [vmem:[#allocation2 + $0x60] sm:$0xe0] }
 0x4be   : > { %16313 = vmatmul.mubr.msk.bf16.gmra.mrb[48].mxu0 %vm493_vm3, %v20774_v48 }
 0x4bf   : > { %16318 = vmatprep.mubr.msk.bf16.mxu0 %vm493_vm3, %v11975_v38  ;;  %v9747_v38 = vld [vmem:[#allocation2 + $0x58] sm:$0xe0] }
 0x4c0   : > { %16099 = vmatmul.mubr.msk.bf16.vlgmr.msra.gmra.mrb[56].mxu1 %vm493_vm3, %v9528_v59  ;;  %v17654_v59 = vld [vmem:[%s21723_s2 + $0x88] sm:$0xff]   ;;  %v9752_v16 = vrot.slane %v9747_v38, 5 }
 0x4c1   : > { %16102 = vmatprep.mubr.msk.bf16.mxu1 %vm493_vm3, %v20820_v3  ;;  %16107 = vmatpush3.bf16.msra.mxu1 %v17651_v60  ;;  %v9532_v60 = vsel %vm363_vm1, %v20803_v39, %v9531_v20 }
 0x4c2   : > { %16116 = vmatprep.subr.bf16.mxu1 %v17653_v1 }
 0x4c6   : > { %16319 = vmatmul.mubr.msk.bf16.vlgmr.msra.gmra.mrb[44].mxu0 %vm493_vm3, %v20086_v62  ;;  %v9638_v62 = vsel %vm3856_vm14, %v9634_v56, %v9637_v55  ;;  %v22020_v55 = vrot.slane %v22019_v43, 5  ;;  %v12181_v56 = vrot.slane %v12179_v5, 3 }
 0x4c7   : > { %16327 = vmatpush3.bf16.msra.mxu0 %v17650_v15  ;;  %16322 = vmatprep.mubr.msk.bf16.mxu0 %vm493_vm3, %v20839_v19  ;;  %v12079_v15 = vrot.slane %v12069_v22, 3  ;;  %v12212_v22 = vsel %vm3271_vm10, %v20774_v48, %v12211_v58 }
 0x4c8   : > { %16103 = vmatmul.mubr.msk.bf16.gmra.mrb[60].mxu1 %vm493_vm3, %v9532_v60  ;;  %16336 = vmatprep.subr.bf16.mxu0 %v17652_v18  ;;  %v9754_v20 = vsel %vm3982_vm11, %v9752_v16, %v22020_v55 }
 0x4c9   : > { %16108 = vmatprep.mubr.msk.bf16.mxu1 %vm493_vm3, %v9638_v62  ;;  %v12081_v26 = vsel %vm2812_vm9, %v12079_v15, %v20722_v32  ;;  %v12184_v32 = vrot.slane %v12182_v21, 4  ;;  %v17657_v62 = vld [vmem:[%s21723_s2 + $0xa8] sm:$0xff]   ;;  %v9871_v21 = vrot.slane %v9856_v37, 4 }
 0x4cb   : > { %v12185_v60 = vor.u32 %v12184_v32, %v12181_v56 }
 0x4ce   : > { %16323 = vmatmul.mubr.msk.bf16.gmra.mrb[48].mxu0 %vm493_vm3, %v20828_v36 }
 0x4cf   : > { %16328 = vmatprep.mubr.msk.bf16.mxu0 %vm493_vm3, %v12081_v26  ;;  %v20919_v26 = vld [vmem:[#allocation2 + $0x78] sm:$0xff] }
 0x4d0   : > { %16109 = vmatmul.mubr.msk.bf16.vlgmr.msra.gmra.mrb[56].mxu1 %vm493_vm3, %v9642_v57  ;;  %v9997_v16 = vshll.u32 %v20919_v26, 16 }
 0x4d1   : > { %16112 = vmatprep.mubr.msk.bf16.mxu1 %vm493_vm3, %v20870_v31  ;;  %16117 = vmatpush3.bf16.msra.mxu1 %v17653_v1  ;;  %v9655_v1 = vsel %vm3856_vm14, %v20854_v61, %v9654_v30 }
 0x4d2   : > { %16126 = vmatprep.subr.bf16.mxu1 %v17655_v25  ;;  %v9999_v32 = vrot.slane %v9997_v16, 5 }
 0x4d6   : > { %16329 = vmatmul.mubr.msk.bf16.vlgmr.msra.gmra.mrb[44].mxu0 %vm493_vm3, %v12083_v10 }
 0x4d7   : > { %16337 = vmatpush3.bf16.msra.mxu0 %v17652_v18  ;;  %16332 = vmatprep.mubr.msk.bf16.mxu0 %vm493_vm3, %v12085_v8  ;;  %v12194_v18 = vsel %vm3271_vm10, %v12185_v60, %v20770_v14  ;;  %v9852_v14 = vld [vmem:[#allocation2 + $0x60] sm:$0xf0]  ;;  %v9994_v8 = vshrl.u32 %v20919_v26, 16 }
 0x4d8   : > { %16113 = vmatmul.mubr.msk.bf16.gmra.mrb[60].mxu1 %vm493_vm3, %v9655_v1  ;;  %16346 = vmatprep.subr.bf16.mxu0 %v17654_v59  ;;  %v9864_v15 = vrot.slane %v9852_v14, 4  ;;  %v9968_v57 = vshrl.u32 %v9852_v14, 16  ;;  %v9971_v23 = vshll.u32 %v9852_v14, 16 }
 0x4d9   : > { %16118 = vmatprep.mubr.msk.bf16.mxu1 %vm493_vm3, %v9754_v20  ;;  %v9964_v20 = vld [vmem:[#allocation2 + $0x80] sm:$0x1f]  ;;  %v9996_v56 = vrot.slane %v9994_v8, 4 }
 0x4da   : > { %v9866_v54 = vsel %vm363_vm1, %v9864_v15, %v20800_v41  ;;  %v17659_v41 = vld [vmem:[%s21723_s2 + $0xb0] sm:$0xff]   ;;  %v9970_v38 = vrot.slane %v9968_v57, 4  ;;  %v9973_v5 = vrot.slane %v9971_v23, 5  ;;  %v10003_v60 = vshrl.u32 %v9964_v20, 16 }
 0x4db   : > { %v10000_v63 = vor.u32 %v9999_v32, %v9996_v56  ;;  %v10112_v57 = vrot.slane %v20919_v26, 5  ;;  %v10211_v23 = vshrl.u32 %v10102_v34, 16  ;;  %v10330_v32 = vld [vmem:[#allocation2 + $0x60] sm:$0xc0] }
 0x4dc   : > { %v9974_v30 = vor.u32 %v9973_v5, %v9970_v38  ;;  %v10114_v38 = vrot.slane %v9964_v20, 5  ;;  %v17662_v5 = vld [vmem:[%s21723_s2 + $0xa8] sm:$0xff]  }
 0x4dd   : > { %v10001_v14 = vsel %vm3856_vm14, %v20854_v61, %v10000_v63  ;;  %v10213_v37 = vrot.slane %v10211_v23, 5  ;;  %v13225_v23 = vld [vmem:[#allocation3 + $0x12] ss:$2 sm:$0x7f] }
 0x4de   : > { %16333 = vmatmul.mubr.msk.bf16.gmra.mrb[48].mxu0 %vm493_vm3, %v12084_v45  ;;  %v20934_v45 = vrot.slane %v20931_v47, 4 }
 0x4df   : > { %16338 = vmatprep.mubr.msk.bf16.mxu0 %vm493_vm3, %v12194_v18  ;;  %v10006_v18 = vshll.u32 %v9964_v20, 16 }
 0x4e0   : > { %16119 = vmatmul.mubr.msk.bf16.vlgmr.msra.gmra.mrb[56].mxu1 %vm493_vm3, %v22021_v0  ;;  %v10005_v0 = vrot.slane %v10003_v60, 4  ;;  %v12747_v60 = vld [vmem:[#allocation2 + $0x80] sm:$0xf0] }
 0x4e1   : > { %16122 = vmatprep.mubr.msk.bf16.mxu1 %vm493_vm3, %v19725_v35  ;;  %16127 = vmatpush3.bf16.msra.mxu1 %v17655_v25  ;;  %v9869_v25 = vrot.slane %v20919_v26, 4 }
 0x4e2   : > { %16136 = vmatprep.subr.bf16.mxu1 %v17657_v62 }
 0x4e3   : > { %v9870_v33 = vsel %vm363_vm1, %v20803_v39, %v9869_v25  ;;  %v17658_v39 = vld [vmem:[%s21723_s2 + $0x98] sm:$0xff]   ;;  %v9872_v1 = vsel %vm363_vm1, %v9869_v25, %v9871_v21 }
 0x4e6   : > { %16339 = vmatmul.mubr.msk.bf16.vlgmr.msra.gmra.mrb[44].mxu0 %vm493_vm3, %v20790_v52  ;;  %v12307_v52 = vrot.slane %v12302_v7, 4  ;;  %v12539_v7 = vld [vmem:[#allocation2 + $0x78] sm:$0xe0] }
 0x4e7   : > { %16347 = vmatpush3.bf16.msra.mxu0 %v17654_v59  ;;  %16342 = vmatprep.mubr.msk.bf16.mxu0 %vm493_vm3, %v12212_v22  ;;  %v17660_v22 = vld [vmem:[%s21723_s2 + $0xa0] sm:$0xff]  }
 0x4e8   : > { %16123 = vmatmul.mubr.msk.bf16.gmra.mrb[60].mxu1 %vm493_vm3, %v9760_v28  ;;  %16356 = vmatprep.subr.bf16.mxu0 %v17656_v27  ;;  %v12309_v48 = vsel %vm363_vm1, %v12307_v52, %v20062_v49  ;;  %v12403_v49 = vld [vmem:[#allocation2 + $0x78] sm:$0xf0]  ;;  %v10107_v28 = vrot.slane %v10102_v34, 5  ;;  %v12547_v52 = vrot.slane %v12539_v7, 5 }
 0x4e9   : > { %16128 = vmatprep.mubr.msk.bf16.mxu1 %vm493_vm3, %v9866_v54  ;;  %v12411_v59 = vshrl.u32 %v12403_v49, 16  ;;  %v12414_v10 = vshll.u32 %v12403_v49, 16 }
 0x4ea   : > { %v10109_v61 = vsel %vm3982_vm11, %v10107_v28, %v19518_v44  ;;  %v17663_v44 = vld [vmem:[%s21723_s2 + $0xc0] sm:$0xff]  }
 0x4eb   : > { %v12413_v43 = vrot.slane %v12411_v59, 4  ;;  %v12416_v55 = vrot.slane %v12414_v10, 5  ;;  %v21019_v59 = vld [vmem:[#allocation2 + $0x80] sm:$0x3f] }
 0x4ec   : > { %v12645_v10 = vld [vmem:[#allocation2 + $0x80] sm:$0xf0] }
 0x4ed   : > { %v12417_v17 = vor.u32 %v12416_v55, %v12413_v43  ;;  %v12651_v43 = vrot.slane %v12645_v10, 4  ;;  %v17670_v10 = vld [vmem:[%s21725_s4 + $0x24] ss:$16 sps:$4 sm:$0xff]  }
 0x4ee   : > { %16343 = vmatmul.mubr.msk.bf16.gmra.mrb[48].mxu0 %vm493_vm3, %v12211_v58  ;;  %v10008_v58 = vrot.slane %v10006_v18, 5 }
 0x4ef   : > { %16348 = vmatprep.mubr.msk.bf16.mxu0 %vm493_vm3, %v12309_v48  ;;  %v22022_v48 = vrot.slane %v20054_v24, 5  ;;  %v21001_v24 = vrot.slane %v20931_v47, 5  ;;  %v10115_v47 = vsel %vm3982_vm11, %v10112_v57, %v10114_v38  ;;  %v12653_v55 = vsel %vm363_vm1, %v12651_v43, %v20828_v36  ;;  %v17665_v38 = vld [vmem:[%s21725_s4] ss:$16 sps:$4 sm:$0xff]   ;;  %v22027_v43 = vld [vmem:[#allocation27_spill] sm:$0xff] }
 0x4f0   : > { %16129 = vmatmul.mubr.msk.bf16.vlgmr.msra.gmra.mrb[56].mxu1 %vm493_vm3, %v20820_v3  ;;  %v20944_v3 = vsel %vm363_vm1, %v20828_v36, %v20934_v45  ;;  %v21042_v36 = vld [vmem:[#allocation2 + $0x98] sm:$0xff] }
 0x4f1   : > { %16132 = vmatprep.mubr.msk.bf16.mxu1 %vm493_vm3, %v9870_v33  ;;  %16137 = vmatpush3.bf16.msra.mxu1 %v17657_v62  ;;  %v17661_v62 = vld [vmem:[%s21723_s2 + $0xb8] sm:$0xff]   ;;  %v12549_v25 = vsel %vm3982_vm11, %v12547_v52, %v22022_v48  ;;  %v10113_v33 = vsel %vm3982_vm11, %v19714_v12, %v10112_v57  ;;  %v21011_v12 = vsel %vm3982_vm11, %v20131_v4, %v21001_v24  ;;  %v12656_v18 = vrot.slane %v21042_v36, 4  ;;  %v13220_v57 = vld [vmem:[#allocation3] ss:$2 sm:$0x7f] }
 0x4f2   : > { %16146 = vmatprep.subr.bf16.mxu1 %v17659_v41  ;;  %v13233_v52 = vld [vmem:[#allocation3 + $0x25] ss:$2 sm:$0x7f]  ;;  %v12781_v48 = vshrl.u32 %v21042_v36, 16 }
 0x4f6   : > { %16349 = vmatmul.mubr.msk.bf16.vlgmr.msra.gmra.mrb[44].mxu0 %vm493_vm3, %v20839_v19  ;;  %v9983_v19 = vsel %vm3856_vm14, %v9974_v30, %v20852_v9  ;;  %v12426_v9 = vsel %vm3856_vm14, %v12417_v17, %v20112_v50  ;;  %v10009_v50 = vor.u32 %v10008_v58, %v10005_v0  ;;  %v10227_v30 = vrot.slane %v9997_v16, 6  ;;  %v13247_v0 = vld [vmem:[#allocation3 + $0x5a] ss:$2 sm:$0x7f] }
 0x4f7   : > { %16357 = vmatpush3.bf16.msra.mxu0 %v17656_v27  ;;  %16352 = vmatprep.mubr.msk.bf16.mxu0 %vm493_vm3, %v20944_v3  ;;  %v12407_v27 = vld [vmem:[#allocation2 + $0x98] sm:$0x1]  ;;  %v13236_v58 = vld [vmem:[#allocation3 + $0x36] ss:$2 sm:$0x7f] }
 0x4f8   : > { %16133 = vmatmul.mubr.msk.bf16.gmra.mrb[60].mxu1 %vm493_vm3, %v9872_v1  ;;  %16366 = vmatprep.subr.bf16.mxu0 %v17658_v39  ;;  %v12446_v15 = vshll.u32 %v12407_v27, 16  ;;  %v10231_v1 = vshrl.u32 %v21019_v59, 16 }
 0x4f9   : > { %16138 = vmatprep.mubr.msk.bf16.mxu1 %vm493_vm3, %v9983_v19  ;;  %v10234_v19 = vshll.u32 %v21019_v59, 16 }
 0x4fa   : > { %v12448_v54 = vrot.slane %v12446_v15, 5  ;;  %v10233_v26 = vrot.slane %v10231_v1, 5 }
 0x4fb   : > { %v10236_v16 = vrot.slane %v10234_v19, 6  ;;  %v22026_v19 = vld [vmem:[#allocation28_spill] sm:$0xff] }
 0x4fd   : > { %v10237_v17 = vor.u32 %v10236_v16, %v10233_v26  ;;  %v10342_v26 = vrot.slane %v21019_v59, 6 }
 0x4fe   : > { %16353 = vmatmul.mubr.msk.bf16.gmra.mrb[48].mxu0 %vm493_vm3, %v20934_v45 }
 0x4ff   : > { %16358 = vmatprep.mubr.msk.bf16.mxu0 %vm493_vm3, %v12426_v9  ;;  %v10335_v9 = vrot.slane %v10330_v32, 6  ;;  %v17671_v32 = vld [vmem:[%s21723_s2 + $0xb8] sm:$0xff]  }
 0x500   : > { %16139 = vmatmul.mubr.msk.bf16.vlgmr.msra.gmra.mrb[56].mxu1 %vm493_vm3, %v20870_v31  ;;  %v10010_v31 = vsel %vm3856_vm14, %v10000_v63, %v10009_v50  ;;  %v12755_v63 = vshrl.u32 %v12747_v60, 16  ;;  %v13242_v50 = vld [vmem:[#allocation3 + $0x48] ss:$2 sm:$0x7f] }
 0x501   : > { %16142 = vmatprep.mubr.msk.bf16.mxu1 %vm493_vm3, %v10001_v14  ;;  %16147 = vmatpush3.bf16.msra.mxu1 %v17659_v41  ;;  %v10214_v41 = vshll.u32 %v10102_v34, 16  ;;  %v13238_v14 = vld [vmem:[#allocation3 + $0x37] ss:$2 sm:$0x7f] }
 0x502   : > { %16156 = vmatprep.subr.bf16.mxu1 %v17661_v62  ;;  %v13244_v34 = vld [vmem:[#allocation3 + $0x49] ss:$2 sm:$0x7f]  ;;  %v12757_v15 = vrot.slane %v12755_v63, 4 }
 0x503   : > { %v10216_v49 = vrot.slane %v10214_v41, 6  ;;  %v22028_v63 = vld [vmem:[#allocation26_spill] sm:$0xff] }
 0x506   : > { %16359 = vmatmul.mubr.msk.bf16.vlgmr.msra.gmra.mrb[44].mxu0 %vm493_vm3, %v20127_v46  ;;  %v12449_v46 = vsel %vm3856_vm14, %v20163_v42, %v12448_v54 }
 0x507   : > { %16367 = vmatpush3.bf16.msra.mxu0 %v17658_v39  ;;  %16362 = vmatprep.mubr.msk.bf16.mxu0 %vm493_vm3, %v20175_v53  ;;  %v10226_v39 = vrot.slane %v9994_v8, 5  ;;  %v17667_v8 = vld [vmem:[%s21725_s4 + $0x4] ss:$16 sps:$4 sm:$0xff]  }
 0x508   : > { %16143 = vmatmul.mubr.msk.bf16.gmra.mrb[60].mxu1 %vm493_vm3, %v10010_v31  ;;  %16376 = vmatprep.subr.bf16.mxu0 %v17660_v22 }
 0x509   : > { %16148 = vmatprep.mubr.msk.bf16.mxu1 %vm493_vm3, %v10109_v61  ;;  %v10228_v20 = vor.u32 %v10227_v30, %v10226_v39  ;;  %v22023_v61 = vld [vmem:[#allocation15_spill] sm:$0xff] }
 0x50a   : > { %v22024_v54 = vrot.slane %v22023_v61, 6  ;;  %v17672_v61 = vld [vmem:[%s21723_s2 + $0xc0] sm:$0xff]  }
 0x50b   : > { %v10229_v56 = vsel %vm4441_vm12, %v19731_v29, %v10228_v20  ;;  %v13249_v29 = vld [vmem:[#allocation3 + $0x5b] ss:$2 sm:$0x7f] }
 0x50c   : > { %v13250_v31 = vmax.f32 %v13247_v0, %v13249_v29  ;;  %v10337_v7 = vsel %vm21837_vm13, %v10335_v9, %v22024_v54 }
 0x50e   : > { %16363 = vmatmul.mubr.msk.bf16.gmra.mrb[48].mxu0 %vm493_vm3, %v12449_v46  ;;  %v13245_v46 = vmax.f32 %v13242_v50, %v13244_v34 }
 0x50f   : > { %16368 = vmatprep.mubr.msk.bf16.mxu0 %vm493_vm3, %v12549_v25  ;;  %v12784_v25 = vshll.u32 %v21042_v36, 16 }
 0x510   : > { %16149 = vmatmul.mubr.msk.bf16.vlgmr.msra.gmra.mrb[56].mxu1 %vm493_vm3, %v19725_v35  ;;  %v10217_v35 = vor.u32 %v10216_v49, %v10213_v37  ;;  %v13222_v37 = vld [vmem:[#allocation3 + $0x1] ss:$2 sm:$0x7f]  ;;  %v13227_v49 = vld [vmem:[#allocation3 + $0x13] ss:$2 sm:$0x7f] }
 0x511   : > { %16152 = vmatprep.mubr.msk.bf16.mxu1 %vm493_vm3, %v10113_v33  ;;  %16157 = vmatpush3.bf16.msra.mxu1 %v17661_v62  ;;  %v12758_v62 = vshll.u32 %v12747_v60, 16  ;;  %v13223_v39 = vmax.f32 %v13220_v57, %v13222_v37  ;;  %v13228_v30 = vmax.f32 %v13225_v23, %v13227_v49  ;;  %v12989_v23 = vld [vmem:[#allocation2 + $0xa0] sm:$0x3]  ;;  %v17675_v49 = vld [vmem:[%s21725_s4 + $0xc] ss:$16 sps:$4 sm:$0xff]  }
 0x512   : > { %16166 = vmatprep.subr.bf16.mxu1 %v17663_v44  ;;  %v10221_v21 = vsel %vm4441_vm12, %v10217_v35, %v19593_v11  ;;  %v22025_v35 = vld [vmem:[#allocation37_spill] sm:$0xff] }
 0x513   : > { %v12760_v28 = vrot.slane %v12758_v62, 5  ;;  %v13229_v16 = vmax.f32 %v13223_v39, %v13228_v30  ;;  %v22029_v62 = vrot.slane %v22028_v63, 6 }
 0x515   : > { %v12761_v33 = vor.u32 %v12760_v28, %v12757_v15  ;;  %v10343_v0 = vsel %vm21837_vm13, %v22029_v62, %v10342_v26  ;;  %v12896_v15 = vrot.slane %v21042_v36, 5 }
 0x516   : > { %16369 = vmatmul.mubr.msk.bf16.vlgmr.msra.gmra.mrb[44].mxu0 %vm493_vm3, %v20148_v51  ;;  %v12554_v51 = vrot.slane %v12407_v27, 5  ;;  %v12657_v27 = vsel %vm363_vm1, %v20934_v45, %v12656_v18  ;;  %v13239_v45 = vmax.f32 %v13236_v58, %v13238_v14  ;;  %v17710_v14 = vmov 0  }
 0x517   : > { %16377 = vmatpush3.bf16.msra.mxu0 %v17660_v22  ;;  %16372 = vmatprep.mubr.msk.bf16.mxu0 %vm493_vm3, %v21011_v12  ;;  %v10238_v22 = vsel %vm4441_vm12, %v10228_v20, %v10237_v17  ;;  %v21096_v17 = vld [vmem:[%s21724_s3] ss:$0 sm:$0xff] }
 0x518   : > { %16153 = vmatmul.mubr.msk.bf16.gmra.mrb[60].mxu1 %vm493_vm3, %v10115_v47  ;;  %16386 = vmatprep.subr.bf16.mxu0 %v17662_v5  ;;  %v12555_v11 = vsel %vm3982_vm11, %v21001_v24, %v12554_v51  ;;  %v12770_v47 = vsel %vm3856_vm14, %v12761_v33, %v22025_v35  ;;  %v12786_v51 = vrot.slane %v12784_v25, 5  ;;  %v13016_v33 = vshll.u32 %v12989_v23, 16  ;;  %v22031_v35 = vld [vmem:[#allocation30_spill] sm:$0xff] }
 0x519   : > { %16158 = vmatprep.mubr.msk.bf16.mxu1 %vm493_vm3, %v10221_v21  ;;  %v12783_v21 = vrot.slane %v12781_v48, 4 }
 0x51b   : > { %v12787_v20 = vor.u32 %v12786_v51, %v12783_v21 }
 0x51d   : > { %v12788_v59 = vsel %vm3856_vm14, %v20163_v42, %v12787_v20 }
 0x51e   : > { %16373 = vmatmul.mubr.msk.bf16.gmra.mrb[48].mxu0 %vm493_vm3, %v12555_v11  ;;  %v17668_v11 = vld [vmem:[%s21725_s4 + $0x20] ss:$16 sps:$4 sm:$0xff]  }
 0x51f   : > { %16378 = vmatprep.mubr.msk.bf16.mxu0 %vm493_vm3, %v12653_v55 }
 0x520   : > { %16159 = vmatmul.mubr.msk.bf16.vlgmr.msra.gmra.mrb[56].mxu1 %vm493_vm3, %v19752_v13  ;;  %v17664_v13 = vld [vmem:[%s21723_s2 + $0xb0] sm:$0xff]  }
 0x521   : > { %16162 = vmatprep.mubr.msk.bf16.mxu1 %vm493_vm3, %v10229_v56  ;;  %16167 = vmatpush3.bf16.msra.mxu1 %v17663_v44  ;;  %v21061_v44 = vmax.f32 %v13245_v46, %v13250_v31  ;;  %v22030_v46 = vld [vmem:[#allocation39_spill] sm:$0xff] }
 0x522   : > { %13410 = vmatprep.subr.bf16.mxu1 %v17667_v8  ;;  %v12751_v8 = vld [vmem:[#allocation2 + $0xa0] sm:$0x1] }
 0x523   : > { %v13300_v1 = vrot.slane %v21061_v44, 2  ;;  %v12790_v60 = vshll.u32 %v12751_v8, 16 }
 0x525   : > { %v12792_v58 = vrot.slane %v12790_v60, 5 }
 0x526   : > { %16379 = vmatmul.mubr.msk.bf16.vlgmr.msra.gmra.mrb[44].mxu0 %vm493_vm3, %v20944_v3  ;;  %v13231_v3 = vld [vmem:[#allocation3 + $0x24] ss:$2 sm:$0x7f] }
 0x527   : > { %16387 = vmatpush3.bf16.msra.mxu0 %v17662_v5  ;;  %16382 = vmatprep.mubr.msk.bf16.mxu0 %vm493_vm3, %v12657_v27  ;;  %v13234_v41 = vmax.f32 %v13231_v3, %v13233_v52  ;;  %v12898_v3 = vrot.slane %v12751_v8, 5 }
 0x528   : > { %16163 = vmatmul.mubr.msk.bf16.gmra.mrb[60].mxu1 %vm493_vm3, %v10238_v22  ;;  %16396 = vmatprep.subr.bf16.mxu0 %v17664_v13 }
 0x529   : > { %16168 = vmatprep.mubr.msk.bf16.mxu1 %vm493_vm3, %v10337_v7  ;;  %v13240_v5 = vmax.f32 %v13234_v41, %v13239_v45  ;;  %v12899_v45 = vsel %vm3982_vm11, %v12896_v15, %v12898_v3  ;;  %v13013_v41 = vshrl.u32 %v12989_v23, 16 }
 0x52b   : > { %v13297_v55 = vrot.slane %v13240_v5, 1  ;;  %v13018_v5 = vrot.slane %v13016_v33, 6 }
 0x52d   : > { %v13317_v56 = vsel %vm2227_vm5, %v13297_v55, %v13300_v1 }
 0x52e   : > { %16383 = vmatmul.mubr.msk.bf16.gmra.mrb[48].mxu0 %vm493_vm3, %v12656_v18  ;;  %v13315_v18 = vsel %vm1997_vm6, %v13229_v16, %v13297_v55  ;;  %v13333_v9 = vadd.f32 %v21096_v17, %v13317_v56  ;;  %v17676_v55 = vld [vmem:[%s21725_s4 + $0x28] ss:$16 sps:$4 sm:$0xff]  }
 0x52f   : > { %16388 = vmatprep.mubr.msk.bf16.mxu0 %vm493_vm3, %v12770_v47  ;;  %v13332_v29 = vadd.f32 %v21096_v17, %v13315_v18  ;;  %v22032_v47 = vld [vmem:[#allocation40_spill] sm:$0xff] }
 0x530   : > { %16169 = vmatmul.mubr.msk.bf16.vlgmr.msra.gmra.mrb[56].mxu1 %vm493_vm3, %v22026_v19  ;;  %v13340_v42 = vmax.f32 %v13333_v9, 0.0  ;;  %v17673_v19 = vld [vmem:[%s21725_s4 + $0x8] ss:$16 sps:$4 sm:$0xff]  }
 0x531   : > { %16172 = vmatprep.mubr.msk.bf16.mxu1 %vm493_vm3, %v22027_v43  ;;  %13411 = vmatpush1.bf16.msra.mxu1 %v17665_v38  ;;  %v13339_v50 = vmax.f32 %v13332_v29, 0.0  ;;  %v13015_v38 = vrot.slane %v13013_v41, 5  ;;  %v17678_v43 = vld [vmem:[%s21725_s4 + $0x2c] ss:$16 sps:$4 sm:$0xff]  }
 0x532   : > { %13412 = vmatprep.subr.bf16.mxu1 %v17670_v10  ;;  %v22033_v10 = vld [vmem:[#allocation36_spill] sm:$0xff] }
 0x533   : > { %v13346_v22 = vpack.c.bf16 %v13340_v42, %v13339_v50  ;;  %v13019_v36 = vor.u32 %v13018_v5, %v13015_v38  ;;  %v22034_v39 = vrot.slane %v22033_v10, 6  ;;  %v13255_v42 = vld [vmem:[#allocation3 + $0x6d] ss:$2 sm:$0x7f] }
 0x535   : > { %13413 = vmatpush1.bf16.msra.mxu1 %v17668_v11  ;;  %v22035_v11 = vld [vmem:[#allocation29_spill] sm:$0xff] }
 0x536   : > { %16389 = vmatmul.mubr.msk.bf16.vlgmr.msra.gmra.mrb[44].mxu0 %vm493_vm3, %v20175_v53  ;;  %v12883_v53 = vld [vmem:[#allocation2 + $0x80] sm:$0xe0] }
 0x537   : > { %16397 = vmatpush3.bf16.msra.mxu0 %v17664_v13  ;;  %16392 = vmatprep.mubr.msk.bf16.mxu0 %vm493_vm3, %v12788_v59  ;;  %v12891_v27 = vrot.slane %v12883_v53, 5  ;;  %v12793_v13 = vsel %vm3856_vm14, %v12787_v20, %v12792_v58  ;;  %v12993_v28 = vshrl.u32 %v12883_v53, 16  ;;  %v12996_v31 = vshll.u32 %v12883_v53, 16  ;;  %v13253_v58 = vld [vmem:[#allocation3 + $0x6c] ss:$2 sm:$0x7f] }
 0x538   : > { %16173 = vmatmul.mubr.msk.bf16.gmra.mrb[60].mxu1 %vm493_vm3, %v10343_v0  ;;  %16406 = vmatprep.subr.bf16.mxu0 %v17671_v32  ;;  %v13122_v20 = vrot.slane %v12989_v23, 6 }
 0x539   : > { %13442 = vmatprep.mubr.bf16.mxu1 %v17710_v14  ;;  %v12893_v34 = vsel %vm3982_vm11, %v12891_v27, %v20131_v4  ;;  %v12897_v4 = vsel %vm3982_vm11, %v21001_v24, %v12896_v15  ;;  %v12995_v54 = vrot.slane %v12993_v28, 5  ;;  %v12998_v7 = vrot.slane %v12996_v31, 6 }
 0x53a   : > { %v13009_v24 = vrot.slane %v12784_v25, 6  ;;  %v13110_v25 = vld [vmem:[#allocation2 + $0x80] sm:$0xc0]  ;;  %v13123_v8 = vsel %vm21837_vm13, %v13120_v40, %v13122_v20 }
 0x53b   : > { %v12999_v52 = vor.u32 %v12998_v7, %v12995_v54  ;;  %v13115_v21 = vrot.slane %v13110_v25, 6 }
 0x53d   : > { %v13003_v57 = vsel %vm4441_vm12, %v12999_v52, %v22030_v46  ;;  %v13117_v30 = vsel %vm21837_vm13, %v13115_v21, %v22034_v39 }
 0x53e   : > { %16393 = vmatmul.mubr.msk.bf16.gmra.mrb[48].mxu0 %vm493_vm3, %v12793_v13 }
 0x53f   : > { %16398 = vmatprep.mubr.msk.bf16.mxu0 %vm493_vm3, %v12893_v34  ;;  %v13256_v34 = vmax.f32 %v13253_v58, %v13255_v42 }
 0x540   : > { %14627 = vmatmul.mubr.msk.bf16.vlgmr.msra.gmra.mrb[64].mxu1 %vm4668_vm15, %v13346_v22 }
 0x541   : > { %13452 = vmatprep.mubr.bf16.mxu1 %v17710_v14 }
 0x546   : > { %16399 = vmatmul.mubr.msk.bf16.vlgmr.msra.gmra.mrb[44].mxu0 %vm493_vm3, %v21011_v12  ;;  %v13008_v12 = vrot.slane %v12781_v48, 5 }
 0x547   : > { %16407 = vmatpush3.bf16.msra.mxu0 %v17671_v32  ;;  %16402 = vmatprep.mubr.msk.bf16.mxu0 %vm493_vm3, %v12897_v4 }
 0x548   : > { %16416 = vmatprep.subr.bf16.mxu0 %v17672_v61  ;;  %v13010_v37 = vor.u32 %v13009_v24, %v13008_v12 }
 0x54a   : > { %v13011_v48 = vsel %vm4441_vm12, %v22032_v47, %v13010_v37  ;;  %v13020_v51 = vsel %vm4441_vm12, %v13010_v37, %v13019_v36 }
 0x54e   : > { %16403 = vmatmul.mubr.msk.bf16.gmra.mrb[48].mxu0 %vm493_vm3, %v12899_v45 }
 0x54f   : > { %16408 = vmatprep.mubr.msk.bf16.mxu0 %vm493_vm3, %v13003_v57 }
 0x556   : > { %16409 = vmatmul.mubr.msk.bf16.vlgmr.msra.gmra.mrb[44].mxu0 %vm493_vm3, %v22031_v35 }
 0x557   : > { %16417 = vmatpush3.bf16.msra.mxu0 %v17672_v61  ;;  %16412 = vmatprep.mubr.msk.bf16.mxu0 %vm493_vm3, %v13011_v48 }
 0x558   : > { %13481 = vmatprep.subr.bf16.mxu0 %v17675_v49 }
 0x55e   : > { %16413 = vmatmul.mubr.msk.bf16.gmra.mrb[48].mxu0 %vm493_vm3, %v13020_v51 }
 0x55f   : > { %16418 = vmatprep.mubr.msk.bf16.mxu0 %vm493_vm3, %v13117_v30 }
 0x566   : > { %16419 = vmatmul.mubr.msk.bf16.vlgmr.msra.gmra.mrb[44].mxu0 %vm493_vm3, %v22035_v11 }
 0x567   : > { %16422 = vmatprep.mubr.msk.bf16.mxu0 %vm493_vm3, %v20465_v6  ;;  %13482 = vmatpush1.bf16.msra.mxu0 %v17673_v19  ;;  %v13552_v6 = vlaneseq }
 0x568   : > { %13483 = vmatprep.subr.bf16.mxu0 %v17678_v43 }
 0x569   : > { %v21169_v26 = vshrl.u32 %v13552_v6, 7  ;;  %v21179_v18 = vand.u32 127, %v13552_v6 }
 0x56b   : > { %13484 = vmatpush1.bf16.msra.mxu0 %v17676_v55  ;;  %v13554_v32 = vadd.s32 8, %v21169_v26  ;;  %v21176_v60 = vmul.u32 10, %v21169_v26  ;;  %v21187_v62 = vadd.s32 128, %v21179_v18  ;;  %v21248_v19 = vadd.s32 256, %v21179_v18 }
 0x56c   : > { %v21251_v11 = vadd.s32 384, %v21179_v18 }
 0x56d   : > { %v21181_v59 = vmul.u32 10, %v13554_v32  ;;  %v21184_v9 = vadd.s32 10, %v21176_v60  ;;  %vm13572_vm0 = vcmp.ge.s32.totalorder %v21179_v18, %v21176_v60 }
 0x56e   : > { %16423 = vmatmul.mubr.msk.bf16.gmra.mrb[48].mxu0 %vm493_vm3, %v13123_v8  ;;  %vm13573_vm3 = vcmp.ge.s32.totalorder %v21187_v62, %v21176_v60 }
 0x56f   : > { %13513 = vmatprep.mubr.bf16.mxu0 %v17710_v14  ;;  %v21191_v29 = vadd.s32 10, %v21181_v59  ;;  %vm13607_vm2 = vcmp.lt.s32.totalorder %v21179_v18, %v21184_v9  ;;  %vm13608_vm4 = vcmp.lt.s32.totalorder %v21187_v62, %v21184_v9  ;;  %vm13576_vm5 = vcmp.ge.s32.totalorder %v21179_v18, %v21181_v59 }
 0x570   : > { %vm21208_vm7 = vmand %vm13572_vm0, %vm13607_vm2  ;;  %vm13577_vm8 = vcmp.ge.s32.totalorder %v21187_v62, %v21181_v59  ;;  %vm13610_vm0 = vcmp.lt.s32.totalorder %v21251_v11, %v21184_v9  ;;  %vm13578_vm2 = vcmp.ge.s32.totalorder %v21248_v19, %v21181_v59 }
 0x571   : > { %vm13611_vm6 = vcmp.lt.s32.totalorder %v21179_v18, %v21191_v29  ;;  %vm13612_vm10 = vcmp.lt.s32.totalorder %v21187_v62, %v21191_v29  ;;  %vm21216_vm12 = vmand %vm13573_vm3, %vm13608_vm4  ;;  %vm13613_vm3 = vcmp.lt.s32.totalorder %v21248_v19, %v21191_v29 }
 0x572   : > { %vm13639_vm14 = vmand %vm13576_vm5, %vm13611_vm6  ;;  %vm13579_vm5 = vcmp.ge.s32.totalorder %v21251_v11, %v21181_v59  ;;  %vm13614_vm6 = vcmp.lt.s32.totalorder %v21251_v11, %v21191_v29 }
 0x573   : > { %vm13640_vm13 = vmand %vm13577_vm8, %vm13612_vm10  ;;  %vm21838_vm10 = vcmask 867328  }
 0x574   : > { %vm13641_vm8 = vmand %vm13578_vm2, %vm13613_vm3 }
 0x576   : > { %14631 = vmatmul.mubr.msk.bf16.vlgmr.msra.gmra.mrb[52].mxu0 %vm4668_vm15, %v13346_v22 }
 0x577   : > { %13523 = vmatprep.mubr.bf16.mxu0 %v17710_v14 }
 0x603   : > { %v16170_v16 = vpop.f32.mrb[56].mxu1 }
 0x604   : > { %10437 = vst.msk [vmem:[#allocation3 + $0x90] sm:$0xff] %vm4668_vm15, %v16170_v16  ;;  %v10396_v56 = vpop.f32.mrb[57].mxu1 }
 0x605   : > { %10435 = vst.msk [vmem:[#allocation3 + $0x80] sm:$0xff] %vm4668_vm15, %v10396_v56  ;;  %v16171_v2 = vpop.f32.mrb[58].mxu1 }
 0x606   : > { %10438 = vst.msk [vmem:[#allocation3 + $0x98] sm:$0xff] %vm4668_vm15, %v16171_v2  ;;  %v10399_v40 = vpop.f32.mrb[59].mxu1 }
 0x607   : > { %10436 = vst.msk [vmem:[#allocation3 + $0x88] sm:$0xff] %vm4668_vm15, %v10399_v40 }
 0x60b   : > { %v16174_v63 = vpop.f32.mrb[60].mxu1 }
 0x60c   : > { %10441 = vst.msk [vmem:[#allocation3 + $0xb0] sm:$0xff] %vm4668_vm15, %v16174_v63  ;;  %v10412_v0 = vpop.f32.mrb[61].mxu1 }
 0x60d   : > { %10439 = vst.msk [vmem:[#allocation3 + $0xa0] sm:$0xff] %vm4668_vm15, %v10412_v0  ;;  %v16175_v53 = vpop.f32.mrb[62].mxu1  ;;  %v13264_v54 = vld [vmem:[#allocation3 + $0x90] ss:$2 sm:$0x7f] }
 0x60e   : > { %10442 = vst.msk [vmem:[#allocation3 + $0xb8] sm:$0xff] %vm4668_vm15, %v16175_v53  ;;  %v10415_v27 = vpop.f32.mrb[63].mxu1  ;;  %v13258_v50 = vld [vmem:[#allocation3 + $0x7e] ss:$2 sm:$0x7f] }
 0x60f   : > { %10440 = vst.msk [vmem:[#allocation3 + $0xa8] sm:$0xff] %vm4668_vm15, %v10415_v27  ;;  %v13260_v13 = vld [vmem:[#allocation3 + $0x7f] ss:$2 sm:$0x7f] }
 0x610   : > { %v13261_v22 = vmax.f32 %v13258_v50, %v13260_v13  ;;  %v13266_v52 = vld [vmem:[#allocation3 + $0x91] ss:$2 sm:$0x7f] }
 0x611   : > { %v13267_v49 = vmax.f32 %v13264_v54, %v13266_v52 }
 0x612   : > { %v13262_v31 = vmax.f32 %v13256_v34, %v13261_v22 }
 0x613   : > { %v13444_v61 = vpop.f32.mrb[64].mxu1 }
 0x614   : > { %v13446_v4 = vpop.f32.mrb[65].mxu1  ;;  %v13663_v7 = vsel %vm21208_vm7, %v13444_v61, 0.0  ;;  %v13303_v12 = vrot.slane %v13262_v31, 3 }
 0x615   : > { %v13448_v3 = vpop.f32.mrb[66].mxu1  ;;  %v13664_v24 = vsel %vm21216_vm12, %v13446_v4, 0.0  ;;  %vm13642_vm12 = vmand %vm13579_vm5, %vm13614_vm6 }
 0x616   : > { %v13667_v45 = vsel %vm13639_vm14, %v13448_v3, 0.0  ;;  %v13450_v46 = vpop.f32.mrb[67].mxu1  ;;  %v13269_v57 = vld [vmem:[#allocation3 + $0xa2] ss:$2 sm:$0x7f]  ;;  %v13319_v35 = vsel %vm2812_vm9, %v13300_v1, %v13303_v12  ;;  %vm13609_vm9 = vcmp.lt.s32.totalorder %v21248_v19, %v21184_v9  ;;  %vm22044_vm14 = vcmask 1041408  }
 0x617   : > { %v21224_v23 = vadd.f32 %v13667_v45, %v13663_v7  ;;  %v13668_v41 = vsel %vm13640_vm13, %v13450_v46, 0.0  ;;  %v13271_v33 = vld [vmem:[#allocation3 + $0xa3] ss:$2 sm:$0x7f]  ;;  %v13334_v48 = vadd.f32 %v21096_v17, %v13319_v35  ;;  %vm13575_vm13 = vcmp.ge.s32.totalorder %v21251_v11, %v21176_v60 }
 0x618   : > { %v21226_v37 = vadd.f32 %v13668_v41, %v13664_v24  ;;  %v13272_v38 = vmax.f32 %v13269_v57, %v13271_v33  ;;  %vm21276_vm7 = vmand %vm13575_vm13, %vm13610_vm0 }
 0x619   : > { %v13341_v21 = vmax.f32 %v13334_v48, 0.0  ;;  %v17711_v48 = vmov 0.0|0.0  }
 0x61a   : > { %v21228_v5 = vmax.f32 %v13267_v49, %v13272_v38  ;;  %16458 = vmatprep.subr.bf16.mxu0 %v17711_v48 }
 0x61c   : > { %v13306_v47 = vrot.slane %v21228_v5, 4 }
 0x61e   : > { %v13320_v36 = vsel %vm363_vm1, %v13303_v12, %v13306_v47  ;;  %vm13574_vm1 = vcmp.ge.s32.totalorder %v21248_v19, %v21176_v60 }
 0x61f   : > { %v13335_v25 = vadd.f32 %v21096_v17, %v13320_v36  ;;  %vm21268_vm4 = vmand %vm13574_vm1, %vm13609_vm9 }
 0x621   : > { %v13342_v51 = vmax.f32 %v13335_v25, 0.0  ;;  %v13787_v25 = vld [vmem:[%s21726_s5 + $0x118] sm:$0xff] }
 0x623   : > { %v13347_v10 = vpack.c.bf16 %v13342_v51, %v13341_v21  ;;  %v13788_v51 = vld [vmem:[%s21726_s5 + $0x120] sm:$0xff] }
 0x625   : > { %14628 = vmatmul.mubr.msk.bf16.gmra.mrb[68].mxu1 %vm4668_vm15, %v13347_v10  ;;  %14632 = vmatmul.mubr.msk.bf16.gmra.mrb[56].mxu0 %vm4668_vm15, %v13347_v10  ;;  %v13789_v10 = vld [vmem:[%s21726_s5 + $0x128] sm:$0xff] }
 0x626   : > { %13462 = vmatprep.mubr.bf16.mxu1 %v17710_v14  ;;  %13533 = vmatprep.mubr.bf16.mxu0 %v17710_v14 }
 0x639   : > { %v16420_v44 = vpop.f32.mrb[44].mxu0 }
 0x63a   : > { %13215 = vst.msk [vmem:[#allocation3 + $0xd0] sm:$0xff] %vm4668_vm15, %v16420_v44  ;;  %v13176_v1 = vpop.f32.mrb[45].mxu0  ;;  %v13768_v44 = vld [vmem:[%s21726_s5 + $0x80] sm:$0xff] }
 0x63b   : > { %13213 = vst.msk [vmem:[#allocation3 + $0xc0] sm:$0xff] %vm4668_vm15, %v13176_v1  ;;  %v16421_v39 = vpop.f32.mrb[46].mxu0  ;;  %v16465_v1 = vpack.c.bf16 %v13789_v10, %v13788_v51  ;;  %v13761_v10 = vld [vmem:[%s21726_s5 + $0x48] sm:$0xff] }
 0x63c   : > { %13216 = vst.msk [vmem:[#allocation3 + $0xd8] sm:$0xff] %vm4668_vm15, %v16421_v39  ;;  %v13179_v30 = vpop.f32.mrb[47].mxu0  ;;  %v13769_v39 = vld [vmem:[%s21726_s5 + $0x88] sm:$0xff] }
 0x63d   : > { %13214 = vst.msk [vmem:[#allocation3 + $0xc8] sm:$0xff] %vm4668_vm15, %v13179_v30  ;;  %v13752_v30 = vld [vmem:[%s21726_s5] sm:$0xff] }
 0x641   : > { %v16424_v43 = vpop.f32.mrb[48].mxu0 }
 0x642   : > { %13219 = vst.msk [vmem:[#allocation3 + $0xf0] sm:$0xff] %vm4668_vm15, %v16424_v43  ;;  %v13192_v55 = vpop.f32.mrb[49].mxu0  ;;  %v13275_v20 = vld [vmem:[#allocation3 + $0xb4] ss:$2 sm:$0x7f]  ;;  %v13790_v43 = vld [vmem:[%s21726_s5 + $0x130] sm:$0xff] }
 0x643   : > { %13217 = vst.msk [vmem:[#allocation3 + $0xe0] sm:$0xff] %vm4668_vm15, %v13192_v55  ;;  %v16425_v8 = vpop.f32.mrb[50].mxu0  ;;  %v13277_v6 = vld [vmem:[#allocation3 + $0xb5] ss:$2 sm:$0x7f] }
 0x644   : > { %v13195_v16 = vpop.f32.mrb[51].mxu0  ;;  %v13280_v56 = vld [vmem:[#allocation3 + $0xc6] ss:$2 sm:$0x7f]  ;;  %v13278_v2 = vmax.f32 %v13275_v20, %v13277_v6  ;;  %v16426_v20 = vpack.c.bf16 %v13769_v39, %v13768_v44 }
 0x645   : > { %13218 = vst.msk [vmem:[#allocation3 + $0xe8] sm:$0xff] %vm4668_vm15, %v13195_v16  ;;  %v13282_v32 = vld [vmem:[#allocation3 + $0xc7] ss:$2 sm:$0x7f] }
 0x646   : > { %v13283_v40 = vmax.f32 %v13280_v56, %v13282_v32  ;;  %v13791_v55 = vld [vmem:[%s21726_s5 + $0x138] sm:$0xff]  ;;  %v13753_v8 = vld [vmem:[%s21726_s5 + $0x8] sm:$0xff]  ;;  %v13770_v16 = vld [vmem:[%s21726_s5 + $0x90] sm:$0xff]  ;;  %16427 = vmatprep.subr.bf16.mxu1 %v16426_v20 }
 0x647   : > { %v16428_v6 = vpack.c.bf16 %v13753_v8, %v13752_v30  ;;  %v13771_v56 = vld [vmem:[%s21726_s5 + $0x98] sm:$0xff]  ;;  %v16468_v63 = vpack.c.bf16 %v13791_v55, %v13790_v43  ;;  %v13806_v44 = vld [vmem:[%s21726_s5 + $0x1b0] sm:$0xff] }
 0x648   : > { %v13284_v9 = vmax.f32 %v13278_v2, %v13283_v40  ;;  %v16430_v32 = vpack.c.bf16 %v13771_v56, %v13770_v16  ;;  %v13754_v2 = vld [vmem:[%s21726_s5 + $0x10] sm:$0xff]  ;;  %v13755_v40 = vld [vmem:[%s21726_s5 + $0x18] sm:$0xff]  ;;  %v13808_v56 = vld [vmem:[%s21726_s5 + $0x1c0] sm:$0xff] }
 0x649   : > { %v13515_v0 = vpop.f32.mrb[52].mxu0  ;;  %16429 = vmatpush3.bf16.msra.mxu1 %v16428_v6  ;;  %v16432_v60 = vpack.c.bf16 %v13755_v40, %v13754_v2  ;;  %v13807_v39 = vld [vmem:[%s21726_s5 + $0x1b8] sm:$0xff]  ;;  %v13778_v30 = vld [vmem:[%s21726_s5 + $0xd0] sm:$0xff]  ;;  %v13780_v2 = vld [vmem:[%s21726_s5 + $0xe0] sm:$0xff] }
 0x64a   : > { %v13517_v58 = vpop.f32.mrb[53].mxu0  ;;  %v13286_v53 = vld [vmem:[#allocation3 + $0xd8] ss:$2 sm:$0x7f]  ;;  %v13665_v42 = vsel %vm21268_vm4, %v13515_v0, 0.0  ;;  %v13309_v22 = vrot.slane %v13284_v9, 5  ;;  %16431 = vmatprep.subr.bf16.mxu1 %v16430_v32  ;;  %v16492_v43 = vpack.c.bf16 %v13807_v39, %v13806_v44 }
 0x64b   : > { %v13666_v59 = vsel %vm21276_vm7, %v13517_v58, 0.0  ;;  %v13519_v27 = vpop.f32.mrb[54].mxu0  ;;  %v13288_v50 = vld [vmem:[#allocation3 + $0xd9] ss:$2 sm:$0x7f]  ;;  %v13779_v55 = vld [vmem:[%s21726_s5 + $0xd8] sm:$0xff] }
 0x64c   : > { %v13669_v29 = vsel %vm13641_vm8, %v13519_v27, 0.0  ;;  %v13521_v13 = vpop.f32.mrb[55].mxu0  ;;  %v13291_v34 = vld [vmem:[#allocation3 + $0xea] ss:$2 sm:$0x7f]  ;;  %v13732_v61 = vsel %vm21838_vm10, %v13666_v59, 0.0  ;;  %v13289_v54 = vmax.f32 %v13286_v53, %v13288_v50  ;;  %v13322_v45 = vsel %vm3982_vm11, %v13306_v47, %v13309_v22 }
 0x64d   : > { %v21284_v15 = vadd.f32 %v13669_v29, %v13665_v42  ;;  %v13670_v28 = vsel %vm13642_vm12, %v13521_v13, 0.0  ;;  %v13293_v31 = vld [vmem:[#allocation3 + $0xeb] ss:$2 sm:$0x7f]  ;;  %v13336_v57 = vadd.f32 %v21096_v17, %v13322_v45  ;;  %v13784_v47 = vld [vmem:[%s21726_s5 + $0x100] sm:$0xff]  ;;  %v13793_v0 = vld [vmem:[%s21726_s5 + $0x148] sm:$0xff]  ;;  %16433 = vmatpush3.bf16.msra.mxu1 %v16432_v60  ;;  %v16446_v6 = vpack.c.bf16 %v13779_v55, %v13778_v30 }
 0x64e   : > { %v13733_v4 = vsel %vm21838_vm10, %v13670_v28, 0.0  ;;  %v13294_v7 = vmax.f32 %v13291_v34, %v13293_v31  ;;  %v13792_v9 = vld [vmem:[%s21726_s5 + $0x140] sm:$0xff]  ;;  %v13794_v53 = vld [vmem:[%s21726_s5 + $0x150] sm:$0xff]  ;;  %v13795_v42 = vld [vmem:[%s21726_s5 + $0x158] sm:$0xff]  ;;  %vm17712_vm11 = vmmov 1  }
 0x64f   : > { %v21288_v3 = vadd.f32 %v13733_v4, %v13732_v61  ;;  %v13343_v41 = vmax.f32 %v13336_v57, 0.0  ;;  %v16471_v58 = vpack.c.bf16 %v13793_v0, %v13792_v9  ;;  %v16474_v59 = vpack.c.bf16 %v13795_v42, %v13794_v53  ;;  %v13796_v27 = vld [vmem:[%s21726_s5 + $0x160] sm:$0xff]  ;;  %v13797_v50 = vld [vmem:[%s21726_s5 + $0x168] sm:$0xff]  ;;  %v13798_v13 = vld [vmem:[%s21726_s5 + $0x170] sm:$0xff] }
 0x650   : > { %v13295_v52 = vmax.f32 %v13289_v54, %v13294_v7  ;;  %v16477_v29 = vpack.c.bf16 %v13797_v50, %v13796_v27  ;;  %v13799_v34 = vld [vmem:[%s21726_s5 + $0x178] sm:$0xff]  ;;  %v13800_v28 = vld [vmem:[%s21726_s5 + $0x180] sm:$0xff]  ;;  %v13801_v31 = vld [vmem:[%s21726_s5 + $0x188] sm:$0xff] }
 0x651   : > { %v16483_v61 = vpack.c.bf16 %v13801_v31, %v13800_v28  ;;  %v13772_v4 = vld [vmem:[%s21726_s5 + $0xa0] sm:$0xff]  ;;  %v13773_v54 = vld [vmem:[%s21726_s5 + $0xa8] sm:$0xff]  ;;  %v13802_v57 = vld [vmem:[%s21726_s5 + $0x190] sm:$0xff] }
 0x652   : > { %v13312_v46 = vrot.slane %v13295_v52, 6  ;;  %v16434_v7 = vpack.c.bf16 %v13773_v54, %v13772_v4  ;;  %v13756_v52 = vld [vmem:[%s21726_s5 + $0x20] sm:$0xff]  ;;  %v13757_v45 = vld [vmem:[%s21726_s5 + $0x28] sm:$0xff]  ;;  %v13762_v20 = vld [vmem:[%s21726_s5 + $0x50] sm:$0xff]  ;;  %v13555_v4 = vadd.s32 16, %v21169_v26 }
 0x653   : > { %v13763_v8 = vld [vmem:[%s21726_s5 + $0x58] sm:$0xff]  ;;  %v13809_v32 = vld [vmem:[%s21726_s5 + $0x1c8] sm:$0xff]  ;;  %v13810_v53 = vld [vmem:[%s21726_s5 + $0x1d0] sm:$0xff] }
 0x654   : > { %v13324_v12 = vsel %vm22044_vm14, %v13309_v22, %v13312_v46  ;;  %v13338_v38 = vadd.f32 %v21096_v17, %v13312_v46  ;;  %v16480_v22 = vpack.c.bf16 %v13799_v34, %v13798_v13  ;;  %16435 = vmatprep.subr.bf16.mxu1 %v16434_v7  ;;  %v16436_v46 = vpack.c.bf16 %v13757_v45, %v13756_v52  ;;  %v13781_v40 = vld [vmem:[%s21726_s5 + $0xe8] sm:$0xff]  ;;  %v13811_v42 = vld [vmem:[%s21726_s5 + $0x1d8] sm:$0xff] }
 0x655   : > { %v13337_v24 = vadd.f32 %v21096_v17, %v13324_v12  ;;  %v13785_v17 = vld [vmem:[%s21726_s5 + $0x108] sm:$0xff]  ;;  %v13803_v12 = vld [vmem:[%s21726_s5 + $0x198] sm:$0xff]  ;;  %v16448_v16 = vpack.c.bf16 %v13763_v8, %v13762_v20  ;;  %v16495_v9 = vpack.c.bf16 %v13809_v32, %v13808_v56  ;;  %v16450_v0 = vpack.c.bf16 %v13781_v40, %v13780_v2 }
 0x656   : > { %v13345_v5 = vmax.f32 %v13338_v38, 0.0  ;;  %v16459_v36 = vpack.c.bf16 %v13785_v17, %v13784_v47  ;;  %16437 = vmatpush3.bf16.msra.mxu1 %v16436_v46  ;;  %v13758_v38 = vld [vmem:[%s21726_s5 + $0x30] sm:$0xff]  ;;  %v13804_v47 = vld [vmem:[%s21726_s5 + $0x1a0] sm:$0xff]  ;;  %v13805_v17 = vld [vmem:[%s21726_s5 + $0x1a8] sm:$0xff]  ;;  %v16498_v34 = vpack.c.bf16 %v13811_v42, %v13810_v53  ;;  %v13562_v54 = vmul.u32 10, %v13555_v4 }
 0x657   : > { %v13344_v33 = vmax.f32 %v13337_v24, 0.0  ;;  %v13774_v24 = vld [vmem:[%s21726_s5 + $0xb0] sm:$0xff]  ;;  %v13765_v60 = vld [vmem:[%s21726_s5 + $0x68] sm:$0xff]  ;;  %v13767_v13 = vld [vmem:[%s21726_s5 + $0x78] sm:$0xff]  ;;  %v13556_v7 = vadd.s32 24, %v21169_v26  ;;  %v13557_v2 = vadd.s32 32, %v21169_v26 }
 0x658   : > { %v13349_v35 = vpack.c.bf16 %v13345_v5, %v13345_v5  ;;  %16460 = vmatpush1.bf16.msra.mxu0 %v16459_v36  ;;  %v13759_v5 = vld [vmem:[%s21726_s5 + $0x38] sm:$0xff]  ;;  %v13776_v36 = vld [vmem:[%s21726_s5 + $0xc0] sm:$0xff]  ;;  %v13813_v28 = vld [vmem:[%s21726_s5 + $0x1e8] sm:$0x3]  ;;  %v13602_v52 = vadd.s32 10, %v13562_v54  ;;  %vm13580_vm9 = vcmp.ge.s32.totalorder %v21179_v18, %v13562_v54  ;;  %vm13582_vm0 = vcmp.ge.s32.totalorder %v21248_v19, %v13562_v54 }
 0x659   : > { %v13348_v49 = vpack.c.bf16 %v13344_v33, %v13343_v41  ;;  %16461 = vmatprep.subr.bf16.mxu0 %v17711_v48  ;;  %v13775_v41 = vld [vmem:[%s21726_s5 + $0xb8] sm:$0xff]  ;;  %v16486_v33 = vpack.c.bf16 %v13803_v12, %v13802_v57  ;;  %v13563_v45 = vmul.u32 10, %v13556_v7  ;;  %vm13581_vm3 = vcmp.ge.s32.totalorder %v21187_v62, %v13562_v54 }
 0x65a   : > { %vm13615_vm13 = vcmp.lt.s32.totalorder %v21179_v18, %v13602_v52  ;;  %vm13617_vm2 = vcmp.lt.s32.totalorder %v21248_v19, %v13602_v52  ;;  %vm13616_vm4 = vcmp.lt.s32.totalorder %v21187_v62, %v13602_v52  ;;  %vm13583_vm6 = vcmp.ge.s32.totalorder %v21251_v11, %v13562_v54 }
 0x65b   : > { %14629 = vmatmul.mubr.msk.bf16.gmra.mrb[72].mxu1 %vm4668_vm15, %v13348_v49  ;;  %14633 = vmatmul.mubr.msk.bf16.gmra.mrb[60].mxu0 %vm4668_vm15, %v13348_v49  ;;  %v16438_v49 = vpack.c.bf16 %v13775_v41, %v13774_v24  ;;  %v13603_v46 = vadd.s32 10, %v13563_v45  ;;  %vm21513_vm5 = vmand %vm13580_vm9, %vm13615_vm13  ;;  %vm13618_vm7 = vcmp.lt.s32.totalorder %v21251_v11, %v13602_v52  ;;  %vm13584_vm12 = vcmp.ge.s32.totalorder %v21179_v18, %v13563_v45 }
 0x65c   : > { %13472 = vmatprep.mubr.bf16.mxu1 %v17710_v14  ;;  %13543 = vmatprep.mubr.bf16.mxu0 %v17710_v14  ;;  %v13786_v14 = vld [vmem:[%s21726_s5 + $0x110] sm:$0xff]  ;;  %vm21519_vm8 = vmand %vm13582_vm0, %vm13617_vm2  ;;  %vm13585_vm13 = vcmp.ge.s32.totalorder %v21187_v62, %v13563_v45  ;;  %v13564_v40 = vmul.u32 10, %v13557_v2 }
 0x65d   : > { %v16462_v21 = vpack.c.bf16 %v13787_v25, %v13786_v14  ;;  %16439 = vmatprep.subr.bf16.mxu1 %v16438_v49  ;;  %v16489_v14 = vpack.c.bf16 %v13805_v17, %v13804_v47  ;;  %v13777_v25 = vld [vmem:[%s21726_s5 + $0xc8] sm:$0xff]  ;;  %vm21531_vm9 = vmand %vm13583_vm6, %vm13618_vm7  ;;  %vm13620_vm0 = vcmp.lt.s32.totalorder %v21187_v62, %v13603_v46  ;;  %vm22060_vm7 = vcmask 867328  }
 0x65e   : > { %v16442_v51 = vpack.c.bf16 %v13777_v25, %v13776_v36  ;;  %vm21551_vm6 = vmand %vm13585_vm13, %vm13620_vm0  ;;  %vm13591_vm13 = vcmp.ge.s32.totalorder %v21251_v11, %v13564_v40 }
 0x65f   : > { %16463 = vmatpush1.bf16.msra.mxu0 %v16462_v21  ;;  %v13760_v21 = vld [vmem:[%s21726_s5 + $0x40] sm:$0xff] }
 0x660   : > { %16464 = vmatprep.subr.bf16.mxu0 %v17711_v48 }
 0x663   : > { %14630 = vmatmul.mubr.msk.bf16.gmra.mrb[76].mxu1 %vm4668_vm15, %v13349_v35  ;;  %14634 = vmatmul.mubr.msk.bf16.gmra.mrb[64].mxu0 %vm4668_vm15, %v13349_v35  ;;  %v16440_v35 = vpack.c.bf16 %v13759_v5, %v13758_v38  ;;  %vm22045_vm15 = vmmov %vm22044_vm14  ;;  %vm13619_vm14 = vcmp.lt.s32.totalorder %v21179_v18, %v13603_v46 }
 0x664   : > { %16466 = vmatpush1.bf16.msra.mxu0 %v16465_v1  ;;  %v16444_v1 = vpack.c.bf16 %v13761_v10, %v13760_v21  ;;  %vm16502_vm1 = vmpackc.low %vm22045_vm15, %vm17712_vm11  ;;  %vm13586_vm15 = vcmp.ge.s32.totalorder %v21248_v19, %v13563_v45 }
 0x665   : > { %16467 = vmatprep.subr.bf16.mxu0 %v17711_v48  ;;  %16441 = vmatpush3.bf16.msra.mxu1 %v16440_v35  ;;  %vm21525_vm11 = vmand %vm13581_vm3, %vm13616_vm4  ;;  %vm13587_vm3 = vcmp.ge.s32.totalorder %v21251_v11, %v13563_v45  ;;  %vm13622_vm4 = vcmp.lt.s32.totalorder %v21251_v11, %v13603_v46 }
 0x666   : > { %16443 = vmatprep.subr.bf16.mxu1 %v16442_v51  ;;  %vm21537_vm2 = vmand %vm13584_vm12, %vm13619_vm14  ;;  %vm13590_vm14 = vcmp.ge.s32.totalorder %v21248_v19, %v13564_v40 }
 0x668   : > { %16469 = vmatpush1.bf16.msra.mxu0 %v16468_v63  ;;  %v13764_v63 = vld [vmem:[%s21726_s5 + $0x60] sm:$0xff] }
 0x669   : > { %16470 = vmatprep.subr.bf16.mxu0 %v17711_v48  ;;  %16445 = vmatpush3.bf16.msra.mxu1 %v16444_v1  ;;  %v16452_v27 = vpack.c.bf16 %v13765_v60, %v13764_v63  ;;  %v13558_v63 = vadd.s32 40, %v21169_v26  ;;  %v13559_v60 = vadd.s32 48, %v21169_v26 }
 0x66a   : > { %16447 = vmatprep.subr.bf16.mxu1 %v16446_v6 }
 0x66c   : > { %16472 = vmatpush1.bf16.msra.mxu0 %v16471_v58  ;;  %v13782_v58 = vld [vmem:[%s21726_s5 + $0xf0] sm:$0xff] }
 0x66d   : > { %16473 = vmatprep.subr.bf16.mxu0 %v17711_v48  ;;  %16449 = vmatpush3.bf16.msra.mxu1 %v16448_v16 }
 0x66e   : > { %16451 = vmatprep.subr.bf16.mxu1 %v16450_v0  ;;  %v13565_v0 = vmul.u32 10, %v13558_v63 }
 0x670   : > { %16475 = vmatpush1.bf16.msra.mxu0 %v16474_v59  ;;  %v13783_v59 = vld [vmem:[%s21726_s5 + $0xf8] sm:$0xff] }
 0x671   : > { %16476 = vmatprep.subr.bf16.mxu0 %v17711_v48  ;;  %v16454_v50 = vpack.c.bf16 %v13783_v59, %v13782_v58  ;;  %16453 = vmatpush3.bf16.msra.mxu1 %v16452_v27  ;;  %v13605_v58 = vadd.s32 10, %v13565_v0 }
 0x673   : > { %16455 = vmatprep.subr.bf16.mxu1 %v16454_v50 }
 0x674   : > { %16478 = vmatpush1.bf16.msra.mxu0 %v16477_v29  ;;  %v13766_v29 = vld [vmem:[%s21726_s5 + $0x70] sm:$0xff] }
 0x675   : > { %16479 = vmatprep.subr.bf16.mxu0 %v17711_v48  ;;  %v16456_v31 = vpack.c.bf16 %v13767_v13, %v13766_v29 }
 0x677   : > { %16457 = vmatpush3.bf16.msra.mxu1 %v16456_v31 }
 0x678   : > { %16481 = vmatpush1.bf16.msra.mxu0 %v16480_v22  ;;  %v13812_v22 = vld [vmem:[%s21726_s5 + $0x1e0] sm:$0xff] }
 0x679   : > { %16482 = vmatprep.subr.bf16.mxu0 %v17711_v48 }
 0x67c   : > { %16484 = vmatpush1.bf16.msra.mxu0 %v16483_v61  ;;  %v16501_v61 = vpack.c.bf16 %v13813_v28, %v13812_v22 }
 0x67d   : > { %16485 = vmatprep.subr.bf16.mxu0 %v17711_v48 }
 0x680   : > { %16487 = vmatpush1.bf16.msra.mxu0 %v16486_v33 }
 0x681   : > { %16488 = vmatprep.subr.bf16.mxu0 %v17711_v48 }
 0x684   : > { %16490 = vmatpush1.bf16.msra.mxu0 %v16489_v14 }
 0x685   : > { %16491 = vmatprep.subr.bf16.mxu0 %v17711_v48 }
 0x688   : > { %16493 = vmatpush1.bf16.msra.mxu0 %v16492_v43 }
 0x689   : > { %16494 = vmatprep.subr.bf16.mxu0 %v17711_v48 }
 0x68c   : > { %16496 = vmatpush1.bf16.msra.mxu0 %v16495_v9  ;;  %v13604_v9 = vadd.s32 10, %v13564_v40 }
 0x68d   : > { %16497 = vmatprep.subr.bf16.mxu0 %v17711_v48 }
 0x68e   : > { %vm13623_vm12 = vcmp.lt.s32.totalorder %v21179_v18, %v13604_v9  ;;  %vm13626_vm0 = vcmp.lt.s32.totalorder %v21251_v11, %v13604_v9 }
 0x690   : > { %16499 = vmatpush1.bf16.msra.mxu0 %v16498_v34 }
 0x691   : > { %16500 = vmatprep.subr.bf16.mxu0 %v17711_v48 }
 0x694   : > { %16503 = vmatpush1.bf16.msk.msra.mxu0 %vm16502_vm1, %v16501_v61  ;;  %vm13621_vm1 = vcmp.lt.s32.totalorder %v21248_v19, %v13603_v46 }
 0x695   : > { %vm21543_vm10 = vmand %vm13586_vm15, %vm13621_vm1  ;;  %vm13589_vm15 = vcmp.ge.s32.totalorder %v21187_v62, %v13564_v40  ;;  %vm13624_vm1 = vcmp.lt.s32.totalorder %v21187_v62, %v13604_v9 }
 0x6f8   : > { %v13454_v33 = vpop.f32.mrb[68].mxu1  ;;  %v13525_v49 = vpop.f32.mrb[56].mxu0 }
 0x6f9   : > { %v13671_v5 = vsel %vm21513_vm5, %v13454_v33, 0.0  ;;  %v13673_v35 = vsel %vm21519_vm8, %v13525_v49, 0.0  ;;  %v13456_v47 = vpop.f32.mrb[69].mxu1  ;;  %v13527_v17 = vpop.f32.mrb[57].mxu0  ;;  %vm13650_vm5 = vmand %vm13587_vm3, %vm13622_vm4  ;;  %vm13592_vm3 = vcmp.ge.s32.totalorder %v21179_v18, %v13565_v0  ;;  %vm13627_vm4 = vcmp.lt.s32.totalorder %v21179_v18, %v13605_v58 }
 0x6fa   : > { %v13692_v14 = vadd.f32 %v21224_v23, %v13671_v5  ;;  %v13719_v25 = vadd.f32 %v21284_v15, %v13673_v35  ;;  %v13672_v21 = vsel %vm21525_vm11, %v13456_v47, 0.0  ;;  %v13674_v51 = vsel %vm21531_vm9, %v13527_v17, 0.0  ;;  %v13458_v10 = vpop.f32.mrb[70].mxu1  ;;  %v13529_v44 = vpop.f32.mrb[58].mxu0  ;;  %vm22061_vm8 = vmmov %vm22060_vm7 }
 0x6fb   : > { %v13706_v1 = vadd.f32 %v21226_v37, %v13672_v21  ;;  %v13735_v39 = vsel %vm22060_vm7, %v13674_v51, 0.0  ;;  %v13675_v23 = vsel %vm21537_vm2, %v13458_v10, 0.0  ;;  %v13677_v15 = vsel %vm21543_vm10, %v13529_v44, 0.0  ;;  %v13460_v30 = vpop.f32.mrb[71].mxu1  ;;  %v13531_v43 = vpop.f32.mrb[59].mxu0 }
 0x6fc   : > { %v13736_v55 = vadd.f32 %v13735_v39, %v21288_v3  ;;  %v13693_v20 = vadd.f32 %v13692_v14, %v13675_v23  ;;  %v13720_v8 = vadd.f32 %v13719_v25, %v13677_v15  ;;  %v13676_v6 = vsel %vm21551_vm6, %v13460_v30, 0.0  ;;  %vm21599_vm6 = vmand %vm13589_vm15, %vm13624_vm1 }
 0x6fd   : > { %v13707_v16 = vadd.f32 %v13706_v1, %v13676_v6  ;;  %v13678_v56 = vsel %vm13650_vm5, %v13531_v43, 0.0  ;;  %v21578_v3 = vmul.u32 10, %v13559_v60  ;;  %vm13588_vm10 = vcmp.ge.s32.totalorder %v21179_v18, %v13564_v40 }
 0x6fe   : > { %v13737_v37 = vsel %vm22061_vm8, %v13678_v56, 0.0  ;;  %vm13625_vm11 = vcmp.lt.s32.totalorder %v21248_v19, %v13604_v9  ;;  %vm21586_vm9 = vmand %vm13588_vm10, %vm13623_vm12  ;;  %vm13594_vm5 = vcmp.ge.s32.totalorder %v21248_v19, %v13565_v0  ;;  %vm13629_vm7 = vcmp.lt.s32.totalorder %v21248_v19, %v13605_v58 }
 0x6ff   : > { %v13738_v32 = vadd.f32 %v13737_v37, %v13736_v55  ;;  %v13606_v42 = vadd.s32 10, %v21578_v3  ;;  %vm21593_vm2 = vmand %vm13590_vm14, %vm13625_vm11  ;;  %vm13593_vm10 = vcmp.ge.s32.totalorder %v21187_v62, %v13565_v0  ;;  %vm13628_vm12 = vcmp.lt.s32.totalorder %v21187_v62, %v13605_v58 }
 0x700   : > { %vm21605_vm8 = vmand %vm13591_vm13, %vm13626_vm0  ;;  %vm13596_vm1 = vcmp.ge.s32.totalorder %v21179_v18, %v21578_v3 }
 0x701   : > { %vm21611_vm14 = vmand %vm13592_vm3, %vm13627_vm4  ;;  %vm13631_vm13 = vcmp.lt.s32.totalorder %v21179_v18, %v13606_v42  ;;  %vm13598_vm3 = vcmp.ge.s32.totalorder %v21248_v19, %v21578_v3  ;;  %vm13633_vm4 = vcmp.lt.s32.totalorder %v21248_v19, %v13606_v42  ;;  %vm13632_vm15 = vcmp.lt.s32.totalorder %v21187_v62, %v13606_v42 }
 0x702   : > { %vm21620_vm0 = vmand %vm13594_vm5, %vm13629_vm7  ;;  %vm13599_vm7 = vcmp.ge.s32.totalorder %v21251_v11, %v21578_v3  ;;  %vm13634_vm11 = vcmp.lt.s32.totalorder %v21251_v11, %v13606_v42 }
 0x703   : > { %vm21638_vm5 = vmand %vm13593_vm10, %vm13628_vm12  ;;  %vm22080_vm12 = vcmask 867328  }
 0x72e   : > { %v13464_v13 = vpop.f32.mrb[72].mxu1  ;;  %v13535_v34 = vpop.f32.mrb[60].mxu0 }
 0x72f   : > { %v13679_v28 = vsel %vm21586_vm9, %v13464_v13, 0.0  ;;  %v13681_v31 = vsel %vm21593_vm2, %v13535_v34, 0.0  ;;  %v13466_v61 = vpop.f32.mrb[73].mxu1  ;;  %v13537_v4 = vpop.f32.mrb[61].mxu0  ;;  %vm22076_vm9 = vcmp.lt.s32.totalorder %v21251_v11, %v13605_v58  ;;  %vm22077_vm2 = vcmp.ge.s32.totalorder %v21251_v11, %v13565_v0 }
 0x730   : > { %v13694_v7 = vadd.f32 %v13693_v20, %v13679_v28  ;;  %v13721_v52 = vadd.f32 %v13720_v8, %v13681_v31  ;;  %v13680_v45 = vsel %vm21599_vm6, %v13466_v61, 0.0  ;;  %v13682_v46 = vsel %vm21605_vm8, %v13537_v4, 0.0  ;;  %v13468_v48 = vpop.f32.mrb[74].mxu1  ;;  %v13539_v57 = vpop.f32.mrb[62].mxu0  ;;  %vm21653_vm10 = vmand %vm22077_vm2, %vm22076_vm9 }
 0x731   : > { %v13708_v24 = vadd.f32 %v13707_v16, %v13680_v45  ;;  %v13739_v41 = vsel %vm22080_vm12, %v13682_v46, 0.0  ;;  %v13683_v33 = vsel %vm21611_vm14, %v13468_v48, 0.0  ;;  %v13685_v49 = vsel %vm21620_vm0, %v13539_v57, 0.0  ;;  %v13470_v38 = vpop.f32.mrb[75].mxu1  ;;  %v13541_v5 = vpop.f32.mrb[63].mxu0  ;;  %vm21669_vm6 = vmand %vm13596_vm1, %vm13631_vm13 }
 0x732   : > { %v13740_v35 = vadd.f32 %v13739_v41, %v13738_v32  ;;  %v13695_v47 = vadd.f32 %v13694_v7, %v13683_v33  ;;  %v13722_v17 = vadd.f32 %v13721_v52, %v13685_v49  ;;  %v13684_v36 = vsel %vm21638_vm5, %v13470_v38, 0.0  ;;  %vm13661_vm8 = vmand %vm13598_vm3, %vm13633_vm4 }
 0x733   : > { %v13709_v25 = vadd.f32 %v13708_v24, %v13684_v36  ;;  %v13686_v21 = vsel %vm21653_vm10, %v13541_v5, 0.0  ;;  %vm22083_vm14 = vmmov %vm22080_vm12  ;;  %vm22084_vm1 = vcmp.ge.s32.totalorder %v21187_v62, %v21578_v3  ;;  %vm13696_vm0 = vcmask 1040384   ;;  %v13814_v24 = vld [vmem:[%s21727_s6] sm:$0x1] }
 0x734   : > { %v13741_v51 = vsel %vm22083_vm14, %v13686_v21, 0.0  ;;  %vm21686_vm13 = vmand %vm22084_vm1, %vm13632_vm15  ;;  %vm13743_vm3 = vcmask 860160   ;;  %v13963_v5 = vsub.s32 0, %v21169_v26  ;;  %vm13965_vm15 = vcmask 80896  }
 0x735   : > { %v13742_v10 = vadd.f32 %v13741_v51, %v13740_v35  ;;  %vm21695_vm5 = vmand %vm13599_vm7, %vm13634_vm11 }
 0x736   : > { %v13474_v44 = vpop.f32.mrb[76].mxu1  ;;  %v13545_v1 = vpop.f32.mrb[64].mxu0  ;;  %vm22089_vm11 = vmmov %vm22080_vm12 }
 0x737   : > { %v13687_v62 = vsel %vm21669_vm6, %v13474_v44, 0.0  ;;  %v13689_v39 = vsel %vm13661_vm8, %v13545_v1, 0.0  ;;  %v13476_v23 = vpop.f32.mrb[77].mxu1  ;;  %v13547_v15 = vpop.f32.mrb[65].mxu0 }
 0x738   : > { %v13697_v30 = vsel %vm13696_vm0, %v13687_v62, 0.0  ;;  %v13723_v43 = vsel %vm13696_vm0, %v13689_v39, 0.0  ;;  %v13688_v11 = vsel %vm21686_vm13, %v13476_v23, 0.0  ;;  %v13690_v55 = vsel %vm21695_vm5, %v13547_v15, 0.0  ;;  %v13478_v20 = vpop.f32.mrb[78].mxu1  ;;  %v13549_v8 = vpop.f32.mrb[66].mxu0 }
 0x739   : > { %v13698_v6 = vadd.f32 %v13697_v30, %v13695_v47  ;;  %v13724_v16 = vadd.f32 %v13723_v43, %v13722_v17  ;;  %v13710_v56 = vsel %vm13696_vm0, %v13688_v11, 0.0  ;;  %v13744_v37 = vsel %vm13743_vm3, %v13690_v55, 0.0  ;;  %v13479_v32 = vpop.f32.mrb[79].mxu1  ;;  %v13550_v2 = vpop.f32.mrb[67].mxu0 }
 0x73a   : > { %v13711_v40 = vadd.f32 %v13710_v56, %v13709_v25  ;;  %v13745_v63 = vadd.f32 %v13744_v37, %v13742_v10 }
 0x73b   : > { %v13699_v60 = vrot.slane %v13698_v6, 4  ;;  %v13725_v9 = vrot.slane %v13724_v16, 4 }
 0x73c   : > { %v13712_v0 = vrot.slane %v13711_v40, 4  ;;  %v13746_v3 = vrot.slane %v13745_v63, 4 }
 0x73d   : > { %v13700_v58 = vadd.f32 %v13699_v60, %v13698_v6  ;;  %v13726_v53 = vadd.f32 %v13725_v9, %v13724_v16 }
 0x73e   : > { %v13713_v42 = vadd.f32 %v13712_v0, %v13711_v40  ;;  %v13747_v59 = vadd.f32 %v13746_v3, %v13745_v63 }
 0x73f   : > { %v13701_v27 = vrot.slane %v13700_v58, 2  ;;  %v13727_v50 = vrot.slane %v13726_v53, 2 }
 0x740   : > { %v13714_v29 = vrot.slane %v13713_v42, 2  ;;  %v13748_v13 = vrot.slane %v13747_v59, 2 }
 0x741   : > { %v13702_v34 = vadd.f32 %v13701_v27, %v13700_v58  ;;  %v13728_v22 = vadd.f32 %v13727_v50, %v13726_v53 }
 0x742   : > { %v13749_v28 = vadd.f32 %v13748_v13, %v13747_v59  ;;  %v13715_v31 = vadd.f32 %v13714_v29, %v13713_v42 }
 0x743   : > { %v13703_v61 = vrot.slane %v13702_v34, 1  ;;  %v13729_v4 = vrot.slane %v13728_v22, 1 }
 0x744   : > { %v13750_v54 = vrot.slane %v13749_v28, 1  ;;  %v13716_v7 = vrot.slane %v13715_v31, 1 }
 0x745   : > { %v13704_v46 = vadd.f32 %v13703_v61, %v13702_v34  ;;  %v13730_v48 = vadd.f32 %v13729_v4, %v13728_v22 }
 0x746   : > { %v13717_v52 = vadd.f32 %v13716_v7, %v13715_v31  ;;  %v13751_v45 = vadd.f32 %v13750_v54, %v13749_v28 }
 0x748   : > { %13885 = vmatprep.mubr.f32.mxu1 %v13717_v52  ;;  %14636 = vmatprep.mubr.msk.f32.mxu0 %vm22089_vm11, %v13751_v45 }
 0x749   : > { %13886 = vmatmul.mubr.f32.vlgmr.msra.gmra.mrb[80].mxu1 %v13704_v46  ;;  %13956 = vmatmul.mubr.f32.vlgmr.msra.gmra.mrb[68].mxu0 %v13730_v48 }
 0x81c   : > { %v15241_v57 = vpop.f32.mrb[80].mxu1  ;;  %v13957_v12 = vpop.f32.mrb[68].mxu0 }
 0x81d   : > { %v15242_v41 = vpop.f32.mrb[81].mxu1  ;;  %v13959_v33 = vpop.f32.mrb[69].mxu0 }
 0x81e   : > { %v15243_v49 = vadd.f32 %v15242_v41, %v15241_v57 }
 0x820   : > { %v13888_v38 = vadd.f32 %v15243_v49, %v13814_v24 }
 0x822   : > { %v13958_v35 = vadd.f32 %v13957_v12, %v13888_v38 }
 0x824   : > { %v13964_v47 = vrot.slane %v13958_v35, %v13963_v5 }
 0x826   : > { %13966 = vst.msk [vmem:[%s278_s28] sm:$0xff] %vm13965_vm15, %v13964_v47 }
 0x827 PF: > { %s17_s24 = sadd.s32 1, %s17704_s24  }
 0x828   : > { %p14_p5 = scmp.ge.s32.totalorder %s17_s24, 4  }
 0x82a   :  { %16 = sbr.rel (!%p14_p5) target bundleno = 1 (0x1), region = 105 }

</bundles_post_ra>
